<compile_context>
chip_gen: v7x
topology: tpu7x:2x2x1
jax: 0.10.0
libtpu: 0.0.40
codegen_flags: <defaults>
</compile_context>

<pallas_src>
import numpy as np
import jax
import jax.numpy as jnp
from jax.experimental import pallas as pl
from jax.experimental.pallas import tpu as pltpu

C = 768          # channel (forward hard-codes view(-1, 7, 7, 768))
RED = 4
HID = C // RED   # 192
H = W = 7
HW = H * W       # 49
KSP = 7          # spatial_kernel
PAD = KSP // 2
OUT = 2          # preflag_linear output features
OUT_PAD = 128    # lane-padded output width (unmasked stores)


def cbam_kernel(x_ref, w1t_ref, w2t_ref, m_maxT_ref, m_avgT_ref, wlt_ref, o_ref):
    tb = x_ref.shape[0]
    inv_hw = 1.0 / HW

    # Single f32 working copy of the bf16 tile; every elementwise/reduction
    # pass below reuses it (no repeated casts, no store+3-reload x1 pattern).
    xf = x_ref[...].astype(jnp.float32)                      # (TB, HW, C)

    # --- channel attention: global max/avg pool over HW + shared MLP (fused) ---
    maxp = jnp.max(xf, axis=1)                               # (TB, C)
    avgp = jnp.sum(xf, axis=1) * inv_hw                      # (TB, C)
    stacked = jnp.concatenate([maxp, avgp], axis=0).astype(jnp.bfloat16)   # (2*TB, C)
    h = jnp.maximum(
        jnp.dot(stacked, w1t_ref[...], preferred_element_type=jnp.float32), 0.0)
    mo = jnp.dot(h.astype(jnp.bfloat16), w2t_ref[...],
                 preferred_element_type=jnp.float32)         # (2*TB, C) f32
    ch_att = jax.nn.sigmoid(mo[:tb] + mo[tb:])               # (TB, C) f32

    # --- spatial attention: channel max/mean of (ch_att * x), 7x7 conv as matmuls ---
    x1 = xf * ch_att[:, None, :]                             # (TB, HW, C) only feeds the
    max_c = jnp.max(x1, axis=2)                              # two channel reductions
    avg_c = jnp.sum(x1, axis=2) * (1.0 / C)                  # (TB, HW)
    sp_logit = (jnp.dot(max_c.astype(jnp.bfloat16), m_maxT_ref[...],
                        preferred_element_type=jnp.float32)
                + jnp.dot(avg_c.astype(jnp.bfloat16), m_avgT_ref[...],
                          preferred_element_type=jnp.float32))
    sp_att = jax.nn.sigmoid(sp_logit)                        # (TB, HW) f32

    # --- spatially-weighted global average pool (VPU multiply + sublane sum) ---
    # pooled[b,c] = ch_att[b,c] * (1/HW) * sum_h sp_att[b,h] * x[b,h,c]
    wsum = jnp.sum(xf * sp_att[:, :, None], axis=1)          # (TB, C)
    pooled = ch_att * wsum * inv_hw                          # (TB, C)

    # --- preflag_linear (768 -> 2, zero-padded to 128 lanes, no bias) ---
    o_ref[...] = jnp.dot(pooled.astype(jnp.bfloat16), wlt_ref[...],
                         preferred_element_type=jnp.float32)


def _conv7x7_as_matmuls(w_sp):
    """Unroll Conv2d(2,1,7,padding=3,bias=False) on a 7x7 grid into two (49,49) mats.

    sp_logit[p] = sum_q m_max[p,q]*max_map[q] + m_avg[p,q]*avg_map[q]
    """
    m_max = np.zeros((HW, HW), np.float32)
    m_avg = np.zeros((HW, HW), np.float32)
    w_sp = np.asarray(w_sp, np.float32)
    for pi in range(H):
        for pj in range(W):
            p = pi * W + pj
            for di in range(KSP):
                for dj in range(KSP):
                    qi, qj = pi + di - PAD, pj + dj - PAD
                    if 0 <= qi < H and 0 <= qj < W:
                        q = qi * W + qj
                        m_max[p, q] = w_sp[0, 0, di, dj]
                        m_avg[p, q] = w_sp[0, 1, di, dj]
    return jnp.asarray(m_max), jnp.asarray(m_avg)


def cbam_forward(x, params, tb=64):
    # same contract as the torch forward: x reshapeable to (-1, 7, 7, 768)
    # bf16 in HBM: the kernel is HBM-bandwidth-bound, so halving x's bytes is
    # a ~2x win on all generations; accumulation stays f32 inside the kernel.
    xr = x.reshape(-1, HW, C).astype(jnp.bfloat16)
    B = xr.shape[0]

    # --- VMEM budget (per grid step), honest about in-kernel temporaries ---
    # per batch row: x tile bf16 double-buffered + 3 f32 full-tile temps
    # (xf, x1, weighted-pool product) + double-buffered 128-wide output row.
    per_row = HW * C * (2 * 2 + 3 * 4) + 2 * OUT_PAD * 4
    weight_bytes = 2 * 2 * (C * HID + HID * C + 2 * HW * HW + C * OUT_PAD)  # bf16, x2 buf
    fixed_bytes = weight_bytes + (6 << 20)                  # + compiler scratch slack
    try:
        vmem_cap = int(getattr(pltpu.get_tpu_info(), "vmem_capacity_bytes", 64 << 20))
    except Exception:
        vmem_cap = 64 << 20                                 # v7x-safe fallback
    vmem_budget = (vmem_cap * 3) // 4                       # ~48 MiB v7x, ~96 MiB v5e/v6e
    tb_vmem = max(8, int((vmem_budget - fixed_bytes) // per_row) // 8 * 8)

    # --- batch tile: multiple of 8 (sublane-aligned mo[:tb]/mo[tb:] split and
    # output rows); keep >= 2 grid steps once B > 8 so 2-TC chips split work.
    tb_cap = 8 * pl.cdiv(B, 16) if B > 8 else 8
    tb_req = max(8, (int(tb) // 8) * 8)
    tb = min(tb_req, tb_cap, tb_vmem)

    n_steps = pl.cdiv(B, tb)
    b_pad = n_steps * tb
    if b_pad != B:
        # padded rows are independent garbage rows sliced off at the end; every
        # reduction is per-sample so they cannot pollute real outputs.
        xr = jnp.pad(xr, ((0, b_pad - B), (0, 0), (0, 0)))

    # --- weights (bf16 operands for the MXU, f32 accumulation in-kernel) ---
    w1t = jnp.asarray(params["w1"], jnp.float32).reshape(HID, C).T.astype(jnp.bfloat16)
    w2t = jnp.asarray(params["w2"], jnp.float32).reshape(C, HID).T.astype(jnp.bfloat16)
    m_max, m_avg = _conv7x7_as_matmuls(params["w_sp"])
    m_maxT = m_max.T.astype(jnp.bfloat16)                    # batch-on-M form
    m_avgT = m_avg.T.astype(jnp.bfloat16)
    wlt = jnp.zeros((C, OUT_PAD), jnp.float32).at[:, :OUT].set(
        jnp.asarray(params["w_lin"], jnp.float32).T).astype(jnp.bfloat16)   # (C, 128)

    needed = tb * per_row + fixed_bytes
    vmem_limit = int(max(32 << 20, min(needed, vmem_budget)))

    out = pl.pallas_call(
        cbam_kernel,
        out_shape=jax.ShapeDtypeStruct((b_pad, OUT_PAD), jnp.float32),
        grid=(n_steps,),
        in_specs=[
            pl.BlockSpec((tb, HW, C), lambda b: (b, 0, 0)),   # x, TB samples per step
            pl.BlockSpec(w1t.shape, lambda b: (0, 0)),
            pl.BlockSpec(w2t.shape, lambda b: (0, 0)),
            pl.BlockSpec(m_maxT.shape, lambda b: (0, 0)),
            pl.BlockSpec(m_avgT.shape, lambda b: (0, 0)),
            pl.BlockSpec(wlt.shape, lambda b: (0, 0)),
        ],
        out_specs=pl.BlockSpec((tb, OUT_PAD), lambda b: (b, 0)),
        compiler_params=pltpu.CompilerParams(
            dimension_semantics=("parallel",),
            vmem_limit_bytes=vmem_limit),
    )(xr, w1t, w2t, m_maxT, m_avgT, wlt)
    return out[:B, :OUT]


def cbam_reference(x, params):
    """Plain NumPy (f32) reference matching the PyTorch forward exactly."""
    xr = np.asarray(x, np.float32).reshape(-1, H, W, C).transpose(0, 3, 1, 2)  # NCHW
    w1 = np.asarray(params["w1"]).reshape(HID, C)
    w2 = np.asarray(params["w2"]).reshape(C, HID)
    w_sp = np.asarray(params["w_sp"])
    wl = np.asarray(params["w_lin"])

    maxp = xr.max(axis=(2, 3))          # (B, C)
    avgp = xr.mean(axis=(2, 3))

    def mlp(p):
        return np.maximum(p @ w1.T, 0.0) @ w2.T

    ch = 1.0 / (1.0 + np.exp(-(mlp(maxp) + mlp(avgp))))        # (B, C)
    x1 = xr * ch[:, :, None, None]
    max_c = x1.max(axis=1)              # (B, 7, 7)
    avg_c = x1.mean(axis=1)
    pm = np.pad(max_c, ((0, 0), (PAD, PAD), (PAD, PAD)))
    pa = np.pad(avg_c, ((0, 0), (PAD, PAD), (PAD, PAD)))
    sp = np.zeros_like(max_c)
    for di in range(KSP):
        for dj in range(KSP):
            sp += w_sp[0, 0, di, dj] * pm[:, di:di + H, dj:dj + W]
            sp += w_sp[0, 1, di, dj] * pa[:, di:di + H, dj:dj + W]
    sp = 1.0 / (1.0 + np.exp(-sp))
    x2 = x1 * sp[:, None, :, :]
    pooled = x2.mean(axis=(2, 3))       # (B, C)
    return pooled @ wl.T                # (B, 2)


if __name__ == "__main__":
    key = jax.random.PRNGKey(0)
    k_x, k1, k2, k3, k4 = jax.random.split(key, 5)

    # input: (B=2, 49, 768), reshapeable to (2, 7, 7, 768) exactly as the torch view()
    x = jax.random.normal(k_x, (2, HW, C), jnp.float32)

    # deterministic synthetic parameters (shapes from CBAMLayer.__init__ with channel=768)
    params = {
        "w1": jax.random.normal(k1, (HID, C, 1, 1), jnp.float32) * 0.05,     # mlp Conv2d(768,192,1)
        "w2": jax.random.normal(k2, (C, HID, 1, 1), jnp.float32) * 0.05,     # mlp Conv2d(192,768,1)
        "w_sp": jax.random.normal(k3, (1, 2, KSP, KSP), jnp.float32) * 0.1,  # Conv2d(2,1,7,pad=3)
        "w_lin": jax.random.normal(k4, (2, C), jnp.float32) * 0.05,          # Linear(768,2)
    }

    out = jax.block_until_ready(cbam_forward(x, params))
    ref = cbam_reference(x, params)
    assert out.shape == (2, 2)
    assert np.allclose(np.asarray(out), ref, rtol=1e-2, atol=1e-2), (np.asarray(out), ref)
    print("KERNEL_OK")
</pallas_src>

<mosaic_0001>
module attributes {stable_mosaic.version = 11 : i64} {
  func.func @cbam_kernel(%arg0: i32, %arg1: memref<8x49x768xbf16, #tpu.memory_space<vmem>>, %arg2: memref<768x192xbf16, #tpu.memory_space<vmem>>, %arg3: memref<192x768xbf16, #tpu.memory_space<vmem>>, %arg4: memref<49x49xbf16, #tpu.memory_space<vmem>>, %arg5: memref<49x49xbf16, #tpu.memory_space<vmem>>, %arg6: memref<768x128xbf16, #tpu.memory_space<vmem>>, %arg7: memref<8x128xf32, #tpu.memory_space<vmem>>) attributes {dimension_semantics = [#tpu.dimension_semantics<parallel>], iteration_bounds = array<i64: 1>, scalar_prefetch = 0 : i64, scratch_operands = 0 : i64, tpu.core_type = #tpu.core_type<tc>, window_params = [{transform_indices = @transform_0, window_bounds = array<i64: 8, 49, 768>}, {pipeline_mode = #tpu.pipeline_mode<synchronous>, transform_indices = @transform_1, window_bounds = array<i64: 768, 192>}, {pipeline_mode = #tpu.pipeline_mode<synchronous>, transform_indices = @transform_2, window_bounds = array<i64: 192, 768>}, {pipeline_mode = #tpu.pipeline_mode<synchronous>, transform_indices = @transform_3, window_bounds = array<i64: 49, 49>}, {pipeline_mode = #tpu.pipeline_mode<synchronous>, transform_indices = @transform_4, window_bounds = array<i64: 49, 49>}, {pipeline_mode = #tpu.pipeline_mode<synchronous>, transform_indices = @transform_5, window_bounds = array<i64: 768, 128>}, {transform_indices = @transform_6, window_bounds = array<i64: 8, 128>}]} {
    %c0 = arith.constant 0 : index
    %c0_0 = arith.constant 0 : index
    %c0_1 = arith.constant 0 : index
    %0 = vector.load %arg1[%c0, %c0_0, %c0_1] : memref<8x49x768xbf16, #tpu.memory_space<vmem>>, vector<8x49x768xbf16>
    %1 = arith.extf %0 : vector<8x49x768xbf16> to vector<8x49x768xf32>
    %cst = arith.constant dense<0xFF800000> : vector<8x768xf32>
    %2 = vector.multi_reduction <maximumf>, %1, %cst [1] : vector<8x49x768xf32> to vector<8x768xf32>
    %cst_2 = arith.constant dense<0.000000e+00> : vector<8x768xf32>
    %3 = vector.multi_reduction <add>, %1, %cst_2 [1] : vector<8x49x768xf32> to vector<8x768xf32>
    %cst_3 = arith.constant 0.0204081628 : f32
    %4 = vector.broadcast %cst_3 : f32 to vector<8x768xf32>
    %5 = arith.mulf %3, %4 : vector<8x768xf32>
    %6 = tpu.concatenate %2, %5 in 0 : vector<8x768xf32>, vector<8x768xf32> -> vector<16x768xf32>
    %7 = arith.truncf %6 : vector<16x768xf32> to vector<16x768xbf16>
    %c0_4 = arith.constant 0 : index
    %c0_5 = arith.constant 0 : index
    %8 = vector.load %arg2[%c0_4, %c0_5] : memref<768x192xbf16, #tpu.memory_space<vmem>>, vector<768x192xbf16>
    %cst_6 = arith.constant dense<0.000000e+00> : vector<16x192xf32>
    %9 = tpu.matmul %7, %8, %cst_6 {dimension_numbers = #tpu.dot_dimension_numbers<[1], [0], [0], [1], [0, 0, 1, 1], [], []>} : vector<16x768xbf16>, vector<768x192xbf16>, vector<16x192xf32> -> vector<16x192xf32>
    %cst_7 = arith.constant 0.000000e+00 : f32
    %10 = vector.broadcast %cst_7 : f32 to vector<16x192xf32>
    %11 = arith.maximumf %9, %10 : vector<16x192xf32>
    %12 = arith.truncf %11 : vector<16x192xf32> to vector<16x192xbf16>
    %c0_8 = arith.constant 0 : index
    %c0_9 = arith.constant 0 : index
    %13 = vector.load %arg3[%c0_8, %c0_9] : memref<192x768xbf16, #tpu.memory_space<vmem>>, vector<192x768xbf16>
    %cst_10 = arith.constant dense<0.000000e+00> : vector<16x768xf32>
    %14 = tpu.matmul %12, %13, %cst_10 {dimension_numbers = #tpu.dot_dimension_numbers<[1], [0], [0], [1], [0, 0, 1, 1], [], []>} : vector<16x192xbf16>, vector<192x768xbf16>, vector<16x768xf32> -> vector<16x768xf32>
    %15 = vector.extract_strided_slice %14 {offsets = [0, 0], sizes = [8, 768], strides = [1, 1]} : vector<16x768xf32> to vector<8x768xf32>
    %16 = vector.extract_strided_slice %14 {offsets = [8, 0], sizes = [8, 768], strides = [1, 1]} : vector<16x768xf32> to vector<8x768xf32>
    %17 = arith.addf %15, %16 : vector<8x768xf32>
    %18 = arith.negf %17 : vector<8x768xf32>
    %19 = math.exp %18 : vector<8x768xf32>
    %cst_11 = arith.constant 1.000000e+00 : f32
    %20 = vector.broadcast %cst_11 : f32 to vector<8x768xf32>
    %21 = arith.addf %20, %19 : vector<8x768xf32>
    %22 = arith.divf %20, %21 : vector<8x768xf32>
    %23 = vector.shape_cast %22 : vector<8x768xf32> to vector<8x1x768xf32>
    %24 = vector.broadcast %23 : vector<8x1x768xf32> to vector<8x49x768xf32>
    %25 = arith.mulf %1, %24 : vector<8x49x768xf32>
    %cst_12 = arith.constant dense<0xFF800000> : vector<8x49xf32>
    %26 = vector.multi_reduction <maximumf>, %25, %cst_12 [2] : vector<8x49x768xf32> to vector<8x49xf32>
    %cst_13 = arith.constant dense<0.000000e+00> : vector<8x49xf32>
    %27 = vector.multi_reduction <add>, %25, %cst_13 [2] : vector<8x49x768xf32> to vector<8x49xf32>
    %cst_14 = arith.constant 0.00130208337 : f32
    %28 = vector.broadcast %cst_14 : f32 to vector<8x49xf32>
    %29 = arith.mulf %27, %28 : vector<8x49xf32>
    %30 = arith.truncf %26 : vector<8x49xf32> to vector<8x49xbf16>
    %c0_15 = arith.constant 0 : index
    %c0_16 = arith.constant 0 : index
    %31 = vector.load %arg4[%c0_15, %c0_16] : memref<49x49xbf16, #tpu.memory_space<vmem>>, vector<49x49xbf16>
    %cst_17 = arith.constant dense<0.000000e+00> : vector<8x49xf32>
    %32 = tpu.matmul %30, %31, %cst_17 {dimension_numbers = #tpu.dot_dimension_numbers<[1], [0], [0], [1], [0, 0, 1, 1], [], []>} : vector<8x49xbf16>, vector<49x49xbf16>, vector<8x49xf32> -> vector<8x49xf32>
    %33 = arith.truncf %29 : vector<8x49xf32> to vector<8x49xbf16>
    %c0_18 = arith.constant 0 : index
    %c0_19 = arith.constant 0 : index
    %34 = vector.load %arg5[%c0_18, %c0_19] : memref<49x49xbf16, #tpu.memory_space<vmem>>, vector<49x49xbf16>
    %cst_20 = arith.constant dense<0.000000e+00> : vector<8x49xf32>
    %35 = tpu.matmul %33, %34, %cst_20 {dimension_numbers = #tpu.dot_dimension_numbers<[1], [0], [0], [1], [0, 0, 1, 1], [], []>} : vector<8x49xbf16>, vector<49x49xbf16>, vector<8x49xf32> -> vector<8x49xf32>
    %36 = arith.addf %32, %35 : vector<8x49xf32>
    %37 = arith.negf %36 : vector<8x49xf32>
    %38 = math.exp %37 : vector<8x49xf32>
    %cst_21 = arith.constant 1.000000e+00 : f32
    %39 = vector.broadcast %cst_21 : f32 to vector<8x49xf32>
    %40 = arith.addf %39, %38 : vector<8x49xf32>
    %41 = arith.divf %39, %40 : vector<8x49xf32>
    %42 = vector.shape_cast %41 : vector<8x49xf32> to vector<8x49x1xf32>
    %43 = vector.broadcast %42 : vector<8x49x1xf32> to vector<8x49x768xf32>
    %44 = arith.mulf %1, %43 : vector<8x49x768xf32>
    %cst_22 = arith.constant dense<0.000000e+00> : vector<8x768xf32>
    %45 = vector.multi_reduction <add>, %44, %cst_22 [1] : vector<8x49x768xf32> to vector<8x768xf32>
    %46 = arith.mulf %22, %45 : vector<8x768xf32>
    %cst_23 = arith.constant 0.0204081628 : f32
    %47 = vector.broadcast %cst_23 : f32 to vector<8x768xf32>
    %48 = arith.mulf %46, %47 : vector<8x768xf32>
    %49 = arith.truncf %48 : vector<8x768xf32> to vector<8x768xbf16>
    %c0_24 = arith.constant 0 : index
    %c0_25 = arith.constant 0 : index
    %50 = vector.load %arg6[%c0_24, %c0_25] : memref<768x128xbf16, #tpu.memory_space<vmem>>, vector<768x128xbf16>
    %cst_26 = arith.constant dense<0.000000e+00> : vector<8x128xf32>
    %51 = tpu.matmul %49, %50, %cst_26 {dimension_numbers = #tpu.dot_dimension_numbers<[1], [0], [0], [1], [0, 0, 1, 1], [], []>} : vector<8x768xbf16>, vector<768x128xbf16>, vector<8x128xf32> -> vector<8x128xf32>
    %c0_27 = arith.constant 0 : index
    %c0_28 = arith.constant 0 : index
    %52 = vector.load %arg7[%c0_27, %c0_28] : memref<8x128xf32, #tpu.memory_space<vmem>>, vector<8x128xf32>
    tpu.vector_store %arg7[%c0_27, %c0_28], %51 {strides = array<i32>} : memref<8x128xf32, #tpu.memory_space<vmem>>, vector<8x128xf32>,
    return
  }
  func.func @transform_0(%arg0: i32) -> (i32, i32, i32) {
    %c0_i32 = arith.constant 0 : i32
    %c0_i32_0 = arith.constant 0 : i32
    %c0_i32_1 = arith.constant 0 : i32
    return %arg0, %c0_i32, %c0_i32_0 : i32, i32, i32
  }
  func.func @transform_1(%arg0: i32) -> (i32, i32) {
    %c0_i32 = arith.constant 0 : i32
    %c0_i32_0 = arith.constant 0 : i32
    %c0_i32_1 = arith.constant 0 : i32
    return %c0_i32, %c0_i32_0 : i32, i32
  }
  func.func @transform_2(%arg0: i32) -> (i32, i32) {
    %c0_i32 = arith.constant 0 : i32
    %c0_i32_0 = arith.constant 0 : i32
    %c0_i32_1 = arith.constant 0 : i32
    return %c0_i32, %c0_i32_0 : i32, i32
  }
  func.func @transform_3(%arg0: i32) -> (i32, i32) {
    %c0_i32 = arith.constant 0 : i32
    %c0_i32_0 = arith.constant 0 : i32
    %c0_i32_1 = arith.constant 0 : i32
    return %c0_i32, %c0_i32_0 : i32, i32
  }
  func.func @transform_4(%arg0: i32) -> (i32, i32) {
    %c0_i32 = arith.constant 0 : i32
    %c0_i32_0 = arith.constant 0 : i32
    %c0_i32_1 = arith.constant 0 : i32
    return %c0_i32, %c0_i32_0 : i32, i32
  }
  func.func @transform_5(%arg0: i32) -> (i32, i32) {
    %c0_i32 = arith.constant 0 : i32
    %c0_i32_0 = arith.constant 0 : i32
    %c0_i32_1 = arith.constant 0 : i32
    return %c0_i32, %c0_i32_0 : i32, i32
  }
  func.func @transform_6(%arg0: i32) -> (i32, i32) {
    %c0_i32 = arith.constant 0 : i32
    %c0_i32_0 = arith.constant 0 : i32
    return %arg0, %c0_i32 : i32, i32
  }
}

</mosaic_0001>

<bundles_post_ra>
// kernel: tpu_custom_call.1
= control target key start
LH: loop header
LB: loop body
LE: loop exit
PB: predicated region body
PF: predicated region fallthrough
CT: control target
= control target key end

     0   :  { %vm534_vm0 = vcmask 1040384   ;;  %vm1874_vm1 = vcmask 1041409   ;;  %vm1876_vm2 = vcmask 1042434   ;;  %vm1878_vm3 = vcmask 1043459   ;;  %s15661_s0 = inlined_call_operand.vmem [shape: bf16[8,49,768], index: 0, kind: input, shape index: {}]   ;;  %s15662_s1 = inlined_call_operand.vmem [shape: bf16[768,192], index: 1, kind: input, shape index: {}]   ;;  %s15663_s2 = inlined_call_operand.vmem [shape: bf16[192,768], index: 2, kind: input, shape index: {}]   ;;  %s15664_s3 = inlined_call_operand.vmem [shape: bf16[49,49], index: 3, kind: input, shape index: {}]   ;;  %s15665_s4 = inlined_call_operand.vmem [shape: bf16[49,49], index: 4, kind: input, shape index: {}]   ;;  %s15666_s5 = inlined_call_operand.vmem [shape: bf16[768,128], index: 5, kind: input, shape index: {}]   ;;  %s15667_s6 = inlined_call_operand.hbm [shape: f32[8,128], index: 6, kind: output, shape index: {}]  }
   0x1   :  { %v8150_v0 = vld [vmem:[%s15662_s1 + $0x4] ss:$8 sps:$4 sm:$0xff]   ;;  %v8152_v1 = vld [vmem:[%s15662_s1] ss:$8 sps:$4 sm:$0xff]   ;;  %v8153_v2 = vld [vmem:[%s15662_s1 + $0x14] ss:$8 sps:$4 sm:$0xff]  }
   0x2   :  { %2607 = vmatprep.subr.bf16.mxu0 %v8150_v0  ;;  %v8155_v3 = vld [vmem:[%s15662_s1 + $0x10] ss:$8 sps:$4 sm:$0xff]   ;;  %v8156_v4 = vld [vmem:[%s15662_s1 + $0x24] ss:$8 sps:$4 sm:$0xff]   ;;  %v8158_v5 = vld [vmem:[%s15662_s1 + $0x20] ss:$8 sps:$4 sm:$0xff]  }
   0x3   :  { %2608 = vmatpush1.bf16.msra.mxu0 %v8152_v1  ;;  %v8159_v6 = vld [vmem:[%s15662_s1 + $0x34] ss:$8 sps:$4 sm:$0xff]   ;;  %v8161_v7 = vld [vmem:[%s15662_s1 + $0x30] ss:$8 sps:$4 sm:$0xff]   ;;  %v8162_v8 = vld [vmem:[%s15662_s1 + $0x44] ss:$8 sps:$4 sm:$0xff]  }
   0x4   :  { %2609 = vmatprep.subr.bf16.mxu0 %v8153_v2  ;;  %v8164_v9 = vld [vmem:[%s15662_s1 + $0x40] ss:$8 sps:$4 sm:$0xff]   ;;  %v8165_v10 = vld [vmem:[%s15662_s1 + $0x54] ss:$8 sps:$4 sm:$0xff]   ;;  %v8167_v11 = vld [vmem:[%s15662_s1 + $0x50] ss:$8 sps:$4 sm:$0xff]  }
   0x5   :  { %v8168_v12 = vld [vmem:[%s15662_s1 + $0x64] ss:$8 sps:$4 sm:$0xff]   ;;  %v8170_v13 = vld [vmem:[%s15662_s1 + $0x60] ss:$8 sps:$4 sm:$0xff]   ;;  %v28_v15 = vld [vmem:[%s15661_s0 + $0x18] sm:$0xff]  ;;  %vm1880_vm4 = vcmask 1044484  }
   0x6   :  { %v25_v14 = vld [vmem:[%s15661_s0] sm:$0xff]  ;;  %v8171_v16 = vld [vmem:[%s15662_s1 + $0x74] ss:$8 sps:$4 sm:$0xff]   ;;  %v34_v18 = vld [vmem:[%s15661_s0 + $0x48] sm:$0xff]  ;;  %v8614_v22 = vunpack.c.l.bf16 %v28_v15  ;;  %v8616_v23 = vunpack.c.h.bf16 %v28_v15  ;;  %vm1882_vm5 = vcmask 1045509   ;;  %vm1884_vm6 = vcmask 1046534  }
   0x7   :  { %2610 = vmatpush1.bf16.msra.mxu0 %v8155_v3  ;;  %v31_v17 = vld [vmem:[%s15661_s0 + $0x30] sm:$0xff]  ;;  %v37_v19 = vld [vmem:[%s15661_s0 + $0x60] sm:$0xff]  ;;  %v8610_v20 = vunpack.c.l.bf16 %v25_v14  ;;  %v8612_v21 = vunpack.c.h.bf16 %v25_v14  ;;  %v40_v24 = vld [vmem:[%s15661_s0 + $0x78] sm:$0xff]  ;;  %v8631_v29 = vunpack.c.l.bf16 %v34_v18  ;;  %v8633_v30 = vunpack.c.h.bf16 %v34_v18 }
   0x8   :  { %2611 = vmatprep.subr.bf16.mxu0 %v8156_v4  ;;  %16560 = vst [vmem:[#allocation7_spill] sm:$0xff] %v8614_v22  ;;  %16561 = vst [vmem:[#allocation8_spill] sm:$0xff] %v8616_v23  ;;  %v43_v25 = vld [vmem:[%s15661_s0 + $0x90] sm:$0x11]  ;;  %v46_v26 = vld [vmem:[%s15661_s0 + $0xa8] sm:$0xff]  ;;  %v8627_v27 = vunpack.c.l.bf16 %v31_v17  ;;  %v8629_v28 = vunpack.c.h.bf16 %v31_v17  ;;  %v8644_v34 = vunpack.c.l.bf16 %v37_v19  ;;  %v8646_v35 = vunpack.c.h.bf16 %v37_v19 }
   0x9   :  { %16558 = vst [vmem:[#allocation5_spill] sm:$0xff] %v8610_v20  ;;  %16559 = vst [vmem:[#allocation6_spill] sm:$0xff] %v8612_v21  ;;  %v49_v31 = vld [vmem:[%s15661_s0 + $0xc0] sm:$0xff]  ;;  %v52_v32 = vld [vmem:[%s15661_s0 + $0xd8] sm:$0xff]  ;;  %v8648_v36 = vunpack.c.l.bf16 %v40_v24  ;;  %v8650_v37 = vunpack.c.h.bf16 %v40_v24  ;;  %v8661_v41 = vunpack.c.l.bf16 %v43_v25  ;;  %v8663_v42 = vunpack.c.h.bf16 %v43_v25 }
   0xa   :  { %16562 = vst [vmem:[#allocation9_spill] sm:$0xff] %v8627_v27  ;;  %16563 = vst [vmem:[#allocation10_spill] sm:$0xff] %v8629_v28  ;;  %v55_v33 = vld [vmem:[%s15661_s0 + $0xf0] sm:$0xff]  ;;  %v58_v38 = vld [vmem:[%s15661_s0 + $0x108] sm:$0xff]  ;;  %v8665_v43 = vunpack.c.l.bf16 %v46_v26  ;;  %v8667_v44 = vunpack.c.h.bf16 %v46_v26  ;;  %v8675_v47 = vunpack.c.l.bf16 %v49_v31  ;;  %v8677_v48 = vunpack.c.h.bf16 %v49_v31 }
   0xb   :  { %2612 = vmatpush1.bf16.msra.mxu0 %v8158_v5  ;;  %16564 = vst [vmem:[#allocation11_spill] sm:$0xff] %v8631_v29  ;;  %16565 = vst [vmem:[#allocation12_spill] sm:$0xff] %v8633_v30  ;;  %v61_v39 = vld [vmem:[%s15661_s0 + $0x120] sm:$0xff]  ;;  %v64_v40 = vld [vmem:[%s15661_s0 + $0x138] sm:$0x11]  ;;  %v8679_v49 = vunpack.c.l.bf16 %v52_v32  ;;  %v8681_v50 = vunpack.c.h.bf16 %v52_v32  ;;  %v8692_v54 = vunpack.c.l.bf16 %v55_v33  ;;  %v8694_v55 = vunpack.c.h.bf16 %v55_v33 }
   0xc   :  { %2613 = vmatprep.subr.bf16.mxu0 %v8159_v6  ;;  %16566 = vst [vmem:[#allocation13_spill] sm:$0xff] %v8644_v34  ;;  %16567 = vst [vmem:[#allocation14_spill] sm:$0xff] %v8646_v35  ;;  %v67_v45 = vld [vmem:[%s15661_s0 + $0x150] sm:$0xff]  ;;  %v70_v46 = vld [vmem:[%s15661_s0 + $0x168] sm:$0xff]  ;;  %v8696_v56 = vunpack.c.l.bf16 %v58_v38  ;;  %v8698_v57 = vunpack.c.h.bf16 %v58_v38  ;;  %v8709_v61 = vunpack.c.l.bf16 %v61_v39  ;;  %v8711_v62 = vunpack.c.h.bf16 %v61_v39 }
   0xd   :  { %16568 = vst [vmem:[#allocation15_spill] sm:$0xff] %v8648_v36  ;;  %16569 = vst [vmem:[#allocation16_spill] sm:$0xff] %v8650_v37  ;;  %v8173_v51 = vld [vmem:[%s15662_s1 + $0x70] ss:$8 sps:$4 sm:$0xff]   ;;  %v73_v52 = vld [vmem:[%s15661_s0 + $0x180] sm:$0xff]  ;;  %v8713_v63 = vunpack.c.l.bf16 %v64_v40  ;;  %v8715_v0 = vunpack.c.h.bf16 %v64_v40  ;;  %v8723_v3 = vunpack.c.l.bf16 %v67_v45  ;;  %v8725_v4 = vunpack.c.h.bf16 %v67_v45 }
   0xe   :  { %16570 = vst [vmem:[#allocation17_spill] sm:$0xff] %v8661_v41  ;;  %16571 = vst [vmem:[#allocation18_spill] sm:$0xff] %v8663_v42  ;;  %v76_v53 = vld [vmem:[%s15661_s0 + $0x198] sm:$0xff]  ;;  %v8174_v58 = vld [vmem:[%s15662_s1 + $0x84] ss:$8 sps:$4 sm:$0xff]   ;;  %v8727_v5 = vunpack.c.l.bf16 %v70_v46  ;;  %v8729_v6 = vunpack.c.h.bf16 %v70_v46  ;;  %vm1886_vm7 = vcmask 1047559  }
   0xf   :  { %2614 = vmatpush1.bf16.msra.mxu0 %v8161_v7  ;;  %16572 = vst [vmem:[#allocation19_spill] sm:$0xff] %v8665_v43  ;;  %16573 = vst [vmem:[#allocation20_spill] sm:$0xff] %v8667_v44  ;;  %v79_v59 = vld [vmem:[%s15661_s0 + $0x1b0] sm:$0xff]  ;;  %v82_v60 = vld [vmem:[%s15661_s0 + $0x1c8] sm:$0xff] }
  0x10   :  { %2615 = vmatprep.subr.bf16.mxu0 %v8162_v8  ;;  %16574 = vst [vmem:[#allocation21_spill] sm:$0xff] %v8675_v47  ;;  %16575 = vst [vmem:[#allocation22_spill] sm:$0xff] %v8677_v48  ;;  %v85_v1 = vld [vmem:[%s15661_s0 + $0x1e0] sm:$0x11]  ;;  %v88_v2 = vld [vmem:[%s15661_s0 + $0x1f8] sm:$0xff]  ;;  %v8756_v17 = vunpack.c.h.bf16 %v79_v59  ;;  %v8758_v18 = vunpack.c.l.bf16 %v82_v60  ;;  %v8760_v19 = vunpack.c.h.bf16 %v82_v60 }
  0x11   :  { %16576 = vst [vmem:[#allocation23_spill] sm:$0xff] %v8679_v49  ;;  %16577 = vst [vmem:[#allocation24_spill] sm:$0xff] %v8681_v50  ;;  %v91_v7 = vld [vmem:[%s15661_s0 + $0x210] sm:$0xff]  ;;  %v94_v8 = vld [vmem:[%s15661_s0 + $0x228] sm:$0xff]  ;;  %v8771_v31 = vunpack.c.l.bf16 %v85_v1  ;;  %v8773_v32 = vunpack.c.h.bf16 %v85_v1  ;;  %v8775_v33 = vunpack.c.l.bf16 %v88_v2  ;;  %v8777_v38 = vunpack.c.h.bf16 %v88_v2 }
  0x12   :  { %16578 = vst [vmem:[#allocation25_spill] sm:$0xff] %v8692_v54  ;;  %16579 = vst [vmem:[#allocation26_spill] sm:$0xff] %v8694_v55  ;;  %v97_v14 = vld [vmem:[%s15661_s0 + $0x240] sm:$0xff]  ;;  %v100_v15 = vld [vmem:[%s15661_s0 + $0x258] sm:$0xff]  ;;  %v8785_v45 = vunpack.c.l.bf16 %v91_v7  ;;  %v8787_v46 = vunpack.c.h.bf16 %v91_v7 }
  0x13   :  { %2616 = vmatpush1.bf16.msra.mxu0 %v8164_v9  ;;  %16580 = vst [vmem:[#allocation27_spill] sm:$0xff] %v8696_v56  ;;  %16581 = vst [vmem:[#allocation28_spill] sm:$0xff] %v8698_v57  ;;  %v8737_v9 = vunpack.c.l.bf16 %v73_v52  ;;  %v8177_v24 = vld [vmem:[%s15662_s1 + $0x94] ss:$8 sps:$4 sm:$0xff]   ;;  %v106_v26 = vld [vmem:[%s15661_s0 + $0x288] sm:$0x11]  ;;  %v8802_v60 = vunpack.c.l.bf16 %v97_v14  ;;  %v8804_v1 = vunpack.c.h.bf16 %v97_v14  ;;  %v8806_v2 = vunpack.c.l.bf16 %v100_v15 }
  0x14   :  { %2617 = vmatprep.subr.bf16.mxu0 %v8165_v10  ;;  %16582 = vst [vmem:[#allocation29_spill] sm:$0xff] %v8709_v61  ;;  %16583 = vst [vmem:[#allocation30_spill] sm:$0xff] %v8711_v62  ;;  %v8739_v10 = vunpack.c.h.bf16 %v73_v52  ;;  %v103_v25 = vld [vmem:[%s15661_s0 + $0x270] sm:$0xff]  ;;  %v109_v39 = vld [vmem:[%s15661_s0 + $0x2a0] sm:$0xff]  ;;  %v8791_v52 = vunpack.c.h.bf16 %v94_v8  ;;  %v8808_v7 = vunpack.c.h.bf16 %v100_v15  ;;  %v8825_v15 = vunpack.c.h.bf16 %v106_v26 }
  0x15   :  { %16584 = vst [vmem:[#allocation31_spill] sm:$0xff] %v8713_v63  ;;  %16585 = vst [vmem:[#allocation32_spill] sm:$0xff] %v8715_v0  ;;  %v112_v40 = vld [vmem:[%s15661_s0 + $0x2b8] sm:$0xff]  ;;  %v8821_v14 = vunpack.c.h.bf16 %v103_v25  ;;  %v130_v56 = vld [vmem:[%s15661_s0 + $0x348] sm:$0xff] }
  0x16   :  { %16586 = vst [vmem:[#allocation33_spill] sm:$0xff] %v8723_v3  ;;  %16587 = vst [vmem:[#allocation34_spill] sm:$0xff] %v8725_v4  ;;  %v124_v61 = vld [vmem:[%s15661_s0 + $0x318] sm:$0xff]  ;;  %v8840_v36 = vunpack.c.l.bf16 %v112_v40  ;;  %v139_v54 = vld [vmem:[%s15661_s0 + $0x390] sm:$0xff] }
  0x17   :  { %2618 = vmatpush1.bf16.msra.mxu0 %v8167_v11  ;;  %16588 = vst [vmem:[#allocation35_spill] sm:$0xff] %v8727_v5  ;;  %16589 = vst [vmem:[#allocation36_spill] sm:$0xff] %v8729_v6  ;;  %v8741_v11 = vunpack.c.l.bf16 %v76_v53  ;;  %v8183_v34 = vld [vmem:[%s15662_s1 + $0xb4] ss:$8 sps:$4 sm:$0xff]   ;;  %v8882_v49 = vunpack.c.h.bf16 %v124_v61  ;;  %v166_v29 = vld [vmem:[%s15661_s0 + $0x468] sm:$0xff]  ;;  %v8924_v63 = vunpack.c.l.bf16 %v139_v54 }
  0x18   :  { %2619 = vmatprep.subr.bf16.mxu0 %v8168_v12  ;;  %16590 = vst [vmem:[#allocation37_spill] sm:$0xff] %v8737_v9  ;;  %16591 = vst [vmem:[#allocation38_spill] sm:$0xff] %v8739_v10  ;;  %v8743_v12 = vunpack.c.h.bf16 %v76_v53  ;;  %v8179_v53 = vld [vmem:[%s15662_s1 + $0x90] ss:$8 sps:$4 sm:$0xff]   ;;  %v178_v47 = vld [vmem:[%s15661_s0 + $0x4c8] sm:$0xff] }
  0x19   :  { %16592 = vst [vmem:[#allocation39_spill] sm:$0xff] %v8741_v11  ;;  %16595 = vst [vmem:[#allocation42_spill] sm:$0xff] %v8756_v17  ;;  %v136_v11 = vld [vmem:[%s15661_s0 + $0x378] sm:$0xff]  ;;  %v175_v43 = vld [vmem:[%s15661_s0 + $0x4b0] sm:$0xff] }
  0x1a   :  { %16593 = vst [vmem:[#allocation40_spill] sm:$0xff] %v8743_v12  ;;  %16596 = vst [vmem:[#allocation43_spill] sm:$0xff] %v8758_v18  ;;  %v121_v18 = vld [vmem:[%s15661_s0 + $0x300] sm:$0xff]  ;;  %v148_v9 = vld [vmem:[%s15661_s0 + $0x3d8] sm:$0x11] }
  0x1b   :  { %2620 = vmatpush1.bf16.msra.mxu0 %v8170_v13  ;;  %v8176_v13 = vld [vmem:[%s15662_s1 + $0x80] ss:$8 sps:$4 sm:$0xff]   ;;  %16597 = vst [vmem:[#allocation44_spill] sm:$0xff] %v8760_v19  ;;  %16598 = vst [vmem:[#allocation45_spill] sm:$0xff] %v8771_v31  ;;  %v160_v31 = vld [vmem:[%s15661_s0 + $0x438] sm:$0xff]  ;;  %v8998_v19 = vunpack.c.h.bf16 %v175_v43 }
  0x1c   :  { %2621 = vmatprep.subr.bf16.mxu0 %v8171_v16  ;;  %v8754_v16 = vunpack.c.l.bf16 %v79_v59  ;;  %16599 = vst [vmem:[#allocation46_spill] sm:$0xff] %v8773_v32  ;;  %16600 = vst [vmem:[#allocation47_spill] sm:$0xff] %v8775_v33  ;;  %v118_v59 = vld [vmem:[%s15661_s0 + $0x2e8] sm:$0xff]  ;;  %v181_v27 = vld [vmem:[%s15661_s0 + $0x4e0] sm:$0xff] }
  0x1d   :  { %16601 = vst [vmem:[#allocation48_spill] sm:$0xff] %v8777_v38  ;;  %16602 = vst [vmem:[#allocation49_spill] sm:$0xff] %v8785_v45  ;;  %v154_v33 = vld [vmem:[%s15661_s0 + $0x408] sm:$0xff]  ;;  %v157_v45 = vld [vmem:[%s15661_s0 + $0x420] sm:$0xff] }
  0x1e   :  { %16594 = vst [vmem:[#allocation41_spill] sm:$0xff] %v8754_v16  ;;  %16603 = vst [vmem:[#allocation50_spill] sm:$0xff] %v8787_v46  ;;  %v8819_v16 = vunpack.c.l.bf16 %v103_v25  ;;  %v8838_v25 = vunpack.c.h.bf16 %v109_v39  ;;  %v184_v41 = vld [vmem:[%s15661_s0 + $0x4f8] sm:$0xff] }
  0x1f   :  { %2622 = vmatpush1.bf16.msra.mxu0 %v8173_v51  ;;  %v8789_v51 = vunpack.c.l.bf16 %v94_v8  ;;  %16605 = vst [vmem:[#allocation52_spill] sm:$0xff] %v8791_v52  ;;  %16606 = vst [vmem:[#allocation53_spill] sm:$0xff] %v8802_v60  ;;  %v8180_v8 = vld [vmem:[%s15662_s1 + $0xa4] ss:$8 sps:$4 sm:$0xff]  }
  0x20   :  { %2623 = vmatprep.subr.bf16.mxu0 %v8174_v58  ;;  %v115_v58 = vld [vmem:[%s15661_s0 + $0x2d0] sm:$0xff]  ;;  %16607 = vst [vmem:[#allocation54_spill] sm:$0xff] %v8804_v1  ;;  %16608 = vst [vmem:[#allocation55_spill] sm:$0xff] %v8806_v2  ;;  %v8823_v2 = vunpack.c.l.bf16 %v106_v26  ;;  %v133_v60 = vld [vmem:[%s15661_s0 + $0x360] sm:$0xff]  ;;  %v8842_v26 = vunpack.c.h.bf16 %v112_v40 }
  0x21   :  { %16604 = vst [vmem:[#allocation51_spill] sm:$0xff] %v8789_v51  ;;  %16609 = vst [vmem:[#allocation56_spill] sm:$0xff] %v8808_v7  ;;  %v8858_v40 = vunpack.c.h.bf16 %v115_v58  ;;  %v8862_v51 = vunpack.c.h.bf16 %v118_v59  ;;  %v8907_v3 = vunpack.c.l.bf16 %v133_v60  ;;  %v8909_v5 = vunpack.c.h.bf16 %v133_v60 }
  0x22   :  { %16610 = vst [vmem:[#allocation57_spill] sm:$0xff] %v8819_v16  ;;  %16611 = vst [vmem:[#allocation58_spill] sm:$0xff] %v8821_v14  ;;  %v8836_v16 = vunpack.c.l.bf16 %v109_v39  ;;  %v142_v39 = vld [vmem:[%s15661_s0 + $0x3a8] sm:$0xff]  ;;  %v8926_v60 = vunpack.c.h.bf16 %v139_v54 }
  0x23   :  { %2624 = vmatpush1.bf16.msra.mxu0 %v8176_v13  ;;  %16612 = vst [vmem:[#allocation59_spill] sm:$0xff] %v8823_v2  ;;  %16613 = vst [vmem:[#allocation60_spill] sm:$0xff] %v8825_v15  ;;  %v127_v13 = vld [vmem:[%s15661_s0 + $0x330] sm:$0x11]  ;;  %v145_v2 = vld [vmem:[%s15661_s0 + $0x3c0] sm:$0xff] }
  0x24   :  { %2625 = vmatprep.subr.bf16.mxu0 %v8177_v24  ;;  %16614 = vst [vmem:[#allocation61_spill] sm:$0xff] %v8836_v16  ;;  %16615 = vst [vmem:[#allocation62_spill] sm:$0xff] %v8838_v25  ;;  %v8182_v24 = vld [vmem:[%s15662_s1 + $0xa0] ss:$8 sps:$4 sm:$0xff]   ;;  %v8856_v16 = vunpack.c.l.bf16 %v115_v58  ;;  %v151_v58 = vld [vmem:[%s15661_s0 + $0x3f0] sm:$0xff]  ;;  %v8943_v54 = vunpack.c.h.bf16 %v145_v2 }
  0x25   :  { %16616 = vst [vmem:[#allocation63_spill] sm:$0xff] %v8840_v36  ;;  %16617 = vst [vmem:[#allocation64_spill] sm:$0xff] %v8842_v26  ;;  %v8860_v36 = vunpack.c.l.bf16 %v118_v59  ;;  %v8878_v59 = vunpack.c.h.bf16 %v121_v18  ;;  %v8955_v20 = vunpack.c.l.bf16 %v151_v58  ;;  %v8957_v22 = vunpack.c.h.bf16 %v151_v58 }
  0x26   :  { %16618 = vst [vmem:[#allocation65_spill] sm:$0xff] %v8856_v16  ;;  %16619 = vst [vmem:[#allocation66_spill] sm:$0xff] %v8858_v40  ;;  %v8876_v16 = vunpack.c.l.bf16 %v121_v18  ;;  %v8895_v18 = vunpack.c.h.bf16 %v127_v13  ;;  %v8975_v58 = vunpack.c.h.bf16 %v160_v31 }
  0x27   :  { %16620 = vst [vmem:[#allocation67_spill] sm:$0xff] %v8860_v36  ;;  %16621 = vst [vmem:[#allocation68_spill] sm:$0xff] %v8862_v51  ;;  %v8880_v36 = vunpack.c.l.bf16 %v124_v61  ;;  %2626 = vmatpush1.bf16.msra.mxu0 %v8179_v53  ;;  %v8899_v61 = vunpack.c.h.bf16 %v130_v56  ;;  %v163_v53 = vld [vmem:[%s15661_s0 + $0x450] sm:$0xff] }
  0x28   :  { %16622 = vst [vmem:[#allocation69_spill] sm:$0xff] %v8876_v16  ;;  %16623 = vst [vmem:[#allocation70_spill] sm:$0xff] %v8878_v59  ;;  %v8893_v16 = vunpack.c.l.bf16 %v127_v13  ;;  %2627 = vmatprep.subr.bf16.mxu0 %v8180_v8  ;;  %v8913_v13 = vunpack.c.h.bf16 %v136_v11  ;;  %v169_v8 = vld [vmem:[%s15661_s0 + $0x480] sm:$0x11] }
  0x29   :  { %16624 = vst [vmem:[#allocation71_spill] sm:$0xff] %v8880_v36  ;;  %16625 = vst [vmem:[#allocation72_spill] sm:$0xff] %v8882_v49  ;;  %v8897_v36 = vunpack.c.l.bf16 %v130_v56  ;;  %v8185_v56 = vld [vmem:[%s15662_s1 + $0xb0] ss:$8 sps:$4 sm:$0xff]   ;;  %v8984_v49 = vunpack.c.l.bf16 %v166_v29  ;;  %v8988_v14 = vunpack.c.l.bf16 %v169_v8 }
  0x2a   :  { %16626 = vst [vmem:[#allocation73_spill] sm:$0xff] %v8893_v16  ;;  %16627 = vst [vmem:[#allocation74_spill] sm:$0xff] %v8895_v18  ;;  %v8911_v16 = vunpack.c.l.bf16 %v136_v11  ;;  %v8930_v11 = vunpack.c.h.bf16 %v142_v39 }
  0x2b   :  { %16628 = vst [vmem:[#allocation75_spill] sm:$0xff] %v8897_v36  ;;  %16629 = vst [vmem:[#allocation76_spill] sm:$0xff] %v8899_v61  ;;  %v172_v36 = vld [vmem:[%s15661_s0 + $0x498] sm:$0xff]  ;;  %2628 = vmatpush1.bf16.msra.mxu0 %v8182_v24  ;;  %v190_v24 = vld [vmem:[%s15661_s0 + $0x528] sm:$0x11] }
  0x2c   :  { %16630 = vst [vmem:[#allocation77_spill] sm:$0xff] %v8907_v3  ;;  %16631 = vst [vmem:[#allocation78_spill] sm:$0xff] %v8909_v5  ;;  %v8928_v3 = vunpack.c.l.bf16 %v142_v39  ;;  %v8947_v39 = vunpack.c.h.bf16 %v148_v9  ;;  %2629 = vmatprep.subr.bf16.mxu0 %v8183_v34  ;;  %v8188_v34 = vld [vmem:[%s15662_s1 + $0xc0] ss:$8 sps:$4 sm:$0xff]  }
  0x2d   :  { %16632 = vst [vmem:[#allocation79_spill] sm:$0xff] %v8911_v16  ;;  %16633 = vst [vmem:[#allocation80_spill] sm:$0xff] %v8913_v13  ;;  %v8186_v16 = vld [vmem:[%s15662_s1 + $0xc4] ss:$8 sps:$4 sm:$0xff]  }
  0x2e   :  { %16634 = vst [vmem:[#allocation81_spill] sm:$0xff] %v8924_v63  ;;  %16635 = vst [vmem:[#allocation82_spill] sm:$0xff] %v8926_v60  ;;  %v8941_v63 = vunpack.c.l.bf16 %v145_v2  ;;  %v8961_v2 = vunpack.c.h.bf16 %v154_v33 }
  0x2f   :  { %16636 = vst [vmem:[#allocation83_spill] sm:$0xff] %v8928_v3  ;;  %16637 = vst [vmem:[#allocation84_spill] sm:$0xff] %v8930_v11  ;;  %v8945_v3 = vunpack.c.l.bf16 %v148_v9  ;;  %v187_v9 = vld [vmem:[%s15661_s0 + $0x510] sm:$0xff]  ;;  %v8986_v11 = vunpack.c.h.bf16 %v166_v29  ;;  %2630 = vmatpush1.bf16.msra.mxu0 %v8185_v56  ;;  %v9013_v56 = vunpack.c.h.bf16 %v184_v41 }
  0x30   :  { %16638 = vst [vmem:[#allocation85_spill] sm:$0xff] %v8941_v63  ;;  %16639 = vst [vmem:[#allocation86_spill] sm:$0xff] %v8943_v54  ;;  %v8959_v63 = vunpack.c.l.bf16 %v154_v33  ;;  %v8971_v54 = vunpack.c.h.bf16 %v157_v45  ;;  %v8980_v33 = vunpack.c.l.bf16 %v163_v53  ;;  %2631 = vmatprep.subr.bf16.mxu0 %v8186_v16  ;;  %v8189_v29 = vld [vmem:[%s15662_s1 + $0xd4] ss:$8 sps:$4 sm:$0xff]   ;;  %v9022_v16 = vunpack.c.l.bf16 %v190_v24 }
  0x31   :  { %16640 = vst [vmem:[#allocation87_spill] sm:$0xff] %v8945_v3  ;;  %16641 = vst [vmem:[#allocation88_spill] sm:$0xff] %v8947_v39  ;;  %v8969_v3 = vunpack.c.l.bf16 %v157_v45  ;;  %v8990_v45 = vunpack.c.h.bf16 %v169_v8  ;;  %v9007_v8 = vunpack.c.l.bf16 %v181_v27 }
  0x32   :  { %16642 = vst [vmem:[#allocation89_spill] sm:$0xff] %v8955_v20  ;;  %16643 = vst [vmem:[#allocation90_spill] sm:$0xff] %v8957_v22  ;;  %v8973_v20 = vunpack.c.l.bf16 %v160_v31  ;;  %v8994_v31 = vunpack.c.h.bf16 %v172_v36 }
  0x33   :  { %16644 = vst [vmem:[#allocation91_spill] sm:$0xff] %v8959_v63  ;;  %16645 = vst [vmem:[#allocation92_spill] sm:$0xff] %v8961_v2  ;;  %v8982_v63 = vunpack.c.h.bf16 %v163_v53  ;;  %v9002_v53 = vunpack.c.h.bf16 %v178_v47  ;;  %2632 = vmatpush1.bf16.msra.mxu0 %v8188_v34 }
  0x34   :  { %16646 = vst [vmem:[#allocation93_spill] sm:$0xff] %v8969_v3  ;;  %16647 = vst [vmem:[#allocation94_spill] sm:$0xff] %v8971_v54  ;;  %v8992_v3 = vunpack.c.l.bf16 %v172_v36  ;;  %v9011_v36 = vunpack.c.l.bf16 %v184_v41  ;;  %v621_v41 = vmax.f32 %v8667_v44, %v8677_v48  ;;  %2633 = vmatprep.subr.bf16.mxu0 %v8189_v29 }
  0x35   :  { %16648 = vst [vmem:[#allocation95_spill] sm:$0xff] %v8973_v20  ;;  %16649 = vst [vmem:[#allocation96_spill] sm:$0xff] %v8975_v58  ;;  %v8996_v20 = vunpack.c.l.bf16 %v175_v43  ;;  %v8191_v43 = vld [vmem:[%s15662_s1 + $0xd0] ss:$8 sps:$4 sm:$0xff]  }
  0x36   :  { %16650 = vst [vmem:[#allocation97_spill] sm:$0xff] %v8980_v33  ;;  %16651 = vst [vmem:[#allocation98_spill] sm:$0xff] %v8982_v63  ;;  %v9000_v33 = vunpack.c.l.bf16 %v178_v47  ;;  %v9020_v47 = vunpack.c.h.bf16 %v187_v9  ;;  %v622_v34 = vmax.f32 %v621_v41, %v8681_v50 }
  0x37   :  { %16652 = vst [vmem:[#allocation99_spill] sm:$0xff] %v8984_v49  ;;  %16653 = vst [vmem:[#allocation100_spill] sm:$0xff] %v8986_v11  ;;  %v9009_v49 = vunpack.c.h.bf16 %v181_v27  ;;  %v543_v27 = vmax.f32 %v8612_v21, %v8616_v23  ;;  %2634 = vmatpush1.bf16.msra.mxu0 %v8191_v43 }
  0x38   :  { %16654 = vst [vmem:[#allocation101_spill] sm:$0xff] %v8988_v14  ;;  %16655 = vst [vmem:[#allocation102_spill] sm:$0xff] %v8990_v45 }
  0x39   :  { %16656 = vst [vmem:[#allocation103_spill] sm:$0xff] %v8992_v3  ;;  %16657 = vst [vmem:[#allocation104_spill] sm:$0xff] %v8994_v31  ;;  %v9024_v3 = vunpack.c.h.bf16 %v190_v24  ;;  %v704_v24 = vsel %vm534_vm0, %v8773_v32, -inf  ;;  %v544_v14 = vmax.f32 %v543_v27, %v8629_v28  ;;  %v860_v32 = vsel %vm534_vm0, %v8895_v18, -inf }
  0x3a   :  { %16658 = vst [vmem:[#allocation105_spill] sm:$0xff] %v8996_v20  ;;  %16659 = vst [vmem:[#allocation106_spill] sm:$0xff] %v8998_v19  ;;  %v8192_v20 = vld [vmem:[%s15662_s1 + $0xe4] ss:$8 sps:$4 sm:$0xff]   ;;  %v938_v27 = vsel %vm534_vm0, %v8947_v39, -inf }
  0x3b   :  { %16660 = vst [vmem:[#allocation107_spill] sm:$0xff] %v9000_v33  ;;  %16661 = vst [vmem:[#allocation108_spill] sm:$0xff] %v9002_v53  ;;  %v9018_v33 = vunpack.c.l.bf16 %v187_v9  ;;  %v699_v9 = vmax.f32 %v8725_v4, %v8729_v6  ;;  %v855_v6 = vmax.f32 %v8838_v25, %v8842_v26  ;;  %v545_v41 = vmax.f32 %v544_v14, %v8633_v30  ;;  %v8195_v14 = vld [vmem:[%s15662_s1 + $0xf4] ss:$8 sps:$4 sm:$0xff]  }
  0x3c   :  { %16662 = vst [vmem:[#allocation109_spill] sm:$0xff] %v9007_v8  ;;  %16663 = vst [vmem:[#allocation110_spill] sm:$0xff] %v9009_v49  ;;  %v626_v8 = vsel %vm534_vm0, %v8715_v0, -inf  ;;  %v623_v26 = vmax.f32 %v622_v34, %v8694_v55  ;;  %v1011_v25 = vmax.f32 %v8957_v22, %v8961_v2  ;;  %2635 = vmatprep.subr.bf16.mxu0 %v8192_v20 }
  0x3d   :  { %16664 = vst [vmem:[#allocation111_spill] sm:$0xff] %v9011_v36  ;;  %16665 = vst [vmem:[#allocation112_spill] sm:$0xff] %v9013_v56  ;;  %v548_v36 = vsel %vm534_vm0, %v8663_v42, -inf  ;;  %v700_v29 = vmax.f32 %v699_v9, %v8739_v10  ;;  %v856_v18 = vmax.f32 %v855_v6, %v8858_v40  ;;  %v546_v6 = vmax.f32 %v545_v41, %v8646_v35 }
  0x3e   :  { %16666 = vst [vmem:[#allocation113_spill] sm:$0xff] %v9018_v33  ;;  %16667 = vst [vmem:[#allocation114_spill] sm:$0xff] %v9020_v47  ;;  %v782_v33 = vsel %vm534_vm0, %v8825_v15, -inf  ;;  %v624_v34 = vmax.f32 %v623_v26, %v8698_v57  ;;  %v1089_v2 = vmax.f32 %v8994_v31, %v8998_v19  ;;  %v16673_v31 = vld [vmem:[#allocation72_spill] sm:$0xff] }
  0x3f   :  { %16668 = vst [vmem:[#allocation115_spill] sm:$0xff] %v9022_v16  ;;  %16669 = vst [vmem:[#allocation116_spill] sm:$0xff] %v9024_v3  ;;  %v777_v16 = vmax.f32 %v8777_v38, %v8787_v46  ;;  %v8194_v46 = vld [vmem:[%s15662_s1 + $0xe0] ss:$8 sps:$4 sm:$0xff]   ;;  %v933_v38 = vmax.f32 %v8899_v61, %v8909_v5  ;;  %v701_v9 = vmax.f32 %v700_v29, %v8743_v12  ;;  %v1016_v5 = vsel %vm534_vm0, %v8990_v45, -inf }
  0x40   :  { %v857_v43 = vmax.f32 %v856_v18, %v8862_v51  ;;  %v1012_v29 = vmax.f32 %v1011_v25, %v8971_v54  ;;  %v547_v41 = vmax.f32 %v546_v6, %v8650_v37  ;;  %v625_v26 = vmax.f32 %v624_v34, %v8711_v62  ;;  %2636 = vmatpush1.bf16.msra.mxu0 %v8194_v46  ;;  %v16670_v54 = vld [vmem:[#allocation44_spill] sm:$0xff]  ;;  %v16671_v51 = vld [vmem:[#allocation58_spill] sm:$0xff] }
  0x41   :  { %v778_v15 = vmax.f32 %v777_v16, %v8791_v52  ;;  %v934_v52 = vmax.f32 %v933_v38, %v8913_v13  ;;  %v8197_v38 = vld [vmem:[%s15662_s1 + $0xf0] ss:$8 sps:$4 sm:$0xff]   ;;  %2637 = vmatprep.subr.bf16.mxu0 %v8195_v14 }
  0x42   :  { %v858_v18 = vmax.f32 %v857_v43, %v8878_v59  ;;  %v1013_v25 = vmax.f32 %v1012_v29, %v8975_v58  ;;  %v627_v19 = vmax.f32 %v625_v26, %v626_v8  ;;  %v8200_v43 = vld [vmem:[%s15662_s1 + $0x104] ss:$8 sps:$4 sm:$0xff]  }
  0x43   :  { %v779_v16 = vmax.f32 %v778_v15, %v8804_v1  ;;  %v702_v15 = vmax.f32 %v701_v9, %v8756_v17  ;;  %v935_v45 = vmax.f32 %v934_v52, %v8926_v60  ;;  %v16672_v17 = vld [vmem:[#allocation84_spill] sm:$0xff]  ;;  %v1090_v52 = vmax.f32 %v1089_v2, %v9002_v53 }
  0x44   :  { %v549_v60 = vmax.f32 %v547_v41, %v548_v36  ;;  %v859_v6 = vmax.f32 %v858_v18, %v16673_v31  ;;  %v1014_v34 = vmax.f32 %v1013_v25, %v8982_v63  ;;  %2638 = vmatpush1.bf16.msra.mxu0 %v8197_v38 }
  0x45   :  { %v780_v20 = vmax.f32 %v779_v16, %v8808_v7  ;;  %v703_v22 = vmax.f32 %v702_v15, %v16670_v54  ;;  %v936_v16 = vmax.f32 %v935_v45, %v16672_v17  ;;  %v16674_v15 = vld [vmem:[#allocation86_spill] sm:$0xff]  ;;  %v628_v17 = vrot.slane %v627_v19, 4  ;;  %2650 = vmatprep.subr.bf16.mxu0 %v8200_v43 }
  0x46   :  { %v550_v45 = vrot.slane %v549_v60, 4  ;;  %v861_v2 = vmax.f32 %v859_v6, %v860_v32  ;;  %v1015_v36 = vmax.f32 %v1014_v34, %v8986_v11 }
  0x47   :  { %v781_v9 = vmax.f32 %v780_v20, %v16671_v51  ;;  %v705_v46 = vmax.f32 %v703_v22, %v704_v24  ;;  %v937_v58 = vmax.f32 %v936_v16, %v16674_v15  ;;  %v1091_v20 = vmax.f32 %v1090_v52, %v9009_v49 }
  0x48   :  { %v551_v18 = vmax.f32 %v549_v60, %v550_v45  ;;  %v629_v25 = vmax.f32 %v627_v19, %v628_v17  ;;  %v862_v63 = vrot.slane %v861_v2, 4  ;;  %v1017_v22 = vmax.f32 %v1015_v36, %v1016_v5 }
  0x49   :  { %v783_v29 = vmax.f32 %v781_v9, %v782_v33  ;;  %v706_v8 = vrot.slane %v705_v46, 4  ;;  %v939_v41 = vmax.f32 %v937_v58, %v938_v27  ;;  %v1092_v26 = vmax.f32 %v1091_v20, %v9013_v56 }
  0x4a   :  { %v552_v52 = vrot.slane %v551_v18, 2  ;;  %v630_v32 = vrot.slane %v629_v25, 2  ;;  %v863_v6 = vmax.f32 %v861_v2, %v862_v63  ;;  %v1018_v34 = vrot.slane %v1017_v22, 4 }
  0x4b   :  { %v784_v14 = vrot.slane %v783_v29, 4  ;;  %v707_v33 = vmax.f32 %v705_v46, %v706_v8  ;;  %v940_v9 = vrot.slane %v939_v41, 4  ;;  %v1093_v16 = vmax.f32 %v1092_v26, %v9020_v47 }
  0x4c   :  { %v1094_v58 = vsel %vm534_vm0, %v9024_v3, -inf  ;;  %v553_v60 = vmax.f32 %v551_v18, %v552_v52  ;;  %v631_v17 = vmax.f32 %v629_v25, %v630_v32  ;;  %v864_v19 = vrot.slane %v863_v6, 2 }
  0x4d   :  { %v785_v24 = vmax.f32 %v783_v29, %v784_v14  ;;  %v708_v38 = vrot.slane %v707_v33, 2  ;;  %v941_v49 = vmax.f32 %v939_v41, %v940_v9  ;;  %v1019_v5 = vmax.f32 %v1017_v22, %v1018_v34 }
  0x4e   :  { %v1095_v29 = vmax.f32 %v1093_v16, %v1094_v58  ;;  %v554_v20 = vrot.slane %v553_v60, 1  ;;  %v632_v45 = vrot.slane %v631_v17, 1  ;;  %v865_v36 = vmax.f32 %v863_v6, %v864_v19  ;;  %v16675_v19 = vld [vmem:[#allocation36_spill] sm:$0xff] }
  0x4f   :  { %v786_v11 = vrot.slane %v785_v24, 2  ;;  %v709_v27 = vmax.f32 %v707_v33, %v708_v38  ;;  %v942_v46 = vrot.slane %v941_v49, 2  ;;  %v1020_v8 = vrot.slane %v1019_v5, 2 }
  0x50   :  { %v1096_v26 = vrot.slane %v1095_v29, 4  ;;  %v9105_v41 = vmax.f32 %v553_v60, %v554_v20  ;;  %v9107_v9 = vmax.f32 %v631_v17, %v632_v45  ;;  %v866_v18 = vrot.slane %v865_v36, 1  ;;  %v16677_v20 = vld [vmem:[#allocation48_spill] sm:$0xff]  ;;  %v16678_v45 = vld [vmem:[#allocation50_spill] sm:$0xff] }
  0x51   :  { %v787_v43 = vmax.f32 %v785_v24, %v786_v11  ;;  %v710_v63 = vrot.slane %v709_v27, 1  ;;  %v943_v14 = vmax.f32 %v941_v49, %v942_v46  ;;  %v1021_v25 = vmax.f32 %v1019_v5, %v1020_v8  ;;  %v16679_v8 = vld [vmem:[#allocation60_spill] sm:$0xff] }
  0x52   :  { %v1097_v33 = vmax.f32 %v1095_v29, %v1096_v26  ;;  %v9113_v24 = vmax.f32 %v865_v36, %v866_v18  ;;  %v1167_v32 = vadd.f32 %v8616_v23, %v8612_v21  ;;  %v1172_v49 = vsel %vm534_vm0, %v8663_v42, 0.0  ;;  %v16680_v26 = vld [vmem:[#allocation62_spill] sm:$0xff]  ;;  %v16681_v18 = vld [vmem:[#allocation64_spill] sm:$0xff] }
  0x53   :  { %v788_v2 = vrot.slane %v787_v43, 1  ;;  %v9109_v52 = vmax.f32 %v709_v27, %v710_v63  ;;  %v944_v11 = vrot.slane %v943_v14, 1  ;;  %v1022_v16 = vrot.slane %v1021_v25, 1  ;;  %v16676_v27 = vld [vmem:[#allocation46_spill] sm:$0xff] }
  0x54   :  { %v1098_v34 = vrot.slane %v1097_v33, 2  ;;  %v1245_v38 = vadd.f32 %v8677_v48, %v8667_v44  ;;  %v1250_v58 = vsel %vm534_vm0, %v8715_v0, 0.0  ;;  %v1168_v17 = vadd.f32 %v1167_v32, %v8629_v28  ;;  %v16684_v0 = vld [vmem:[#allocation78_spill] sm:$0xff]  ;;  %v16692_v48 = vld [vmem:[#allocation84_spill] sm:$0xff] }
  0x55   :  { %v9111_v22 = vmax.f32 %v787_v43, %v788_v2  ;;  %v9119_v6 = vmax.f32 %v943_v14, %v944_v11  ;;  %v9125_v60 = vmax.f32 %v1021_v25, %v1022_v16  ;;  %v1323_v5 = vadd.f32 %v16675_v19, %v8725_v4  ;;  %v16682_v11 = vld [vmem:[#allocation74_spill] sm:$0xff]  ;;  %v16731_v4 = vld [vmem:[#allocation55_spill] sm:$0xff]  ;;  %v16735_v19 = vld [vmem:[#allocation81_spill] sm:$0xff] }
  0x56   :  { %v1328_v43 = vsel %vm534_vm0, %v16676_v27, 0.0  ;;  %v1099_v46 = vmax.f32 %v1097_v33, %v1098_v34  ;;  %v1246_v29 = vadd.f32 %v1245_v38, %v8681_v50  ;;  %v1401_v36 = vadd.f32 %v16678_v45, %v16677_v20  ;;  %v16683_v34 = vld [vmem:[#allocation52_spill] sm:$0xff] }
  0x57   :  { %v1406_v63 = vsel %vm534_vm0, %v16679_v8, 0.0  ;;  %v1169_v2 = vadd.f32 %v1168_v17, %v8633_v30  ;;  %v1324_v14 = vadd.f32 %v1323_v5, %v8739_v10  ;;  %v1479_v25 = vadd.f32 %v16681_v18, %v16680_v26  ;;  %v16736_v30 = vld [vmem:[#allocation91_spill] sm:$0xff] }
  0x58   :  { %v1484_v16 = vsel %vm534_vm0, %v16682_v11, 0.0  ;;  %v1100_v32 = vrot.slane %v1099_v46, 1  ;;  %v1247_v33 = vadd.f32 %v1246_v29, %v8694_v55  ;;  %v1402_v38 = vadd.f32 %v1401_v36, %v16683_v34  ;;  %v16688_v55 = vld [vmem:[#allocation92_spill] sm:$0xff] }
  0x59   :  { %v1557_v20 = vadd.f32 %v16684_v0, %v8899_v61  ;;  %v1170_v8 = vadd.f32 %v1169_v2, %v8646_v35  ;;  %v1325_v17 = vadd.f32 %v1324_v14, %v8743_v12  ;;  %v1480_v5 = vadd.f32 %v1479_v25, %v8858_v40  ;;  %v16685_v61 = vld [vmem:[#allocation42_spill] sm:$0xff]  ;;  %v16686_v2 = vld [vmem:[#allocation68_spill] sm:$0xff]  ;;  %v16725_v40 = vld [vmem:[#allocation53_spill] sm:$0xff] }
  0x5a   :  { %v1562_v50 = vsel %vm534_vm0, %v8947_v39, 0.0  ;;  %v9152_v45 = vmax.f32 %v1099_v46, %v1100_v32  ;;  %v1248_v11 = vadd.f32 %v1247_v33, %v8698_v57  ;;  %v1403_v29 = vadd.f32 %v1402_v38, %v8804_v1  ;;  %v16687_v14 = vld [vmem:[#allocation90_spill] sm:$0xff]  ;;  %v16729_v35 = vld [vmem:[#allocation41_spill] sm:$0xff] }
  0x5b   :  { %v1558_v36 = vadd.f32 %v1557_v20, %v8913_v13  ;;  %v1171_v34 = vadd.f32 %v1170_v8, %v8650_v37  ;;  %v1326_v0 = vadd.f32 %v1325_v17, %v16685_v61  ;;  %v1481_v27 = vadd.f32 %v1480_v5, %v16686_v2  ;;  %v16689_v32 = vld [vmem:[#allocation82_spill] sm:$0xff]  ;;  %v16727_v61 = vld [vmem:[#allocation87_spill] sm:$0xff] }
  0x5c   :  { %v1635_v25 = vadd.f32 %v16688_v55, %v16687_v14  ;;  %v1249_v42 = vadd.f32 %v1248_v11, %v8711_v62  ;;  %v1404_v46 = vadd.f32 %v1403_v29, %v8808_v7  ;;  %v16690_v33 = vld [vmem:[#allocation102_spill] sm:$0xff]  ;;  %v16693_v11 = vld [vmem:[#allocation104_spill] sm:$0xff]  ;;  %v925_v55 = vsel %vm534_vm0, %v16727_v61, -inf  ;;  %v16728_v2 = vld [vmem:[#allocation27_spill] sm:$0xff] }
  0x5d   :  { %v1559_v39 = vadd.f32 %v1558_v36, %v16689_v32  ;;  %v1640_v38 = vsel %vm534_vm0, %v16690_v33, 0.0  ;;  %v1173_v57 = vadd.f32 %v1172_v49, %v1171_v34  ;;  %v1327_v20 = vadd.f32 %v1326_v0, %v16670_v54  ;;  %v16691_v17 = vld [vmem:[#allocation94_spill] sm:$0xff]  ;;  %v16695_v33 = vld [vmem:[#allocation96_spill] sm:$0xff]  ;;  %v16730_v54 = vld [vmem:[#allocation79_spill] sm:$0xff] }
  0x5e   :  { %v1482_v8 = vadd.f32 %v1481_v27, %v8878_v59  ;;  %v1636_v13 = vadd.f32 %v1635_v25, %v16691_v17  ;;  %v1251_v5 = vadd.f32 %v1250_v58, %v1249_v42  ;;  %v1405_v1 = vadd.f32 %v1404_v46, %v16671_v51  ;;  %v16694_v62 = vld [vmem:[#allocation106_spill] sm:$0xff]  ;;  %v16726_v59 = vld [vmem:[#allocation65_spill] sm:$0xff] }
  0x5f   :  { %v1560_v44 = vadd.f32 %v1559_v39, %v16692_v48  ;;  %v1713_v29 = vadd.f32 %v16694_v62, %v16693_v11  ;;  %v1174_v7 = vrot.slane %v1173_v57, 4  ;;  %v1329_v36 = vadd.f32 %v1328_v43, %v1327_v20  ;;  %v16696_v51 = vld [vmem:[#allocation98_spill] sm:$0xff] }
  0x60   :  { %v1483_v32 = vadd.f32 %v1482_v8, %v16673_v31  ;;  %v1637_v49 = vadd.f32 %v1636_v13, %v16695_v33  ;;  %v1252_v34 = vrot.slane %v1251_v5, 4  ;;  %v1407_v0 = vadd.f32 %v1406_v63, %v1405_v1  ;;  %v16697_v11 = vld [vmem:[#allocation110_spill] sm:$0xff]  ;;  %v16698_v33 = vld [vmem:[#allocation100_spill] sm:$0xff] }
  0x61   :  { %v1561_v27 = vadd.f32 %v1560_v44, %v16674_v15  ;;  %v1714_v25 = vadd.f32 %v1713_v29, %v9002_v53  ;;  %v1175_v42 = vadd.f32 %v1174_v7, %v1173_v57  ;;  %v1330_v58 = vrot.slane %v1329_v36, 4  ;;  %v16720_v15 = vld [vmem:[#allocation25_spill] sm:$0xff] }
  0x62   :  { %v1485_v46 = vadd.f32 %v1484_v16, %v1483_v32  ;;  %v1638_v39 = vadd.f32 %v1637_v49, %v16696_v51  ;;  %v1253_v48 = vadd.f32 %v1252_v34, %v1251_v5  ;;  %v1408_v14 = vrot.slane %v1407_v0, 4  ;;  %v16724_v51 = vld [vmem:[#allocation15_spill] sm:$0xff] }
  0x63   :  { %v1563_v62 = vadd.f32 %v1562_v50, %v1561_v27  ;;  %v1715_v43 = vadd.f32 %v1714_v25, %v16697_v11  ;;  %v1176_v20 = vrot.slane %v1175_v42, 2  ;;  %v1331_v8 = vadd.f32 %v1330_v58, %v1329_v36 }
  0x64   :  { %v1486_v13 = vrot.slane %v1485_v46, 4  ;;  %v1639_v1 = vadd.f32 %v1638_v39, %v16698_v33  ;;  %v1254_v44 = vrot.slane %v1253_v48, 2  ;;  %v1409_v63 = vadd.f32 %v1408_v14, %v1407_v0  ;;  %v16722_v33 = vld [vmem:[#allocation77_spill] sm:$0xff] }
  0x65   :  { %v1564_v29 = vrot.slane %v1563_v62, 4  ;;  %v1716_v57 = vadd.f32 %v1715_v43, %v9013_v56  ;;  %v1177_v7 = vadd.f32 %v1176_v20, %v1175_v42  ;;  %v1332_v16 = vrot.slane %v1331_v8, 2 }
  0x66   :  { %v1487_v32 = vadd.f32 %v1486_v13, %v1485_v46  ;;  %v1641_v5 = vadd.f32 %v1640_v38, %v1639_v1  ;;  %v1255_v50 = vadd.f32 %v1254_v44, %v1253_v48  ;;  %v1410_v49 = vrot.slane %v1409_v63, 2 }
  0x67   :  { %v1565_v34 = vadd.f32 %v1564_v29, %v1563_v62  ;;  %v1717_v36 = vadd.f32 %v1716_v57, %v9020_v47  ;;  %v1178_v27 = vrot.slane %v1177_v7, 1  ;;  %v1333_v25 = vadd.f32 %v1332_v16, %v1331_v8 }
  0x68   :  { %v1488_v58 = vrot.slane %v1487_v32, 2  ;;  %v1642_v39 = vrot.slane %v1641_v5, 4  ;;  %v1256_v14 = vrot.slane %v1255_v50, 1  ;;  %v1411_v0 = vadd.f32 %v1410_v49, %v1409_v63 }
  0x69   :  { %v1566_v43 = vrot.slane %v1565_v34, 2  ;;  %v1718_v42 = vsel %vm534_vm0, %v9024_v3, 0.0  ;;  %v1179_v38 = vadd.f32 %v1178_v27, %v1177_v7  ;;  %v1334_v46 = vrot.slane %v1333_v25, 1 }
  0x6a   :  { %v1489_v48 = vadd.f32 %v1488_v58, %v1487_v32  ;;  %v1643_v20 = vadd.f32 %v1642_v39, %v1641_v5  ;;  %v1257_v62 = vadd.f32 %v1256_v14, %v1255_v50  ;;  %v1412_v13 = vrot.slane %v1411_v0, 1 }
  0x6b   :  { %v1567_v1 = vadd.f32 %v1566_v43, %v1565_v34  ;;  %v1719_v44 = vadd.f32 %v1718_v42, %v1717_v36  ;;  %v1335_v29 = vadd.f32 %v1334_v46, %v1333_v25  ;;  %v1779_v16 = vmul.f32 0.020408163, %v1179_v38  ;;  %v16701_v46 = vld [vmem:[#allocation17_spill] sm:$0xff] }
  0x6c   :  { %v1490_v8 = vrot.slane %v1489_v48, 1  ;;  %v1644_v57 = vrot.slane %v1643_v20, 2  ;;  %v1413_v56 = vadd.f32 %v1412_v13, %v1411_v0  ;;  %v1785_v49 = vmul.f32 0.020408163, %v1257_v62  ;;  %v16703_v13 = vld [vmem:[#allocation21_spill] sm:$0xff] }
  0x6d   :  { %v1568_v53 = vrot.slane %v1567_v1, 1  ;;  %v1720_v63 = vrot.slane %v1719_v44, 4  ;;  %v1791_v3 = vmul.f32 0.020408163, %v1335_v29  ;;  %v1888_v7 = vsel %vm1874_vm1, %v9107_v9, %v9105_v41  ;;  %v16705_v29 = vld [vmem:[#allocation31_spill] sm:$0xff] }
  0x6e   :  { %v1491_v47 = vadd.f32 %v1490_v8, %v1489_v48  ;;  %v1645_v11 = vadd.f32 %v1644_v57, %v1643_v20  ;;  %v1797_v50 = vmul.f32 0.020408163, %v1413_v56  ;;  %v1889_v34 = vsel %vm1876_vm2, %v9109_v52, %v1888_v7  ;;  %v16699_v52 = vld [vmem:[#allocation7_spill] sm:$0xff]  ;;  %v16707_v57 = vld [vmem:[#allocation33_spill] sm:$0xff] }
  0x6f   :  { %v1569_v32 = vadd.f32 %v1568_v53, %v1567_v1  ;;  %v1721_v5 = vadd.f32 %v1720_v63, %v1719_v44  ;;  %v1890_v25 = vsel %vm1878_vm3, %v9111_v22, %v1889_v34  ;;  %v1984_v58 = vsel %vm1874_vm1, %v1785_v49, %v1779_v16  ;;  %v16704_v1 = vld [vmem:[#allocation19_spill] sm:$0xff] }
  0x70   :  { %v1646_v36 = vrot.slane %v1645_v11, 1  ;;  %v1803_v27 = vmul.f32 0.020408163, %v1491_v47  ;;  %v1891_v0 = vsel %vm1880_vm4, %v9113_v24, %v1890_v25  ;;  %v1985_v41 = vsel %vm1876_vm2, %v1791_v3, %v1984_v58  ;;  %v16700_v47 = vld [vmem:[#allocation5_spill] sm:$0xff]  ;;  %v16706_v8 = vld [vmem:[#allocation35_spill] sm:$0xff] }
  0x71   :  { %v1722_v39 = vrot.slane %v1721_v5, 2  ;;  %v1809_v14 = vmul.f32 0.020408163, %v1569_v32  ;;  %v1892_v56 = vsel %vm1882_vm5, %v9119_v6, %v1891_v0  ;;  %v1986_v9 = vsel %vm1878_vm3, %v1797_v50, %v1985_v41  ;;  %v16708_v49 = vld [vmem:[#allocation11_spill] sm:$0xff]  ;;  %v16709_v32 = vld [vmem:[#allocation45_spill] sm:$0xff] }
  0x72   :  { %v1647_v53 = vadd.f32 %v1646_v36, %v1645_v11  ;;  %v529_v43 = vmax.f32 %v16700_v47, %v16699_v52  ;;  %v1893_v22 = vsel %vm1884_vm6, %v9125_v60, %v1892_v56  ;;  %v1987_v38 = vsel %vm1880_vm4, %v1803_v27, %v1986_v9  ;;  %v16702_v11 = vld [vmem:[#allocation9_spill] sm:$0xff]  ;;  %v16711_v50 = vld [vmem:[#allocation47_spill] sm:$0xff] }
  0x73   :  { %v1723_v42 = vadd.f32 %v1722_v39, %v1721_v5  ;;  %v535_v24 = vsel %vm534_vm0, %v16701_v46, -inf  ;;  %v1894_v3 = vsel %vm1886_vm7, %v9152_v45, %v1893_v22  ;;  %v1988_v6 = vsel %vm1882_vm5, %v1809_v14, %v1987_v38  ;;  %v16710_v5 = vld [vmem:[#allocation49_spill] sm:$0xff]  ;;  %v16712_v27 = vld [vmem:[#allocation23_spill] sm:$0xff] }
  0x74   :  { %v1815_v48 = vmul.f32 0.020408163, %v1647_v53  ;;  %v530_v20 = vmax.f32 %v529_v43, %v16702_v11  ;;  %v608_v44 = vmax.f32 %v16704_v1, %v16703_v13  ;;  %v613_v60 = vsel %vm534_vm0, %v16705_v29, -inf  ;;  %v16713_v58 = vld [vmem:[#allocation37_spill] sm:$0xff]  ;;  %v16714_v14 = vld [vmem:[#allocation59_spill] sm:$0xff] }
  0x75   :  { %v1724_v62 = vrot.slane %v1723_v42, 1  ;;  %v686_v16 = vmax.f32 %v16707_v57, %v16706_v8  ;;  %v691_v45 = vsel %vm534_vm0, %v16709_v32, -inf  ;;  %v764_v34 = vmax.f32 %v16711_v50, %v16710_v5  ;;  %v16715_v41 = vld [vmem:[#allocation13_spill] sm:$0xff]  ;;  %v16716_v56 = vld [vmem:[#allocation51_spill] sm:$0xff] }
  0x76   :  { %v1989_v63 = vsel %vm1884_vm6, %v1815_v48, %v1988_v6  ;;  %v531_v7 = vmax.f32 %v530_v20, %v16708_v49  ;;  %v609_v25 = vmax.f32 %v608_v44, %v16712_v27  ;;  %v769_v0 = vsel %vm534_vm0, %v16714_v14, -inf  ;;  %v16717_v43 = vld [vmem:[#allocation63_spill] sm:$0xff]  ;;  %v16718_v22 = vld [vmem:[#allocation61_spill] sm:$0xff] }
  0x77   :  { %v1725_v36 = vadd.f32 %v1724_v62, %v1723_v42  ;;  %v687_v39 = vmax.f32 %v686_v16, %v16713_v58  ;;  %v765_v9 = vmax.f32 %v764_v34, %v16716_v56  ;;  %v842_v38 = vmax.f32 %v16718_v22, %v16717_v43  ;;  %v16719_v48 = vld [vmem:[#allocation73_spill] sm:$0xff]  ;;  %v16721_v62 = vld [vmem:[#allocation39_spill] sm:$0xff] }
  0x78   :  { %v532_v53 = vmax.f32 %v531_v7, %v16715_v41  ;;  %v847_v6 = vsel %vm534_vm0, %v16719_v48, -inf  ;;  %v610_v42 = vmax.f32 %v609_v25, %v16720_v15  ;;  %v16723_v16 = vld [vmem:[#allocation75_spill] sm:$0xff] }
  0x79   :  { %v1821_v20 = vmul.f32 0.020408163, %v1725_v36  ;;  %v688_v44 = vmax.f32 %v687_v39, %v16721_v62  ;;  %v920_v31 = vmax.f32 %v16723_v16, %v16722_v33  ;;  %v766_v7 = vmax.f32 %v765_v9, %v16725_v40  ;;  %v16733_v9 = vld [vmem:[#allocation29_spill] sm:$0xff] }
  0x7a   :  { %v533_v17 = vmax.f32 %v532_v53, %v16724_v51  ;;  %v843_v34 = vmax.f32 %v842_v38, %v16726_v59  ;;  %v611_v36 = vmax.f32 %v610_v42, %v16728_v2  ;;  %v16732_v53 = vld [vmem:[#allocation67_spill] sm:$0xff] }
  0x7b   :  { %v1990_v26 = vsel %vm1886_vm7, %v1821_v20, %v1989_v63  ;;  %v689_v25 = vmax.f32 %v688_v44, %v16729_v35  ;;  %v921_v39 = vmax.f32 %v920_v31, %v16730_v54  ;;  %v767_v37 = vmax.f32 %v766_v7, %v16731_v4  ;;  %v16734_v38 = vld [vmem:[#allocation43_spill] sm:$0xff]  ;;  %v16737_v63 = vld [vmem:[#allocation89_spill] sm:$0xff] }
  0x7c   :  { %v2026_v10 = vpack.c.bf16 %v1990_v26, %v1894_v3  ;;  %v536_v18 = vmax.f32 %v533_v17, %v535_v24  ;;  %v844_v28 = vmax.f32 %v843_v34, %v16732_v53  ;;  %v612_v12 = vmax.f32 %v611_v36, %v16733_v9  ;;  %v16738_v44 = vld [vmem:[#allocation57_spill] sm:$0xff]  ;;  %v16741_v34 = vld [vmem:[#allocation83_spill] sm:$0xff] }
  0x7d   :  { %v690_v23 = vmax.f32 %v689_v25, %v16734_v38  ;;  %v922_v21 = vmax.f32 %v921_v39, %v16735_v19  ;;  %v998_v20 = vmax.f32 %v16737_v63, %v16736_v30  ;;  %v768_v61 = vmax.f32 %v767_v37, %v16738_v44  ;;  %v16739_v31 = vld [vmem:[#allocation69_spill] sm:$0xff]  ;;  %v16743_v19 = vld [vmem:[#allocation71_spill] sm:$0xff] }
  0x7e   :  { %2639 = vmatprep.mubr.bf16.mxu0 %v2026_v10  ;;  %v537_v42 = vrot.slane %v536_v18, 4  ;;  %v845_v26 = vmax.f32 %v844_v28, %v16739_v31  ;;  %v16740_v17 = vld [vmem:[#allocation101_spill] sm:$0xff]  ;;  %v614_v3 = vmax.f32 %v612_v12, %v613_v60  ;;  %v16745_v10 = vld [vmem:[#allocation103_spill] sm:$0xff] }
  0x7f   :  { %v1003_v24 = vsel %vm534_vm0, %v16740_v17, -inf  ;;  %v692_v7 = vmax.f32 %v690_v23, %v691_v45  ;;  %v923_v36 = vmax.f32 %v922_v21, %v16741_v34  ;;  %v16742_v54 = vld [vmem:[#allocation93_spill] sm:$0xff]  ;;  %v770_v39 = vmax.f32 %v768_v61, %v769_v0  ;;  %v16747_v31 = vld [vmem:[#allocation95_spill] sm:$0xff] }
  0x80   :  { %v999_v25 = vmax.f32 %v998_v20, %v16742_v54  ;;  %v538_v38 = vmax.f32 %v536_v18, %v537_v42  ;;  %v846_v53 = vmax.f32 %v845_v26, %v16743_v19  ;;  %v16744_v30 = vld [vmem:[#allocation105_spill] sm:$0xff]  ;;  %v615_v4 = vrot.slane %v614_v3, 4  ;;  %v16748_v60 = vld [vmem:[#allocation107_spill] sm:$0xff] }
  0x81   :  { %v1076_v63 = vmax.f32 %v16745_v10, %v16744_v30  ;;  %v693_v37 = vrot.slane %v692_v7, 4  ;;  %v16746_v44 = vld [vmem:[#allocation85_spill] sm:$0xff]  ;;  %v771_v12 = vrot.slane %v770_v39, 4 }
  0x82   :  { %v924_v28 = vmax.f32 %v923_v36, %v16746_v44  ;;  %v1000_v33 = vmax.f32 %v999_v25, %v16747_v31  ;;  %v539_v17 = vrot.slane %v538_v38, 2  ;;  %v848_v23 = vmax.f32 %v846_v53, %v847_v6  ;;  %v16749_v61 = vld [vmem:[#allocation97_spill] sm:$0xff]  ;;  %v16751_v44 = vld [vmem:[#allocation99_spill] sm:$0xff] }
  0x83   :  { %v1077_v21 = vmax.f32 %v1076_v63, %v16748_v60  ;;  %v616_v45 = vmax.f32 %v614_v3, %v615_v4  ;;  %v694_v20 = vmax.f32 %v692_v7, %v693_v37  ;;  %v772_v26 = vmax.f32 %v770_v39, %v771_v12  ;;  %v16750_v30 = vld [vmem:[#allocation109_spill] sm:$0xff]  ;;  %v16752_v53 = vld [vmem:[#allocation111_spill] sm:$0xff] }
  0x84   :  { %v926_v18 = vmax.f32 %v924_v28, %v925_v55  ;;  %v1001_v0 = vmax.f32 %v1000_v33, %v16749_v61  ;;  %v540_v42 = vmax.f32 %v538_v38, %v539_v17  ;;  %v849_v34 = vrot.slane %v848_v23, 4  ;;  %v16753_v39 = vld [vmem:[#allocation113_spill] sm:$0xff]  ;;  %v16754_v60 = vld [vmem:[#allocation115_spill] sm:$0xff] }
  0x85   :  { %v1078_v10 = vmax.f32 %v1077_v21, %v16750_v30  ;;  %v617_v19 = vrot.slane %v616_v45, 2  ;;  %v695_v54 = vrot.slane %v694_v20, 2  ;;  %v773_v16 = vrot.slane %v772_v26, 2 }
  0x86   :  { %v927_v36 = vrot.slane %v926_v18, 4  ;;  %v1002_v25 = vmax.f32 %v1001_v0, %v16751_v44  ;;  %v541_v31 = vrot.slane %v540_v42, 1  ;;  %v850_v6 = vmax.f32 %v848_v23, %v849_v34 }
  0x87   :  { %v1079_v63 = vmax.f32 %v1078_v10, %v16752_v53  ;;  %v618_v4 = vmax.f32 %v616_v45, %v617_v19  ;;  %v696_v3 = vmax.f32 %v694_v20, %v695_v54  ;;  %v774_v38 = vmax.f32 %v772_v26, %v773_v16 }
  0x88   :  { %v928_v55 = vmax.f32 %v926_v18, %v927_v36  ;;  %v1004_v7 = vmax.f32 %v1002_v25, %v1003_v24  ;;  %v9268_v33 = vmax.f32 %v540_v42, %v541_v31  ;;  %v851_v17 = vrot.slane %v850_v6, 2 }
  0x89   :  { %v1080_v37 = vmax.f32 %v1079_v63, %v16753_v39  ;;  %v619_v28 = vrot.slane %v618_v4, 1  ;;  %v697_v12 = vrot.slane %v696_v3, 1  ;;  %v775_v0 = vrot.slane %v774_v38, 1 }
  0x8a   :  { %v929_v21 = vrot.slane %v928_v55, 2  ;;  %v1005_v30 = vrot.slane %v1004_v7, 4  ;;  %v852_v44 = vmax.f32 %v850_v6, %v851_v17  ;;  %v1081_v34 = vsel %vm534_vm0, %v16754_v60, -inf }
  0x8b   :  { %v1154_v54 = vadd.f32 %v16699_v52, %v16700_v47  ;;  %v9275_v19 = vmax.f32 %v618_v4, %v619_v28  ;;  %v9277_v31 = vmax.f32 %v696_v3, %v697_v12  ;;  %v9279_v10 = vmax.f32 %v774_v38, %v775_v0 }
  0x8c   :  { %v930_v16 = vmax.f32 %v928_v55, %v929_v21  ;;  %v1006_v24 = vmax.f32 %v1004_v7, %v1005_v30  ;;  %v853_v23 = vrot.slane %v852_v44, 1  ;;  %v1082_v45 = vmax.f32 %v1080_v37, %v1081_v34 }
  0x8d   :  { %v1155_v20 = vadd.f32 %v1154_v54, %v16702_v11  ;;  %v1159_v26 = vsel %vm534_vm0, %v16701_v46, 0.0  ;;  %v1232_v36 = vadd.f32 %v16703_v13, %v16704_v1  ;;  %v1237_v30 = vsel %vm534_vm0, %v16705_v29, 0.0  ;;  %v16758_v29 = vld [vmem:[#allocation55_spill] sm:$0xff] }
  0x8e   :  { %v931_v18 = vrot.slane %v930_v16, 1  ;;  %v1007_v42 = vrot.slane %v1006_v24, 2  ;;  %v9286_v25 = vmax.f32 %v852_v44, %v853_v23  ;;  %v1083_v6 = vrot.slane %v1082_v45, 4 }
  0x8f   :  { %v1156_v63 = vadd.f32 %v1155_v20, %v16708_v49  ;;  %v1233_v55 = vadd.f32 %v1232_v36, %v16712_v27  ;;  %v1310_v7 = vadd.f32 %v16706_v8, %v16707_v57  ;;  %v1315_v44 = vsel %vm534_vm0, %v16709_v32, 0.0  ;;  %v16768_v32 = vld [vmem:[#allocation71_spill] sm:$0xff] }
  0x90   :  { %v9291_v4 = vmax.f32 %v930_v16, %v931_v18  ;;  %v1008_v3 = vmax.f32 %v1006_v24, %v1007_v42  ;;  %v1084_v38 = vmax.f32 %v1082_v45, %v1083_v6  ;;  %v1388_v37 = vadd.f32 %v16710_v5, %v16711_v50  ;;  %v16763_v50 = vld [vmem:[#allocation91_spill] sm:$0xff] }
  0x91   :  { %v1157_v17 = vadd.f32 %v1156_v63, %v16715_v41  ;;  %v1234_v12 = vadd.f32 %v1233_v55, %v16720_v15  ;;  %v1311_v21 = vadd.f32 %v1310_v7, %v16713_v58  ;;  %v1393_v0 = vsel %vm534_vm0, %v16714_v14, 0.0 }
  0x92   :  { %v1009_v28 = vrot.slane %v1008_v3, 1  ;;  %v1085_v34 = vrot.slane %v1084_v38, 2  ;;  %v1389_v16 = vadd.f32 %v1388_v37, %v16716_v56  ;;  %v1466_v24 = vadd.f32 %v16717_v43, %v16718_v22 }
  0x93   :  { %v1158_v54 = vadd.f32 %v1157_v17, %v16724_v51  ;;  %v1235_v45 = vadd.f32 %v1234_v12, %v16728_v2  ;;  %v1312_v20 = vadd.f32 %v1311_v21, %v16721_v62  ;;  %v1471_v18 = vsel %vm534_vm0, %v16719_v48, 0.0  ;;  %v16755_v17 = vld [vmem:[#allocation75_spill] sm:$0xff] }
  0x94   :  { %v9309_v23 = vmax.f32 %v1008_v3, %v1009_v28  ;;  %v1086_v42 = vmax.f32 %v1084_v38, %v1085_v34  ;;  %v1390_v6 = vadd.f32 %v1389_v16, %v16725_v40  ;;  %v1467_v63 = vadd.f32 %v1466_v24, %v16726_v59  ;;  %v16756_v3 = vld [vmem:[#allocation77_spill] sm:$0xff]  ;;  %v16757_v28 = vld [vmem:[#allocation87_spill] sm:$0xff] }
  0x95   :  { %v1160_v36 = vadd.f32 %v1159_v26, %v1158_v54  ;;  %v1236_v55 = vadd.f32 %v1235_v45, %v16733_v9  ;;  %v1313_v7 = vadd.f32 %v1312_v20, %v16729_v35  ;;  %v1544_v37 = vadd.f32 %v16756_v3, %v16755_v17  ;;  %v16759_v38 = vld [vmem:[#allocation67_spill] sm:$0xff]  ;;  %v16762_v45 = vld [vmem:[#allocation89_spill] sm:$0xff] }
  0x96   :  { %v1549_v12 = vsel %vm534_vm0, %v16757_v28, 0.0  ;;  %v1087_v21 = vrot.slane %v1086_v42, 1  ;;  %v1391_v56 = vadd.f32 %v1390_v6, %v16758_v29  ;;  %v1468_v26 = vadd.f32 %v1467_v63, %v16759_v38  ;;  %v16760_v54 = vld [vmem:[#allocation43_spill] sm:$0xff]  ;;  %v16764_v3 = vld [vmem:[#allocation57_spill] sm:$0xff] }
  0x97   :  { %v1161_v14 = vrot.slane %v1160_v36, 4  ;;  %v1238_v34 = vadd.f32 %v1237_v30, %v1236_v55  ;;  %v1314_v16 = vadd.f32 %v1313_v7, %v16760_v54  ;;  %v16761_v24 = vld [vmem:[#allocation79_spill] sm:$0xff]  ;;  %v1622_v20 = vadd.f32 %v16763_v50, %v16762_v45  ;;  %v16765_v28 = vld [vmem:[#allocation69_spill] sm:$0xff] }
  0x98   :  { %v1545_v2 = vadd.f32 %v1544_v37, %v16761_v24  ;;  %v9329_v27 = vmax.f32 %v1086_v42, %v1087_v21  ;;  %v1392_v40 = vadd.f32 %v1391_v56, %v16764_v3  ;;  %v1469_v9 = vadd.f32 %v1468_v26, %v16765_v28  ;;  %v16766_v6 = vld [vmem:[#allocation81_spill] sm:$0xff]  ;;  %v16771_v56 = vld [vmem:[#allocation95_spill] sm:$0xff] }
  0x99   :  { %v1162_v17 = vadd.f32 %v1161_v14, %v1160_v36  ;;  %v1239_v48 = vrot.slane %v1238_v34, 4  ;;  %v1316_v5 = vadd.f32 %v1315_v44, %v1314_v16  ;;  %v16767_v63 = vld [vmem:[#allocation93_spill] sm:$0xff]  ;;  %v16770_v14 = vld [vmem:[#allocation83_spill] sm:$0xff] }
  0x9a   :  { %v1546_v29 = vadd.f32 %v1545_v2, %v16766_v6  ;;  %v1623_v30 = vadd.f32 %v1622_v20, %v16767_v63  ;;  %v1394_v7 = vadd.f32 %v1393_v0, %v1392_v40  ;;  %v1470_v37 = vadd.f32 %v1469_v9, %v16768_v32  ;;  %v16769_v24 = vld [vmem:[#allocation101_spill] sm:$0xff]  ;;  %v16772_v16 = vld [vmem:[#allocation103_spill] sm:$0xff] }
  0x9b   :  { %v1163_v55 = vrot.slane %v1162_v17, 2  ;;  %v1627_v15 = vsel %vm534_vm0, %v16769_v24, 0.0  ;;  %v1240_v42 = vadd.f32 %v1239_v48, %v1238_v34  ;;  %v1317_v21 = vrot.slane %v1316_v5, 4  ;;  %v16773_v2 = vld [vmem:[#allocation105_spill] sm:$0xff]  ;;  %v16775_v34 = vld [vmem:[#allocation107_spill] sm:$0xff] }
  0x9c   :  { %v1547_v36 = vadd.f32 %v1546_v29, %v16770_v14  ;;  %v1624_v3 = vadd.f32 %v1623_v30, %v16771_v56  ;;  %v1395_v46 = vrot.slane %v1394_v7, 4  ;;  %v1472_v44 = vadd.f32 %v1471_v18, %v1470_v37  ;;  %v16774_v40 = vld [vmem:[#allocation85_spill] sm:$0xff] }
  0x9d   :  { %v1164_v26 = vadd.f32 %v1163_v55, %v1162_v17  ;;  %v1700_v6 = vadd.f32 %v16773_v2, %v16772_v16  ;;  %v1241_v20 = vrot.slane %v1240_v42, 2  ;;  %v1318_v13 = vadd.f32 %v1317_v21, %v1316_v5  ;;  %v16776_v17 = vld [vmem:[#allocation99_spill] sm:$0xff]  ;;  %v16777_v2 = vld [vmem:[#allocation109_spill] sm:$0xff] }
  0x9e   :  { %v1548_v0 = vadd.f32 %v1547_v36, %v16774_v40  ;;  %v1625_v9 = vadd.f32 %v1624_v3, %v16749_v61  ;;  %v1396_v24 = vadd.f32 %v1395_v46, %v1394_v7  ;;  %v1473_v48 = vrot.slane %v1472_v44, 4 }
  0x9f   :  { %v1165_v1 = vrot.slane %v1164_v26, 1  ;;  %v1701_v32 = vadd.f32 %v1700_v6, %v16775_v34  ;;  %v1242_v29 = vadd.f32 %v1241_v20, %v1240_v42  ;;  %v1319_v14 = vrot.slane %v1318_v13, 2 }
  0xa0   :  { %v1550_v30 = vadd.f32 %v1549_v12, %v1548_v0  ;;  %v1626_v55 = vadd.f32 %v1625_v9, %v16776_v17  ;;  %v1397_v37 = vrot.slane %v1396_v24, 2  ;;  %v1474_v56 = vadd.f32 %v1473_v48, %v1472_v44 }
  0xa1   :  { %v1166_v18 = vadd.f32 %v1165_v1, %v1164_v26  ;;  %v1702_v16 = vadd.f32 %v1701_v32, %v16777_v2  ;;  %v1243_v5 = vrot.slane %v1242_v29, 1  ;;  %v1320_v21 = vadd.f32 %v1319_v14, %v1318_v13 }
  0xa2   :  { %v1551_v36 = vrot.slane %v1550_v30, 4  ;;  %v1628_v40 = vadd.f32 %v1627_v15, %v1626_v55  ;;  %v1398_v3 = vadd.f32 %v1397_v37, %v1396_v24  ;;  %v1475_v61 = vrot.slane %v1474_v56, 2 }
  0xa3   :  { %v1703_v46 = vadd.f32 %v1702_v16, %v16752_v53  ;;  %v1705_v6 = vsel %vm534_vm0, %v16754_v60, 0.0  ;;  %v1244_v7 = vadd.f32 %v1243_v5, %v1242_v29  ;;  %v1321_v12 = vrot.slane %v1320_v21, 1 }
  0xa4   :  { %v1552_v42 = vadd.f32 %v1551_v36, %v1550_v30  ;;  %v1629_v20 = vrot.slane %v1628_v40, 4  ;;  %v1399_v1 = vrot.slane %v1398_v3, 1  ;;  %v1476_v26 = vadd.f32 %v1475_v61, %v1474_v56  ;;  %v26_v56 = vld [vmem:[%s15661_s0 + $0x8] sm:$0xff] }
  0xa5   :  { %v1704_v44 = vadd.f32 %v1703_v46, %v16753_v39  ;;  %v1778_v32 = vmul.f32 0.020408163, %v1166_v18  ;;  %v1322_v0 = vadd.f32 %v1321_v12, %v1320_v21  ;;  %v1784_v15 = vmul.f32 0.020408163, %v1244_v7  ;;  %v35_v12 = vld [vmem:[%s15661_s0 + $0x50] sm:$0xff] }
  0xa6   :  { %v1553_v13 = vrot.slane %v1552_v42, 2  ;;  %v1630_v14 = vadd.f32 %v1629_v20, %v1628_v40  ;;  %v1400_v24 = vadd.f32 %v1399_v1, %v1398_v3  ;;  %v1477_v9 = vrot.slane %v1476_v26, 1  ;;  %v32_v3 = vld [vmem:[%s15661_s0 + $0x38] sm:$0xff] }
  0xa7   :  { %v1706_v48 = vadd.f32 %v1705_v6, %v1704_v44  ;;  %v1875_v16 = vsel %vm1874_vm1, %v9275_v19, %v9268_v33  ;;  %v1790_v30 = vmul.f32 0.020408163, %v1322_v0  ;;  %v29_v33 = vld [vmem:[%s15661_s0 + $0x20] sm:$0xff] }
  0xa8   :  { %v1554_v29 = vadd.f32 %v1553_v13, %v1552_v42  ;;  %v1631_v55 = vrot.slane %v1630_v14, 2  ;;  %v1877_v61 = vsel %vm1876_vm2, %v9277_v31, %v1875_v16  ;;  %v1478_v18 = vadd.f32 %v1477_v9, %v1476_v26  ;;  %v38_v26 = vld [vmem:[%s15661_s0 + $0x68] sm:$0xff]  ;;  %v41_v0 = vld [vmem:[%s15661_s0 + $0x80] sm:$0xff] }
  0xa9   :  { %v1707_v40 = vrot.slane %v1706_v48, 4  ;;  %v1796_v37 = vmul.f32 0.020408163, %v1400_v24  ;;  %v1879_v5 = vsel %vm1878_vm3, %v9279_v10, %v1877_v61  ;;  %v1977_v31 = vsel %vm1874_vm1, %v1784_v15, %v1778_v32  ;;  %v47_v24 = vld [vmem:[%s15661_s0 + $0xb0] sm:$0xff] }
  0xaa   :  { %v1555_v19 = vrot.slane %v1554_v29, 1  ;;  %v1632_v21 = vadd.f32 %v1631_v55, %v1630_v14  ;;  %v1881_v36 = vsel %vm1880_vm4, %v9286_v25, %v1879_v5  ;;  %v1802_v6 = vmul.f32 0.020408163, %v1478_v18  ;;  %v56_v55 = vld [vmem:[%s15661_s0 + $0xf8] sm:$0xff] }
  0xab   :  { %v1708_v46 = vadd.f32 %v1707_v40, %v1706_v48  ;;  %v1883_v10 = vsel %vm1882_vm5, %v9291_v4, %v1881_v36  ;;  %v1978_v7 = vsel %vm1876_vm2, %v1790_v30, %v1977_v31  ;;  %v9393_v13 = vunpack.c.l.bf16 %v26_v56  ;;  %v65_v36 = vld [vmem:[%s15661_s0 + $0x140] sm:$0x11] }
  0xac   :  { %v1556_v42 = vadd.f32 %v1555_v19, %v1554_v29  ;;  %v1633_v20 = vrot.slane %v1632_v21, 1  ;;  %v1885_v25 = vsel %vm1884_vm6, %v9309_v23, %v1883_v10  ;;  %v1979_v1 = vsel %vm1878_vm3, %v1796_v37, %v1978_v7  ;;  %v44_v23 = vld [vmem:[%s15661_s0 + $0x98] sm:$0x11]  ;;  %v53_v29 = vld [vmem:[%s15661_s0 + $0xe0] sm:$0xff]  ;;  %v59_v37 = vld [vmem:[%s15661_s0 + $0x110] sm:$0xff] }
  0xad   :  { %v1709_v44 = vrot.slane %v1708_v46, 2  ;;  %v9384_v4 = vsel %vm1886_vm7, %v9329_v27, %v1885_v25  ;;  %v1980_v32 = vsel %vm1880_vm4, %v1802_v6, %v1979_v1  ;;  %16778 = vst [vmem:[#allocation117_spill] sm:$0xff] %v9393_v13  ;;  %v50_v27 = vld [vmem:[%s15661_s0 + $0xc8] sm:$0xff]  ;;  %v9401_v9 = vunpack.c.h.bf16 %v26_v56  ;;  %v68_v10 = vld [vmem:[%s15661_s0 + $0x158] sm:$0xff] }
  0xae   :  { %v1634_v14 = vadd.f32 %v1633_v20, %v1632_v21  ;;  %v1808_v15 = vmul.f32 0.020408163, %v1556_v42  ;;  %v9403_v48 = vunpack.c.l.bf16 %v29_v33  ;;  %v9411_v30 = vunpack.c.h.bf16 %v29_v33  ;;  %v62_v33 = vld [vmem:[%s15661_s0 + $0x128] sm:$0xff] }
  0xaf   :  { %16779 = vst [vmem:[#allocation118_spill] sm:$0xff] %v9401_v9  ;;  %v1710_v16 = vadd.f32 %v1709_v44, %v1708_v46  ;;  %v9413_v61 = vunpack.c.l.bf16 %v32_v3  ;;  %v9415_v18 = vunpack.c.h.bf16 %v32_v3  ;;  %v9421_v5 = vunpack.c.l.bf16 %v35_v12  ;;  %v71_v44 = vld [vmem:[%s15661_s0 + $0x170] sm:$0xff] }
  0xb0   :  { %16780 = vst [vmem:[#allocation119_spill] sm:$0xff] %v9403_v48  ;;  %16781 = vst [vmem:[#allocation120_spill] sm:$0xff] %v9411_v30  ;;  %v1814_v40 = vmul.f32 0.020408163, %v1634_v14  ;;  %v1981_v56 = vsel %vm1882_vm5, %v1808_v15, %v1980_v32  ;;  %v9423_v19 = vunpack.c.h.bf16 %v35_v12  ;;  %v9431_v31 = vunpack.c.l.bf16 %v38_v26 }
  0xb1   :  { %16782 = vst [vmem:[#allocation121_spill] sm:$0xff] %v9413_v61  ;;  %16783 = vst [vmem:[#allocation122_spill] sm:$0xff] %v9415_v18  ;;  %v1711_v21 = vrot.slane %v1710_v16, 1  ;;  %v9433_v3 = vunpack.c.h.bf16 %v38_v26  ;;  %v9435_v46 = vunpack.c.l.bf16 %v41_v0  ;;  %v9441_v7 = vunpack.c.h.bf16 %v41_v0 }
  0xb2   :  { %16784 = vst [vmem:[#allocation123_spill] sm:$0xff] %v9421_v5  ;;  %16785 = vst [vmem:[#allocation124_spill] sm:$0xff] %v9423_v19  ;;  %v1982_v6 = vsel %vm1884_vm6, %v1814_v40, %v1981_v56  ;;  %v9443_v12 = vunpack.c.l.bf16 %v44_v23  ;;  %v9445_v42 = vunpack.c.h.bf16 %v44_v23  ;;  %v9447_v25 = vunpack.c.l.bf16 %v47_v24 }
  0xb3   :  { %16786 = vst [vmem:[#allocation125_spill] sm:$0xff] %v9431_v31  ;;  %16787 = vst [vmem:[#allocation126_spill] sm:$0xff] %v9433_v3  ;;  %v1712_v20 = vadd.f32 %v1711_v21, %v1710_v16  ;;  %v9449_v1 = vunpack.c.h.bf16 %v47_v24  ;;  %v9451_v26 = vunpack.c.l.bf16 %v50_v27  ;;  %v9456_v32 = vunpack.c.h.bf16 %v50_v27 }
  0xb4   :  { %16788 = vst [vmem:[#allocation127_spill] sm:$0xff] %v9435_v46  ;;  %16789 = vst [vmem:[#allocation128_spill] sm:$0xff] %v9441_v7  ;;  %v9458_v14 = vunpack.c.l.bf16 %v53_v29  ;;  %v9460_v0 = vunpack.c.h.bf16 %v53_v29  ;;  %v9462_v15 = vunpack.c.l.bf16 %v56_v55 }
  0xb5   :  { %16790 = vst [vmem:[#allocation129_spill] sm:$0xff] %v9443_v12  ;;  %16791 = vst [vmem:[#allocation130_spill] sm:$0xff] %v9445_v42 }
  0xb6   :  { %16792 = vst [vmem:[#allocation131_spill] sm:$0xff] %v9447_v25  ;;  %16793 = vst [vmem:[#allocation132_spill] sm:$0xff] %v9449_v1 }
  0xb7   :  { %16794 = vst [vmem:[#allocation133_spill] sm:$0xff] %v9451_v26  ;;  %16795 = vst [vmem:[#allocation134_spill] sm:$0xff] %v9456_v32 }
  0xb8   :  { %16796 = vst [vmem:[#allocation135_spill] sm:$0xff] %v9458_v14  ;;  %16797 = vst [vmem:[#allocation136_spill] sm:$0xff] %v9460_v0 }
  0xb9   :  { %16798 = vst [vmem:[#allocation137_spill] sm:$0xff] %v9462_v15 }
  0xba   :  { %11 = vsyncpa [#allocation3], 0  ;;  %v1820_v23 = vmul.f32 0.020408163, %v1712_v20  ;;  %v74_v24 = vld [vmem:[%s15661_s0 + $0x188] sm:$0xff]  ;;  %v9467_v16 = vunpack.c.h.bf16 %v56_v55  ;;  %v9469_v40 = vunpack.c.l.bf16 %v59_v37  ;;  %v9471_v56 = vunpack.c.h.bf16 %v59_v37  ;;  %v77_v27 = vld [vmem:[%s15661_s0 + $0x1a0] sm:$0xff] }
  0xbb   :  { %v80_v29 = vld [vmem:[%s15661_s0 + $0x1b8] sm:$0xff]  ;;  %v9479_v21 = vunpack.c.l.bf16 %v62_v33  ;;  %v9481_v20 = vunpack.c.h.bf16 %v62_v33  ;;  %v9483_v60 = vunpack.c.l.bf16 %v65_v36  ;;  %v9485_v55 = vunpack.c.h.bf16 %v65_v36  ;;  %v8198_v37 = vld [vmem:[%s15662_s1 + $0x100] ss:$8 sps:$4 sm:$0xff]   ;;  %v83_v34 = vld [vmem:[%s15661_s0 + $0x1d0] sm:$0xff]  ;;  %s8514_s29 = smov [#allocation2]  }
  0xbc   :  { %16799 = vst [vmem:[#allocation138_spill] sm:$0xff] %v9467_v16  ;;  %16800 = vst [vmem:[#allocation139_spill] sm:$0xff] %v9469_v40  ;;  %v1983_v53 = vsel %vm1886_vm7, %v1820_v23, %v1982_v6  ;;  %v86_v39 = vld [vmem:[%s15661_s0 + $0x1e8] sm:$0x11]  ;;  %v9497_v33 = vunpack.c.l.bf16 %v68_v10  ;;  %v9499_v2 = vunpack.c.h.bf16 %v68_v10  ;;  %v9501_v36 = vunpack.c.l.bf16 %v71_v44  ;;  %v8203_v6 = vld [vmem:[%s15662_s1 + $0x114] ss:$8 sps:$4 sm:$0xff]  }
  0xbd   :  { %16801 = vst [vmem:[#allocation140_spill] sm:$0xff] %v9471_v56  ;;  %16802 = vst [vmem:[#allocation141_spill] sm:$0xff] %v9479_v21  ;;  %v2025_v17 = vpack.c.bf16 %v1983_v53, %v9384_v4  ;;  %v89_v23 = vld [vmem:[%s15661_s0 + $0x200] sm:$0xff]  ;;  %v92_v45 = vld [vmem:[%s15661_s0 + $0x218] sm:$0xff]  ;;  %v9513_v63 = vunpack.c.h.bf16 %v71_v44  ;;  %v9515_v10 = vunpack.c.l.bf16 %v74_v24  ;;  %v9517_v59 = vunpack.c.h.bf16 %v74_v24 }
  0xbe   :  { %16803 = vst [vmem:[#allocation142_spill] sm:$0xff] %v9481_v20  ;;  %16804 = vst [vmem:[#allocation143_spill] sm:$0xff] %v9483_v60  ;;  %v95_v53 = vld [vmem:[%s15661_s0 + $0x230] sm:$0xff]  ;;  %v98_v4 = vld [vmem:[%s15661_s0 + $0x248] sm:$0xff]  ;;  %v9525_v28 = vunpack.c.l.bf16 %v77_v27  ;;  %v9527_v35 = vunpack.c.h.bf16 %v77_v27  ;;  %v9529_v50 = vunpack.c.l.bf16 %v80_v29  ;;  %v9531_v44 = vunpack.c.h.bf16 %v80_v29 }
  0xbf   :  { %16805 = vst [vmem:[#allocation144_spill] sm:$0xff] %v9485_v55  ;;  %16806 = vst [vmem:[#allocation145_spill] sm:$0xff] %v9497_v33  ;;  %2640 = vmatmul.mubr.bf16.vlgmr.msra.gmra.mrb[0].mxu0 %v2025_v17  ;;  %v101_v24 = vld [vmem:[%s15661_s0 + $0x260] sm:$0xff]  ;;  %v104_v22 = vld [vmem:[%s15661_s0 + $0x278] sm:$0xff]  ;;  %v9539_v38 = vunpack.c.l.bf16 %v83_v34  ;;  %v9541_v41 = vunpack.c.h.bf16 %v83_v34  ;;  %v9543_v54 = vunpack.c.l.bf16 %v86_v39  ;;  %v9545_v27 = vunpack.c.h.bf16 %v86_v39 }
  0xc0   :  { %16807 = vst [vmem:[#allocation146_spill] sm:$0xff] %v9499_v2  ;;  %16808 = vst [vmem:[#allocation147_spill] sm:$0xff] %v9501_v36  ;;  %2651 = vmatpush1.bf16.msra.mxu0 %v8198_v37  ;;  %v8201_v17 = vld [vmem:[%s15662_s1 + $0x110] ss:$8 sps:$4 sm:$0xff]   ;;  %v110_v58 = vld [vmem:[%s15661_s0 + $0x2a8] sm:$0xff]  ;;  %v9556_v43 = vunpack.c.l.bf16 %v89_v23  ;;  %v9558_v34 = vunpack.c.h.bf16 %v89_v23  ;;  %v9560_v57 = vunpack.c.l.bf16 %v92_v45  ;;  %v9562_v39 = vunpack.c.h.bf16 %v92_v45 }
  0xc1   :  { %16809 = vst [vmem:[#allocation148_spill] sm:$0xff] %v9513_v63  ;;  %16810 = vst [vmem:[#allocation149_spill] sm:$0xff] %v9515_v10  ;;  %v107_v29 = vld [vmem:[%s15661_s0 + $0x290] sm:$0x11]  ;;  %2652 = vmatprep.subr.bf16.mxu0 %v8203_v6  ;;  %v8206_v37 = vld [vmem:[%s15662_s1 + $0x124] ss:$8 sps:$4 sm:$0xff]   ;;  %v9573_v62 = vunpack.c.l.bf16 %v95_v53  ;;  %v9575_v23 = vunpack.c.h.bf16 %v95_v53  ;;  %v9577_v52 = vunpack.c.l.bf16 %v98_v4  ;;  %v9579_v45 = vunpack.c.h.bf16 %v98_v4 }
  0xc2   :  { %16811 = vst [vmem:[#allocation150_spill] sm:$0xff] %v9517_v59  ;;  %16812 = vst [vmem:[#allocation151_spill] sm:$0xff] %v9525_v28  ;;  %v113_v51 = vld [vmem:[%s15661_s0 + $0x2c0] sm:$0xff]  ;;  %v116_v11 = vld [vmem:[%s15661_s0 + $0x2d8] sm:$0xff]  ;;  %v9587_v47 = vunpack.c.l.bf16 %v101_v24  ;;  %v9589_v49 = vunpack.c.h.bf16 %v101_v24  ;;  %v9593_v53 = vunpack.c.h.bf16 %v104_v22  ;;  %v9603_v40 = vunpack.c.h.bf16 %v107_v29 }
  0xc3   :  { %16813 = vst [vmem:[#allocation152_spill] sm:$0xff] %v9527_v35  ;;  %16814 = vst [vmem:[#allocation153_spill] sm:$0xff] %v9529_v50  ;;  %v119_v6 = vld [vmem:[%s15661_s0 + $0x2f0] sm:$0xff]  ;;  %v122_v8 = vld [vmem:[%s15661_s0 + $0x308] sm:$0xff]  ;;  %v9601_v50 = vunpack.c.l.bf16 %v107_v29  ;;  %v9605_v46 = vunpack.c.l.bf16 %v110_v58  ;;  %v9607_v24 = vunpack.c.h.bf16 %v110_v58  ;;  %v9620_v29 = vunpack.c.h.bf16 %v113_v51 }
  0xc4   :  { %16815 = vst [vmem:[#allocation154_spill] sm:$0xff] %v9531_v44  ;;  %16816 = vst [vmem:[#allocation155_spill] sm:$0xff] %v9539_v38  ;;  %v9591_v38 = vunpack.c.l.bf16 %v104_v22  ;;  %v125_v4 = vld [vmem:[%s15661_s0 + $0x320] sm:$0xff]  ;;  %v128_v21 = vld [vmem:[%s15661_s0 + $0x338] sm:$0x11]  ;;  %2653 = vmatpush1.bf16.msra.mxu0 %v8201_v17  ;;  %v9622_v28 = vunpack.c.l.bf16 %v116_v11  ;;  %v9624_v58 = vunpack.c.h.bf16 %v116_v11  ;;  %v9641_v11 = vunpack.c.h.bf16 %v122_v8 }
  0xc5   :  { %16817 = vst [vmem:[#allocation156_spill] sm:$0xff] %v9541_v41  ;;  %16818 = vst [vmem:[#allocation157_spill] sm:$0xff] %v9543_v54  ;;  %v8204_v22 = vld [vmem:[%s15662_s1 + $0x120] ss:$8 sps:$4 sm:$0xff]   ;;  %2654 = vmatprep.subr.bf16.mxu0 %v8206_v37  ;;  %v8209_v17 = vld [vmem:[%s15662_s1 + $0x134] ss:$8 sps:$4 sm:$0xff]   ;;  %v9651_v10 = vunpack.c.h.bf16 %v125_v4 }
  0xc6   :  { %16819 = vst [vmem:[#allocation158_spill] sm:$0xff] %v9545_v27  ;;  %16820 = vst [vmem:[#allocation159_spill] sm:$0xff] %v9556_v43  ;;  %v137_v15 = vld [vmem:[%s15661_s0 + $0x380] sm:$0xff]  ;;  %v140_v31 = vld [vmem:[%s15661_s0 + $0x398] sm:$0xff]  ;;  %vm3174_vm8 = vcmask 523264   ;;  %vm8512_vm9 = vmmov 0  }
  0xc7   :  { %16821 = vst [vmem:[#allocation160_spill] sm:$0xff] %v9558_v34  ;;  %16822 = vst [vmem:[#allocation161_spill] sm:$0xff] %v9560_v57  ;;  %v143_v37 = vld [vmem:[%s15661_s0 + $0x3b0] sm:$0xff]  ;;  %v161_v43 = vld [vmem:[%s15661_s0 + $0x440] sm:$0xff]  ;;  %vm5162_vm10 = vcmask 130112   ;;  %vm5169_vm11 = vcmask 195712  }
  0xc8   :  { %16823 = vst [vmem:[#allocation162_spill] sm:$0xff] %v9562_v39  ;;  %16824 = vst [vmem:[#allocation163_spill] sm:$0xff] %v9573_v62  ;;  %v9649_v62 = vunpack.c.l.bf16 %v125_v4  ;;  %2655 = vmatpush1.bf16.msra.mxu0 %v8204_v22  ;;  %v8212_v22 = vld [vmem:[%s15662_s1 + $0x144] ss:$8 sps:$4 sm:$0xff]   ;;  %v164_v57 = vld [vmem:[%s15661_s0 + $0x458] sm:$0xff]  ;;  %vm5176_vm12 = vcmask 261312  }
  0xc9   :  { %16825 = vst [vmem:[#allocation164_spill] sm:$0xff] %v9575_v23  ;;  %16826 = vst [vmem:[#allocation165_spill] sm:$0xff] %v9577_v52  ;;  %v9618_v52 = vunpack.c.l.bf16 %v113_v51  ;;  %v9637_v51 = vunpack.c.h.bf16 %v119_v6  ;;  %2656 = vmatprep.subr.bf16.mxu0 %v8209_v17  ;;  %v167_v17 = vld [vmem:[%s15661_s0 + $0x470] sm:$0xff]  ;;  %v170_v54 = vld [vmem:[%s15661_s0 + $0x488] sm:$0x11]  ;;  %vm5183_vm13 = vcmask 326912  }
  0xca   :  { %16827 = vst [vmem:[#allocation166_spill] sm:$0xff] %v9579_v45  ;;  %16828 = vst [vmem:[#allocation167_spill] sm:$0xff] %v9587_v47  ;;  %v134_v47 = vld [vmem:[%s15661_s0 + $0x368] sm:$0xff]  ;;  %v185_v61 = vld [vmem:[%s15661_s0 + $0x500] sm:$0xff]  ;;  %vm5190_vm14 = vcmask 392512   ;;  %vm5197_vm15 = vcmask 458112  }
  0xcb   :  { %16829 = vst [vmem:[#allocation168_spill] sm:$0xff] %v9589_v49  ;;  %16830 = vst [vmem:[#allocation169_spill] sm:$0xff] %v9591_v38  ;;  %v131_v38 = vld [vmem:[%s15661_s0 + $0x350] sm:$0xff]  ;;  %v9667_v5 = vunpack.c.l.bf16 %v134_v47  ;;  %v9669_v4 = vunpack.c.h.bf16 %v134_v47  ;;  %v9686_v47 = vunpack.c.h.bf16 %v140_v31  ;;  %v188_v12 = vld [vmem:[%s15661_s0 + $0x518] sm:$0xff] }
  0xcc   :  { %16831 = vst [vmem:[#allocation170_spill] sm:$0xff] %v9593_v53  ;;  %16832 = vst [vmem:[#allocation171_spill] sm:$0xff] %v9601_v50  ;;  %v9653_v50 = vunpack.c.l.bf16 %v128_v21  ;;  %v9665_v14 = vunpack.c.h.bf16 %v131_v38 }
  0xcd   :  { %16833 = vst [vmem:[#allocation172_spill] sm:$0xff] %v9603_v40  ;;  %16834 = vst [vmem:[#allocation173_spill] sm:$0xff] %v9605_v46  ;;  %v9635_v46 = vunpack.c.l.bf16 %v119_v6  ;;  %v9655_v6 = vunpack.c.h.bf16 %v128_v21  ;;  %v8207_v21 = vld [vmem:[%s15662_s1 + $0x130] ss:$8 sps:$4 sm:$0xff]  }
  0xce   :  { %16835 = vst [vmem:[#allocation174_spill] sm:$0xff] %v9607_v24  ;;  %16836 = vst [vmem:[#allocation175_spill] sm:$0xff] %v9618_v52  ;;  %v146_v52 = vld [vmem:[%s15661_s0 + $0x3c8] sm:$0xff]  ;;  %2657 = vmatpush1.bf16.msra.mxu0 %v8207_v21  ;;  %v8215_v21 = vld [vmem:[%s15662_s1 + $0x154] ss:$8 sps:$4 sm:$0xff]  }
  0xcf   :  { %16837 = vst [vmem:[#allocation176_spill] sm:$0xff] %v9620_v29  ;;  %16838 = vst [vmem:[#allocation177_spill] sm:$0xff] %v9622_v28  ;;  %v9639_v28 = vunpack.c.l.bf16 %v122_v8  ;;  %v149_v8 = vld [vmem:[%s15661_s0 + $0x3e0] sm:$0x11]  ;;  %2658 = vmatprep.subr.bf16.mxu0 %v8212_v22  ;;  %v191_v22 = vld [vmem:[%s15661_s0 + $0x530] sm:$0x11] }
  0xd0   :  { %16839 = vst [vmem:[#allocation178_spill] sm:$0xff] %v9624_v58  ;;  %16840 = vst [vmem:[#allocation179_spill] sm:$0xff] %v9635_v46  ;;  %v9663_v46 = vunpack.c.l.bf16 %v131_v38  ;;  %v9682_v38 = vunpack.c.h.bf16 %v137_v15  ;;  %v9711_v33 = vunpack.c.l.bf16 %v149_v8  ;;  %v9713_v36 = vunpack.c.h.bf16 %v149_v8 }
  0xd1   :  { %16841 = vst [vmem:[#allocation180_spill] sm:$0xff] %v9637_v51  ;;  %16842 = vst [vmem:[#allocation181_spill] sm:$0xff] %v9639_v28  ;;  %v152_v28 = vld [vmem:[%s15661_s0 + $0x3f8] sm:$0xff] }
  0xd2   :  { %16843 = vst [vmem:[#allocation182_spill] sm:$0xff] %v9641_v11  ;;  %16844 = vst [vmem:[#allocation183_spill] sm:$0xff] %v9649_v62  ;;  %v155_v62 = vld [vmem:[%s15661_s0 + $0x410] sm:$0xff]  ;;  %v9715_v60 = vunpack.c.l.bf16 %v152_v28 }
  0xd3   :  { %16845 = vst [vmem:[#allocation184_spill] sm:$0xff] %v9651_v10  ;;  %16846 = vst [vmem:[#allocation185_spill] sm:$0xff] %v9653_v50  ;;  %v158_v50 = vld [vmem:[%s15661_s0 + $0x428] sm:$0xff]  ;;  %v9727_v25 = vunpack.c.h.bf16 %v155_v62 }
  0xd4   :  { %16847 = vst [vmem:[#allocation186_spill] sm:$0xff] %v9655_v6  ;;  %16848 = vst [vmem:[#allocation187_spill] sm:$0xff] %v9663_v46  ;;  %v9680_v46 = vunpack.c.l.bf16 %v137_v15  ;;  %v9699_v15 = vunpack.c.h.bf16 %v143_v37  ;;  %v9729_v26 = vunpack.c.l.bf16 %v158_v50  ;;  %v9731_v8 = vunpack.c.h.bf16 %v158_v50 }
  0xd5   :  { %16849 = vst [vmem:[#allocation188_spill] sm:$0xff] %v9665_v14  ;;  %16850 = vst [vmem:[#allocation189_spill] sm:$0xff] %v9667_v5  ;;  %v9684_v5 = vunpack.c.l.bf16 %v140_v31  ;;  %v9703_v31 = vunpack.c.h.bf16 %v146_v52  ;;  %v9748_v50 = vunpack.c.h.bf16 %v164_v57 }
  0xd6   :  { %16851 = vst [vmem:[#allocation190_spill] sm:$0xff] %v9669_v4  ;;  %16852 = vst [vmem:[#allocation191_spill] sm:$0xff] %v9680_v46  ;;  %v9697_v46 = vunpack.c.l.bf16 %v143_v37  ;;  %v9717_v37 = vunpack.c.h.bf16 %v152_v28  ;;  %v8210_v28 = vld [vmem:[%s15662_s1 + $0x140] ss:$8 sps:$4 sm:$0xff]  }
  0xd7   :  { %16853 = vst [vmem:[#allocation192_spill] sm:$0xff] %v9682_v38  ;;  %16854 = vst [vmem:[#allocation193_spill] sm:$0xff] %v9684_v5  ;;  %v9701_v5 = vunpack.c.l.bf16 %v146_v52  ;;  %v173_v52 = vld [vmem:[%s15661_s0 + $0x4a0] sm:$0xff]  ;;  %2659 = vmatpush1.bf16.msra.mxu0 %v8210_v28  ;;  %v9802_v28 = vunpack.c.h.bf16 %v191_v22 }
  0xd8   :  { %16855 = vst [vmem:[#allocation194_spill] sm:$0xff] %v9686_v47  ;;  %16856 = vst [vmem:[#allocation195_spill] sm:$0xff] %v9697_v46  ;;  %v9725_v46 = vunpack.c.l.bf16 %v155_v62  ;;  %v9744_v62 = vunpack.c.h.bf16 %v161_v43  ;;  %v9770_v13 = vunpack.c.l.bf16 %v173_v52  ;;  %v9772_v48 = vunpack.c.h.bf16 %v173_v52  ;;  %2660 = vmatprep.subr.bf16.mxu0 %v8215_v21 }
  0xd9   :  { %16857 = vst [vmem:[#allocation196_spill] sm:$0xff] %v9699_v15  ;;  %16858 = vst [vmem:[#allocation197_spill] sm:$0xff] %v9701_v5  ;;  %v176_v5 = vld [vmem:[%s15661_s0 + $0x4b8] sm:$0xff]  ;;  %v9791_v52 = vunpack.c.h.bf16 %v185_v61  ;;  %v725_v21 = vmax.f32 %v9499_v2, %v9513_v63 }
  0xda   :  { %16859 = vst [vmem:[#allocation198_spill] sm:$0xff] %v9703_v31  ;;  %16860 = vst [vmem:[#allocation199_spill] sm:$0xff] %v9711_v33  ;;  %v182_v33 = vld [vmem:[%s15661_s0 + $0x4e8] sm:$0xff]  ;;  %v9776_v31 = vunpack.c.h.bf16 %v176_v5 }
  0xdb   :  { %16861 = vst [vmem:[#allocation200_spill] sm:$0xff] %v9713_v36  ;;  %16862 = vst [vmem:[#allocation201_spill] sm:$0xff] %v9715_v60  ;;  %v179_v60 = vld [vmem:[%s15661_s0 + $0x4d0] sm:$0xff] }
  0xdc   :  { %16863 = vst [vmem:[#allocation202_spill] sm:$0xff] %v9717_v37  ;;  %16864 = vst [vmem:[#allocation203_spill] sm:$0xff] %v9725_v46  ;;  %v9742_v46 = vunpack.c.l.bf16 %v161_v43  ;;  %v9761_v43 = vunpack.c.h.bf16 %v167_v17  ;;  %v9778_v10 = vunpack.c.l.bf16 %v179_v60 }
  0xdd   :  { %16865 = vst [vmem:[#allocation204_spill] sm:$0xff] %v9727_v25  ;;  %16866 = vst [vmem:[#allocation205_spill] sm:$0xff] %v9729_v26  ;;  %v9746_v26 = vunpack.c.l.bf16 %v164_v57  ;;  %v9765_v57 = vunpack.c.h.bf16 %v170_v54 }
  0xde   :  { %16867 = vst [vmem:[#allocation206_spill] sm:$0xff] %v9731_v8  ;;  %16868 = vst [vmem:[#allocation207_spill] sm:$0xff] %v9742_v46  ;;  %v9759_v46 = vunpack.c.l.bf16 %v167_v17  ;;  %v9780_v17 = vunpack.c.h.bf16 %v179_v60  ;;  %v8218_v60 = vld [vmem:[%s15662_s1 + $0x164] ss:$8 sps:$4 sm:$0xff]  }
  0xdf   :  { %16869 = vst [vmem:[#allocation208_spill] sm:$0xff] %v9744_v62  ;;  %16870 = vst [vmem:[#allocation209_spill] sm:$0xff] %v9746_v26  ;;  %v9763_v26 = vunpack.c.l.bf16 %v170_v54  ;;  %v9784_v54 = vunpack.c.h.bf16 %v182_v33 }
  0xe0   :  { %16871 = vst [vmem:[#allocation210_spill] sm:$0xff] %v9748_v50  ;;  %16872 = vst [vmem:[#allocation211_spill] sm:$0xff] %v9759_v46  ;;  %v9774_v50 = vunpack.c.l.bf16 %v176_v5  ;;  %v9782_v46 = vunpack.c.l.bf16 %v182_v33  ;;  %v9795_v5 = vunpack.c.h.bf16 %v188_v12  ;;  %v9800_v33 = vunpack.c.l.bf16 %v191_v22 }
  0xe1   :  { %16873 = vst [vmem:[#allocation212_spill] sm:$0xff] %v9761_v43  ;;  %16874 = vst [vmem:[#allocation213_spill] sm:$0xff] %v9763_v26  ;;  %v8213_v26 = vld [vmem:[%s15662_s1 + $0x150] ss:$8 sps:$4 sm:$0xff]  }
  0xe2   :  { %16875 = vst [vmem:[#allocation214_spill] sm:$0xff] %v9765_v57  ;;  %16876 = vst [vmem:[#allocation215_spill] sm:$0xff] %v9770_v13  ;;  %v9789_v13 = vunpack.c.l.bf16 %v185_v61  ;;  %v574_v61 = vsel %vm534_vm0, %v9445_v42, -inf  ;;  %2661 = vmatpush1.bf16.msra.mxu0 %v8213_v26 }
  0xe3   :  { %16877 = vst [vmem:[#allocation216_spill] sm:$0xff] %v9772_v48  ;;  %16878 = vst [vmem:[#allocation217_spill] sm:$0xff] %v9774_v50  ;;  %v9793_v50 = vunpack.c.l.bf16 %v188_v12  ;;  %v652_v12 = vsel %vm534_vm0, %v9485_v55, -inf  ;;  %v8216_v55 = vld [vmem:[%s15662_s1 + $0x160] ss:$8 sps:$4 sm:$0xff]   ;;  %2662 = vmatprep.subr.bf16.mxu0 %v8218_v60  ;;  %v1037_v60 = vmax.f32 %v9717_v37, %v9727_v25 }
  0xe4   :  { %16879 = vst [vmem:[#allocation218_spill] sm:$0xff] %v9776_v31  ;;  %16880 = vst [vmem:[#allocation219_spill] sm:$0xff] %v9778_v10  ;;  %v808_v10 = vsel %vm534_vm0, %v9603_v40, -inf  ;;  %v16890_v37 = vld [vmem:[#allocation184_spill] sm:$0xff] }
  0xe5   :  { %16881 = vst [vmem:[#allocation220_spill] sm:$0xff] %v9780_v17  ;;  %16882 = vst [vmem:[#allocation221_spill] sm:$0xff] %v9782_v46  ;;  %v569_v46 = vmax.f32 %v9401_v9, %v9411_v30 }
  0xe6   :  { %16883 = vst [vmem:[#allocation222_spill] sm:$0xff] %v9784_v54  ;;  %16884 = vst [vmem:[#allocation223_spill] sm:$0xff] %v9789_v13  ;;  %v803_v13 = vmax.f32 %v9558_v34, %v9562_v39  ;;  %v959_v39 = vmax.f32 %v9665_v14, %v9669_v4  ;;  %2663 = vmatpush1.bf16.msra.mxu0 %v8216_v55 }
  0xe7   :  { %16885 = vst [vmem:[#allocation224_spill] sm:$0xff] %v9791_v52  ;;  %16886 = vst [vmem:[#allocation225_spill] sm:$0xff] %v9793_v50  ;;  %v647_v50 = vmax.f32 %v9449_v1, %v9456_v32  ;;  %v570_v22 = vmax.f32 %v569_v46, %v9415_v18  ;;  %v881_v32 = vmax.f32 %v9607_v24, %v9620_v29  ;;  %v886_v46 = vsel %vm534_vm0, %v9655_v6, -inf  ;;  %v8221_v29 = vld [vmem:[%s15662_s1 + $0x174] ss:$8 sps:$4 sm:$0xff]  }
  0xe8   :  { %16887 = vst [vmem:[#allocation226_spill] sm:$0xff] %v9795_v5  ;;  %16888 = vst [vmem:[#allocation227_spill] sm:$0xff] %v9800_v33  ;;  %v730_v33 = vsel %vm534_vm0, %v9545_v27, -inf  ;;  %v726_v27 = vmax.f32 %v725_v21, %v9517_v59  ;;  %v804_v24 = vmax.f32 %v803_v13, %v9575_v23  ;;  %v960_v4 = vmax.f32 %v959_v39, %v9682_v38 }
  0xe9   :  { %16889 = vst [vmem:[#allocation228_spill] sm:$0xff] %v9802_v28  ;;  %v648_v63 = vmax.f32 %v647_v50, %v9460_v0  ;;  %v571_v26 = vmax.f32 %v570_v22, %v9423_v19  ;;  %v882_v40 = vmax.f32 %v881_v32, %v9624_v58  ;;  %v964_v50 = vsel %vm534_vm0, %v9713_v36, -inf  ;;  %2664 = vmatprep.subr.bf16.mxu0 %v8221_v29 }
  0xea   :  { %v727_v6 = vmax.f32 %v726_v27, %v9527_v35  ;;  %v805_v22 = vmax.f32 %v804_v24, %v9579_v45  ;;  %v1042_v32 = vsel %vm534_vm0, %v9765_v57, -inf  ;;  %v961_v25 = vmax.f32 %v960_v4, %v9686_v47 }
  0xeb   :  { %v649_v21 = vmax.f32 %v648_v63, %v9467_v16  ;;  %v572_v14 = vmax.f32 %v571_v26, %v9433_v3  ;;  %v883_v13 = vmax.f32 %v882_v40, %v9637_v51  ;;  %v8219_v63 = vld [vmem:[%s15662_s1 + $0x170] ss:$8 sps:$4 sm:$0xff]   ;;  %v1038_v26 = vmax.f32 %v1037_v60, %v9731_v8  ;;  %v8224_v40 = vld [vmem:[%s15662_s1 + $0x184] ss:$8 sps:$4 sm:$0xff]  }
  0xec   :  { %v728_v39 = vmax.f32 %v727_v6, %v9531_v44  ;;  %v806_v55 = vmax.f32 %v805_v22, %v9589_v49  ;;  %v962_v60 = vmax.f32 %v961_v25, %v9699_v15  ;;  %2665 = vmatpush1.bf16.msra.mxu0 %v8219_v63 }
  0xed   :  { %v650_v27 = vmax.f32 %v649_v21, %v9471_v56  ;;  %v573_v24 = vmax.f32 %v572_v14, %v9441_v7  ;;  %v884_v57 = vmax.f32 %v883_v13, %v9641_v11  ;;  %v1115_v21 = vmax.f32 %v9772_v48, %v9776_v31  ;;  %v8222_v13 = vld [vmem:[%s15662_s1 + $0x180] ss:$8 sps:$4 sm:$0xff]   ;;  %v16891_v48 = vld [vmem:[#allocation198_spill] sm:$0xff]  ;;  %2666 = vmatprep.subr.bf16.mxu0 %v8224_v40 }
  0xee   :  { %v729_v4 = vmax.f32 %v728_v39, %v9541_v41  ;;  %v1039_v29 = vmax.f32 %v1038_v26, %v9744_v62  ;;  %v807_v47 = vmax.f32 %v806_v55, %v9593_v53  ;;  %v963_v39 = vmax.f32 %v962_v60, %v16891_v48  ;;  %v16892_v11 = vld [vmem:[#allocation210_spill] sm:$0xff] }
  0xef   :  { %v651_v6 = vmax.f32 %v650_v27, %v9481_v20  ;;  %v575_v8 = vmax.f32 %v573_v24, %v574_v61  ;;  %v885_v14 = vmax.f32 %v884_v57, %v16890_v37  ;;  %v1116_v22 = vmax.f32 %v1115_v21, %v9780_v17  ;;  %v8227_v61 = vld [vmem:[%s15662_s1 + $0x194] ss:$8 sps:$4 sm:$0xff]   ;;  %v8225_v40 = vld [vmem:[%s15662_s1 + $0x190] ss:$8 sps:$4 sm:$0xff]  }
  0xf0   :  { %v731_v27 = vmax.f32 %v729_v4, %v730_v33  ;;  %v1040_v25 = vmax.f32 %v1039_v29, %v16892_v11  ;;  %v809_v57 = vmax.f32 %v807_v47, %v808_v10  ;;  %v965_v17 = vmax.f32 %v963_v39, %v964_v50  ;;  %2667 = vmatpush1.bf16.msra.mxu0 %v8222_v13  ;;  %v8230_v50 = vld [vmem:[%s15662_s1 + $0x1a4] ss:$8 sps:$4 sm:$0xff]  }
  0xf1   :  { %v653_v31 = vmax.f32 %v651_v6, %v652_v12  ;;  %v576_v26 = vrot.slane %v575_v8, 4  ;;  %v887_v24 = vmax.f32 %v885_v14, %v886_v46  ;;  %v1117_v63 = vmax.f32 %v1116_v22, %v9784_v54  ;;  %2668 = vmatprep.subr.bf16.mxu0 %v8227_v61 }
  0xf2   :  { %v732_v21 = vrot.slane %v731_v27, 4  ;;  %v1041_v12 = vmax.f32 %v1040_v25, %v9761_v43  ;;  %v810_v6 = vrot.slane %v809_v57, 4  ;;  %v966_v47 = vrot.slane %v965_v17, 4 }
  0xf3   :  { %v654_v55 = vrot.slane %v653_v31, 4  ;;  %v577_v33 = vmax.f32 %v575_v8, %v576_v26  ;;  %v888_v4 = vrot.slane %v887_v24, 4  ;;  %v1118_v60 = vmax.f32 %v1117_v63, %v9791_v52 }
  0xf4   :  { %v733_v10 = vmax.f32 %v731_v27, %v732_v21  ;;  %v1043_v46 = vmax.f32 %v1041_v12, %v1042_v32  ;;  %v811_v8 = vmax.f32 %v809_v57, %v810_v6  ;;  %v967_v26 = vmax.f32 %v965_v17, %v966_v47  ;;  %2669 = vmatpush1.bf16.msra.mxu0 %v8225_v40  ;;  %v8228_v27 = vld [vmem:[%s15662_s1 + $0x1a0] ss:$8 sps:$4 sm:$0xff]   ;;  %v8233_v17 = vld [vmem:[%s15662_s1 + $0x1b4] ss:$8 sps:$4 sm:$0xff]  }
  0xf5   :  { %v655_v29 = vmax.f32 %v653_v31, %v654_v55  ;;  %v578_v14 = vrot.slane %v577_v33, 2  ;;  %v889_v22 = vmax.f32 %v887_v24, %v888_v4  ;;  %v1119_v39 = vmax.f32 %v1118_v60, %v9795_v5  ;;  %2670 = vmatprep.subr.bf16.mxu0 %v8230_v50 }
  0xf6   :  { %v734_v13 = vrot.slane %v733_v10, 2  ;;  %v1044_v63 = vrot.slane %v1043_v46, 4  ;;  %v812_v43 = vrot.slane %v811_v8, 2  ;;  %v1120_v32 = vsel %vm534_vm0, %v9802_v28, -inf }
  0xf7   :  { %v656_v25 = vrot.slane %v655_v29, 2  ;;  %v579_v52 = vmax.f32 %v577_v33, %v578_v14  ;;  %v890_v31 = vrot.slane %v889_v22, 2  ;;  %v968_v24 = vrot.slane %v967_v26, 2 }
  0xf8   :  { %v735_v57 = vmax.f32 %v733_v10, %v734_v13  ;;  %v1045_v55 = vmax.f32 %v1043_v46, %v1044_v63  ;;  %v813_v12 = vmax.f32 %v811_v8, %v812_v43  ;;  %v1121_v6 = vmax.f32 %v1119_v39, %v1120_v32  ;;  %2671 = vmatpush1.bf16.msra.mxu0 %v8228_v27  ;;  %v8231_v46 = vld [vmem:[%s15662_s1 + $0x1b0] ss:$8 sps:$4 sm:$0xff]  }
  0xf9   :  { %v657_v61 = vmax.f32 %v655_v29, %v656_v25  ;;  %v580_v21 = vrot.slane %v579_v52, 1  ;;  %v891_v33 = vmax.f32 %v889_v22, %v890_v31  ;;  %v969_v40 = vmax.f32 %v967_v26, %v968_v24  ;;  %2672 = vmatprep.subr.bf16.mxu0 %v8233_v17  ;;  %v16893_v27 = vld [vmem:[#allocation134_spill] sm:$0xff]  ;;  %v16895_v17 = vld [vmem:[#allocation148_spill] sm:$0xff] }
  0xfa   :  { %v736_v60 = vrot.slane %v735_v57, 1  ;;  %v1046_v47 = vrot.slane %v1045_v55, 2  ;;  %v814_v28 = vrot.slane %v813_v12, 1  ;;  %v1122_v10 = vrot.slane %v1121_v6, 4 }
  0xfb   :  { %v658_v4 = vrot.slane %v657_v61, 1  ;;  %v9898_v14 = vmax.f32 %v579_v52, %v580_v21  ;;  %v892_v29 = vrot.slane %v891_v33, 1  ;;  %v970_v43 = vrot.slane %v969_v40, 1  ;;  %v8236_v52 = vld [vmem:[%s15662_s1 + $0x1c4] ss:$8 sps:$4 sm:$0xff]  }
  0xfc   :  { %v9905_v25 = vmax.f32 %v735_v57, %v736_v60  ;;  %v1047_v8 = vmax.f32 %v1045_v55, %v1046_v47  ;;  %v9910_v22 = vmax.f32 %v813_v12, %v814_v28  ;;  %v1123_v13 = vmax.f32 %v1121_v6, %v1122_v10  ;;  %v16894_v28 = vld [vmem:[#allocation144_spill] sm:$0xff]  ;;  %2673 = vmatpush1.bf16.msra.mxu0 %v8231_v46 }
  0xfd   :  { %v9903_v50 = vmax.f32 %v657_v61, %v658_v4  ;;  %v9912_v39 = vmax.f32 %v891_v33, %v892_v29  ;;  %v1193_v26 = vadd.f32 %v9411_v30, %v9401_v9  ;;  %v9916_v63 = vmax.f32 %v969_v40, %v970_v43  ;;  %v8234_v12 = vld [vmem:[%s15662_s1 + $0x1c0] ss:$8 sps:$4 sm:$0xff]   ;;  %v16896_v4 = vld [vmem:[#allocation158_spill] sm:$0xff]  ;;  %2674 = vmatprep.subr.bf16.mxu0 %v8236_v52 }
  0xfe   :  { %v1048_v31 = vrot.slane %v1047_v8, 1  ;;  %v1198_v32 = vsel %vm534_vm0, %v9445_v42, 0.0  ;;  %v1271_v61 = vadd.f32 %v16893_v27, %v9449_v1  ;;  %v1124_v57 = vrot.slane %v1123_v13, 2  ;;  %v16897_v40 = vld [vmem:[#allocation162_spill] sm:$0xff] }
  0xff   :  { %v1194_v24 = vadd.f32 %v1193_v26, %v9415_v18  ;;  %v1276_v55 = vsel %vm534_vm0, %v16894_v28, 0.0  ;;  %v1349_v21 = vadd.f32 %v16895_v17, %v9499_v2  ;;  %v1354_v60 = vsel %vm534_vm0, %v16896_v4, 0.0  ;;  %v8239_v29 = vld [vmem:[%s15662_s1 + $0x1d4] ss:$8 sps:$4 sm:$0xff]  }
 0x100   :  { %v9930_v33 = vmax.f32 %v1047_v8, %v1048_v31  ;;  %v1272_v6 = vadd.f32 %v1271_v61, %v9460_v0  ;;  %v1427_v47 = vadd.f32 %v16897_v40, %v9558_v34  ;;  %v1125_v10 = vmax.f32 %v1123_v13, %v1124_v57  ;;  %v16898_v8 = vld [vmem:[#allocation172_spill] sm:$0xff]  ;;  %v16899_v28 = vld [vmem:[#allocation174_spill] sm:$0xff]  ;;  %2675 = vmatpush1.bf16.msra.mxu0 %v8234_v12 }
 0x101   :  { %v1195_v46 = vadd.f32 %v1194_v24, %v9423_v19  ;;  %v1350_v43 = vadd.f32 %v1349_v21, %v9517_v59  ;;  %v1432_v26 = vsel %vm534_vm0, %v16898_v8, 0.0  ;;  %v16900_v0 = vld [vmem:[#allocation176_spill] sm:$0xff]  ;;  %v16901_v52 = vld [vmem:[#allocation186_spill] sm:$0xff]  ;;  %2676 = vmatprep.subr.bf16.mxu0 %v8239_v29  ;;  %v16947_v59 = vld [vmem:[#allocation153_spill] sm:$0xff] }
 0x102   :  { %v1273_v31 = vadd.f32 %v1272_v6, %v9467_v16  ;;  %v1428_v61 = vadd.f32 %v1427_v47, %v9575_v23  ;;  %v1505_v34 = vadd.f32 %v16900_v0, %v16899_v28  ;;  %v1510_v40 = vsel %vm534_vm0, %v16901_v52, 0.0  ;;  %v16902_v24 = vld [vmem:[#allocation188_spill] sm:$0xff]  ;;  %v16903_v21 = vld [vmem:[#allocation190_spill] sm:$0xff]  ;;  %v16954_v19 = vld [vmem:[#allocation181_spill] sm:$0xff] }
 0x103   :  { %v1126_v4 = vrot.slane %v1125_v10, 1  ;;  %v1196_v13 = vadd.f32 %v1195_v46, %v9433_v3  ;;  %v1351_v57 = vadd.f32 %v1350_v43, %v9527_v35  ;;  %v1583_v42 = vadd.f32 %v16903_v21, %v16902_v24  ;;  %v8237_v6 = vld [vmem:[%s15662_s1 + $0x1d0] ss:$8 sps:$4 sm:$0xff]   ;;  %v8242_v46 = vld [vmem:[%s15662_s1 + $0x1e4] ss:$8 sps:$4 sm:$0xff]  }
 0x104   :  { %v1274_v47 = vadd.f32 %v1273_v31, %v9471_v56  ;;  %v1429_v8 = vadd.f32 %v1428_v61, %v9579_v45  ;;  %v1506_v23 = vadd.f32 %v1505_v34, %v9624_v58  ;;  %v1588_v52 = vsel %vm534_vm0, %v9713_v36, 0.0  ;;  %v16904_v36 = vld [vmem:[#allocation202_spill] sm:$0xff]  ;;  %v16905_v29 = vld [vmem:[#allocation204_spill] sm:$0xff]  ;;  %2677 = vmatpush1.bf16.msra.mxu0 %v8237_v6  ;;  %v16942_v58 = vld [vmem:[#allocation177_spill] sm:$0xff] }
 0x105   :  { %v9965_v43 = vmax.f32 %v1125_v10, %v1126_v4  ;;  %v1197_v12 = vadd.f32 %v1196_v13, %v9441_v7  ;;  %v1352_v24 = vadd.f32 %v1351_v57, %v9531_v44  ;;  %v1584_v31 = vadd.f32 %v1583_v42, %v9682_v38  ;;  %v16906_v4 = vld [vmem:[#allocation194_spill] sm:$0xff]  ;;  %v8240_v42 = vld [vmem:[%s15662_s1 + $0x1e0] ss:$8 sps:$4 sm:$0xff]   ;;  %2678 = vmatprep.subr.bf16.mxu0 %v8242_v46 }
 0x106   :  { %v1275_v61 = vadd.f32 %v1274_v47, %v9481_v20  ;;  %v1430_v34 = vadd.f32 %v1429_v8, %v9589_v49  ;;  %v1507_v56 = vadd.f32 %v1506_v23, %v9637_v51  ;;  %v1661_v21 = vadd.f32 %v16905_v29, %v16904_v36  ;;  %v16907_v27 = vld [vmem:[#allocation214_spill] sm:$0xff]  ;;  %v16944_v29 = vld [vmem:[#allocation139_spill] sm:$0xff] }
 0x107   :  { %v1199_v45 = vadd.f32 %v1198_v32, %v1197_v12  ;;  %v1353_v16 = vadd.f32 %v1352_v24, %v9541_v41  ;;  %v1585_v10 = vadd.f32 %v1584_v31, %v16906_v4  ;;  %v1666_v13 = vsel %vm534_vm0, %v16907_v27, 0.0  ;;  %v16908_v23 = vld [vmem:[#allocation182_spill] sm:$0xff]  ;;  %v16910_v31 = vld [vmem:[#allocation216_spill] sm:$0xff] }
 0x108   :  { %v1277_v57 = vadd.f32 %v1276_v55, %v1275_v61  ;;  %v1431_v8 = vadd.f32 %v1430_v34, %v9593_v53  ;;  %v1508_v47 = vadd.f32 %v1507_v56, %v16908_v23  ;;  %v16909_v38 = vld [vmem:[#allocation206_spill] sm:$0xff]  ;;  %v16912_v53 = vld [vmem:[#allocation220_spill] sm:$0xff]  ;;  %2679 = vmatpush1.bf16.msra.mxu0 %v8240_v42  ;;  %v16943_v23 = vld [vmem:[#allocation127_spill] sm:$0xff] }
 0x109   :  { %v1662_v49 = vadd.f32 %v1661_v21, %v16909_v38  ;;  %v8245_v32 = vld [vmem:[%s15662_s1 + $0x1f4] ss:$8 sps:$4 sm:$0xff]   ;;  %v1200_v24 = vrot.slane %v1199_v45, 4  ;;  %v1355_v12 = vadd.f32 %v1354_v60, %v1353_v16  ;;  %v1586_v6 = vadd.f32 %v1585_v10, %v9699_v15  ;;  %v8243_v16 = vld [vmem:[%s15662_s1 + $0x1f0] ss:$8 sps:$4 sm:$0xff]  }
 0x10a   :  { %v16911_v4 = vld [vmem:[#allocation218_spill] sm:$0xff]  ;;  %v1278_v27 = vrot.slane %v1277_v57, 4  ;;  %v1433_v55 = vadd.f32 %v1432_v26, %v1431_v8  ;;  %v1509_v61 = vadd.f32 %v1508_v47, %v16890_v37  ;;  %2680 = vmatprep.subr.bf16.mxu0 %v8245_v32  ;;  %v16940_v38 = vld [vmem:[#allocation151_spill] sm:$0xff] }
 0x10b   :  { %v1739_v20 = vadd.f32 %v16911_v4, %v16910_v31  ;;  %v1663_v56 = vadd.f32 %v1662_v49, %v9744_v62  ;;  %v1201_v34 = vadd.f32 %v1200_v24, %v1199_v45  ;;  %v1356_v21 = vrot.slane %v1355_v12, 4  ;;  %v16915_v62 = vld [vmem:[#allocation228_spill] sm:$0xff] }
 0x10c   :  { %v1587_v46 = vadd.f32 %v1586_v6, %v16891_v48  ;;  %v1279_v60 = vadd.f32 %v1278_v27, %v1277_v57  ;;  %v1434_v10 = vrot.slane %v1433_v55, 4  ;;  %v1511_v15 = vadd.f32 %v1510_v40, %v1509_v61  ;;  %v16914_v61 = vld [vmem:[#allocation224_spill] sm:$0xff]  ;;  %2681 = vmatpush1.bf16.msra.mxu0 %v8243_v16 }
 0x10d   :  { %v1740_v1 = vadd.f32 %v1739_v20, %v16912_v53  ;;  %v1664_v26 = vadd.f32 %v1663_v56, %v16892_v11  ;;  %v1202_v8 = vrot.slane %v1201_v34, 2  ;;  %v1357_v47 = vadd.f32 %v1356_v21, %v1355_v12  ;;  %v8248_v20 = vld [vmem:[%s15662_s1 + $0x204] ss:$8 sps:$4 sm:$0xff]  }
 0x10e   :  { %v1589_v49 = vadd.f32 %v1588_v52, %v1587_v46  ;;  %v1280_v42 = vrot.slane %v1279_v60, 2  ;;  %v1435_v24 = vadd.f32 %v1434_v10, %v1433_v55  ;;  %v1512_v6 = vrot.slane %v1511_v15, 4  ;;  %v16913_v53 = vld [vmem:[#allocation212_spill] sm:$0xff]  ;;  %2693 = vmatprep.subr.bf16.mxu0 %v8248_v20 }
 0x10f   :  { %v1741_v45 = vadd.f32 %v1740_v1, %v9784_v54  ;;  %v1665_v4 = vadd.f32 %v1664_v26, %v16913_v53  ;;  %v1203_v27 = vadd.f32 %v1202_v8, %v1201_v34  ;;  %v1358_v57 = vrot.slane %v1357_v47, 2 }
 0x110   :  { %v1590_v40 = vrot.slane %v1589_v49, 4  ;;  %v1281_v32 = vadd.f32 %v1280_v42, %v1279_v60  ;;  %v1436_v12 = vrot.slane %v1435_v24, 2  ;;  %v1513_v52 = vadd.f32 %v1512_v6, %v1511_v15 }
 0x111   :  { %v1742_v56 = vadd.f32 %v1741_v45, %v16914_v61  ;;  %v1667_v21 = vadd.f32 %v1666_v13, %v1665_v4  ;;  %v1204_v1 = vrot.slane %v1203_v27, 1  ;;  %v1359_v46 = vadd.f32 %v1358_v57, %v1357_v47 }
 0x112   :  { %v1591_v54 = vadd.f32 %v1590_v40, %v1589_v49  ;;  %v1282_v55 = vrot.slane %v1281_v32, 1  ;;  %v1437_v10 = vadd.f32 %v1436_v12, %v1435_v24  ;;  %v1514_v31 = vrot.slane %v1513_v52, 2 }
 0x113   :  { %v1743_v48 = vadd.f32 %v1742_v56, %v9795_v5  ;;  %v1668_v26 = vrot.slane %v1667_v21, 4  ;;  %v1205_v34 = vadd.f32 %v1204_v1, %v1203_v27  ;;  %v1360_v8 = vrot.slane %v1359_v46, 1  ;;  %v16936_v5 = vld [vmem:[#allocation137_spill] sm:$0xff] }
 0x114   :  { %v1592_v53 = vrot.slane %v1591_v54, 2  ;;  %v1744_v16 = vsel %vm534_vm0, %v16915_v62, 0.0  ;;  %v1283_v60 = vadd.f32 %v1282_v55, %v1281_v32  ;;  %v1438_v45 = vrot.slane %v1437_v10, 1  ;;  %v16935_v62 = vld [vmem:[#allocation125_spill] sm:$0xff] }
 0x115   :  { %v1515_v15 = vadd.f32 %v1514_v31, %v1513_v52  ;;  %v1669_v4 = vadd.f32 %v1668_v26, %v1667_v21  ;;  %v1361_v13 = vadd.f32 %v1360_v8, %v1359_v46  ;;  %v1745_v49 = vadd.f32 %v1744_v16, %v1743_v48 }
 0x116   :  { %v1593_v47 = vadd.f32 %v1592_v53, %v1591_v54  ;;  %v1781_v42 = vmul.f32 0.020408163, %v1205_v34  ;;  %v1439_v6 = vadd.f32 %v1438_v45, %v1437_v10  ;;  %v1787_v24 = vmul.f32 0.020408163, %v1283_v60  ;;  %v16916_v60 = vld [vmem:[#allocation119_spill] sm:$0xff]  ;;  %v16917_v45 = vld [vmem:[#allocation117_spill] sm:$0xff] }
 0x117   :  { %v1516_v20 = vrot.slane %v1515_v15, 1  ;;  %v1670_v57 = vrot.slane %v1669_v4, 2  ;;  %v1746_v56 = vrot.slane %v1745_v49, 4  ;;  %v1793_v27 = vmul.f32 0.020408163, %v1361_v13 }
 0x118   :  { %v1594_v40 = vrot.slane %v1593_v47, 1  ;;  %v1902_v12 = vsel %vm1874_vm1, %v9903_v50, %v9898_v14  ;;  %v1799_v55 = vmul.f32 0.020408163, %v1439_v6  ;;  %v1998_v52 = vsel %vm1874_vm1, %v1787_v24, %v1781_v42  ;;  %v16919_v42 = vld [vmem:[#allocation121_spill] sm:$0xff]  ;;  %v16922_v24 = vld [vmem:[#allocation143_spill] sm:$0xff] }
 0x119   :  { %v1517_v1 = vadd.f32 %v1516_v20, %v1515_v15  ;;  %v1671_v32 = vadd.f32 %v1670_v57, %v1669_v4  ;;  %v1903_v31 = vsel %vm1876_vm2, %v9905_v25, %v1902_v12  ;;  %v1747_v48 = vadd.f32 %v1746_v56, %v1745_v49  ;;  %v16920_v20 = vld [vmem:[#allocation133_spill] sm:$0xff]  ;;  %v16921_v57 = vld [vmem:[#allocation131_spill] sm:$0xff] }
 0x11a   :  { %v1595_v53 = vadd.f32 %v1594_v40, %v1593_v47  ;;  %v1904_v54 = vsel %vm1878_vm3, %v9910_v22, %v1903_v31  ;;  %v1999_v14 = vsel %vm1876_vm2, %v1793_v27, %v1998_v52  ;;  %v556_v15 = vmax.f32 %v16917_v45, %v16916_v60  ;;  %v16918_v47 = vld [vmem:[#allocation129_spill] sm:$0xff]  ;;  %v16923_v27 = vld [vmem:[#allocation147_spill] sm:$0xff] }
 0x11b   :  { %v1672_v21 = vrot.slane %v1671_v32, 1  ;;  %v1805_v46 = vmul.f32 0.020408163, %v1517_v1  ;;  %v1905_v10 = vsel %vm1880_vm4, %v9912_v39, %v1904_v54  ;;  %v1748_v50 = vrot.slane %v1747_v48, 2  ;;  %v16924_v12 = vld [vmem:[#allocation145_spill] sm:$0xff]  ;;  %v16927_v31 = vld [vmem:[#allocation159_spill] sm:$0xff] }
 0x11c   :  { %v1811_v26 = vmul.f32 0.020408163, %v1595_v53  ;;  %v1906_v34 = vsel %vm1882_vm5, %v9916_v63, %v1905_v10  ;;  %v2000_v25 = vsel %vm1878_vm3, %v1799_v55, %v1999_v14  ;;  %v561_v63 = vsel %vm534_vm0, %v16918_v47, -inf  ;;  %v16926_v55 = vld [vmem:[#allocation161_spill] sm:$0xff]  ;;  %v16928_v54 = vld [vmem:[#allocation123_spill] sm:$0xff] }
 0x11d   :  { %v1673_v8 = vadd.f32 %v1672_v21, %v1671_v32  ;;  %v1907_v22 = vsel %vm1884_vm6, %v9930_v33, %v1906_v34  ;;  %v2001_v16 = vsel %vm1880_vm4, %v1805_v46, %v2000_v25  ;;  %v1749_v4 = vadd.f32 %v1748_v50, %v1747_v48  ;;  %v16925_v32 = vld [vmem:[#allocation157_spill] sm:$0xff]  ;;  %v16929_v21 = vld [vmem:[#allocation135_spill] sm:$0xff] }
 0x11e   :  { %v1908_v39 = vsel %vm1886_vm7, %v9965_v43, %v1907_v22  ;;  %v2002_v13 = vsel %vm1882_vm5, %v1811_v26, %v2001_v16  ;;  %v557_v6 = vmax.f32 %v556_v15, %v16919_v42  ;;  %v634_v33 = vmax.f32 %v16921_v57, %v16920_v20  ;;  %v16930_v10 = vld [vmem:[#allocation171_spill] sm:$0xff]  ;;  %v16931_v26 = vld [vmem:[#allocation149_spill] sm:$0xff] }
 0x11f   :  { %v1817_v49 = vmul.f32 0.020408163, %v1673_v8  ;;  %v639_v40 = vsel %vm534_vm0, %v16922_v24, -inf  ;;  %v1750_v56 = vrot.slane %v1749_v4, 1  ;;  %v712_v1 = vmax.f32 %v16924_v12, %v16923_v27  ;;  %v16932_v25 = vld [vmem:[#allocation163_spill] sm:$0xff]  ;;  %v16934_v16 = vld [vmem:[#allocation173_spill] sm:$0xff] }
 0x120   :  { %v717_v43 = vsel %vm534_vm0, %v16925_v32, -inf  ;;  %v790_v53 = vmax.f32 %v16927_v31, %v16926_v55  ;;  %v558_v52 = vmax.f32 %v557_v6, %v16928_v54  ;;  %v635_v46 = vmax.f32 %v634_v33, %v16929_v21  ;;  %v16933_v22 = vld [vmem:[#allocation175_spill] sm:$0xff]  ;;  %v16938_v6 = vld [vmem:[#allocation189_spill] sm:$0xff] }
 0x121   :  { %v2003_v48 = vsel %vm1884_vm6, %v1817_v49, %v2002_v13  ;;  %v795_v14 = vsel %vm534_vm0, %v16930_v10, -inf  ;;  %v1751_v50 = vadd.f32 %v1750_v56, %v1749_v4  ;;  %v713_v34 = vmax.f32 %v712_v1, %v16931_v26  ;;  %v16937_v13 = vld [vmem:[#allocation185_spill] sm:$0xff]  ;;  %v16939_v33 = vld [vmem:[#allocation187_spill] sm:$0xff] }
 0x122   :  { %v791_v8 = vmax.f32 %v790_v53, %v16932_v25  ;;  %v868_v15 = vmax.f32 %v16934_v16, %v16933_v22  ;;  %v559_v61 = vmax.f32 %v558_v52, %v16935_v62  ;;  %v636_v37 = vmax.f32 %v635_v46, %v16936_v5  ;;  %v16941_v56 = vld [vmem:[#allocation165_spill] sm:$0xff]  ;;  %v16945_v52 = vld [vmem:[#allocation191_spill] sm:$0xff] }
 0x123   :  { %v873_v49 = vsel %vm534_vm0, %v16937_v13, -inf  ;;  %v946_v11 = vmax.f32 %v16939_v33, %v16938_v6  ;;  %v1823_v36 = vmul.f32 0.020408163, %v1751_v50  ;;  %v714_v4 = vmax.f32 %v713_v34, %v16940_v38  ;;  %v16946_v46 = vld [vmem:[#allocation199_spill] sm:$0xff] }
 0x124   :  { %v792_v1 = vmax.f32 %v791_v8, %v16941_v56  ;;  %v869_v53 = vmax.f32 %v868_v15, %v16942_v58  ;;  %v560_v44 = vmax.f32 %v559_v61, %v16943_v23  ;;  %v637_v28 = vmax.f32 %v636_v37, %v16944_v29  ;;  %v16948_v50 = vld [vmem:[#allocation167_spill] sm:$0xff]  ;;  %v16950_v15 = vld [vmem:[#allocation141_spill] sm:$0xff] }
 0x125   :  { %v947_v51 = vmax.f32 %v946_v11, %v16945_v52  ;;  %v951_v3 = vsel %vm534_vm0, %v16946_v46, -inf  ;;  %v2004_v41 = vsel %vm1886_vm7, %v1823_v36, %v2003_v48  ;;  %v715_v0 = vmax.f32 %v714_v4, %v16947_v59  ;;  %v16949_v34 = vld [vmem:[#allocation179_spill] sm:$0xff]  ;;  %v16951_v61 = vld [vmem:[#allocation193_spill] sm:$0xff] }
 0x126   :  { %v793_v2 = vmax.f32 %v792_v1, %v16948_v50  ;;  %v870_v7 = vmax.f32 %v869_v53, %v16949_v34  ;;  %v2028_v8 = vpack.c.bf16 %v2004_v41, %v1908_v39  ;;  %v562_v18 = vmax.f32 %v560_v44, %v561_v63  ;;  %v16952_v37 = vld [vmem:[#allocation155_spill] sm:$0xff]  ;;  %v16953_v11 = vld [vmem:[#allocation169_spill] sm:$0xff] }
 0x127   :  { %v638_v35 = vmax.f32 %v637_v28, %v16950_v15  ;;  %v948_v30 = vmax.f32 %v947_v51, %v16951_v61  ;;  %v716_v17 = vmax.f32 %v715_v0, %v16952_v37  ;;  %v16955_v46 = vld [vmem:[#allocation203_spill] sm:$0xff]  ;;  %v16956_v36 = vld [vmem:[#allocation201_spill] sm:$0xff] }
 0x128   :  { %v794_v9 = vmax.f32 %v793_v2, %v16953_v11  ;;  %v871_v52 = vmax.f32 %v870_v7, %v16954_v19  ;;  %v1024_v48 = vmax.f32 %v16956_v36, %v16955_v46  ;;  %2682 = vmatprep.mubr.bf16.mxu0 %v2028_v8  ;;  %v563_v4 = vrot.slane %v562_v18, 4  ;;  %v16957_v50 = vld [vmem:[#allocation195_spill] sm:$0xff]  ;;  %v16958_v41 = vld [vmem:[#allocation213_spill] sm:$0xff] }
 0x129   :  { %v640_v1 = vmax.f32 %v638_v35, %v639_v40  ;;  %v949_v53 = vmax.f32 %v948_v30, %v16957_v50  ;;  %v1029_v44 = vsel %vm534_vm0, %v16958_v41, -inf  ;;  %v718_v28 = vmax.f32 %v716_v17, %v717_v43  ;;  %v16959_v51 = vld [vmem:[#allocation183_spill] sm:$0xff]  ;;  %v16960_v0 = vld [vmem:[#allocation205_spill] sm:$0xff] }
 0x12a   :  { %v796_v39 = vmax.f32 %v794_v9, %v795_v14  ;;  %v872_v63 = vmax.f32 %v871_v52, %v16959_v51  ;;  %v1025_v61 = vmax.f32 %v1024_v48, %v16960_v0  ;;  %v564_v2 = vmax.f32 %v562_v18, %v563_v4  ;;  %v16961_v7 = vld [vmem:[#allocation197_spill] sm:$0xff]  ;;  %v16963_v46 = vld [vmem:[#allocation215_spill] sm:$0xff] }
 0x12b   :  { %v641_v11 = vrot.slane %v640_v1, 4  ;;  %v950_v19 = vmax.f32 %v949_v53, %v16961_v7  ;;  %v16962_v37 = vld [vmem:[#allocation217_spill] sm:$0xff]  ;;  %v719_v36 = vrot.slane %v718_v28, 4  ;;  %v16964_v30 = vld [vmem:[#allocation207_spill] sm:$0xff] }
 0x12c   :  { %v1102_v8 = vmax.f32 %v16963_v46, %v16962_v37  ;;  %v797_v35 = vrot.slane %v796_v39, 4  ;;  %v874_v40 = vmax.f32 %v872_v63, %v873_v49  ;;  %v1026_v50 = vmax.f32 %v1025_v61, %v16964_v30  ;;  %v16965_v9 = vld [vmem:[#allocation219_spill] sm:$0xff]  ;;  %v16966_v18 = vld [vmem:[#allocation209_spill] sm:$0xff] }
 0x12d   :  { %v565_v34 = vrot.slane %v564_v2, 2  ;;  %v642_v41 = vmax.f32 %v640_v1, %v641_v11  ;;  %v952_v17 = vmax.f32 %v950_v19, %v951_v3  ;;  %v720_v14 = vmax.f32 %v718_v28, %v719_v36  ;;  %v16967_v51 = vld [vmem:[#allocation221_spill] sm:$0xff]  ;;  %v16968_v63 = vld [vmem:[#allocation211_spill] sm:$0xff] }
 0x12e   :  { %v1103_v43 = vmax.f32 %v1102_v8, %v16965_v9  ;;  %v798_v52 = vmax.f32 %v796_v39, %v797_v35  ;;  %v875_v48 = vrot.slane %v874_v40, 4  ;;  %v1027_v4 = vmax.f32 %v1026_v50, %v16966_v18  ;;  %v16969_v3 = vld [vmem:[#allocation223_spill] sm:$0xff]  ;;  %v16970_v35 = vld [vmem:[#allocation225_spill] sm:$0xff] }
 0x12f   :  { %v566_v0 = vmax.f32 %v564_v2, %v565_v34  ;;  %v643_v53 = vrot.slane %v642_v41, 2  ;;  %v953_v7 = vrot.slane %v952_v17, 4  ;;  %v721_v46 = vrot.slane %v720_v14, 2 }
 0x130   :  { %v1104_v37 = vmax.f32 %v1103_v43, %v16967_v51  ;;  %v799_v15 = vrot.slane %v798_v52, 2  ;;  %v876_v49 = vmax.f32 %v874_v40, %v875_v48  ;;  %v1028_v61 = vmax.f32 %v1027_v4, %v16968_v63 }
 0x131   :  { %v567_v30 = vrot.slane %v566_v0, 1  ;;  %v644_v11 = vmax.f32 %v642_v41, %v643_v53  ;;  %v954_v19 = vmax.f32 %v952_v17, %v953_v7  ;;  %v722_v36 = vmax.f32 %v720_v14, %v721_v46  ;;  %v16971_v7 = vld [vmem:[#allocation227_spill] sm:$0xff] }
 0x132   :  { %v1105_v1 = vmax.f32 %v1104_v37, %v16969_v3  ;;  %v800_v28 = vmax.f32 %v798_v52, %v799_v15  ;;  %v877_v39 = vrot.slane %v876_v49, 2  ;;  %v1030_v8 = vmax.f32 %v1028_v61, %v1029_v44 }
 0x133   :  { %v10091_v50 = vmax.f32 %v566_v0, %v567_v30  ;;  %v645_v34 = vrot.slane %v644_v11, 1  ;;  %v955_v2 = vrot.slane %v954_v19, 2  ;;  %v723_v51 = vrot.slane %v722_v36, 1 }
 0x134   :  { %v1106_v43 = vmax.f32 %v1105_v1, %v16970_v35  ;;  %v801_v9 = vrot.slane %v800_v28, 1  ;;  %v878_v40 = vmax.f32 %v876_v49, %v877_v39  ;;  %v1031_v48 = vrot.slane %v1030_v8, 4 }
 0x135   :  { %v10094_v4 = vmax.f32 %v644_v11, %v645_v34  ;;  %v956_v41 = vmax.f32 %v954_v19, %v955_v2  ;;  %v1107_v37 = vsel %vm534_vm0, %v16971_v7, -inf  ;;  %v1180_v46 = vadd.f32 %v16916_v60, %v16917_v45 }
 0x136   :  { %v10100_v15 = vmax.f32 %v722_v36, %v723_v51  ;;  %v10102_v44 = vmax.f32 %v800_v28, %v801_v9  ;;  %v879_v0 = vrot.slane %v878_v40, 1  ;;  %v1032_v30 = vmax.f32 %v1030_v8, %v1031_v48 }
 0x137   :  { %v957_v17 = vrot.slane %v956_v41, 1  ;;  %v1108_v14 = vmax.f32 %v1106_v43, %v1107_v37  ;;  %v1181_v52 = vadd.f32 %v1180_v46, %v16919_v42  ;;  %v1185_v53 = vsel %vm534_vm0, %v16918_v47, 0.0  ;;  %v16984_v47 = vld [vmem:[#allocation205_spill] sm:$0xff] }
 0x138   :  { %v10107_v49 = vmax.f32 %v878_v40, %v879_v0  ;;  %v1033_v61 = vrot.slane %v1032_v30, 2  ;;  %v1258_v11 = vadd.f32 %v16920_v20, %v16921_v57  ;;  %v1263_v51 = vsel %vm534_vm0, %v16922_v24, 0.0  ;;  %v16973_v24 = vld [vmem:[#allocation167_spill] sm:$0xff] }
 0x139   :  { %v10113_v9 = vmax.f32 %v956_v41, %v957_v17  ;;  %v1109_v19 = vrot.slane %v1108_v14, 4  ;;  %v1182_v1 = vadd.f32 %v1181_v52, %v16928_v54  ;;  %v1336_v36 = vadd.f32 %v16923_v27, %v16924_v12  ;;  %v126_v54 = vld [vmem:[%s15661_s0 + $0x328] sm:$0xff] }
 0x13a   :  { %v1034_v28 = vmax.f32 %v1032_v30, %v1033_v61  ;;  %v1259_v39 = vadd.f32 %v1258_v11, %v16929_v21  ;;  %v1341_v8 = vsel %vm534_vm0, %v16925_v32, 0.0  ;;  %v1414_v34 = vadd.f32 %v16926_v55, %v16927_v31  ;;  %v16974_v31 = vld [vmem:[#allocation179_spill] sm:$0xff] }
 0x13b   :  { %v1110_v2 = vmax.f32 %v1108_v14, %v1109_v19  ;;  %v1183_v43 = vadd.f32 %v1182_v1, %v16935_v62  ;;  %v1337_v40 = vadd.f32 %v1336_v36, %v16931_v26  ;;  %v1419_v48 = vsel %vm534_vm0, %v16930_v10, 0.0  ;;  %v16972_v10 = vld [vmem:[#allocation141_spill] sm:$0xff]  ;;  %v16976_v21 = vld [vmem:[#allocation155_spill] sm:$0xff] }
 0x13c   :  { %v1035_v41 = vrot.slane %v1034_v28, 1  ;;  %v1260_v37 = vadd.f32 %v1259_v39, %v16936_v5  ;;  %v1415_v46 = vadd.f32 %v1414_v34, %v16932_v25  ;;  %v1492_v0 = vadd.f32 %v16933_v22, %v16934_v16  ;;  %v16983_v5 = vld [vmem:[#allocation183_spill] sm:$0xff] }
 0x13d   :  { %v1111_v30 = vrot.slane %v1110_v2, 2  ;;  %v1184_v17 = vadd.f32 %v1183_v43, %v16943_v23  ;;  %v1338_v14 = vadd.f32 %v1337_v40, %v16940_v38  ;;  %v1497_v52 = vsel %vm534_vm0, %v16937_v13, 0.0  ;;  %v16982_v13 = vld [vmem:[#allocation193_spill] sm:$0xff]  ;;  %v108_v62 = vld [vmem:[%s15661_s0 + $0x298] sm:$0x11]  ;;  %v117_v38 = vld [vmem:[%s15661_s0 + $0x2e0] sm:$0xff] }
 0x13e   :  { %v10135_v61 = vmax.f32 %v1034_v28, %v1035_v41  ;;  %v1261_v11 = vadd.f32 %v1260_v37, %v16944_v29  ;;  %v1416_v19 = vadd.f32 %v1415_v46, %v16941_v56  ;;  %v1493_v1 = vadd.f32 %v1492_v0, %v16942_v58  ;;  %v16975_v41 = vld [vmem:[#allocation199_spill] sm:$0xff]  ;;  %v16979_v56 = vld [vmem:[#allocation181_spill] sm:$0xff] }
 0x13f   :  { %v1112_v36 = vmax.f32 %v1110_v2, %v1111_v30  ;;  %v1186_v39 = vadd.f32 %v1185_v53, %v1184_v17  ;;  %v1339_v34 = vadd.f32 %v1338_v14, %v16947_v59  ;;  %v1570_v43 = vadd.f32 %v16938_v6, %v16939_v33  ;;  %v16977_v2 = vld [vmem:[#allocation191_spill] sm:$0xff]  ;;  %v16978_v17 = vld [vmem:[#allocation169_spill] sm:$0xff] }
 0x140   :  { %v1262_v40 = vadd.f32 %v1261_v11, %v16972_v10  ;;  %v1417_v25 = vadd.f32 %v1416_v19, %v16973_v24  ;;  %v1494_v28 = vadd.f32 %v1493_v1, %v16974_v31  ;;  %v1575_v37 = vsel %vm534_vm0, %v16975_v41, 0.0  ;;  %v16980_v6 = vld [vmem:[#allocation201_spill] sm:$0xff]  ;;  %v16981_v11 = vld [vmem:[#allocation203_spill] sm:$0xff] }
 0x141   :  { %v1113_v29 = vrot.slane %v1112_v36, 1  ;;  %v1187_v46 = vrot.slane %v1186_v39, 4  ;;  %v1340_v0 = vadd.f32 %v1339_v34, %v16976_v21  ;;  %v1571_v53 = vadd.f32 %v1570_v43, %v16977_v2  ;;  %v96_v58 = vld [vmem:[%s15661_s0 + $0x238] sm:$0xff] }
 0x142   :  { %v1264_v30 = vadd.f32 %v1263_v51, %v1262_v40  ;;  %v1418_v14 = vadd.f32 %v1417_v25, %v16978_v17  ;;  %v1495_v33 = vadd.f32 %v1494_v28, %v16979_v56  ;;  %v1648_v10 = vadd.f32 %v16981_v11, %v16980_v6  ;;  %v16985_v25 = vld [vmem:[#allocation195_spill] sm:$0xff]  ;;  %v16986_v28 = vld [vmem:[#allocation213_spill] sm:$0xff] }
 0x143   :  { %v10154_v19 = vmax.f32 %v1112_v36, %v1113_v29  ;;  %v1188_v1 = vadd.f32 %v1187_v46, %v1186_v39  ;;  %v1342_v24 = vadd.f32 %v1341_v8, %v1340_v0  ;;  %v1572_v41 = vadd.f32 %v1571_v53, %v16982_v13  ;;  %v16987_v39 = vld [vmem:[#allocation207_spill] sm:$0xff]  ;;  %v16988_v53 = vld [vmem:[#allocation197_spill] sm:$0xff] }
 0x144   :  { %v1265_v55 = vrot.slane %v1264_v30, 4  ;;  %v1420_v32 = vadd.f32 %v1419_v48, %v1418_v14  ;;  %v1496_v34 = vadd.f32 %v1495_v33, %v16983_v5  ;;  %v1649_v43 = vadd.f32 %v1648_v10, %v16984_v47  ;;  %v16989_v14 = vld [vmem:[#allocation215_spill] sm:$0xff]  ;;  %v16990_v33 = vld [vmem:[#allocation217_spill] sm:$0xff] }
 0x145   :  { %v1189_v51 = vrot.slane %v1188_v1, 2  ;;  %v1343_v40 = vrot.slane %v1342_v24, 4  ;;  %v1573_v2 = vadd.f32 %v1572_v41, %v16985_v25  ;;  %v1653_v17 = vsel %vm534_vm0, %v16986_v28, 0.0 }
 0x146   :  { %v1266_v20 = vadd.f32 %v1265_v55, %v1264_v30  ;;  %v1421_v29 = vrot.slane %v1420_v32, 4  ;;  %v1498_v36 = vadd.f32 %v1497_v52, %v1496_v34  ;;  %v1650_v8 = vadd.f32 %v1649_v43, %v16987_v39  ;;  %v16991_v55 = vld [vmem:[#allocation219_spill] sm:$0xff] }
 0x147   :  { %v1190_v46 = vadd.f32 %v1189_v51, %v1188_v1  ;;  %v1344_v0 = vadd.f32 %v1343_v40, %v1342_v24  ;;  %v1574_v48 = vadd.f32 %v1573_v2, %v16988_v53  ;;  %v1726_v13 = vadd.f32 %v16990_v33, %v16989_v14  ;;  %v16992_v40 = vld [vmem:[#allocation221_spill] sm:$0xff] }
 0x148   :  { %v1267_v10 = vrot.slane %v1266_v20, 2  ;;  %v1422_v57 = vadd.f32 %v1421_v29, %v1420_v32  ;;  %v1499_v5 = vrot.slane %v1498_v36, 4  ;;  %v1651_v41 = vadd.f32 %v1650_v8, %v16966_v18 }
 0x149   :  { %v1191_v25 = vrot.slane %v1190_v46, 1  ;;  %v1345_v6 = vrot.slane %v1344_v0, 2  ;;  %v1576_v28 = vadd.f32 %v1575_v37, %v1574_v48  ;;  %v1727_v30 = vadd.f32 %v1726_v13, %v16991_v55 }
 0x14a   :  { %v1268_v52 = vadd.f32 %v1267_v10, %v1266_v20  ;;  %v1423_v34 = vrot.slane %v1422_v57, 2  ;;  %v1500_v43 = vadd.f32 %v1499_v5, %v1498_v36  ;;  %v1652_v24 = vadd.f32 %v1651_v41, %v16968_v63 }
 0x14b   :  { %v1192_v1 = vadd.f32 %v1191_v25, %v1190_v46  ;;  %v1346_v2 = vadd.f32 %v1345_v6, %v1344_v0  ;;  %v1577_v51 = vrot.slane %v1576_v28, 4  ;;  %v1728_v33 = vadd.f32 %v1727_v30, %v16992_v40  ;;  %v87_v40 = vld [vmem:[%s15661_s0 + $0x1f0] sm:$0x11] }
 0x14c   :  { %v1269_v53 = vrot.slane %v1268_v52, 1  ;;  %v1424_v32 = vadd.f32 %v1423_v34, %v1422_v57  ;;  %v1501_v29 = vrot.slane %v1500_v43, 2  ;;  %v1654_v14 = vadd.f32 %v1653_v17, %v1652_v24 }
 0x14d   :  { %v1347_v8 = vrot.slane %v1346_v2, 1  ;;  %v1578_v39 = vadd.f32 %v1577_v51, %v1576_v28  ;;  %v1729_v37 = vadd.f32 %v1728_v33, %v16969_v3  ;;  %v1731_v20 = vsel %vm534_vm0, %v16971_v7, 0.0 }
 0x14e   :  { %v1270_v13 = vadd.f32 %v1269_v53, %v1268_v52  ;;  %v1425_v5 = vrot.slane %v1424_v32, 1  ;;  %v1502_v36 = vadd.f32 %v1501_v29, %v1500_v43  ;;  %v1655_v48 = vrot.slane %v1654_v14, 4 }
 0x14f   :  { %v1348_v25 = vadd.f32 %v1347_v8, %v1346_v2  ;;  %v1579_v6 = vrot.slane %v1578_v39, 2  ;;  %v1730_v46 = vadd.f32 %v1729_v37, %v16970_v35  ;;  %v1780_v0 = vmul.f32 0.020408163, %v1192_v1 }
 0x150   :  { %v1426_v10 = vadd.f32 %v1425_v5, %v1424_v32  ;;  %v1503_v57 = vrot.slane %v1502_v36, 1  ;;  %v1656_v41 = vadd.f32 %v1655_v48, %v1654_v14  ;;  %v1786_v17 = vmul.f32 0.020408163, %v1270_v13 }
 0x151   :  { %v1580_v30 = vadd.f32 %v1579_v6, %v1578_v39  ;;  %v1732_v28 = vadd.f32 %v1731_v20, %v1730_v46  ;;  %v1792_v34 = vmul.f32 0.020408163, %v1348_v25  ;;  %v1895_v33 = vsel %vm1874_vm1, %v10094_v4, %v10091_v50  ;;  %v27_v4 = vld [vmem:[%s15661_s0 + $0x10] sm:$0xff]  ;;  %v30_v20 = vld [vmem:[%s15661_s0 + $0x28] sm:$0xff]  ;;  %v36_v6 = vld [vmem:[%s15661_s0 + $0x58] sm:$0xff] }
 0x152   :  { %v1504_v53 = vadd.f32 %v1503_v57, %v1502_v36  ;;  %v1657_v52 = vrot.slane %v1656_v41, 2  ;;  %v1798_v43 = vmul.f32 0.020408163, %v1426_v10  ;;  %v1896_v24 = vsel %vm1876_vm2, %v10100_v15, %v1895_v33  ;;  %v33_v36 = vld [vmem:[%s15661_s0 + $0x40] sm:$0xff]  ;;  %v42_v10 = vld [vmem:[%s15661_s0 + $0x88] sm:$0xff] }
 0x153   :  { %v1581_v2 = vrot.slane %v1580_v30, 1  ;;  %v1733_v51 = vrot.slane %v1732_v28, 4  ;;  %v1897_v1 = vsel %vm1878_vm3, %v10102_v44, %v1896_v24  ;;  %v1991_v14 = vsel %vm1874_vm1, %v1786_v17, %v1780_v0 }
 0x154   :  { %v1658_v39 = vadd.f32 %v1657_v52, %v1656_v41  ;;  %v1804_v32 = vmul.f32 0.020408163, %v1504_v53  ;;  %v1898_v29 = vsel %vm1880_vm4, %v10107_v49, %v1897_v1  ;;  %v1992_v50 = vsel %vm1876_vm2, %v1792_v34, %v1991_v14  ;;  %v48_v34 = vld [vmem:[%s15661_s0 + $0xb8] sm:$0xff]  ;;  %v54_v14 = vld [vmem:[%s15661_s0 + $0xe8] sm:$0xff] }
 0x155   :  { %v1582_v8 = vadd.f32 %v1581_v2, %v1580_v30  ;;  %v1734_v15 = vadd.f32 %v1733_v51, %v1732_v28  ;;  %v1899_v37 = vsel %vm1882_vm5, %v10113_v9, %v1898_v29  ;;  %v1993_v44 = vsel %vm1878_vm3, %v1798_v43, %v1992_v50  ;;  %v45_v28 = vld [vmem:[%s15661_s0 + $0xa0] sm:$0x11]  ;;  %v51_v43 = vld [vmem:[%s15661_s0 + $0xd0] sm:$0xff] }
 0x156   :  { %v1659_v13 = vrot.slane %v1658_v39, 1  ;;  %v1900_v49 = vsel %vm1884_vm6, %v10135_v61, %v1899_v37  ;;  %v1994_v5 = vsel %vm1880_vm4, %v1804_v32, %v1993_v44  ;;  %v39_v61 = vld [vmem:[%s15661_s0 + $0x70] sm:$0xff]  ;;  %v10210_v46 = vunpack.c.l.bf16 %v27_v4 }
 0x157   :  { %v1735_v48 = vrot.slane %v1734_v15, 2  ;;  %v1810_v25 = vmul.f32 0.020408163, %v1582_v8  ;;  %v10202_v9 = vsel %vm1886_vm7, %v10154_v19, %v1900_v49  ;;  %v10215_v57 = vunpack.c.h.bf16 %v27_v4  ;;  %v60_v8 = vld [vmem:[%s15661_s0 + $0x118] sm:$0xff]  ;;  %v66_v49 = vld [vmem:[%s15661_s0 + $0x148] sm:$0x11] }
 0x158   :  { %16993 = vst [vmem:[#allocation229_spill] sm:$0xff] %v10210_v46  ;;  %v1660_v0 = vadd.f32 %v1659_v13, %v1658_v39  ;;  %v10217_v41 = vunpack.c.l.bf16 %v30_v20  ;;  %v10219_v19 = vunpack.c.h.bf16 %v30_v20  ;;  %v10228_v33 = vunpack.c.l.bf16 %v33_v36  ;;  %v57_v39 = vld [vmem:[%s15661_s0 + $0x100] sm:$0xff] }
 0x159   :  { %16994 = vst [vmem:[#allocation230_spill] sm:$0xff] %v10215_v57  ;;  %v1736_v17 = vadd.f32 %v1735_v48, %v1734_v15  ;;  %v1995_v30 = vsel %vm1882_vm5, %v1810_v25, %v1994_v5  ;;  %v10230_v53 = vunpack.c.h.bf16 %v33_v36  ;;  %v10235_v24 = vunpack.c.l.bf16 %v36_v6  ;;  %v63_v15 = vld [vmem:[%s15661_s0 + $0x130] sm:$0xff]  ;;  %v69_v5 = vld [vmem:[%s15661_s0 + $0x160] sm:$0xff] }
 0x15a   :  { %16995 = vst [vmem:[#allocation231_spill] sm:$0xff] %v10217_v41  ;;  %16996 = vst [vmem:[#allocation232_spill] sm:$0xff] %v10219_v19  ;;  %v1816_v52 = vmul.f32 0.020408163, %v1660_v0  ;;  %v10237_v2 = vunpack.c.h.bf16 %v36_v6  ;;  %v10239_v51 = vunpack.c.l.bf16 %v39_v61  ;;  %v10247_v32 = vunpack.c.h.bf16 %v39_v61  ;;  %v72_v6 = vld [vmem:[%s15661_s0 + $0x178] sm:$0xff] }
 0x15b   :  { %16997 = vst [vmem:[#allocation233_spill] sm:$0xff] %v10228_v33  ;;  %16998 = vst [vmem:[#allocation234_spill] sm:$0xff] %v10230_v53  ;;  %v1737_v1 = vrot.slane %v1736_v17, 1  ;;  %v10249_v29 = vunpack.c.l.bf16 %v42_v10  ;;  %v10251_v50 = vunpack.c.h.bf16 %v42_v10  ;;  %v10260_v37 = vunpack.c.l.bf16 %v45_v28 }
 0x15c   :  { %16999 = vst [vmem:[#allocation235_spill] sm:$0xff] %v10235_v24  ;;  %17000 = vst [vmem:[#allocation236_spill] sm:$0xff] %v10237_v2  ;;  %v1996_v4 = vsel %vm1884_vm6, %v1816_v52, %v1995_v30  ;;  %v10262_v44 = vunpack.c.h.bf16 %v45_v28  ;;  %v10264_v20 = vunpack.c.l.bf16 %v48_v34  ;;  %v10272_v36 = vunpack.c.h.bf16 %v48_v34  ;;  %v75_v28 = vld [vmem:[%s15661_s0 + $0x190] sm:$0xff]  ;;  %v78_v34 = vld [vmem:[%s15661_s0 + $0x1a8] sm:$0xff] }
 0x15d   :  { %17001 = vst [vmem:[#allocation237_spill] sm:$0xff] %v10239_v51  ;;  %17002 = vst [vmem:[#allocation238_spill] sm:$0xff] %v10247_v32  ;;  %v1738_v13 = vadd.f32 %v1737_v1, %v1736_v17  ;;  %v10274_v48 = vunpack.c.l.bf16 %v51_v43  ;;  %v10276_v25 = vunpack.c.h.bf16 %v51_v43  ;;  %v10281_v61 = vunpack.c.l.bf16 %v54_v14  ;;  %v150_v51 = vld [vmem:[%s15661_s0 + $0x3e8] sm:$0x11] }
 0x15e   :  { %17003 = vst [vmem:[#allocation239_spill] sm:$0xff] %v10249_v29  ;;  %17004 = vst [vmem:[#allocation240_spill] sm:$0xff] %v10251_v50  ;;  %v10283_v0 = vunpack.c.h.bf16 %v54_v14  ;;  %v10285_v10 = vunpack.c.l.bf16 %v57_v39  ;;  %v10287_v17 = vunpack.c.h.bf16 %v57_v39  ;;  %v10295_v52 = vunpack.c.l.bf16 %v60_v8  ;;  %v81_v14 = vld [vmem:[%s15661_s0 + $0x1c0] sm:$0xff]  ;;  %v84_v39 = vld [vmem:[%s15661_s0 + $0x1d8] sm:$0xff] }
 0x15f   :  { %17005 = vst [vmem:[#allocation241_spill] sm:$0xff] %v10260_v37  ;;  %17006 = vst [vmem:[#allocation242_spill] sm:$0xff] %v10262_v44  ;;  %v1822_v30 = vmul.f32 0.020408163, %v1738_v13  ;;  %v10297_v43 = vunpack.c.h.bf16 %v60_v8  ;;  %v10299_v1 = vunpack.c.l.bf16 %v63_v15  ;;  %v10307_v13 = vunpack.c.h.bf16 %v63_v15  ;;  %v8246_v8 = vld [vmem:[%s15662_s1 + $0x200] ss:$8 sps:$4 sm:$0xff]  }
 0x160   :  { %17007 = vst [vmem:[#allocation243_spill] sm:$0xff] %v10264_v20  ;;  %17008 = vst [vmem:[#allocation244_spill] sm:$0xff] %v10272_v36  ;;  %v10309_v7 = vunpack.c.l.bf16 %v66_v49  ;;  %v10311_v3 = vunpack.c.h.bf16 %v66_v49  ;;  %v10313_v55 = vunpack.c.l.bf16 %v69_v5  ;;  %v90_v15 = vld [vmem:[%s15661_s0 + $0x208] sm:$0xff]  ;;  %v10325_v63 = vunpack.c.h.bf16 %v69_v5  ;;  %v189_v37 = vld [vmem:[%s15661_s0 + $0x520] sm:$0xff] }
 0x161   :  { %17009 = vst [vmem:[#allocation245_spill] sm:$0xff] %v10274_v48  ;;  %17010 = vst [vmem:[#allocation246_spill] sm:$0xff] %v10276_v25  ;;  %v1997_v35 = vsel %vm1886_vm7, %v1822_v30, %v1996_v4  ;;  %v10327_v49 = vunpack.c.l.bf16 %v72_v6  ;;  %v10329_v18 = vunpack.c.h.bf16 %v72_v6  ;;  %v8251_v4 = vld [vmem:[%s15662_s1 + $0x214] ss:$8 sps:$4 sm:$0xff]   ;;  %v93_v30 = vld [vmem:[%s15661_s0 + $0x220] sm:$0xff]  ;;  %v10341_v5 = vunpack.c.l.bf16 %v75_v28 }
 0x162   :  { %17011 = vst [vmem:[#allocation247_spill] sm:$0xff] %v10281_v61  ;;  %17012 = vst [vmem:[#allocation248_spill] sm:$0xff] %v10283_v0  ;;  %v2027_v47 = vpack.c.bf16 %v1997_v35, %v10202_v9  ;;  %v10343_v56 = vunpack.c.h.bf16 %v75_v28  ;;  %v10345_v6 = vunpack.c.l.bf16 %v78_v34  ;;  %v99_v35 = vld [vmem:[%s15661_s0 + $0x250] sm:$0xff]  ;;  %v102_v9 = vld [vmem:[%s15661_s0 + $0x268] sm:$0xff]  ;;  %v10353_v59 = vunpack.c.h.bf16 %v78_v34 }
 0x163   :  { %17013 = vst [vmem:[#allocation249_spill] sm:$0xff] %v10285_v10  ;;  %17014 = vst [vmem:[#allocation250_spill] sm:$0xff] %v10287_v17  ;;  %v10355_v11 = vunpack.c.l.bf16 %v81_v14  ;;  %v10357_v16 = vunpack.c.h.bf16 %v81_v14  ;;  %v10359_v31 = vunpack.c.l.bf16 %v84_v39  ;;  %v105_v28 = vld [vmem:[%s15661_s0 + $0x280] sm:$0xff]  ;;  %v10367_v21 = vunpack.c.h.bf16 %v84_v39  ;;  %v111_v14 = vld [vmem:[%s15661_s0 + $0x2b0] sm:$0xff] }
 0x164   :  { %17015 = vst [vmem:[#allocation251_spill] sm:$0xff] %v10295_v52  ;;  %17016 = vst [vmem:[#allocation252_spill] sm:$0xff] %v10297_v43  ;;  %2683 = vmatmul.mubr.bf16.vlgmr.msra.gmra.mrb[0].mxu0 %v2027_v47  ;;  %v10369_v26 = vunpack.c.l.bf16 %v87_v40  ;;  %v10371_v34 = vunpack.c.h.bf16 %v87_v40  ;;  %v10373_v22 = vunpack.c.l.bf16 %v90_v15  ;;  %v8249_v47 = vld [vmem:[%s15662_s1 + $0x210] ss:$8 sps:$4 sm:$0xff]   ;;  %v114_v39 = vld [vmem:[%s15661_s0 + $0x2c8] sm:$0xff]  ;;  %v10384_v12 = vunpack.c.h.bf16 %v90_v15 }
 0x165   :  { %17017 = vst [vmem:[#allocation253_spill] sm:$0xff] %v10299_v1  ;;  %17018 = vst [vmem:[#allocation254_spill] sm:$0xff] %v10307_v13  ;;  %2694 = vmatpush1.bf16.msra.mxu0 %v8246_v8  ;;  %v10386_v23 = vunpack.c.l.bf16 %v93_v30  ;;  %v10388_v40 = vunpack.c.h.bf16 %v93_v30  ;;  %v10390_v42 = vunpack.c.l.bf16 %v96_v58  ;;  %v8254_v8 = vld [vmem:[%s15662_s1 + $0x224] ss:$8 sps:$4 sm:$0xff]   ;;  %v120_v15 = vld [vmem:[%s15661_s0 + $0x2f8] sm:$0xff]  ;;  %v10401_v60 = vunpack.c.h.bf16 %v96_v58 }
 0x166   :  { %17019 = vst [vmem:[#allocation255_spill] sm:$0xff] %v10309_v7  ;;  %17020 = vst [vmem:[#allocation256_spill] sm:$0xff] %v10311_v3  ;;  %2695 = vmatprep.subr.bf16.mxu0 %v8251_v4  ;;  %v10403_v27 = vunpack.c.l.bf16 %v99_v35  ;;  %v10405_v30 = vunpack.c.h.bf16 %v99_v35  ;;  %v10407_v45 = vunpack.c.l.bf16 %v102_v9  ;;  %v123_v4 = vld [vmem:[%s15661_s0 + $0x310] sm:$0xff]  ;;  %v10417_v1 = vunpack.c.l.bf16 %v105_v28  ;;  %v129_v35 = vld [vmem:[%s15661_s0 + $0x340] sm:$0x11] }
 0x167   :  { %17021 = vst [vmem:[#allocation257_spill] sm:$0xff] %v10313_v55  ;;  %17022 = vst [vmem:[#allocation258_spill] sm:$0xff] %v10325_v63  ;;  %v10419_v58 = vunpack.c.h.bf16 %v105_v28  ;;  %v10429_v52 = vunpack.c.h.bf16 %v108_v62  ;;  %v10435_v29 = vunpack.c.l.bf16 %v114_v39  ;;  %v8252_v28 = vld [vmem:[%s15662_s1 + $0x220] ss:$8 sps:$4 sm:$0xff]   ;;  %v10448_v10 = vunpack.c.l.bf16 %v117_v38 }
 0x168   :  { %17023 = vst [vmem:[#allocation259_spill] sm:$0xff] %v10327_v49  ;;  %17024 = vst [vmem:[#allocation260_spill] sm:$0xff] %v10329_v18  ;;  %v174_v55 = vld [vmem:[%s15661_s0 + $0x4a8] sm:$0xff]  ;;  %v10539_v49 = vunpack.c.h.bf16 %v150_v51 }
 0x169   :  { %17025 = vst [vmem:[#allocation261_spill] sm:$0xff] %v10341_v5  ;;  %17026 = vst [vmem:[#allocation262_spill] sm:$0xff] %v10343_v56  ;;  %2696 = vmatpush1.bf16.msra.mxu0 %v8249_v47  ;;  %v8257_v47 = vld [vmem:[%s15662_s1 + $0x234] ss:$8 sps:$4 sm:$0xff]   ;;  %v10479_v5 = vunpack.c.l.bf16 %v129_v35 }
 0x16a   :  { %17027 = vst [vmem:[#allocation263_spill] sm:$0xff] %v10345_v6  ;;  %17028 = vst [vmem:[#allocation264_spill] sm:$0xff] %v10353_v59  ;;  %v10446_v6 = vunpack.c.h.bf16 %v114_v39  ;;  %2697 = vmatprep.subr.bf16.mxu0 %v8254_v8  ;;  %v144_v39 = vld [vmem:[%s15661_s0 + $0x3b8] sm:$0xff]  ;;  %v147_v8 = vld [vmem:[%s15661_s0 + $0x3d0] sm:$0xff] }
 0x16b   :  { %17029 = vst [vmem:[#allocation265_spill] sm:$0xff] %v10355_v11  ;;  %17030 = vst [vmem:[#allocation266_spill] sm:$0xff] %v10357_v16  ;;  %v10421_v11 = vunpack.c.l.bf16 %v108_v62  ;;  %v138_v62 = vld [vmem:[%s15661_s0 + $0x388] sm:$0xff]  ;;  %v10525_v24 = vunpack.c.h.bf16 %v144_v39 }
 0x16c   :  { %17031 = vst [vmem:[#allocation267_spill] sm:$0xff] %v10359_v31  ;;  %17032 = vst [vmem:[#allocation268_spill] sm:$0xff] %v10367_v21  ;;  %v10415_v31 = vunpack.c.h.bf16 %v102_v9  ;;  %v10433_v9 = vunpack.c.h.bf16 %v111_v14 }
 0x16d   :  { %17033 = vst [vmem:[#allocation269_spill] sm:$0xff] %v10369_v26  ;;  %17034 = vst [vmem:[#allocation270_spill] sm:$0xff] %v10371_v34  ;;  %2698 = vmatpush1.bf16.msra.mxu0 %v8252_v28  ;;  %v8260_v28 = vld [vmem:[%s15662_s1 + $0x244] ss:$8 sps:$4 sm:$0xff]  }
 0x16e   :  { %17035 = vst [vmem:[#allocation271_spill] sm:$0xff] %v10373_v22  ;;  %17036 = vst [vmem:[#allocation272_spill] sm:$0xff] %v10384_v12  ;;  %2699 = vmatprep.subr.bf16.mxu0 %v8257_v47  ;;  %v165_v26 = vld [vmem:[%s15661_s0 + $0x460] sm:$0xff]  ;;  %v171_v47 = vld [vmem:[%s15661_s0 + $0x490] sm:$0x11] }
 0x16f   :  { %17037 = vst [vmem:[#allocation273_spill] sm:$0xff] %v10386_v23  ;;  %17038 = vst [vmem:[#allocation274_spill] sm:$0xff] %v10388_v40  ;;  %v10497_v23 = vunpack.c.l.bf16 %v138_v62 }
 0x170   :  { %17039 = vst [vmem:[#allocation275_spill] sm:$0xff] %v10390_v42  ;;  %17040 = vst [vmem:[#allocation276_spill] sm:$0xff] %v10401_v60  ;;  %v10463_v42 = vunpack.c.h.bf16 %v120_v15 }
 0x171   :  { %17041 = vst [vmem:[#allocation277_spill] sm:$0xff] %v10403_v27  ;;  %17042 = vst [vmem:[#allocation278_spill] sm:$0xff] %v10405_v30  ;;  %v10431_v27 = vunpack.c.l.bf16 %v111_v14  ;;  %v10450_v14 = vunpack.c.h.bf16 %v117_v38  ;;  %v10467_v38 = vunpack.c.h.bf16 %v123_v4 }
 0x172   :  { %17043 = vst [vmem:[#allocation279_spill] sm:$0xff] %v10407_v45  ;;  %17044 = vst [vmem:[#allocation280_spill] sm:$0xff] %v10415_v31  ;;  %v132_v45 = vld [vmem:[%s15661_s0 + $0x358] sm:$0xff] }
 0x173   :  { %17045 = vst [vmem:[#allocation281_spill] sm:$0xff] %v10417_v1  ;;  %17046 = vst [vmem:[#allocation282_spill] sm:$0xff] %v10419_v58  ;;  %v135_v1 = vld [vmem:[%s15661_s0 + $0x370] sm:$0xff]  ;;  %v10483_v61 = vunpack.c.l.bf16 %v132_v45 }
 0x174   :  { %17047 = vst [vmem:[#allocation283_spill] sm:$0xff] %v10421_v11  ;;  %17048 = vst [vmem:[#allocation284_spill] sm:$0xff] %v10429_v52  ;;  %v10477_v11 = vunpack.c.h.bf16 %v126_v54  ;;  %v10493_v22 = vunpack.c.l.bf16 %v135_v1 }
 0x175   :  { %17049 = vst [vmem:[#allocation285_spill] sm:$0xff] %v10431_v27  ;;  %17050 = vst [vmem:[#allocation286_spill] sm:$0xff] %v10433_v9  ;;  %v10452_v27 = vunpack.c.l.bf16 %v120_v15  ;;  %v10481_v15 = vunpack.c.h.bf16 %v129_v35  ;;  %v8255_v35 = vld [vmem:[%s15662_s1 + $0x230] ss:$8 sps:$4 sm:$0xff]  }
 0x176   :  { %17051 = vst [vmem:[#allocation287_spill] sm:$0xff] %v10435_v29  ;;  %17052 = vst [vmem:[#allocation288_spill] sm:$0xff] %v10446_v6  ;;  %v141_v29 = vld [vmem:[%s15661_s0 + $0x3a0] sm:$0xff]  ;;  %2700 = vmatpush1.bf16.msra.mxu0 %v8255_v35  ;;  %v8263_v35 = vld [vmem:[%s15662_s1 + $0x254] ss:$8 sps:$4 sm:$0xff]  }
 0x177   :  { %17053 = vst [vmem:[#allocation289_spill] sm:$0xff] %v10448_v10  ;;  %17054 = vst [vmem:[#allocation290_spill] sm:$0xff] %v10450_v14  ;;  %v10465_v10 = vunpack.c.l.bf16 %v123_v4  ;;  %v153_v4 = vld [vmem:[%s15661_s0 + $0x400] sm:$0xff]  ;;  %2701 = vmatprep.subr.bf16.mxu0 %v8260_v28  ;;  %v10595_v28 = vunpack.c.l.bf16 %v174_v55 }
 0x178   :  { %17055 = vst [vmem:[#allocation291_spill] sm:$0xff] %v10452_v27  ;;  %17056 = vst [vmem:[#allocation292_spill] sm:$0xff] %v10463_v42  ;;  %v10469_v27 = vunpack.c.l.bf16 %v126_v54  ;;  %v10495_v54 = vunpack.c.h.bf16 %v135_v1  ;;  %v10512_v1 = vunpack.c.h.bf16 %v141_v29  ;;  %v10541_v7 = vunpack.c.l.bf16 %v153_v4 }
 0x179   :  { %17057 = vst [vmem:[#allocation293_spill] sm:$0xff] %v10465_v10  ;;  %17058 = vst [vmem:[#allocation294_spill] sm:$0xff] %v10467_v38  ;;  %v10491_v10 = vunpack.c.h.bf16 %v132_v45  ;;  %v162_v45 = vld [vmem:[%s15661_s0 + $0x448] sm:$0xff] }
 0x17a   :  { %17059 = vst [vmem:[#allocation295_spill] sm:$0xff] %v10469_v27  ;;  %17060 = vst [vmem:[#allocation296_spill] sm:$0xff] %v10477_v11  ;;  %v156_v27 = vld [vmem:[%s15661_s0 + $0x418] sm:$0xff]  ;;  %v10559_v33 = vunpack.c.l.bf16 %v162_v45 }
 0x17b   :  { %17061 = vst [vmem:[#allocation297_spill] sm:$0xff] %v10479_v5  ;;  %17062 = vst [vmem:[#allocation298_spill] sm:$0xff] %v10481_v15  ;;  %v10508_v5 = vunpack.c.h.bf16 %v138_v62  ;;  %v168_v62 = vld [vmem:[%s15661_s0 + $0x478] sm:$0xff]  ;;  %v10545_v20 = vunpack.c.l.bf16 %v156_v27 }
 0x17c   :  { %17063 = vst [vmem:[#allocation299_spill] sm:$0xff] %v10483_v61  ;;  %17064 = vst [vmem:[#allocation300_spill] sm:$0xff] %v10491_v10  ;;  %v159_v61 = vld [vmem:[%s15661_s0 + $0x430] sm:$0xff]  ;;  %v10589_v46 = vunpack.c.h.bf16 %v168_v62  ;;  %v8294_v11 = vld [vmem:[%s15663_s2 + $0x4] ss:$24 sps:$4 sm:$0xff]  }
 0x17d   :  { %17065 = vst [vmem:[#allocation301_spill] sm:$0xff] %v10493_v22  ;;  %17066 = vst [vmem:[#allocation302_spill] sm:$0xff] %v10495_v54  ;;  %v10510_v22 = vunpack.c.l.bf16 %v141_v29  ;;  %v10529_v29 = vunpack.c.h.bf16 %v147_v8  ;;  %v10555_v48 = vunpack.c.l.bf16 %v159_v61  ;;  %3178 = vmatprep.subr.bf16.mxu1 %v8294_v11  ;;  %v751_v11 = vmax.f32 %v10325_v63, %v10329_v18 }
 0x17e   :  { %17067 = vst [vmem:[#allocation303_spill] sm:$0xff] %v10497_v23  ;;  %17068 = vst [vmem:[#allocation304_spill] sm:$0xff] %v10508_v5  ;;  %v10514_v23 = vunpack.c.l.bf16 %v144_v39  ;;  %v10543_v39 = vunpack.c.h.bf16 %v153_v4  ;;  %v8258_v4 = vld [vmem:[%s15662_s1 + $0x240] ss:$8 sps:$4 sm:$0xff]   ;;  %v907_v18 = vmax.f32 %v10433_v9, %v10446_v6  ;;  %v990_v6 = vsel %vm534_vm0, %v10539_v49, -inf }
 0x17f   :  { %17069 = vst [vmem:[#allocation305_spill] sm:$0xff] %v10510_v22  ;;  %17070 = vst [vmem:[#allocation306_spill] sm:$0xff] %v10512_v1  ;;  %v10527_v22 = vunpack.c.l.bf16 %v147_v8  ;;  %v177_v8 = vld [vmem:[%s15661_s0 + $0x4c0] sm:$0xff]  ;;  %2702 = vmatpush1.bf16.msra.mxu0 %v8258_v4  ;;  %v595_v4 = vmax.f32 %v10215_v57, %v10219_v19 }
 0x180   :  { %17071 = vst [vmem:[#allocation307_spill] sm:$0xff] %v10514_v23  ;;  %17072 = vst [vmem:[#allocation308_spill] sm:$0xff] %v10525_v24  ;;  %v10531_v23 = vunpack.c.l.bf16 %v150_v51  ;;  %v10557_v51 = vunpack.c.h.bf16 %v159_v61  ;;  %v10574_v61 = vunpack.c.h.bf16 %v165_v26  ;;  %v10599_v41 = vunpack.c.l.bf16 %v177_v8  ;;  %2703 = vmatprep.subr.bf16.mxu0 %v8263_v35 }
 0x181   :  { %17073 = vst [vmem:[#allocation309_spill] sm:$0xff] %v10527_v22  ;;  %17074 = vst [vmem:[#allocation310_spill] sm:$0xff] %v10529_v29  ;;  %v180_v22 = vld [vmem:[%s15661_s0 + $0x4d8] sm:$0xff]  ;;  %v10601_v29 = vunpack.c.h.bf16 %v177_v8  ;;  %v10629_v24 = vunpack.c.h.bf16 %v189_v37  ;;  %v756_v35 = vsel %vm534_vm0, %v10371_v34, -inf  ;;  %v912_v34 = vsel %vm534_vm0, %v10481_v15, -inf }
 0x182   :  { %17075 = vst [vmem:[#allocation311_spill] sm:$0xff] %v10531_v23  ;;  %17076 = vst [vmem:[#allocation312_spill] sm:$0xff] %v10539_v49  ;;  %v10553_v23 = vunpack.c.h.bf16 %v156_v27  ;;  %v186_v27 = vld [vmem:[%s15661_s0 + $0x508] sm:$0xff]  ;;  %v8269_v15 = vld [vmem:[%s15662_s1 + $0x274] ss:$8 sps:$4 sm:$0xff]  }
 0x183   :  { %17077 = vst [vmem:[#allocation313_spill] sm:$0xff] %v10541_v7  ;;  %17078 = vst [vmem:[#allocation314_spill] sm:$0xff] %v10543_v39  ;;  %v183_v7 = vld [vmem:[%s15661_s0 + $0x4f0] sm:$0xff] }
 0x184   :  { %17079 = vst [vmem:[#allocation315_spill] sm:$0xff] %v10545_v20  ;;  %17080 = vst [vmem:[#allocation316_spill] sm:$0xff] %v10553_v23  ;;  %v10570_v20 = vunpack.c.h.bf16 %v162_v45  ;;  %v10587_v45 = vld [vmem:[%s15661_s0 + $0x538] sm:$0x11]  ;;  %v10618_v8 = vunpack.c.h.bf16 %v183_v7 }
 0x185   :  { %17081 = vst [vmem:[#allocation317_spill] sm:$0xff] %v10555_v48  ;;  %17082 = vst [vmem:[#allocation318_spill] sm:$0xff] %v10557_v51  ;;  %v10572_v48 = vunpack.c.l.bf16 %v165_v26  ;;  %v10591_v26 = vunpack.c.l.bf16 %v171_v47 }
 0x186   :  { %17083 = vst [vmem:[#allocation319_spill] sm:$0xff] %v10559_v33  ;;  %17084 = vst [vmem:[#allocation320_spill] sm:$0xff] %v10570_v20  ;;  %v10576_v33 = vunpack.c.l.bf16 %v168_v62  ;;  %v8296_v62 = vld [vmem:[%s15663_s2] ss:$24 sps:$4 sm:$0xff]  }
 0x187   :  { %17085 = vst [vmem:[#allocation321_spill] sm:$0xff] %v10572_v48  ;;  %17086 = vst [vmem:[#allocation322_spill] sm:$0xff] %v10574_v61  ;;  %v10593_v48 = vunpack.c.h.bf16 %v171_v47  ;;  %v10603_v61 = vunpack.c.l.bf16 %v180_v22  ;;  %v8297_v47 = vld [vmem:[%s15663_s2 + $0x34] ss:$24 sps:$4 sm:$0xff]   ;;  %3179 = vmatpush1.bf16.msra.mxu1 %v8296_v62 }
 0x188   :  { %17087 = vst [vmem:[#allocation323_spill] sm:$0xff] %v10576_v33  ;;  %17088 = vst [vmem:[#allocation324_spill] sm:$0xff] %v10587_v45  ;;  %v10597_v33 = vunpack.c.h.bf16 %v174_v55  ;;  %v10614_v55 = vunpack.c.h.bf16 %v180_v22  ;;  %v10632_v22 = vunpack.c.h.bf16 %v10587_v45  ;;  %v834_v45 = vsel %vm534_vm0, %v10429_v52, -inf  ;;  %3180 = vmatprep.subr.bf16.mxu1 %v8297_v47  ;;  %v8264_v47 = vld [vmem:[%s15662_s1 + $0x260] ss:$8 sps:$4 sm:$0xff]  }
 0x189   :  { %17089 = vst [vmem:[#allocation325_spill] sm:$0xff] %v10589_v46  ;;  %17090 = vst [vmem:[#allocation326_spill] sm:$0xff] %v10591_v26  ;;  %v10625_v26 = vunpack.c.h.bf16 %v186_v27  ;;  %v10627_v46 = vunpack.c.l.bf16 %v189_v37  ;;  %v678_v37 = vsel %vm534_vm0, %v10311_v3, -inf  ;;  %v596_v3 = vmax.f32 %v595_v4, %v10230_v53 }
 0x18a   :  { %17091 = vst [vmem:[#allocation327_spill] sm:$0xff] %v10593_v48  ;;  %17092 = vst [vmem:[#allocation328_spill] sm:$0xff] %v10595_v28  ;;  %v10616_v28 = vunpack.c.l.bf16 %v183_v7  ;;  %v8266_v7 = vld [vmem:[%s15662_s1 + $0x264] ss:$8 sps:$4 sm:$0xff]   ;;  %v752_v52 = vmax.f32 %v751_v11, %v10343_v56 }
 0x18b   :  { %17093 = vst [vmem:[#allocation329_spill] sm:$0xff] %v10597_v33  ;;  %17094 = vst [vmem:[#allocation330_spill] sm:$0xff] %v10599_v41  ;;  %v10620_v41 = vunpack.c.l.bf16 %v186_v27  ;;  %v600_v27 = vsel %vm534_vm0, %v10262_v44, -inf }
 0x18c   :  { %17095 = vst [vmem:[#allocation331_spill] sm:$0xff] %v10601_v29  ;;  %17096 = vst [vmem:[#allocation332_spill] sm:$0xff] %v10603_v61  ;;  %v8261_v61 = vld [vmem:[%s15662_s1 + $0x250] ss:$8 sps:$4 sm:$0xff]   ;;  %v753_v11 = vmax.f32 %v752_v52, %v10353_v59 }
 0x18d   :  { %17097 = vst [vmem:[#allocation333_spill] sm:$0xff] %v10614_v55  ;;  %17098 = vst [vmem:[#allocation334_spill] sm:$0xff] %v10616_v28  ;;  %v8299_v28 = vld [vmem:[%s15663_s2 + $0x30] ss:$24 sps:$4 sm:$0xff]   ;;  %2704 = vmatpush1.bf16.msra.mxu0 %v8261_v61  ;;  %v597_v61 = vmax.f32 %v596_v3, %v10237_v2  ;;  %v8302_v3 = vld [vmem:[%s15663_s2 + $0x60] ss:$24 sps:$4 sm:$0xff]  }
 0x18e   :  { %17099 = vst [vmem:[#allocation335_spill] sm:$0xff] %v10618_v8  ;;  %17100 = vst [vmem:[#allocation336_spill] sm:$0xff] %v10620_v41  ;;  %v829_v41 = vmax.f32 %v10384_v12, %v10388_v40  ;;  %v8300_v40 = vld [vmem:[%s15663_s2 + $0x64] ss:$24 sps:$4 sm:$0xff]   ;;  %2705 = vmatprep.subr.bf16.mxu0 %v8266_v7  ;;  %v908_v12 = vmax.f32 %v907_v18, %v10450_v14  ;;  %v1068_v7 = vsel %vm534_vm0, %v10593_v48, -inf  ;;  %3181 = vmatpush1.bf16.msra.mxu1 %v8299_v28 }
 0x18f   :  { %17101 = vst [vmem:[#allocation337_spill] sm:$0xff] %v10625_v26  ;;  %17102 = vst [vmem:[#allocation338_spill] sm:$0xff] %v10627_v46  ;;  %v673_v46 = vmax.f32 %v10272_v36, %v10276_v25  ;;  %3182 = vmatprep.subr.bf16.mxu1 %v8300_v40  ;;  %v8267_v28 = vld [vmem:[%s15662_s1 + $0x270] ss:$8 sps:$4 sm:$0xff]   ;;  %v8272_v40 = vld [vmem:[%s15662_s1 + $0x284] ss:$8 sps:$4 sm:$0xff]  }
 0x190   :  { %17103 = vst [vmem:[#allocation339_spill] sm:$0xff] %v10629_v24  ;;  %17104 = vst [vmem:[#allocation340_spill] sm:$0xff] %v10632_v22  ;;  %v830_v4 = vmax.f32 %v829_v41, %v10401_v60  ;;  %v1063_v41 = vmax.f32 %v10543_v39, %v10553_v23  ;;  %v909_v23 = vmax.f32 %v908_v12, %v10463_v42  ;;  %v17105_v48 = vld [vmem:[#allocation308_spill] sm:$0xff] }
 0x191   :  { %v674_v62 = vmax.f32 %v673_v46, %v10283_v0  ;;  %v985_v46 = vmax.f32 %v10491_v10, %v10495_v54  ;;  %2706 = vmatpush1.bf16.msra.mxu0 %v8264_v47  ;;  %v1141_v12 = vmax.f32 %v10597_v33, %v10601_v29  ;;  %v8305_v29 = vld [vmem:[%s15663_s2 + $0x90] ss:$24 sps:$4 sm:$0xff]  }
 0x192   :  { %v831_v54 = vmax.f32 %v830_v4, %v10405_v30  ;;  %v1064_v52 = vmax.f32 %v1063_v41, %v10557_v51  ;;  %v8303_v4 = vld [vmem:[%s15663_s2 + $0x94] ss:$24 sps:$4 sm:$0xff]   ;;  %2707 = vmatprep.subr.bf16.mxu0 %v8269_v15  ;;  %v910_v51 = vmax.f32 %v909_v23, %v10467_v38  ;;  %3183 = vmatpush1.bf16.msra.mxu1 %v8302_v3  ;;  %v8270_v3 = vld [vmem:[%s15662_s1 + $0x280] ss:$8 sps:$4 sm:$0xff]  }
 0x193   :  { %v675_v9 = vmax.f32 %v674_v62, %v10287_v17  ;;  %v986_v49 = vmax.f32 %v985_v46, %v10508_v5  ;;  %v598_v62 = vmax.f32 %v597_v61, %v10247_v32  ;;  %v754_v46 = vmax.f32 %v753_v11, %v10357_v16  ;;  %v17107_v23 = vld [vmem:[#allocation322_spill] sm:$0xff]  ;;  %3184 = vmatprep.subr.bf16.mxu1 %v8303_v4 }
 0x194   :  { %v832_v61 = vmax.f32 %v831_v54, %v10415_v31  ;;  %v1065_v11 = vmax.f32 %v1064_v52, %v10570_v20  ;;  %v1142_v15 = vmax.f32 %v1141_v12, %v10614_v55  ;;  %v8306_v52 = vld [vmem:[%s15663_s2 + $0xc4] ss:$24 sps:$4 sm:$0xff]  }
 0x195   :  { %v676_v18 = vmax.f32 %v675_v9, %v10297_v43  ;;  %v987_v9 = vmax.f32 %v986_v49, %v10512_v1  ;;  %v599_v47 = vmax.f32 %v598_v62, %v10251_v50  ;;  %v755_v54 = vmax.f32 %v754_v46, %v10367_v21  ;;  %2708 = vmatpush1.bf16.msra.mxu0 %v8267_v28 }
 0x196   :  { %v833_v49 = vmax.f32 %v832_v61, %v10419_v58  ;;  %v1066_v38 = vmax.f32 %v1065_v11, %v17107_v23  ;;  %2709 = vmatprep.subr.bf16.mxu0 %v8272_v40  ;;  %3185 = vmatpush1.bf16.msra.mxu1 %v8305_v29 }
 0x197   :  { %v677_v41 = vmax.f32 %v676_v18, %v10307_v13  ;;  %v988_v1 = vmax.f32 %v987_v9, %v17105_v48  ;;  %v601_v62 = vmax.f32 %v599_v47, %v600_v27  ;;  %v17106_v18 = vld [vmem:[#allocation296_spill] sm:$0xff]  ;;  %v757_v46 = vmax.f32 %v755_v54, %v756_v35  ;;  %v17108_v9 = vld [vmem:[#allocation310_spill] sm:$0xff]  ;;  %3186 = vmatprep.subr.bf16.mxu1 %v8306_v52 }
 0x198   :  { %v911_v31 = vmax.f32 %v910_v51, %v17106_v18  ;;  %v835_v61 = vmax.f32 %v833_v49, %v834_v45  ;;  %v1143_v27 = vmax.f32 %v1142_v15, %v10618_v8  ;;  %v8275_v51 = vld [vmem:[%s15662_s1 + $0x294] ss:$8 sps:$4 sm:$0xff]  }
 0x199   :  { %v679_v33 = vmax.f32 %v677_v41, %v678_v37  ;;  %v989_v12 = vmax.f32 %v988_v1, %v17108_v9  ;;  %v602_v37 = vrot.slane %v601_v62, 4  ;;  %v17109_v41 = vld [vmem:[#allocation325_spill] sm:$0xff]  ;;  %v758_v11 = vrot.slane %v757_v46, 4  ;;  %v8308_v1 = vld [vmem:[%s15663_s2 + $0xc0] ss:$24 sps:$4 sm:$0xff]   ;;  %2710 = vmatpush1.bf16.msra.mxu0 %v8270_v3 }
 0x19a   :  { %v913_v47 = vmax.f32 %v911_v31, %v912_v34  ;;  %v1067_v28 = vmax.f32 %v1066_v38, %v17109_v41  ;;  %v836_v23 = vrot.slane %v835_v61, 4  ;;  %v1144_v35 = vmax.f32 %v1143_v27, %v10625_v26  ;;  %v8309_v31 = vld [vmem:[%s15663_s2 + $0xf4] ss:$24 sps:$4 sm:$0xff]   ;;  %2711 = vmatprep.subr.bf16.mxu0 %v8275_v51  ;;  %3187 = vmatpush1.bf16.msra.mxu1 %v8308_v1 }
 0x19b   :  { %v680_v4 = vrot.slane %v679_v33, 4  ;;  %v991_v55 = vmax.f32 %v989_v12, %v990_v6  ;;  %v603_v45 = vmax.f32 %v601_v62, %v602_v37  ;;  %v8273_v6 = vld [vmem:[%s15662_s1 + $0x290] ss:$8 sps:$4 sm:$0xff]   ;;  %v759_v34 = vmax.f32 %v757_v46, %v758_v11  ;;  %3188 = vmatprep.subr.bf16.mxu1 %v8309_v31 }
 0x19c   :  { %v914_v54 = vrot.slane %v913_v47, 4  ;;  %v1069_v49 = vmax.f32 %v1067_v28, %v1068_v7  ;;  %v837_v38 = vmax.f32 %v835_v61, %v836_v23  ;;  %v1145_v15 = vmax.f32 %v1144_v35, %v10629_v24  ;;  %v8311_v23 = vld [vmem:[%s15663_s2 + $0xf0] ss:$24 sps:$4 sm:$0xff]  }
 0x19d   :  { %v681_v40 = vmax.f32 %v679_v33, %v680_v4  ;;  %v992_v29 = vrot.slane %v991_v55, 4  ;;  %v8278_v33 = vld [vmem:[%s15662_s1 + $0x2a4] ss:$8 sps:$4 sm:$0xff]   ;;  %v604_v7 = vrot.slane %v603_v45, 2  ;;  %v760_v27 = vrot.slane %v759_v34, 2  ;;  %2712 = vmatpush1.bf16.msra.mxu0 %v8273_v6 }
 0x19e   :  { %v915_v52 = vmax.f32 %v913_v47, %v914_v54  ;;  %v1070_v12 = vrot.slane %v1069_v49, 4  ;;  %v838_v3 = vrot.slane %v837_v38, 2  ;;  %v1146_v4 = vsel %vm534_vm0, %v10632_v22, -inf  ;;  %v8312_v47 = vld [vmem:[%s15663_s2 + $0x124] ss:$24 sps:$4 sm:$0xff]   ;;  %2713 = vmatprep.subr.bf16.mxu0 %v8278_v33  ;;  %3189 = vmatpush1.bf16.msra.mxu1 %v8311_v23 }
 0x19f   :  { %v682_v62 = vrot.slane %v681_v40, 2  ;;  %v993_v37 = vmax.f32 %v991_v55, %v992_v29  ;;  %v605_v46 = vmax.f32 %v603_v45, %v604_v7  ;;  %v8276_v55 = vld [vmem:[%s15662_s1 + $0x2a0] ss:$8 sps:$4 sm:$0xff]   ;;  %v761_v11 = vmax.f32 %v759_v34, %v760_v27  ;;  %v8281_v45 = vld [vmem:[%s15662_s1 + $0x2b4] ss:$8 sps:$4 sm:$0xff]   ;;  %3190 = vmatprep.subr.bf16.mxu1 %v8312_v47 }
 0x1a0   :  { %v916_v51 = vrot.slane %v915_v52, 2  ;;  %v1071_v28 = vmax.f32 %v1069_v49, %v1070_v12  ;;  %v839_v35 = vmax.f32 %v837_v38, %v838_v3  ;;  %v1147_v54 = vmax.f32 %v1145_v15, %v1146_v4  ;;  %v8314_v34 = vld [vmem:[%s15663_s2 + $0x120] ss:$24 sps:$4 sm:$0xff]  }
 0x1a1   :  { %v683_v61 = vmax.f32 %v681_v40, %v682_v62  ;;  %v994_v1 = vrot.slane %v993_v37, 2  ;;  %v606_v40 = vrot.slane %v605_v46, 1  ;;  %v762_v7 = vrot.slane %v761_v11, 1  ;;  %2714 = vmatpush1.bf16.msra.mxu0 %v8276_v55  ;;  %v8279_v3 = vld [vmem:[%s15662_s1 + $0x2b0] ss:$8 sps:$4 sm:$0xff]  }
 0x1a2   :  { %v917_v31 = vmax.f32 %v915_v52, %v916_v51  ;;  %v1072_v29 = vrot.slane %v1071_v28, 2  ;;  %v840_v62 = vrot.slane %v839_v35, 1  ;;  %v1148_v12 = vrot.slane %v1147_v54, 4  ;;  %v8315_v52 = vld [vmem:[%s15663_s2 + $0x154] ss:$24 sps:$4 sm:$0xff]   ;;  %2715 = vmatprep.subr.bf16.mxu0 %v8281_v45  ;;  %3191 = vmatpush1.bf16.msra.mxu1 %v8314_v34 }
 0x1a3   :  { %v684_v49 = vrot.slane %v683_v61, 1  ;;  %v995_v6 = vmax.f32 %v993_v37, %v994_v1  ;;  %v10764_v38 = vmax.f32 %v605_v46, %v606_v40  ;;  %v10774_v37 = vmax.f32 %v761_v11, %v762_v7  ;;  %v8317_v40 = vld [vmem:[%s15663_s2 + $0x150] ss:$24 sps:$4 sm:$0xff]   ;;  %3192 = vmatprep.subr.bf16.mxu1 %v8315_v52  ;;  %v8287_v52 = vld [vmem:[%s15662_s1 + $0x2d4] ss:$8 sps:$4 sm:$0xff]  }
 0x1a4   :  { %v918_v33 = vrot.slane %v917_v31, 1  ;;  %v1073_v27 = vmax.f32 %v1071_v28, %v1072_v29  ;;  %v10776_v4 = vmax.f32 %v839_v35, %v840_v62  ;;  %v1149_v46 = vmax.f32 %v1147_v54, %v1148_v12  ;;  %v17110_v54 = vld [vmem:[#allocation256_spill] sm:$0xff]  ;;  %v17112_v62 = vld [vmem:[#allocation270_spill] sm:$0xff] }
 0x1a5   :  { %v10766_v15 = vmax.f32 %v683_v61, %v684_v49  ;;  %v996_v23 = vrot.slane %v995_v6, 1  ;;  %v8284_v61 = vld [vmem:[%s15662_s1 + $0x2c4] ss:$8 sps:$4 sm:$0xff]   ;;  %v1219_v47 = vadd.f32 %v10219_v19, %v10215_v57  ;;  %v1224_v55 = vsel %vm534_vm0, %v10262_v44, 0.0  ;;  %2716 = vmatpush1.bf16.msra.mxu0 %v8279_v3  ;;  %v8282_v34 = vld [vmem:[%s15662_s1 + $0x2c0] ss:$8 sps:$4 sm:$0xff]  }
 0x1a6   :  { %v10781_v51 = vmax.f32 %v917_v31, %v918_v33  ;;  %v1074_v28 = vrot.slane %v1073_v27, 1  ;;  %v1150_v35 = vrot.slane %v1149_v46, 2  ;;  %v1297_v1 = vadd.f32 %v10276_v25, %v10272_v36  ;;  %v17111_v29 = vld [vmem:[#allocation260_spill] sm:$0xff]  ;;  %2717 = vmatprep.subr.bf16.mxu0 %v8284_v61  ;;  %v17116_v36 = vld [vmem:[#allocation286_spill] sm:$0xff]  ;;  %3193 = vmatpush1.bf16.msra.mxu1 %v8317_v40 }
 0x1a7   :  { %v10787_v11 = vmax.f32 %v995_v6, %v996_v23  ;;  %v1302_v45 = vsel %vm534_vm0, %v17110_v54, 0.0  ;;  %v1220_v31 = vadd.f32 %v1219_v47, %v10230_v53  ;;  %v1375_v7 = vadd.f32 %v17111_v29, %v10325_v63  ;;  %v8318_v12 = vld [vmem:[%s15663_s2 + $0x184] ss:$24 sps:$4 sm:$0xff]   ;;  %v17119_v61 = vld [vmem:[#allocation302_spill] sm:$0xff]  ;;  %v17167_v29 = vld [vmem:[#allocation305_spill] sm:$0xff] }
 0x1a8   :  { %v10796_v49 = vmax.f32 %v1073_v27, %v1074_v28  ;;  %v1380_v6 = vsel %vm534_vm0, %v17112_v62, 0.0  ;;  %v1151_v33 = vmax.f32 %v1149_v46, %v1150_v35  ;;  %v1298_v27 = vadd.f32 %v1297_v1, %v10283_v0  ;;  %v17113_v23 = vld [vmem:[#allocation272_spill] sm:$0xff]  ;;  %v17114_v28 = vld [vmem:[#allocation274_spill] sm:$0xff]  ;;  %3194 = vmatprep.subr.bf16.mxu1 %v8318_v12  ;;  %v17163_v63 = vld [vmem:[#allocation279_spill] sm:$0xff] }
 0x1a9   :  { %v1453_v47 = vadd.f32 %v17114_v28, %v17113_v23  ;;  %v17115_v54 = vld [vmem:[#allocation284_spill] sm:$0xff]  ;;  %v1221_v3 = vadd.f32 %v1220_v31, %v10237_v2  ;;  %v1376_v62 = vadd.f32 %v1375_v7, %v10343_v56  ;;  %v17118_v35 = vld [vmem:[#allocation298_spill] sm:$0xff]  ;;  %v1609_v28 = vadd.f32 %v17119_v61, %v10491_v10  ;;  %2718 = vmatpush1.bf16.msra.mxu0 %v8282_v34  ;;  %v17168_v2 = vld [vmem:[#allocation315_spill] sm:$0xff] }
 0x1aa   :  { %v1458_v25 = vsel %vm534_vm0, %v17115_v54, 0.0  ;;  %v17117_v44 = vld [vmem:[#allocation288_spill] sm:$0xff]  ;;  %v1536_v1 = vsel %vm534_vm0, %v17118_v35, 0.0  ;;  %v1152_v0 = vrot.slane %v1151_v33, 1  ;;  %v1299_v23 = vadd.f32 %v1298_v27, %v10287_v17  ;;  %v8321_v27 = vld [vmem:[%s15663_s2 + $0x1b4] ss:$24 sps:$4 sm:$0xff]   ;;  %2719 = vmatprep.subr.bf16.mxu0 %v8287_v52 }
 0x1ab   :  { %v1531_v46 = vadd.f32 %v17117_v44, %v17116_v36  ;;  %v1454_v54 = vadd.f32 %v1453_v47, %v10401_v60  ;;  %v8320_v31 = vld [vmem:[%s15663_s2 + $0x180] ss:$24 sps:$4 sm:$0xff]   ;;  %v1222_v7 = vadd.f32 %v1221_v3, %v10247_v32  ;;  %v1377_v36 = vadd.f32 %v1376_v62, %v10353_v59  ;;  %v8290_v12 = vld [vmem:[%s15662_s1 + $0x2e4] ss:$8 sps:$4 sm:$0xff]   ;;  %v17125_v61 = vld [vmem:[#allocation294_spill] sm:$0xff] }
 0x1ac   :  { %v17120_v35 = vld [vmem:[#allocation312_spill] sm:$0xff]  ;;  %v8285_v40 = vld [vmem:[%s15662_s1 + $0x2d0] ss:$8 sps:$4 sm:$0xff]   ;;  %v10841_v47 = vmax.f32 %v1151_v33, %v1152_v0  ;;  %v1300_v3 = vadd.f32 %v1299_v23, %v10297_v43  ;;  %3195 = vmatpush1.bf16.msra.mxu1 %v8320_v31 }
 0x1ad   :  { %v1532_v56 = vadd.f32 %v1531_v46, %v10450_v14  ;;  %v1614_v44 = vsel %vm534_vm0, %v17120_v35, 0.0  ;;  %v1455_v62 = vadd.f32 %v1454_v54, %v10405_v30  ;;  %v1610_v46 = vadd.f32 %v1609_v28, %v10508_v5  ;;  %v17121_v0 = vld [vmem:[#allocation316_spill] sm:$0xff]  ;;  %v17123_v43 = vld [vmem:[#allocation306_spill] sm:$0xff]  ;;  %v17124_v52 = vld [vmem:[#allocation327_spill] sm:$0xff]  ;;  %3196 = vmatprep.subr.bf16.mxu1 %v8321_v27  ;;  %2720 = vmatpush1.bf16.msra.mxu0 %v8285_v40 }
 0x1ae   :  { %v1223_v35 = vadd.f32 %v1222_v7, %v10251_v50  ;;  %v1378_v34 = vadd.f32 %v1377_v36, %v10357_v16  ;;  %v1687_v33 = vadd.f32 %v17121_v0, %v10543_v39  ;;  %v1301_v23 = vadd.f32 %v1300_v3, %v10307_v13  ;;  %v17122_v60 = vld [vmem:[#allocation280_spill] sm:$0xff]  ;;  %v8323_v7 = vld [vmem:[%s15663_s2 + $0x1b0] ss:$24 sps:$4 sm:$0xff]   ;;  %2721 = vmatprep.subr.bf16.mxu0 %v8290_v12  ;;  %v17160_v16 = vld [vmem:[#allocation251_spill] sm:$0xff] }
 0x1af   :  { %v1533_v10 = vadd.f32 %v1532_v56, %v10463_v42  ;;  %v1456_v54 = vadd.f32 %v1455_v62, %v17122_v60  ;;  %v1611_v28 = vadd.f32 %v1610_v46, %v17123_v43  ;;  %v1692_v5 = vsel %vm534_vm0, %v17124_v52, 0.0  ;;  %v17126_v17 = vld [vmem:[#allocation318_spill] sm:$0xff]  ;;  %v8288_v3 = vld [vmem:[%s15662_s1 + $0x2e0] ss:$8 sps:$4 sm:$0xff]   ;;  %v17128_v43 = vld [vmem:[#allocation331_spill] sm:$0xff] }
 0x1b0   :  { %v1225_v36 = vadd.f32 %v1224_v55, %v1223_v35  ;;  %v1379_v56 = vadd.f32 %v1378_v34, %v10367_v21  ;;  %v1688_v39 = vadd.f32 %v1687_v33, %v17126_v17  ;;  %v1303_v62 = vadd.f32 %v1302_v45, %v1301_v23  ;;  %v17127_v60 = vld [vmem:[#allocation329_spill] sm:$0xff]  ;;  %3197 = vmatpush1.bf16.msra.mxu1 %v8323_v7  ;;  %v17159_v17 = vld [vmem:[#allocation311_spill] sm:$0xff] }
 0x1b1   :  { %v1534_v30 = vadd.f32 %v1533_v10, %v17125_v61  ;;  %v1457_v31 = vadd.f32 %v1456_v54, %v10419_v58  ;;  %v1612_v46 = vadd.f32 %v1611_v28, %v17105_v48  ;;  %v1765_v55 = vadd.f32 %v17128_v43, %v17127_v60  ;;  %v8293_v10 = vld [vmem:[%s15662_s1 + $0x2f4] ss:$8 sps:$4 sm:$0xff]   ;;  %v17129_v54 = vld [vmem:[#allocation333_spill] sm:$0xff]  ;;  %2722 = vmatpush1.bf16.msra.mxu0 %v8288_v3 }
 0x1b2   :  { %v1226_v35 = vrot.slane %v1225_v36, 4  ;;  %v1381_v27 = vadd.f32 %v1380_v6, %v1379_v56  ;;  %v1689_v34 = vadd.f32 %v1688_v39, %v10570_v20  ;;  %v1304_v33 = vrot.slane %v1303_v62, 4  ;;  %v17130_v60 = vld [vmem:[#allocation322_spill] sm:$0xff]  ;;  %2723 = vmatprep.subr.bf16.mxu0 %v8293_v10  ;;  %v17154_v13 = vld [vmem:[#allocation301_spill] sm:$0xff]  ;;  %v17162_v42 = vld [vmem:[#allocation303_spill] sm:$0xff] }
 0x1b3   :  { %v1535_v40 = vadd.f32 %v1534_v30, %v17106_v18  ;;  %v1459_v45 = vadd.f32 %v1458_v25, %v1457_v31  ;;  %v1613_v23 = vadd.f32 %v1612_v46, %v17108_v9  ;;  %v1766_v28 = vadd.f32 %v1765_v55, %v17129_v54  ;;  %v8291_v6 = vld [vmem:[%s15662_s1 + $0x2f0] ss:$8 sps:$4 sm:$0xff]   ;;  %v17157_v18 = vld [vmem:[#allocation277_spill] sm:$0xff] }
 0x1b4   :  { %v1227_v48 = vadd.f32 %v1226_v35, %v1225_v36  ;;  %v1382_v43 = vrot.slane %v1381_v27, 4  ;;  %v1690_v58 = vadd.f32 %v1689_v34, %v17130_v60  ;;  %v1305_v30 = vadd.f32 %v1304_v33, %v1303_v62  ;;  %v17158_v60 = vld [vmem:[#allocation289_spill] sm:$0xff] }
 0x1b5   :  { %v1537_v12 = vadd.f32 %v1536_v1, %v1535_v40  ;;  %v1460_v56 = vrot.slane %v1459_v45, 4  ;;  %v1615_v39 = vadd.f32 %v1614_v44, %v1613_v23  ;;  %v1767_v25 = vadd.f32 %v1766_v28, %v10618_v8  ;;  %2724 = vmatpush1.bf16.msra.mxu0 %v8291_v6  ;;  %v17161_v0 = vld [vmem:[#allocation265_spill] sm:$0xff] }
 0x1b6   :  { %v1228_v31 = vrot.slane %v1227_v48, 2  ;;  %v1383_v46 = vadd.f32 %v1382_v43, %v1381_v27  ;;  %v1691_v7 = vadd.f32 %v1690_v58, %v17109_v41  ;;  %v1306_v36 = vrot.slane %v1305_v30, 2  ;;  %v17156_v41 = vld [vmem:[#allocation239_spill] sm:$0xff] }
 0x1b7   :  { %v1538_v55 = vrot.slane %v1537_v12, 4  ;;  %v1461_v1 = vadd.f32 %v1460_v56, %v1459_v45  ;;  %v1616_v35 = vrot.slane %v1615_v39, 4  ;;  %v1768_v3 = vadd.f32 %v1767_v25, %v10625_v26 }
 0x1b8   :  { %v1229_v40 = vadd.f32 %v1228_v31, %v1227_v48  ;;  %v1384_v34 = vrot.slane %v1383_v46, 2  ;;  %v1693_v9 = vadd.f32 %v1692_v5, %v1691_v7  ;;  %v1307_v62 = vadd.f32 %v1306_v36, %v1305_v30 }
 0x1b9   :  { %v1539_v54 = vadd.f32 %v1538_v55, %v1537_v12  ;;  %v1462_v44 = vrot.slane %v1461_v1, 2  ;;  %v1617_v33 = vadd.f32 %v1616_v35, %v1615_v39  ;;  %v1769_v10 = vadd.f32 %v1768_v3, %v10629_v24 }
 0x1ba   :  { %v1230_v23 = vrot.slane %v1229_v40, 1  ;;  %v1385_v43 = vadd.f32 %v1384_v34, %v1383_v46  ;;  %v1694_v28 = vrot.slane %v1693_v9, 4  ;;  %v1308_v58 = vrot.slane %v1307_v62, 1 }
 0x1bb   :  { %v1540_v27 = vrot.slane %v1539_v54, 2  ;;  %v1463_v8 = vadd.f32 %v1462_v44, %v1461_v1  ;;  %v1618_v45 = vrot.slane %v1617_v33, 2  ;;  %v1770_v56 = vsel %vm534_vm0, %v10632_v22, 0.0  ;;  %v17152_v22 = vld [vmem:[#allocation249_spill] sm:$0xff] }
 0x1bc   :  { %v1231_v48 = vadd.f32 %v1230_v23, %v1229_v40  ;;  %v1386_v25 = vrot.slane %v1385_v43, 1  ;;  %v1695_v5 = vadd.f32 %v1694_v28, %v1693_v9  ;;  %v1309_v6 = vadd.f32 %v1308_v58, %v1307_v62 }
 0x1bd   :  { %v1541_v12 = vadd.f32 %v1540_v27, %v1539_v54  ;;  %v1464_v30 = vrot.slane %v1463_v8, 1  ;;  %v1619_v31 = vadd.f32 %v1618_v45, %v1617_v33  ;;  %v1771_v39 = vadd.f32 %v1770_v56, %v1769_v10  ;;  %v17131_v56 = vld [vmem:[#allocation231_spill] sm:$0xff] }
 0x1be   :  { %v1387_v55 = vadd.f32 %v1386_v25, %v1385_v43  ;;  %v1696_v36 = vrot.slane %v1695_v5, 2  ;;  %v1783_v46 = vmul.f32 0.020408163, %v1231_v48  ;;  %v1789_v1 = vmul.f32 0.020408163, %v1309_v6  ;;  %v17132_v48 = vld [vmem:[#allocation229_spill] sm:$0xff] }
 0x1bf   :  { %v1542_v7 = vrot.slane %v1541_v12, 1  ;;  %v1465_v35 = vadd.f32 %v1464_v30, %v1463_v8  ;;  %v1620_v3 = vrot.slane %v1619_v31, 1  ;;  %v1772_v34 = vrot.slane %v1771_v39, 4  ;;  %v17133_v6 = vld [vmem:[#allocation241_spill] sm:$0xff] }
 0x1c0   :  { %v1697_v26 = vadd.f32 %v1696_v36, %v1695_v5  ;;  %v1795_v24 = vmul.f32 0.020408163, %v1387_v55  ;;  %v1916_v54 = vsel %vm1874_vm1, %v10766_v15, %v10764_v38  ;;  %v2012_v43 = vsel %vm1874_vm1, %v1789_v1, %v1783_v46  ;;  %v17135_v55 = vld [vmem:[#allocation245_spill] sm:$0xff]  ;;  %v17137_v46 = vld [vmem:[#allocation255_spill] sm:$0xff] }
 0x1c1   :  { %v1543_v44 = vadd.f32 %v1542_v7, %v1541_v12  ;;  %v1621_v9 = vadd.f32 %v1620_v3, %v1619_v31  ;;  %v1773_v40 = vadd.f32 %v1772_v34, %v1771_v39  ;;  %v1801_v62 = vmul.f32 0.020408163, %v1465_v35  ;;  %v17136_v7 = vld [vmem:[#allocation243_spill] sm:$0xff]  ;;  %v17139_v3 = vld [vmem:[#allocation257_spill] sm:$0xff] }
 0x1c2   :  { %v1917_v33 = vsel %vm1876_vm2, %v10774_v37, %v1916_v54  ;;  %v1698_v10 = vrot.slane %v1697_v26, 1  ;;  %v2013_v38 = vsel %vm1876_vm2, %v1795_v24, %v2012_v43  ;;  %v582_v25 = vmax.f32 %v17132_v48, %v17131_v56  ;;  %v17138_v35 = vld [vmem:[#allocation259_spill] sm:$0xff]  ;;  %v17145_v43 = vld [vmem:[#allocation261_spill] sm:$0xff] }
 0x1c3   :  { %v1807_v23 = vmul.f32 0.020408163, %v1543_v44  ;;  %v1918_v8 = vsel %vm1878_vm3, %v10776_v4, %v1917_v33  ;;  %v1774_v27 = vrot.slane %v1773_v40, 2  ;;  %v1813_v28 = vmul.f32 0.020408163, %v1621_v9  ;;  %v17140_v44 = vld [vmem:[#allocation235_spill] sm:$0xff] }
 0x1c4   :  { %v1919_v58 = vsel %vm1880_vm4, %v10781_v51, %v1918_v8  ;;  %v1699_v15 = vadd.f32 %v1698_v10, %v1697_v26  ;;  %v2014_v37 = vsel %vm1878_vm3, %v1801_v62, %v2013_v38  ;;  %v587_v51 = vsel %vm534_vm0, %v17133_v6, -inf  ;;  %v17141_v9 = vld [vmem:[#allocation269_spill] sm:$0xff]  ;;  %v17143_v62 = vld [vmem:[#allocation271_spill] sm:$0xff] }
 0x1c5   :  { %v1920_v45 = vsel %vm1882_vm5, %v10787_v11, %v1919_v58  ;;  %v1775_v12 = vadd.f32 %v1774_v27, %v1773_v40  ;;  %v2015_v5 = vsel %vm1880_vm4, %v1807_v23, %v2014_v37  ;;  %v17134_v11 = vld [vmem:[#allocation233_spill] sm:$0xff]  ;;  %v660_v36 = vmax.f32 %v17136_v7, %v17135_v55  ;;  %v17144_v23 = vld [vmem:[#allocation247_spill] sm:$0xff] }
 0x1c6   :  { %v1921_v4 = vsel %vm1884_vm6, %v10796_v49, %v1920_v45  ;;  %v1819_v30 = vmul.f32 0.020408163, %v1699_v15  ;;  %v2016_v26 = vsel %vm1882_vm5, %v1813_v28, %v2015_v5  ;;  %v583_v31 = vmax.f32 %v582_v25, %v17134_v11  ;;  %v17142_v40 = vld [vmem:[#allocation273_spill] sm:$0xff]  ;;  %v17146_v28 = vld [vmem:[#allocation283_spill] sm:$0xff] }
 0x1c7   :  { %v1922_v24 = vsel %vm1886_vm7, %v10841_v47, %v1921_v4  ;;  %v1776_v39 = vrot.slane %v1775_v12, 1  ;;  %v665_v49 = vsel %vm534_vm0, %v17137_v46, -inf  ;;  %v738_v34 = vmax.f32 %v17139_v3, %v17138_v35  ;;  %v17147_v38 = vld [vmem:[#allocation237_spill] sm:$0xff]  ;;  %v17148_v45 = vld [vmem:[#allocation275_spill] sm:$0xff] }
 0x1c8   :  { %v2017_v1 = vsel %vm1884_vm6, %v1819_v30, %v2016_v26  ;;  %v584_v54 = vmax.f32 %v583_v31, %v17140_v44  ;;  %v743_v47 = vsel %vm534_vm0, %v17141_v9, -inf  ;;  %v816_v33 = vmax.f32 %v17143_v62, %v17142_v40  ;;  %v17149_v25 = vld [vmem:[#allocation287_spill] sm:$0xff]  ;;  %v17150_v4 = vld [vmem:[#allocation285_spill] sm:$0xff] }
 0x1c9   :  { %v1777_v10 = vadd.f32 %v1776_v39, %v1775_v12  ;;  %v661_v8 = vmax.f32 %v660_v36, %v17144_v23  ;;  %v739_v27 = vmax.f32 %v738_v34, %v17145_v43  ;;  %v821_v58 = vsel %vm534_vm0, %v17146_v28, -inf  ;;  %v17151_v30 = vld [vmem:[#allocation297_spill] sm:$0xff]  ;;  %v17153_v39 = vld [vmem:[#allocation263_spill] sm:$0xff] }
 0x1ca   :  { %v585_v15 = vmax.f32 %v584_v54, %v17147_v38  ;;  %v817_v37 = vmax.f32 %v816_v33, %v17148_v45  ;;  %v894_v5 = vmax.f32 %v17150_v4, %v17149_v25  ;;  %v899_v26 = vsel %vm534_vm0, %v17151_v30, -inf  ;;  %v17155_v34 = vld [vmem:[#allocation299_spill] sm:$0xff] }
 0x1cb   :  { %v1825_v31 = vmul.f32 0.020408163, %v1777_v10  ;;  %v662_v12 = vmax.f32 %v661_v8, %v17152_v22  ;;  %v740_v36 = vmax.f32 %v739_v27, %v17153_v39  ;;  %v972_v52 = vmax.f32 %v17155_v34, %v17154_v13 }
 0x1cc   :  { %v586_v20 = vmax.f32 %v585_v15, %v17156_v41  ;;  %v818_v54 = vmax.f32 %v817_v37, %v17157_v18  ;;  %v895_v33 = vmax.f32 %v894_v5, %v17158_v60  ;;  %v977_v14 = vsel %vm534_vm0, %v17159_v17, -inf  ;;  %v17164_v15 = vld [vmem:[#allocation291_spill] sm:$0xff]  ;;  %v17165_v37 = vld [vmem:[#allocation253_spill] sm:$0xff] }
 0x1cd   :  { %v2018_v61 = vsel %vm1886_vm7, %v1825_v31, %v2017_v1  ;;  %v663_v10 = vmax.f32 %v662_v12, %v17160_v16  ;;  %v741_v8 = vmax.f32 %v740_v36, %v17161_v0  ;;  %v973_v27 = vmax.f32 %v972_v52, %v17162_v42  ;;  %v17166_v5 = vld [vmem:[#allocation267_spill] sm:$0xff]  ;;  %v17169_v1 = vld [vmem:[#allocation313_spill] sm:$0xff] }
 0x1ce   :  { %v2030_v32 = vpack.c.bf16 %v2018_v61, %v1922_v24  ;;  %v588_v21 = vmax.f32 %v586_v20, %v587_v51  ;;  %v819_v50 = vmax.f32 %v818_v54, %v17163_v63  ;;  %v896_v53 = vmax.f32 %v895_v33, %v17164_v15  ;;  %v17170_v36 = vld [vmem:[#allocation281_spill] sm:$0xff]  ;;  %v17172_v20 = vld [vmem:[#allocation326_spill] sm:$0xff]  ;;  %v17173_v33 = vld [vmem:[#allocation307_spill] sm:$0xff] }
 0x1cf   :  { %v664_v59 = vmax.f32 %v663_v10, %v17165_v37  ;;  %v742_v19 = vmax.f32 %v741_v8, %v17166_v5  ;;  %v974_v57 = vmax.f32 %v973_v27, %v17167_v29  ;;  %v1050_v31 = vmax.f32 %v17169_v1, %v17168_v2  ;;  %v17171_v52 = vld [vmem:[#allocation293_spill] sm:$0xff]  ;;  %v17175_v29 = vld [vmem:[#allocation295_spill] sm:$0xff]  ;;  %v17176_v2 = vld [vmem:[#allocation330_spill] sm:$0xff] }
 0x1d0   :  { %2725 = vmatprep.mubr.bf16.mxu0 %v2030_v32  ;;  %v589_v12 = vrot.slane %v588_v21, 4  ;;  %v820_v17 = vmax.f32 %v819_v50, %v17170_v36  ;;  %v897_v61 = vmax.f32 %v896_v53, %v17171_v52  ;;  %v1055_v51 = vsel %vm534_vm0, %v17172_v20, -inf  ;;  %v17174_v42 = vld [vmem:[#allocation317_spill] sm:$0xff]  ;;  %v17177_v32 = vld [vmem:[#allocation328_spill] sm:$0xff]  ;;  %v17179_v52 = vld [vmem:[#allocation319_spill] sm:$0xff] }
 0x1d1   :  { %v666_v24 = vmax.f32 %v664_v59, %v665_v49  ;;  %v744_v54 = vmax.f32 %v742_v19, %v743_v47  ;;  %v975_v10 = vmax.f32 %v974_v57, %v17173_v33  ;;  %v1051_v8 = vmax.f32 %v1050_v31, %v17174_v42  ;;  %v17178_v36 = vld [vmem:[#allocation309_spill] sm:$0xff]  ;;  %v17180_v49 = vld [vmem:[#allocation332_spill] sm:$0xff] }
 0x1d2   :  { %v590_v5 = vmax.f32 %v588_v21, %v589_v12  ;;  %v822_v27 = vmax.f32 %v820_v17, %v821_v58  ;;  %v898_v15 = vmax.f32 %v897_v61, %v17175_v29  ;;  %v1128_v1 = vmax.f32 %v17177_v32, %v17176_v2  ;;  %v17181_v17 = vld [vmem:[#allocation321_spill] sm:$0xff]  ;;  %v17182_v2 = vld [vmem:[#allocation334_spill] sm:$0xff] }
 0x1d3   :  { %v667_v63 = vrot.slane %v666_v24, 4  ;;  %v745_v50 = vrot.slane %v744_v54, 4  ;;  %v976_v53 = vmax.f32 %v975_v10, %v17178_v36  ;;  %v1052_v13 = vmax.f32 %v1051_v8, %v17179_v52  ;;  %v17183_v36 = vld [vmem:[#allocation323_spill] sm:$0xff]  ;;  %v17184_v52 = vld [vmem:[#allocation324_spill] sm:$0xff] }
 0x1d4   :  { %v591_v20 = vrot.slane %v590_v5, 2  ;;  %v823_v59 = vrot.slane %v822_v27, 4  ;;  %v900_v19 = vmax.f32 %v898_v15, %v899_v26  ;;  %v1129_v57 = vmax.f32 %v1128_v1, %v17180_v49 }
 0x1d5   :  { %v668_v47 = vmax.f32 %v666_v24, %v667_v63  ;;  %v746_v31 = vmax.f32 %v744_v54, %v745_v50  ;;  %v978_v21 = vmax.f32 %v976_v53, %v977_v14  ;;  %v1053_v58 = vmax.f32 %v1052_v13, %v17181_v17  ;;  %v17186_v63 = vld [vmem:[#allocation336_spill] sm:$0xff]  ;;  %v17187_v50 = vld [vmem:[#allocation338_spill] sm:$0xff] }
 0x1d6   :  { %v592_v12 = vmax.f32 %v590_v5, %v591_v20  ;;  %v824_v61 = vmax.f32 %v822_v27, %v823_v59  ;;  %v901_v33 = vrot.slane %v900_v19, 4  ;;  %v1130_v32 = vmax.f32 %v1129_v57, %v17182_v2 }
 0x1d7   :  { %v669_v29 = vrot.slane %v668_v47, 2  ;;  %v747_v42 = vrot.slane %v746_v31, 2  ;;  %v979_v10 = vrot.slane %v978_v21, 4  ;;  %v1054_v8 = vmax.f32 %v1053_v58, %v17183_v36 }
 0x1d8   :  { %v10972_v34 = vunpack.c.l.bf16 %v17184_v52  ;;  %v825_v26 = vrot.slane %v824_v61, 2  ;;  %v902_v15 = vmax.f32 %v900_v19, %v901_v33  ;;  %v1131_v1 = vmax.f32 %v1130_v32, %v17186_v63 }
 0x1d9   :  { %v670_v14 = vmax.f32 %v668_v47, %v669_v29  ;;  %v748_v24 = vmax.f32 %v746_v31, %v747_v42  ;;  %v980_v13 = vmax.f32 %v978_v21, %v979_v10  ;;  %v1056_v5 = vmax.f32 %v1054_v8, %v1055_v51 }
 0x1da   :  { %17185 = vst [vmem:[#allocation324_spill] sm:$0xff] %v10972_v34  ;;  %v593_v20 = vrot.slane %v592_v12, 1  ;;  %v826_v54 = vmax.f32 %v824_v61, %v825_v26  ;;  %v903_v27 = vrot.slane %v902_v15, 2  ;;  %v1132_v53 = vmax.f32 %v1131_v1, %v17187_v50 }
 0x1db   :  { %v671_v59 = vrot.slane %v670_v14, 1  ;;  %v749_v57 = vrot.slane %v748_v24, 1  ;;  %v981_v2 = vrot.slane %v980_v13, 2  ;;  %v1057_v58 = vrot.slane %v1056_v5, 4 }
 0x1dc   :  { %v827_v36 = vrot.slane %v826_v54, 1  ;;  %v904_v52 = vmax.f32 %v902_v15, %v903_v27  ;;  %v1133_v33 = vsel %vm534_vm0, %v10972_v34, -inf  ;;  %v1206_v29 = vadd.f32 %v17131_v56, %v17132_v48 }
 0x1dd   :  { %v10980_v42 = vmax.f32 %v980_v13, %v981_v2  ;;  %v1058_v51 = vmax.f32 %v1056_v5, %v1057_v58  ;;  %v1134_v32 = vmax.f32 %v1132_v53, %v1133_v33  ;;  %v10983_v47 = vmax.f32 %v592_v12, %v593_v20 }
 0x1de   :  { %v1207_v19 = vadd.f32 %v1206_v29, %v17134_v11  ;;  %v10985_v31 = vmax.f32 %v670_v14, %v671_v59  ;;  %v905_v21 = vrot.slane %v904_v52, 1  ;;  %v1284_v61 = vadd.f32 %v17135_v55, %v17136_v7 }
 0x1df   :  { %v10989_v10 = vmax.f32 %v748_v24, %v749_v57  ;;  %v10991_v8 = vmax.f32 %v826_v54, %v827_v36  ;;  %v1135_v26 = vrot.slane %v1134_v32, 4  ;;  %v1059_v1 = vrot.slane %v1058_v51, 2 }
 0x1e0   :  { %v1208_v2 = vadd.f32 %v1207_v19, %v17140_v44  ;;  %v1285_v13 = vadd.f32 %v1284_v61, %v17144_v23  ;;  %v1362_v12 = vadd.f32 %v17138_v35, %v17139_v3  ;;  %v1211_v24 = vsel %vm534_vm0, %v17133_v6, 0.0 }
 0x1e1   :  { %v1136_v14 = vmax.f32 %v1134_v32, %v1135_v26  ;;  %v1440_v36 = vadd.f32 %v17142_v40, %v17143_v62  ;;  %v11003_v20 = vmax.f32 %v904_v52, %v905_v21  ;;  %v1289_v27 = vsel %vm534_vm0, %v17137_v46, 0.0  ;;  %v17192_v46 = vld [vmem:[#allocation267_spill] sm:$0xff]  ;;  %v17197_v40 = vld [vmem:[#allocation293_spill] sm:$0xff] }
 0x1e2   :  { %v1209_v5 = vadd.f32 %v1208_v2, %v17147_v38  ;;  %v1286_v54 = vadd.f32 %v1285_v13, %v17152_v22  ;;  %v1363_v53 = vadd.f32 %v1362_v12, %v17145_v43  ;;  %v1518_v33 = vadd.f32 %v17149_v25, %v17150_v4  ;;  %v17188_v12 = vld [vmem:[#allocation299_spill] sm:$0xff]  ;;  %v17202_v22 = vld [vmem:[#allocation326_spill] sm:$0xff] }
 0x1e3   :  { %v1137_v59 = vrot.slane %v1136_v14, 2  ;;  %v1441_v58 = vadd.f32 %v1440_v36, %v17148_v45  ;;  %v11013_v29 = vmax.f32 %v1058_v51, %v1059_v1  ;;  %v1367_v19 = vsel %vm534_vm0, %v17141_v9, 0.0  ;;  %v17193_v45 = vld [vmem:[#allocation303_spill] sm:$0xff] }
 0x1e4   :  { %v1210_v57 = vadd.f32 %v1209_v5, %v17156_v41  ;;  %v1287_v52 = vadd.f32 %v1286_v54, %v17160_v16  ;;  %v1364_v32 = vadd.f32 %v1363_v53, %v17153_v39  ;;  %v1445_v26 = vsel %vm534_vm0, %v17146_v28, 0.0  ;;  %v17189_v5 = vld [vmem:[#allocation301_spill] sm:$0xff]  ;;  %v17190_v53 = vld [vmem:[#allocation279_spill] sm:$0xff] }
 0x1e5   :  { %v1442_v61 = vadd.f32 %v1441_v58, %v17157_v18  ;;  %v1519_v2 = vadd.f32 %v1518_v33, %v17158_v60  ;;  %v1523_v1 = vsel %vm534_vm0, %v17151_v30, 0.0  ;;  %v1596_v36 = vadd.f32 %v17189_v5, %v17188_v12  ;;  %v17191_v58 = vld [vmem:[#allocation291_spill] sm:$0xff]  ;;  %v17194_v16 = vld [vmem:[#allocation313_spill] sm:$0xff] }
 0x1e6   :  { %v1212_v21 = vadd.f32 %v1211_v24, %v1210_v57  ;;  %v1288_v13 = vadd.f32 %v1287_v52, %v17165_v37  ;;  %v1365_v51 = vadd.f32 %v1364_v32, %v17161_v0  ;;  %v11029_v54 = vmax.f32 %v1136_v14, %v1137_v59  ;;  %v17195_v32 = vld [vmem:[#allocation315_spill] sm:$0xff]  ;;  %v17196_v18 = vld [vmem:[#allocation281_spill] sm:$0xff] }
 0x1e7   :  { %v1443_v57 = vadd.f32 %v1442_v61, %v17190_v53  ;;  %v1520_v15 = vadd.f32 %v1519_v2, %v17191_v58  ;;  %v1597_v52 = vadd.f32 %v1596_v36, %v17193_v45  ;;  %v1674_v62 = vadd.f32 %v17195_v32, %v17194_v16  ;;  %v17198_v14 = vld [vmem:[#allocation311_spill] sm:$0xff]  ;;  %v17199_v53 = vld [vmem:[#allocation305_spill] sm:$0xff] }
 0x1e8   :  { %v1213_v24 = vrot.slane %v1212_v21, 4  ;;  %v1290_v28 = vadd.f32 %v1289_v27, %v1288_v13  ;;  %v1366_v33 = vadd.f32 %v1365_v51, %v17192_v46  ;;  %v1601_v59 = vsel %vm534_vm0, %v17198_v14, 0.0  ;;  %v17200_v27 = vld [vmem:[#allocation317_spill] sm:$0xff]  ;;  %v17201_v36 = vld [vmem:[#allocation295_spill] sm:$0xff] }
 0x1e9   :  { %v1444_v37 = vadd.f32 %v1443_v57, %v17196_v18  ;;  %v1521_v12 = vadd.f32 %v1520_v15, %v17197_v40  ;;  %v1598_v2 = vadd.f32 %v1597_v52, %v17199_v53  ;;  %v1675_v13 = vadd.f32 %v1674_v62, %v17200_v27  ;;  %v17203_v18 = vld [vmem:[#allocation307_spill] sm:$0xff]  ;;  %v17206_v52 = vld [vmem:[#allocation330_spill] sm:$0xff] }
 0x1ea   :  { %v1214_v23 = vadd.f32 %v1213_v24, %v1212_v21  ;;  %v1291_v5 = vrot.slane %v1290_v28, 4  ;;  %v1368_v61 = vadd.f32 %v1367_v19, %v1366_v33  ;;  %v1679_v21 = vsel %vm534_vm0, %v17202_v22, 0.0  ;;  %v17204_v9 = vld [vmem:[#allocation319_spill] sm:$0xff]  ;;  %v17205_v33 = vld [vmem:[#allocation328_spill] sm:$0xff] }
 0x1eb   :  { %v1446_v30 = vadd.f32 %v1445_v26, %v1444_v37  ;;  %v1522_v45 = vadd.f32 %v1521_v12, %v17201_v36  ;;  %v1599_v15 = vadd.f32 %v1598_v2, %v17203_v18  ;;  %v1676_v55 = vadd.f32 %v1675_v13, %v17204_v9  ;;  %v17207_v37 = vld [vmem:[#allocation309_spill] sm:$0xff] }
 0x1ec   :  { %v1215_v51 = vrot.slane %v1214_v23, 2  ;;  %v1292_v24 = vadd.f32 %v1291_v5, %v1290_v28  ;;  %v1369_v57 = vrot.slane %v1368_v61, 4  ;;  %v1752_v53 = vadd.f32 %v17206_v52, %v17205_v33  ;;  %v17209_v52 = vld [vmem:[#allocation334_spill] sm:$0xff] }
 0x1ed   :  { %v1447_v6 = vrot.slane %v1446_v30, 4  ;;  %v1524_v19 = vadd.f32 %v1523_v1, %v1522_v45  ;;  %v1600_v26 = vadd.f32 %v1599_v15, %v17207_v37  ;;  %v1677_v12 = vadd.f32 %v1676_v55, %v17181_v17 }
 0x1ee   :  { %v1216_v14 = vadd.f32 %v1215_v51, %v1214_v23  ;;  %v1293_v62 = vrot.slane %v1292_v24, 2  ;;  %v1370_v7 = vadd.f32 %v1369_v57, %v1368_v61  ;;  %v1753_v5 = vadd.f32 %v1752_v53, %v17180_v49  ;;  %v17208_v23 = vld [vmem:[#allocation323_spill] sm:$0xff] }
 0x1ef   :  { %v1448_v22 = vadd.f32 %v1447_v6, %v1446_v30  ;;  %v1525_v28 = vrot.slane %v1524_v19, 4  ;;  %v1602_v13 = vadd.f32 %v1601_v59, %v1600_v26  ;;  %v1678_v51 = vadd.f32 %v1677_v12, %v17208_v23 }
 0x1f0   :  { %v1217_v36 = vrot.slane %v1216_v14, 1  ;;  %v1294_v2 = vadd.f32 %v1293_v62, %v1292_v24  ;;  %v1371_v18 = vrot.slane %v1370_v7, 2  ;;  %v1754_v33 = vadd.f32 %v1753_v5, %v17209_v52  ;;  %v17262_v52 = vld [vmem:[#allocation36_spill] sm:$0xff] }
 0x1f1   :  { %v1449_v1 = vrot.slane %v1448_v22, 2  ;;  %v1526_v9 = vadd.f32 %v1525_v28, %v1524_v19  ;;  %v1603_v15 = vrot.slane %v1602_v13, 4  ;;  %v1680_v37 = vadd.f32 %v1679_v21, %v1678_v51 }
 0x1f2   :  { %v1218_v45 = vadd.f32 %v1217_v36, %v1216_v14  ;;  %v1295_v61 = vrot.slane %v1294_v2, 1  ;;  %v1372_v57 = vadd.f32 %v1371_v18, %v1370_v7  ;;  %v1755_v6 = vadd.f32 %v1754_v33, %v17186_v63  ;;  %v17260_v63 = vld [vmem:[#allocation230_spill] sm:$0xff] }
 0x1f3   :  { %v1450_v55 = vadd.f32 %v1449_v1, %v1448_v22  ;;  %v1527_v17 = vrot.slane %v1526_v9, 2  ;;  %v1757_v30 = vsel %vm534_vm0, %v10972_v34, 0.0  ;;  %v1604_v24 = vadd.f32 %v1603_v15, %v1602_v13  ;;  %v17258_v34 = vld [vmem:[#allocation35_spill] sm:$0xff] }
 0x1f4   :  { %v1296_v53 = vadd.f32 %v1295_v61, %v1294_v2  ;;  %v1373_v59 = vrot.slane %v1372_v57, 1  ;;  %v1681_v62 = vrot.slane %v1680_v37, 4  ;;  %v1756_v19 = vadd.f32 %v1755_v6, %v17187_v50 }
 0x1f5   :  { %v1451_v14 = vrot.slane %v1450_v55, 1  ;;  %v1528_v36 = vadd.f32 %v1527_v17, %v1526_v9  ;;  %v1782_v26 = vmul.f32 0.020408163, %v1218_v45  ;;  %v1605_v18 = vrot.slane %v1604_v24, 2 }
 0x1f6   :  { %v1374_v12 = vadd.f32 %v1373_v59, %v1372_v57  ;;  %v1682_v7 = vadd.f32 %v1681_v62, %v1680_v37  ;;  %v1788_v21 = vmul.f32 0.020408163, %v1296_v53  ;;  %v1758_v5 = vadd.f32 %v1757_v30, %v1756_v19 }
 0x1f7   :  { %v1452_v22 = vadd.f32 %v1451_v14, %v1450_v55  ;;  %v1529_v28 = vrot.slane %v1528_v36, 1  ;;  %v1909_v33 = vsel %vm1874_vm1, %v10985_v31, %v10983_v47  ;;  %v1606_v2 = vadd.f32 %v1605_v18, %v1604_v24 }
 0x1f8   :  { %v1683_v51 = vrot.slane %v1682_v7, 2  ;;  %v1794_v13 = vmul.f32 0.020408163, %v1374_v12  ;;  %v1910_v9 = vsel %vm1876_vm2, %v10989_v10, %v1909_v33  ;;  %v1759_v1 = vrot.slane %v1758_v5, 4 }
 0x1f9   :  { %v1530_v17 = vadd.f32 %v1529_v28, %v1528_v36  ;;  %v1800_v45 = vmul.f32 0.020408163, %v1452_v22  ;;  %v1911_v37 = vsel %vm1878_vm3, %v10991_v8, %v1910_v9  ;;  %v1061_v61 = vrot.slane %v11013_v29, 1  ;;  %v8324_v9 = vld [vmem:[%s15663_s2 + $0x1e4] ss:$24 sps:$4 sm:$0xff]  }
 0x1fa   :  { %v1607_v57 = vrot.slane %v1606_v2, 1  ;;  %v1684_v15 = vadd.f32 %v1683_v51, %v1682_v7  ;;  %v2005_v55 = vsel %vm1874_vm1, %v1788_v21, %v1782_v26  ;;  %v17210_v47 = vrot.slane %v10980_v42, 1  ;;  %3198 = vmatprep.subr.bf16.mxu1 %v8324_v9  ;;  %v8368_v9 = vld [vmem:[%s15663_s2 + $0x14] ss:$24 sps:$4 sm:$0xff]  }
 0x1fb   :  { %v1760_v6 = vadd.f32 %v1759_v1, %v1758_v5  ;;  %v1806_v30 = vmul.f32 0.020408163, %v1530_v17  ;;  %v2006_v10 = vsel %vm1876_vm2, %v1794_v13, %v2005_v55  ;;  %v1912_v24 = vsel %vm1880_vm4, %v11003_v20, %v1911_v37  ;;  %v8327_v17 = vld [vmem:[%s15663_s2 + $0x214] ss:$24 sps:$4 sm:$0xff]   ;;  %v8329_v1 = vld [vmem:[%s15663_s2 + $0x210] ss:$24 sps:$4 sm:$0xff]  }
 0x1fc   :  { %v984_v31 = vmax.f32 %v10980_v42, %v17210_v47  ;;  %v1608_v53 = vadd.f32 %v1607_v57, %v1606_v2  ;;  %v1685_v59 = vrot.slane %v1684_v15, 1  ;;  %v2007_v8 = vsel %vm1878_vm3, %v1800_v45, %v2006_v10  ;;  %v8332_v45 = vld [vmem:[%s15663_s2 + $0xc] ss:$24 sps:$4 sm:$0xff]  }
 0x1fd   :  { %v1139_v62 = vrot.slane %v11029_v54, 1  ;;  %v1761_v14 = vrot.slane %v1760_v6, 2  ;;  %v1062_v36 = vmax.f32 %v11013_v29, %v1061_v61  ;;  %v2008_v42 = vsel %vm1880_vm4, %v1806_v30, %v2007_v8  ;;  %v8338_v8 = vld [vmem:[%s15663_s2 + $0x6c] ss:$24 sps:$4 sm:$0xff]  }
 0x1fe   :  { %v1686_v19 = vadd.f32 %v1685_v59, %v1684_v15  ;;  %v1812_v26 = vmul.f32 0.020408163, %v1608_v53  ;;  %v1913_v18 = vsel %vm1882_vm5, %v984_v31, %v1912_v24  ;;  %v8330_v53 = vld [vmem:[%s15663_s2 + $0x8] ss:$24 sps:$4 sm:$0xff]   ;;  %v8335_v59 = vld [vmem:[%s15663_s2 + $0x3c] ss:$24 sps:$4 sm:$0xff]  }
 0x1ff   :  { %v1762_v12 = vadd.f32 %v1761_v14, %v1760_v6  ;;  %v1140_v21 = vmax.f32 %v11029_v54, %v1139_v62  ;;  %v1914_v28 = vsel %vm1884_vm6, %v1062_v36, %v1913_v18  ;;  %v8326_v54 = vld [vmem:[%s15663_s2 + $0x1e0] ss:$24 sps:$4 sm:$0xff]   ;;  %v8341_v14 = vld [vmem:[%s15663_s2 + $0x9c] ss:$24 sps:$4 sm:$0xff]   ;;  %v8350_v18 = vld [vmem:[%s15663_s2 + $0x12c] ss:$24 sps:$4 sm:$0xff]  }
 0x200   :  { %v1818_v7 = vmul.f32 0.020408163, %v1686_v19  ;;  %v2009_v20 = vsel %vm1882_vm5, %v1812_v26, %v2008_v42  ;;  %3199 = vmatpush1.bf16.msra.mxu1 %v8326_v54  ;;  %v8333_v24 = vld [vmem:[%s15663_s2 + $0x38] ss:$24 sps:$4 sm:$0xff]   ;;  %v8336_v62 = vld [vmem:[%s15663_s2 + $0x68] ss:$24 sps:$4 sm:$0xff]  }
 0x201   :  { %v1763_v22 = vrot.slane %v1762_v12, 1  ;;  %v1915_v29 = vsel %vm1886_vm7, %v1140_v21, %v1914_v28  ;;  %3200 = vmatprep.subr.bf16.mxu1 %v8327_v17  ;;  %v8339_v36 = vld [vmem:[%s15663_s2 + $0x98] ss:$24 sps:$4 sm:$0xff]   ;;  %v8344_v19 = vld [vmem:[%s15663_s2 + $0xcc] ss:$24 sps:$4 sm:$0xff]  }
 0x202   :  { %v2010_v33 = vsel %vm1884_vm6, %v1818_v7, %v2009_v20  ;;  %v8342_v26 = vld [vmem:[%s15663_s2 + $0xc8] ss:$24 sps:$4 sm:$0xff]   ;;  %v8347_v42 = vld [vmem:[%s15663_s2 + $0xfc] ss:$24 sps:$4 sm:$0xff]   ;;  %v8356_v20 = vld [vmem:[%s15663_s2 + $0x18c] ss:$24 sps:$4 sm:$0xff]  }
 0x203   :  { %v1764_v5 = vadd.f32 %v1763_v22, %v1762_v12  ;;  %v8345_v12 = vld [vmem:[%s15663_s2 + $0xf8] ss:$24 sps:$4 sm:$0xff]   ;;  %v8348_v7 = vld [vmem:[%s15663_s2 + $0x128] ss:$24 sps:$4 sm:$0xff]   ;;  %v8353_v21 = vld [vmem:[%s15663_s2 + $0x15c] ss:$24 sps:$4 sm:$0xff]  }
 0x204   :  { %3201 = vmatpush1.bf16.msra.mxu1 %v8329_v1  ;;  %v8351_v22 = vld [vmem:[%s15663_s2 + $0x158] ss:$24 sps:$4 sm:$0xff]   ;;  %v8354_v28 = vld [vmem:[%s15663_s2 + $0x188] ss:$24 sps:$4 sm:$0xff]   ;;  %v8371_v17 = vld [vmem:[%s15663_s2 + $0x44] ss:$24 sps:$4 sm:$0xff]  }
 0x205   :  { %v1824_v2 = vmul.f32 0.020408163, %v1764_v5  ;;  %3221 = vmatprep.subr.bf16.mxu1 %v8332_v45  ;;  %v8359_v5 = vld [vmem:[%s15663_s2 + $0x1bc] ss:$24 sps:$4 sm:$0xff]   ;;  %v8366_v54 = vld [vmem:[%s15663_s2 + $0x10] ss:$24 sps:$4 sm:$0xff]  }
 0x206   :  { %v8369_v1 = vld [vmem:[%s15663_s2 + $0x40] ss:$24 sps:$4 sm:$0xff]   ;;  %v8374_v45 = vld [vmem:[%s15663_s2 + $0x74] ss:$24 sps:$4 sm:$0xff]  }
 0x207   :  { %v2011_v51 = vsel %vm1886_vm7, %v1824_v2, %v2010_v33  ;;  %v8357_v33 = vld [vmem:[%s15663_s2 + $0x1b8] ss:$24 sps:$4 sm:$0xff]   ;;  %v8362_v2 = vld [vmem:[%s15663_s2 + $0x1ec] ss:$24 sps:$4 sm:$0xff]  }
 0x208   :  { %v2029_v13 = vpack.c.bf16 %v2011_v51, %v1915_v29  ;;  %v8360_v29 = vld [vmem:[%s15663_s2 + $0x1e8] ss:$24 sps:$4 sm:$0xff]   ;;  %v8365_v51 = vld [vmem:[%s15663_s2 + $0x21c] ss:$24 sps:$4 sm:$0xff]  }
 0x20a   :  { %2726 = vmatmul.mubr.bf16.vlgmr.msra.gmra.mrb[0].mxu0 %v2029_v13  ;;  %v8363_v13 = vld [vmem:[%s15663_s2 + $0x218] ss:$24 sps:$4 sm:$0xff]  }
 0x2dd   :  { %v2727_v37 = vpop.f32.mrb[0].mxu0 }
 0x2de   :  { %v2729_v61 = vpop.f32.mrb[1].mxu0  ;;  %v2736_v15 = vmax.f32 %v2727_v37, 0.0  ;;  %v8372_v37 = vld [vmem:[%s15663_s2 + $0x70] ss:$24 sps:$4 sm:$0xff]  }
 0x2df   :  { %v2731_v57 = vpop.f32.mrb[2].mxu0  ;;  %v2737_v31 = vmax.f32 %v2729_v61, 0.0  ;;  %v8377_v61 = vld [vmem:[%s15663_s2 + $0xa4] ss:$24 sps:$4 sm:$0xff]  }
 0x2e0   :  { %v2738_v55 = vmax.f32 %v2731_v57, 0.0  ;;  %v2733_v47 = vpop.f32.mrb[3].mxu0  ;;  %v8375_v57 = vld [vmem:[%s15663_s2 + $0xa0] ss:$24 sps:$4 sm:$0xff]  }
 0x2e1   :  { %v2739_v6 = vmax.f32 %v2733_v47, 0.0  ;;  %v8383_v47 = vld [vmem:[%s15663_s2 + $0x104] ss:$24 sps:$4 sm:$0xff]  }
 0x2e2   :  { %v11100_v30 = vpack.c.bf16 %v2738_v55, %v2736_v15  ;;  %v8380_v15 = vld [vmem:[%s15663_s2 + $0xd4] ss:$24 sps:$4 sm:$0xff]   ;;  %v8378_v55 = vld [vmem:[%s15663_s2 + $0xd0] ss:$24 sps:$4 sm:$0xff]  }
 0x2e3   :  { %v2741_v10 = vpack.c.bf16 %v2739_v6, %v2737_v31  ;;  %v8381_v31 = vld [vmem:[%s15663_s2 + $0x100] ss:$24 sps:$4 sm:$0xff]   ;;  %v8386_v6 = vld [vmem:[%s15663_s2 + $0x134] ss:$24 sps:$4 sm:$0xff]  }
 0x2e5   :  { %7965 = vmatprep.mubr.msk.bf16.mxu1 %vm3174_vm8, %v2741_v10 }
 0x2e6   :  { %3211 = vmatmul.mubr.bf16.vlgmr.msra.gmra.mrb[0].mxu1 %v11100_v30 }
 0x2e7   :  { %3222 = vmatpush1.bf16.msra.mxu1 %v8330_v53  ;;  %7966 = vmatprep.mubr.msk.bf16.mxu1 %vm3174_vm8, %v2741_v10  ;;  %v8389_v53 = vld [vmem:[%s15663_s2 + $0x164] ss:$24 sps:$4 sm:$0xff]  }
 0x2e8   :  { %3223 = vmatprep.subr.bf16.mxu1 %v8335_v59  ;;  %v8387_v59 = vld [vmem:[%s15663_s2 + $0x160] ss:$24 sps:$4 sm:$0xff]  }
 0x2eb   :  { %3224 = vmatpush1.bf16.msra.mxu1 %v8333_v24  ;;  %v8392_v24 = vld [vmem:[%s15663_s2 + $0x194] ss:$24 sps:$4 sm:$0xff]  }
 0x2ec   :  { %3225 = vmatprep.subr.bf16.mxu1 %v8338_v8  ;;  %v8390_v8 = vld [vmem:[%s15663_s2 + $0x190] ss:$24 sps:$4 sm:$0xff]  }
 0x2ef   :  { %3226 = vmatpush1.bf16.msra.mxu1 %v8336_v62  ;;  %v8395_v62 = vld [vmem:[%s15663_s2 + $0x1c4] ss:$24 sps:$4 sm:$0xff]  }
 0x2f0   :  { %3227 = vmatprep.subr.bf16.mxu1 %v8341_v14  ;;  %v8393_v14 = vld [vmem:[%s15663_s2 + $0x1c0] ss:$24 sps:$4 sm:$0xff]  }
 0x2f3   :  { %3228 = vmatpush1.bf16.msra.mxu1 %v8339_v36  ;;  %v8398_v36 = vld [vmem:[%s15663_s2 + $0x1f4] ss:$24 sps:$4 sm:$0xff]  }
 0x2f4   :  { %3229 = vmatprep.subr.bf16.mxu1 %v8344_v19  ;;  %v8396_v19 = vld [vmem:[%s15663_s2 + $0x1f0] ss:$24 sps:$4 sm:$0xff]  }
 0x2f7   :  { %3230 = vmatpush1.bf16.msra.mxu1 %v8342_v26  ;;  %v8401_v26 = vld [vmem:[%s15663_s2 + $0x224] ss:$24 sps:$4 sm:$0xff]  }
 0x2f8   :  { %3231 = vmatprep.subr.bf16.mxu1 %v8347_v42  ;;  %v8399_v42 = vld [vmem:[%s15663_s2 + $0x220] ss:$24 sps:$4 sm:$0xff]  }
 0x2fb   :  { %3232 = vmatpush1.bf16.msra.mxu1 %v8345_v12 }
 0x2fc   :  { %3233 = vmatprep.subr.bf16.mxu1 %v8350_v18 }
 0x2ff   :  { %3234 = vmatpush1.bf16.msra.mxu1 %v8348_v7 }
 0x300   :  { %3235 = vmatprep.subr.bf16.mxu1 %v8353_v21 }
 0x303   :  { %3236 = vmatpush1.bf16.msra.mxu1 %v8351_v22 }
 0x304   :  { %3237 = vmatprep.subr.bf16.mxu1 %v8356_v20 }
 0x307   :  { %3238 = vmatpush1.bf16.msra.mxu1 %v8354_v28 }
 0x308   :  { %3239 = vmatprep.subr.bf16.mxu1 %v8359_v5 }
 0x30b   :  { %3240 = vmatpush1.bf16.msra.mxu1 %v8357_v33 }
 0x30c   :  { %3241 = vmatprep.subr.bf16.mxu1 %v8362_v2 }
 0x30f   :  { %3242 = vmatpush1.bf16.msra.mxu1 %v8360_v29 }
 0x310   :  { %3243 = vmatprep.subr.bf16.mxu1 %v8365_v51 }
 0x313   :  { %3244 = vmatpush1.bf16.msra.mxu1 %v8363_v13 }
 0x314   :  { %3264 = vmatprep.subr.bf16.mxu1 %v8368_v9 }
 0x316   :  { %3254 = vmatmul.mubr.bf16.vlgmr.msra.gmra.mrb[4].mxu1 %v11100_v30 }
 0x317   :  { %3265 = vmatpush1.bf16.msra.mxu1 %v8366_v54  ;;  %7967 = vmatprep.mubr.msk.bf16.mxu1 %vm3174_vm8, %v2741_v10  ;;  %v8384_v10 = vld [vmem:[%s15663_s2 + $0x130] ss:$24 sps:$4 sm:$0xff]   ;;  %vm5466_vm8 = vcmask 400384  }
 0x318   :  { %3266 = vmatprep.subr.bf16.mxu1 %v8371_v17 }
 0x31b   :  { %3267 = vmatpush1.bf16.msra.mxu1 %v8369_v1 }
 0x31c   :  { %3268 = vmatprep.subr.bf16.mxu1 %v8374_v45 }
 0x31f   :  { %3269 = vmatpush1.bf16.msra.mxu1 %v8372_v37 }
 0x320   :  { %3270 = vmatprep.subr.bf16.mxu1 %v8377_v61 }
 0x323   :  { %3271 = vmatpush1.bf16.msra.mxu1 %v8375_v57 }
 0x324   :  { %3272 = vmatprep.subr.bf16.mxu1 %v8380_v15 }
 0x327   :  { %3273 = vmatpush1.bf16.msra.mxu1 %v8378_v55 }
 0x328   :  { %3274 = vmatprep.subr.bf16.mxu1 %v8383_v47  ;;  %v8510_v47 = vmov 1966171168  }
 0x32b   :  { %3275 = vmatpush1.bf16.msra.mxu1 %v8381_v31  ;;  %v3362_v31 = vunpack.c.l.s4 %v8510_v47 }
 0x32c   :  { %3276 = vmatprep.subr.bf16.mxu1 %v8386_v6  ;;  %v16254_v6 = vlaneseq }
 0x32f   :  { %3277 = vmatpush1.bf16.msra.mxu1 %v8384_v10 }
 0x330   :  { %3278 = vmatprep.subr.bf16.mxu1 %v8389_v53  ;;  %v3363_v53 = vunpack.c.0.s8 %v3362_v31 }
 0x333   :  { %3279 = vmatpush1.bf16.msra.mxu1 %v8387_v59  ;;  %v11252_v59 = vshrl.u32 %v16254_v6, 7  ;;  %v17243_v6 = vld [vmem:[#allocation5_spill] sm:$0xff] }
 0x334   :  { %3280 = vmatprep.subr.bf16.mxu1 %v8392_v24 }
 0x335   :  { %17212 = vst [vmem:[#allocation342_spill] sm:$0xff] %v11252_v59 }
 0x337   :  { %3281 = vmatpush1.bf16.msra.mxu1 %v8390_v8 }
 0x338   :  { %3282 = vmatprep.subr.bf16.mxu1 %v8395_v62 }
 0x33b   :  { %3283 = vmatpush1.bf16.msra.mxu1 %v8393_v14 }
 0x33c   :  { %3284 = vmatprep.subr.bf16.mxu1 %v8398_v36  ;;  %v3366_v36 = vsub.s32 %v3363_v53, %v11252_v59  ;;  %v11278_v53 = vsub.s32 0, %v11252_v59 }
 0x33e   :  { %17218 = vst [vmem:[#allocation348_spill] sm:$0xff] %v11278_v53 }
 0x33f   :  { %3285 = vmatpush1.bf16.msra.mxu1 %v8396_v19 }
 0x340   :  { %3286 = vmatprep.subr.bf16.mxu1 %v8401_v26 }
 0x343   :  { %3287 = vmatpush1.bf16.msra.mxu1 %v8399_v42 }
 0x346   :  { %3297 = vmatmul.mubr.bf16.vlgmr.msra.gmra.mrb[8].mxu1 %v11100_v30 }
 0x3b9   :  { %v3212_v12 = vpop.f32.mrb[0].mxu1 }
 0x3ba   :  { %v3214_v18 = vpop.f32.mrb[1].mxu1 }
 0x3bb   :  { %v3216_v7 = vpop.f32.mrb[2].mxu1 }
 0x3bc   :  { %v3307_v21 = vadd.f32 %v3216_v7, %v3212_v12  ;;  %v3218_v22 = vpop.f32.mrb[3].mxu1 }
 0x3bd   :  { %v3308_v20 = vadd.f32 %v3218_v22, %v3214_v18 }
 0x3be   :  { %v7968_v28 = vmul.f32 -1.442695, %v3307_v21 }
 0x3bf   :  { %v7969_v5 = vmul.f32 -1.442695, %v3308_v20 }
 0x3c0   :  { %8458 = vpow2.f32 %v7968_v28 }
 0x3c1   :  { %8460 = vpow2.f32 %v7969_v5 }
 0x3ca   :  { %v8459_v30 = vpop.eup %8458 }
 0x3cb   :  { %v8461_v1 = vpop.eup %8460  ;;  %v3331_v45 = vadd.f32 1.0, %v8459_v30 }
 0x3cc   :  { %v3332_v37 = vadd.f32 1.0, %v8461_v1 }
 0x3e9   :  { %v3255_v33 = vpop.f32.mrb[4].mxu1 }
 0x3ea   :  { %v3257_v2 = vpop.f32.mrb[5].mxu1 }
 0x3eb   :  { %v3259_v29 = vpop.f32.mrb[6].mxu1 }
 0x3ec   :  { %v3309_v51 = vadd.f32 %v3259_v29, %v3255_v33  ;;  %v3261_v13 = vpop.f32.mrb[7].mxu1 }
 0x3ed   :  { %v3310_v9 = vadd.f32 %v3261_v13, %v3257_v2 }
 0x3ee   :  { %v7970_v54 = vmul.f32 -1.442695, %v3309_v51 }
 0x3ef   :  { %v7971_v17 = vmul.f32 -1.442695, %v3310_v9 }
 0x3f0   :  { %8462 = vpow2.f32 %v7970_v54 }
 0x3f1   :  { %8464 = vpow2.f32 %v7971_v17 }
 0x3f2   :  { %8466 = vrcp.f32 %v3331_v45 }
 0x3f3   :  { %8468 = vrcp.f32 %v3332_v37 }
 0x3fa   :  { %v8463_v61 = vpop.eup %8462 }
 0x3fb   :  { %v8465_v57 = vpop.eup %8464  ;;  %v3333_v15 = vadd.f32 1.0, %v8463_v61 }
 0x3fc   :  { %v3334_v55 = vadd.f32 1.0, %v8465_v57  ;;  %v11249_v10 = vpop.eup %8466 }
 0x3fd   :  { %8470 = vrcp.f32 %v3333_v15  ;;  %17211 = vst [vmem:[#allocation341_spill] sm:$0xff] %v11249_v10  ;;  %v11254_v24 = vpop.eup %8468 }
 0x3fe   :  { %8472 = vrcp.f32 %v3334_v55  ;;  %17213 = vst [vmem:[#allocation343_spill] sm:$0xff] %v11254_v24  ;;  %v3355_v62 = vcombine.low %v11249_v10, %v11254_v24  ;;  %v3356_v14 = vcombine.high %v11249_v10, %v11254_v24  ;;  %v17247_v10 = vld [vmem:[#allocation236_spill] sm:$0xff] }
 0x400   :  { %v3367_v12 = vrot.slane %v3355_v62, %v3366_v36  ;;  %v3374_v18 = vrot.slane %v3356_v14, %v3366_v36  ;;  %v11281_v62 = vsub.s32 1, %v11252_v59 }
 0x402   :  { %17219 = vst [vmem:[#allocation349_spill] sm:$0xff] %v11281_v62 }
 0x407   :  { %v11256_v8 = vpop.eup %8470 }
 0x408   :  { %17214 = vst [vmem:[#allocation344_spill] sm:$0xff] %v11256_v8  ;;  %v11263_v19 = vpop.eup %8472 }
 0x409   :  { %17215 = vst [vmem:[#allocation345_spill] sm:$0xff] %v11263_v19  ;;  %v3357_v26 = vcombine.low %v11256_v8, %v11263_v19  ;;  %v3358_v42 = vcombine.high %v11256_v8, %v11263_v19 }
 0x40b   :  { %v3381_v7 = vrot.slane %v3357_v26, %v3366_v36  ;;  %v3388_v21 = vrot.slane %v3358_v42, %v3366_v36  ;;  %v11284_v26 = vsub.s32 2, %v11252_v59  ;;  %v11287_v42 = vsub.s32 3, %v11252_v59 }
 0x40d   :  { %v3404_v22 = vcombine.high %v3367_v12, %v3381_v7  ;;  %v3406_v20 = vcombine.high %v3374_v18, %v3388_v21  ;;  %v3403_v61 = vcombine.low %v3367_v12, %v3381_v7  ;;  %v3405_v55 = vcombine.low %v3374_v18, %v3388_v21  ;;  %17220 = vst [vmem:[#allocation350_spill] sm:$0xff] %v11284_v26 }
 0x40e   :  { %17221 = vst [vmem:[#allocation351_spill] sm:$0xff] %v11287_v42  ;;  %v11290_v12 = vsub.s32 4, %v11252_v59 }
 0x40f   :  { %v3415_v14 = vrot.slane %v3403_v61, %v3366_v36 }
 0x410   :  { %17222 = vst [vmem:[#allocation352_spill] sm:$0xff] %v11290_v12 }
 0x419   :  { %v3298_v28 = vpop.f32.mrb[8].mxu1 }
 0x41a   :  { %v3300_v5 = vpop.f32.mrb[9].mxu1 }
 0x41b   :  { %v3302_v33 = vpop.f32.mrb[10].mxu1 }
 0x41c   :  { %v3311_v2 = vadd.f32 %v3302_v33, %v3298_v28  ;;  %v3304_v29 = vpop.f32.mrb[11].mxu1  ;;  %v3429_v33 = vrot.slane %v3404_v22, %v3366_v36 }
 0x41d   :  { %v3312_v51 = vadd.f32 %v3304_v29, %v3300_v5  ;;  %v3422_v5 = vrot.slane %v3405_v55, %v3366_v36  ;;  %v11293_v29 = vsub.s32 5, %v11252_v59 }
 0x41e   :  { %v7972_v13 = vmul.f32 -1.442695, %v3311_v2  ;;  %v3436_v2 = vrot.slane %v3406_v20, %v3366_v36 }
 0x41f   :  { %v7973_v9 = vmul.f32 -1.442695, %v3312_v51  ;;  %17223 = vst [vmem:[#allocation353_spill] sm:$0xff] %v11293_v29 }
 0x420   :  { %8474 = vpow2.f32 %v7972_v13 }
 0x421   :  { %8476 = vpow2.f32 %v7973_v9 }
 0x42a   :  { %v8475_v54 = vpop.eup %8474 }
 0x42b   :  { %v8477_v17 = vpop.eup %8476  ;;  %v3335_v30 = vadd.f32 1.0, %v8475_v54 }
 0x42c   :  { %v3336_v1 = vadd.f32 1.0, %v8477_v17 }
 0x42d   :  { %8478 = vrcp.f32 %v3335_v30 }
 0x42e   :  { %8480 = vrcp.f32 %v3336_v1 }
 0x437   :  { %v11269_v45 = vpop.eup %8478 }
 0x438   :  { %17216 = vst [vmem:[#allocation346_spill] sm:$0xff] %v11269_v45  ;;  %v11271_v37 = vpop.eup %8480 }
 0x439   :  { %17217 = vst [vmem:[#allocation347_spill] sm:$0xff] %v11271_v37  ;;  %v3359_v57 = vcombine.low %v11269_v45, %v11271_v37  ;;  %v3360_v15 = vcombine.high %v11269_v45, %v11271_v37  ;;  %v17245_v37 = vld [vmem:[#allocation6_spill] sm:$0xff] }
 0x43b   :  { %v3395_v47 = vrot.slane %v3359_v57, %v3366_v36  ;;  %v3402_v31 = vrot.slane %v3360_v15, %v3366_v36 }
 0x43d   :  { %v3407_v7 = vcombine.high %v3395_v47, %v3395_v47  ;;  %v3408_v18 = vcombine.high %v3402_v31, %v3402_v31  ;;  %v3443_v21 = vrot.slane %v3395_v47, %v3366_v36  ;;  %v3450_v28 = vrot.slane %v3402_v31, %v3366_v36 }
 0x43f   :  { %v3457_v51 = vrot.slane %v3407_v7, %v3366_v36  ;;  %v3464_v13 = vrot.slane %v3408_v18, %v3366_v36  ;;  %v3465_v9 = vcombine.low %v3415_v14, %v3443_v21  ;;  %v3466_v54 = vcombine.high %v3415_v14, %v3443_v21  ;;  %v17235_v7 = vld [vmem:[#allocation11_spill] sm:$0xff]  ;;  %v17236_v21 = vld [vmem:[#allocation12_spill] sm:$0xff] }
 0x440   :  { %v11295_v17 = vcombine.low %v3422_v5, %v3450_v28  ;;  %v11317_v55 = vcombine.high %v3422_v5, %v3450_v28 }
 0x441   :  { %v11297_v30 = vcombine.low %v3429_v33, %v3457_v51  ;;  %v11299_v1 = vcombine.high %v3429_v33, %v3457_v51  ;;  %v11301_v61 = vcombine.low %v3436_v2, %v3464_v13  ;;  %v11303_v57 = vcombine.high %v3436_v2, %v3464_v13  ;;  %v17237_v2 = vld [vmem:[#allocation123_spill] sm:$0xff]  ;;  %v17240_v51 = vld [vmem:[#allocation124_spill] sm:$0xff] }
 0x442   :  { %v11306_v22 = vrot.slane %v3465_v9, %v11278_v53  ;;  %v11309_v20 = vrot.slane %v3465_v9, %v11281_v62  ;;  %v11312_v36 = vrot.slane %v3465_v9, %v11284_v26  ;;  %v11315_v15 = vrot.slane %v3465_v9, %v11287_v42 }
 0x443   :  { %17224 = vst [vmem:[#allocation354_spill] sm:$0xff] %v11297_v30  ;;  %17225 = vst [vmem:[#allocation355_spill] sm:$0xff] %v11299_v1  ;;  %v11320_v47 = vrot.slane %v3465_v9, %v11290_v12  ;;  %v11323_v31 = vrot.slane %v3465_v9, %v11293_v29  ;;  %v11326_v14 = vrot.slane %v3466_v54, %v11278_v53  ;;  %v17266_v1 = vld [vmem:[#allocation148_spill] sm:$0xff]  ;;  %v17269_v30 = vld [vmem:[#allocation7_spill] sm:$0xff] }
 0x444   :  { %17226 = vst [vmem:[#allocation356_spill] sm:$0xff] %v11301_v61  ;;  %17227 = vst [vmem:[#allocation357_spill] sm:$0xff] %v11303_v57  ;;  %v11330_v18 = vmul.f32 %v11306_v22, %v17235_v7  ;;  %v11334_v33 = vmul.f32 %v11309_v20, %v17236_v21  ;;  %v11338_v28 = vmul.f32 %v11312_v36, %v17237_v2 }
 0x445   :  { %17228 = vst [vmem:[#allocation358_spill] sm:$0xff] %v11306_v22  ;;  %17229 = vst [vmem:[#allocation359_spill] sm:$0xff] %v11309_v20  ;;  %v11341_v5 = vrot.slane %v3466_v54, %v11281_v62  ;;  %v11345_v13 = vmul.f32 %v11315_v15, %v17240_v51  ;;  %v11349_v9 = vmul.f32 %v11320_v47, %v17140_v44  ;;  %v17249_v51 = vld [vmem:[#allocation117_spill] sm:$0xff]  ;;  %v17251_v44 = vld [vmem:[#allocation118_spill] sm:$0xff] }
 0x446   :  { %17230 = vst [vmem:[#allocation360_spill] sm:$0xff] %v11312_v36  ;;  %17231 = vst [vmem:[#allocation361_spill] sm:$0xff] %v11315_v15  ;;  %v11353_v45 = vmul.f32 %v11306_v22, %v17243_v6  ;;  %v11357_v8 = vmul.f32 %v11309_v20, %v17245_v37  ;;  %v11361_v19 = vmul.f32 %v11323_v31, %v17247_v10 }
 0x447   :  { %17232 = vst [vmem:[#allocation362_spill] sm:$0xff] %v11320_v47  ;;  %17233 = vst [vmem:[#allocation363_spill] sm:$0xff] %v11323_v31  ;;  %v4510_v24 = vadd.f32 %v11334_v33, %v11330_v18  ;;  %v11367_v2 = vmul.f32 %v11312_v36, %v17249_v51  ;;  %v11371_v21 = vmul.f32 %v11315_v15, %v17251_v44 }
 0x448   :  { %17234 = vst [vmem:[#allocation364_spill] sm:$0xff] %v11326_v14  ;;  %17238 = vst [vmem:[#allocation365_spill] sm:$0xff] %v11338_v28  ;;  %v11375_v7 = vmul.f32 %v11320_v47, %v17132_v48  ;;  %v4489_v37 = vadd.f32 %v11357_v8, %v11353_v45  ;;  %v11380_v10 = vrot.slane %v3466_v54, %v11284_v26 }
 0x449   :  { %17239 = vst [vmem:[#allocation366_spill] sm:$0xff] %v11341_v5  ;;  %17241 = vst [vmem:[#allocation367_spill] sm:$0xff] %v11345_v13  ;;  %v11383_v6 = vrot.slane %v3466_v54, %v11287_v42  ;;  %v4511_v51 = vadd.f32 %v4510_v24, %v11338_v28  ;;  %v11387_v59 = vrot.slane %v3466_v54, %v11290_v12  ;;  %v17264_v24 = vld [vmem:[#allocation147_spill] sm:$0xff]  ;;  %v17283_v28 = vld [vmem:[#allocation152_spill] sm:$0xff] }
 0x44a   :  { %17242 = vst [vmem:[#allocation368_spill] sm:$0xff] %v11349_v9  ;;  %17244 = vst [vmem:[#allocation369_spill] sm:$0xff] %v11353_v45  ;;  %v11390_v44 = vrot.slane %v3466_v54, %v11293_v29  ;;  %v11394_v48 = vmul.f32 %v11326_v14, %v17258_v34  ;;  %v11398_v49 = vmul.f32 %v11323_v31, %v17260_v63  ;;  %v17272_v45 = vld [vmem:[#allocation8_spill] sm:$0xff] }
 0x44b   :  { %17246 = vst [vmem:[#allocation370_spill] sm:$0xff] %v11357_v8  ;;  %17248 = vst [vmem:[#allocation371_spill] sm:$0xff] %v11361_v19  ;;  %v4490_v50 = vadd.f32 %v4489_v37, %v11367_v2  ;;  %v11403_v57 = vmul.f32 %v11341_v5, %v17262_v52  ;;  %v11407_v61 = vmul.f32 %v11380_v10, %v17264_v24  ;;  %v17273_v8 = vld [vmem:[#allocation119_spill] sm:$0xff] }
 0x44c   :  { %17250 = vst [vmem:[#allocation372_spill] sm:$0xff] %v11367_v2  ;;  %17252 = vst [vmem:[#allocation373_spill] sm:$0xff] %v11371_v21  ;;  %v4512_v54 = vadd.f32 %v4511_v51, %v11345_v13  ;;  %v11412_v34 = vmul.f32 %v11383_v6, %v17266_v1  ;;  %v11416_v63 = vmul.f32 %v11387_v59, %v17138_v35  ;;  %v17270_v2 = vld [vmem:[#allocation260_spill] sm:$0xff] }
 0x44d   :  { %17253 = vst [vmem:[#allocation374_spill] sm:$0xff] %v11375_v7  ;;  %17254 = vst [vmem:[#allocation375_spill] sm:$0xff] %v11380_v10  ;;  %v11420_v37 = vmul.f32 %v11306_v22, %v17269_v30  ;;  %v4491_v52 = vadd.f32 %v4490_v50, %v11371_v21  ;;  %v11425_v24 = vmul.f32 %v11390_v44, %v17270_v2  ;;  %v17274_v30 = vld [vmem:[#allocation120_spill] sm:$0xff] }
 0x44e   :  { %17255 = vst [vmem:[#allocation376_spill] sm:$0xff] %v11383_v6  ;;  %17256 = vst [vmem:[#allocation377_spill] sm:$0xff] %v11387_v59  ;;  %v4606_v51 = vadd.f32 %v11403_v57, %v11394_v48  ;;  %v11431_v1 = vmul.f32 %v11309_v20, %v17272_v45  ;;  %v4513_v35 = vadd.f32 %v4512_v54, %v11349_v9  ;;  %v17275_v54 = vld [vmem:[#allocation39_spill] sm:$0xff]  ;;  %v17279_v13 = vld [vmem:[#allocation40_spill] sm:$0xff] }
 0x44f   :  { %17257 = vst [vmem:[#allocation378_spill] sm:$0xff] %v11390_v44  ;;  %17259 = vst [vmem:[#allocation379_spill] sm:$0xff] %v11394_v48  ;;  %v11436_v23 = vmul.f32 %v11312_v36, %v17273_v8  ;;  %v11440_v50 = vmul.f32 %v11315_v15, %v17274_v30  ;;  %v11444_v2 = vmul.f32 %v11320_v47, %v17131_v56 }
 0x450   :  { %17261 = vst [vmem:[#allocation380_spill] sm:$0xff] %v11398_v49  ;;  %17263 = vst [vmem:[#allocation381_spill] sm:$0xff] %v11403_v57  ;;  %v4492_v21 = vadd.f32 %v4491_v52, %v11375_v7  ;;  %v4607_v48 = vadd.f32 %v4606_v51, %v11407_v61  ;;  %v4496_v45 = vadd.f32 %v11431_v1, %v11420_v37  ;;  %v17277_v57 = vld [vmem:[#allocation232_spill] sm:$0xff]  ;;  %v17281_v52 = vld [vmem:[#allocation151_spill] sm:$0xff] }
 0x451   :  { %17265 = vst [vmem:[#allocation382_spill] sm:$0xff] %v11407_v61  ;;  %17267 = vst [vmem:[#allocation383_spill] sm:$0xff] %v11412_v34  ;;  %v11452_v9 = vmul.f32 %v11326_v14, %v17275_v54  ;;  %v4514_v8 = vadd.f32 %v4513_v35, %v11361_v19  ;;  %v11457_v30 = vmul.f32 %v11323_v31, %v17277_v57 }
 0x452   :  { %17268 = vst [vmem:[#allocation384_spill] sm:$0xff] %v11416_v63  ;;  %17271 = vst [vmem:[#allocation385_spill] sm:$0xff] %v11425_v24  ;;  %v11461_v56 = vmul.f32 %v11341_v5, %v17279_v13  ;;  %v11465_v51 = vmul.f32 %v11380_v10, %v17281_v52  ;;  %v4493_v7 = vadd.f32 %v4492_v21, %v11398_v49  ;;  %v17286_v52 = vld [vmem:[#allocation9_spill] sm:$0xff]  ;;  %v17288_v21 = vld [vmem:[#allocation10_spill] sm:$0xff] }
 0x453   :  { %17276 = vst [vmem:[#allocation386_spill] sm:$0xff] %v11452_v9  ;;  %17278 = vst [vmem:[#allocation387_spill] sm:$0xff] %v11457_v30  ;;  %v4608_v61 = vadd.f32 %v4607_v48, %v11412_v34  ;;  %v4497_v54 = vadd.f32 %v4496_v45, %v11436_v23  ;;  %v11472_v35 = vmul.f32 %v11383_v6, %v17283_v28  ;;  %4515 = vadd.xlane.f32.xlu1 %v4514_v8  ;;  %v17290_v28 = vld [vmem:[#allocation264_spill] sm:$0xff]  ;;  %v17292_v49 = vld [vmem:[#allocation121_spill] sm:$0xff] }
 0x454   :  { %17280 = vst [vmem:[#allocation388_spill] sm:$0xff] %v11461_v56  ;;  %17282 = vst [vmem:[#allocation389_spill] sm:$0xff] %v11465_v51  ;;  %v11476_v57 = vmul.f32 %v11387_v59, %v17153_v39  ;;  %v4620_v13 = vadd.f32 %v11461_v56, %v11452_v9  ;;  %v11482_v19 = vmul.f32 %v11306_v22, %v17286_v52  ;;  %4494 = vadd.xlane.f32.xlu0 %v4493_v7  ;;  %v17294_v9 = vld [vmem:[#allocation122_spill] sm:$0xff] }
 0x455   :  { %17284 = vst [vmem:[#allocation390_spill] sm:$0xff] %v11472_v35  ;;  %v11486_v48 = vmul.f32 %v11309_v20, %v17288_v21  ;;  %v4609_v45 = vadd.f32 %v4608_v61, %v11416_v63  ;;  %v4498_v8 = vadd.f32 %v4497_v54, %v11440_v50  ;;  %v11492_v39 = vmul.f32 %v11390_v44, %v17290_v28  ;;  %v17297_v21 = vld [vmem:[#allocation15_spill] sm:$0xff] }
 0x456   :  { %17285 = vst [vmem:[#allocation391_spill] sm:$0xff] %v11476_v57  ;;  %17287 = vst [vmem:[#allocation392_spill] sm:$0xff] %v11482_v19  ;;  %v11496_v34 = vmul.f32 %v11312_v36, %v17292_v49  ;;  %v4621_v52 = vadd.f32 %v4620_v13, %v11465_v51  ;;  %v11501_v56 = vmul.f32 %v11315_v15, %v17294_v9  ;;  %v17299_v13 = vld [vmem:[#allocation16_spill] sm:$0xff]  ;;  %v17301_v51 = vld [vmem:[#allocation234_spill] sm:$0xff] }
 0x457   :  { %17289 = vst [vmem:[#allocation393_spill] sm:$0xff] %v11486_v48  ;;  %17291 = vst [vmem:[#allocation394_spill] sm:$0xff] %v11492_v39  ;;  %v11505_v7 = vmul.f32 %v11320_v47, %v17134_v11  ;;  %v4503_v61 = vadd.f32 %v11486_v48, %v11482_v19  ;;  %v4610_v54 = vadd.f32 %v4609_v45, %v11425_v24  ;;  %v17303_v48 = vld [vmem:[#allocation127_spill] sm:$0xff] }
 0x458   :  { %17293 = vst [vmem:[#allocation395_spill] sm:$0xff] %v11496_v34  ;;  %17295 = vst [vmem:[#allocation396_spill] sm:$0xff] %v11501_v56  ;;  %v4499_v28 = vadd.f32 %v4498_v8, %v11444_v2  ;;  %v11513_v49 = vmul.f32 %v11306_v22, %v17297_v21  ;;  %v11517_v63 = vmul.f32 %v11309_v20, %v17299_v13  ;;  %v17305_v21 = vld [vmem:[#allocation128_spill] sm:$0xff] }
 0x459   :  { %17296 = vst [vmem:[#allocation397_spill] sm:$0xff] %v11505_v7  ;;  %v4622_v9 = vadd.f32 %v4621_v52, %v11472_v35  ;;  %v11522_v11 = vmul.f32 %v11323_v31, %v17301_v51  ;;  %v4504_v19 = vadd.f32 %v4503_v61, %v11496_v34  ;;  %v11527_v45 = vmul.f32 %v11312_v36, %v17303_v48  ;;  %v17308_v48 = vld [vmem:[#allocation33_spill] sm:$0xff] }
 0x45a   :  { %17298 = vst [vmem:[#allocation398_spill] sm:$0xff] %v11513_v49  ;;  %17300 = vst [vmem:[#allocation399_spill] sm:$0xff] %v11517_v63  ;;  %4611 = vadd.xlane.f32.xlu1 %v4610_v54  ;;  %v4500_v8 = vadd.f32 %v4499_v28, %v11457_v30  ;;  %v11532_v24 = vmul.f32 %v11315_v15, %v17305_v21  ;;  %v11536_v52 = vmul.f32 %v11320_v47, %v17156_v41  ;;  %v17310_v28 = vld [vmem:[#allocation34_spill] sm:$0xff]  ;;  %v17312_v21 = vld [vmem:[#allocation240_spill] sm:$0xff] }
 0x45b   :  { %17302 = vst [vmem:[#allocation400_spill] sm:$0xff] %v11522_v11  ;;  %17304 = vst [vmem:[#allocation401_spill] sm:$0xff] %v11527_v45  ;;  %v4524_v13 = vadd.f32 %v11517_v63, %v11513_v49  ;;  %v4623_v61 = vadd.f32 %v4622_v9, %v11476_v57  ;;  %v4505_v51 = vadd.f32 %v4504_v19, %v11501_v56  ;;  %v17314_v49 = vld [vmem:[#allocation145_spill] sm:$0xff]  ;;  %v17316_v19 = vld [vmem:[#allocation146_spill] sm:$0xff] }
 0x45c   :  { %17306 = vst [vmem:[#allocation402_spill] sm:$0xff] %v11532_v24  ;;  %17307 = vst [vmem:[#allocation403_spill] sm:$0xff] %v11536_v52  ;;  %v11544_v54 = vmul.f32 %v11326_v14, %v17308_v48  ;;  %v11548_v35 = vmul.f32 %v11341_v5, %v17310_v28  ;;  %4501 = vadd.xlane.f32.xlu0 %v4500_v8  ;;  %v11552_v41 = vmul.f32 %v11323_v31, %v17312_v21  ;;  %v17325_v56 = vld [vmem:[#allocation63_spill] sm:$0xff]  ;;  %v17349_v63 = vld [vmem:[#allocation262_spill] sm:$0xff] }
 0x45d   :  { %v4525_v34 = vadd.f32 %v4524_v13, %v11527_v45  ;;  %v11557_v9 = vmul.f32 %v11380_v10, %v17314_v49  ;;  %v11561_v57 = vmul.f32 %v11383_v6, %v17316_v19  ;;  %v4624_v48 = vadd.f32 %v4623_v61, %v11492_v39 }
 0x45e   :  { %17309 = vst [vmem:[#allocation404_spill] sm:$0xff] %v11544_v54  ;;  %17311 = vst [vmem:[#allocation405_spill] sm:$0xff] %v11548_v35  ;;  %v4506_v28 = vadd.f32 %v4505_v51, %v11505_v7  ;;  %v11567_v8 = vmul.f32 %v11387_v59, %v17139_v3  ;;  %v4599_v21 = vadd.f32 %v11548_v35, %v11544_v54 }
 0x45f   :  { %17313 = vst [vmem:[#allocation406_spill] sm:$0xff] %v11552_v41  ;;  %17315 = vst [vmem:[#allocation407_spill] sm:$0xff] %v11557_v9  ;;  %v4526_v13 = vadd.f32 %v4525_v34, %v11532_v24  ;;  %v11574_v49 = vrot.slane %v11295_v17, %v11278_v53  ;;  %v11578_v19 = vrot.slane %v11295_v17, %v11281_v62  ;;  %4625 = vadd.xlane.f32.xlu1 %v4624_v48 }
 0x460   :  { %17317 = vst [vmem:[#allocation408_spill] sm:$0xff] %v11561_v57  ;;  %17318 = vst [vmem:[#allocation409_spill] sm:$0xff] %v11567_v8  ;;  %v11582_v51 = vrot.slane %v11295_v17, %v11284_v26  ;;  %v4507_v61 = vadd.f32 %v4506_v28, %v11522_v11  ;;  %v4600_v3 = vadd.f32 %v4599_v21, %v11557_v9  ;;  %v17327_v28 = vld [vmem:[#allocation64_spill] sm:$0xff]  ;;  %v17329_v11 = vld [vmem:[#allocation258_spill] sm:$0xff] }
 0x461   :  { %17319 = vst [vmem:[#allocation410_spill] sm:$0xff] %v11574_v49  ;;  %17320 = vst [vmem:[#allocation411_spill] sm:$0xff] %v11578_v19  ;;  %v11588_v34 = vrot.slane %v11295_v17, %v11287_v42  ;;  %v11592_v39 = vrot.slane %v11295_v17, %v11290_v12  ;;  %v4527_v7 = vadd.f32 %v4526_v13, %v11536_v52  ;;  %v17331_v13 = vld [vmem:[#allocation175_spill] sm:$0xff] }
 0x462   :  { %17321 = vst [vmem:[#allocation412_spill] sm:$0xff] %v11582_v51  ;;  %v11597_v24 = vrot.slane %v11295_v17, %v11293_v29  ;;  %v11601_v48 = vmul.f32 %v11574_v49, %v17325_v56  ;;  %v11605_v21 = vmul.f32 %v11578_v19, %v17327_v28  ;;  %4508 = vadd.xlane.f32.xlu0 %v4507_v61  ;;  %v17333_v17 = vld [vmem:[#allocation176_spill] sm:$0xff] }
 0x463   :  { %17322 = vst [vmem:[#allocation413_spill] sm:$0xff] %v11588_v34  ;;  %17323 = vst [vmem:[#allocation414_spill] sm:$0xff] %v11592_v39  ;;  %v11609_v9 = vmul.f32 %v11390_v44, %v17329_v11  ;;  %v4601_v54 = vadd.f32 %v4600_v3, %v11561_v57  ;;  %v11614_v52 = vmul.f32 %v11582_v51, %v17331_v13  ;;  %v17336_v11 = vld [vmem:[#allocation37_spill] sm:$0xff]  ;;  %v17338_v57 = vld [vmem:[#allocation288_spill] sm:$0xff] }
 0x464   :  { %17324 = vst [vmem:[#allocation415_spill] sm:$0xff] %v11597_v24  ;;  %17326 = vst [vmem:[#allocation416_spill] sm:$0xff] %v11601_v48  ;;  %v11618_v35 = vmul.f32 %v11588_v34, %v17333_v17  ;;  %v4528_v56 = vadd.f32 %v4527_v7, %v11552_v41  ;;  %v11623_v28 = vmul.f32 %v11592_v39, %v17149_v25  ;;  %v17340_v17 = vld [vmem:[#allocation38_spill] sm:$0xff]  ;;  %v17342_v41 = vld [vmem:[#allocation149_spill] sm:$0xff] }
 0x465   :  { %17328 = vst [vmem:[#allocation417_spill] sm:$0xff] %v11605_v21  ;;  %17330 = vst [vmem:[#allocation418_spill] sm:$0xff] %v11609_v9  ;;  %v4716_v61 = vadd.f32 %v11605_v21, %v11601_v48  ;;  %v11629_v3 = vmul.f32 %v11326_v14, %v17336_v11  ;;  %v4602_v13 = vadd.f32 %v4601_v54, %v11567_v8  ;;  %v17344_v21 = vld [vmem:[#allocation150_spill] sm:$0xff] }
 0x466   :  { %17332 = vst [vmem:[#allocation419_spill] sm:$0xff] %v11614_v52  ;;  %17334 = vst [vmem:[#allocation420_spill] sm:$0xff] %v11618_v35  ;;  %v11634_v45 = vmul.f32 %v11597_v24, %v17338_v57  ;;  %v11638_v7 = vmul.f32 %v11341_v5, %v17340_v17  ;;  %v11642_v25 = vmul.f32 %v11380_v10, %v17342_v41  ;;  %4529 = vadd.xlane.f32.xlu1 %v4528_v56  ;;  %v17347_v57 = vld [vmem:[#allocation43_spill] sm:$0xff] }
 0x467   :  { %17335 = vst [vmem:[#allocation421_spill] sm:$0xff] %v11623_v28  ;;  %17337 = vst [vmem:[#allocation422_spill] sm:$0xff] %v11629_v3  ;;  %v4717_v48 = vadd.f32 %v4716_v61, %v11614_v52  ;;  %v11647_v11 = vmul.f32 %v11383_v6, %v17344_v21  ;;  %v11651_v54 = vmul.f32 %v11387_v59, %v17145_v43  ;;  %v17351_v61 = vld [vmem:[#allocation44_spill] sm:$0xff]  ;;  %v17352_v52 = vld [vmem:[#allocation155_spill] sm:$0xff] }
 0x468   :  { %17339 = vst [vmem:[#allocation423_spill] sm:$0xff] %v11634_v45  ;;  %17341 = vst [vmem:[#allocation424_spill] sm:$0xff] %v11638_v7  ;;  %v11655_v8 = vmul.f32 %v11326_v14, %v17347_v57  ;;  %v4603_v17 = vadd.f32 %v4602_v13, %v11609_v9  ;;  %v11660_v41 = vmul.f32 %v11390_v44, %v17349_v63  ;;  %v17353_v57 = vld [vmem:[#allocation156_spill] sm:$0xff] }
 0x469   :  { %17343 = vst [vmem:[#allocation425_spill] sm:$0xff] %v11642_v25  ;;  %17345 = vst [vmem:[#allocation426_spill] sm:$0xff] %v11647_v11  ;;  %v4613_v56 = vadd.f32 %v11638_v7, %v11629_v3  ;;  %v11666_v21 = vmul.f32 %v11341_v5, %v17351_v61  ;;  %v4718_v43 = vadd.f32 %v4717_v48, %v11618_v35  ;;  %v17356_v3 = vld [vmem:[#allocation13_spill] sm:$0xff]  ;;  %v17358_v35 = vld [vmem:[#allocation268_spill] sm:$0xff] }
 0x46a   :  { %17346 = vst [vmem:[#allocation427_spill] sm:$0xff] %v11651_v54  ;;  %17348 = vst [vmem:[#allocation428_spill] sm:$0xff] %v11655_v8  ;;  %v11671_v30 = vmul.f32 %v11380_v10, %v17352_v52  ;;  %v11675_v13 = vmul.f32 %v11383_v6, %v17353_v57  ;;  %v11679_v63 = vmul.f32 %v11387_v59, %v17192_v46  ;;  %4604 = vadd.xlane.f32.xlu0 %v4603_v17  ;;  %v17357_v52 = vld [vmem:[#allocation14_spill] sm:$0xff]  ;;  %v17360_v17 = vld [vmem:[#allocation125_spill] sm:$0xff] }
 0x46b   :  { %17350 = vst [vmem:[#allocation429_spill] sm:$0xff] %v11660_v41  ;;  %v4614_v9 = vadd.f32 %v4613_v56, %v11642_v25  ;;  %v4634_v61 = vadd.f32 %v11666_v21, %v11655_v8  ;;  %v11686_v48 = vmul.f32 %v11306_v22, %v17356_v3  ;;  %v11690_v7 = vmul.f32 %v11309_v20, %v17357_v52  ;;  %v17362_v25 = vld [vmem:[#allocation126_spill] sm:$0xff] }
 0x46c   :  { %17354 = vst [vmem:[#allocation430_spill] sm:$0xff] %v11675_v13  ;;  %17355 = vst [vmem:[#allocation431_spill] sm:$0xff] %v11679_v63  ;;  %v4719_v57 = vadd.f32 %v4718_v43, %v11623_v28  ;;  %v11695_v46 = vmul.f32 %v11390_v44, %v17358_v35  ;;  %v11699_v56 = vmul.f32 %v11312_v36, %v17360_v17  ;;  %v17364_v20 = vld [vmem:[#allocation238_spill] sm:$0xff]  ;;  %v17366_v36 = vld [vmem:[#allocation67_spill] sm:$0xff] }
 0x46d   :  { %v11703_v8 = vmul.f32 %v11315_v15, %v17362_v25  ;;  %v4615_v3 = vadd.f32 %v4614_v9, %v11647_v11  ;;  %v4635_v22 = vadd.f32 %v4634_v61, %v11671_v30  ;;  %v11709_v52 = vmul.f32 %v11320_v47, %v17147_v38  ;;  %v17367_v9 = vld [vmem:[#allocation68_spill] sm:$0xff]  ;;  %v17368_v11 = vld [vmem:[#allocation179_spill] sm:$0xff]  ;;  %v17375_v28 = vld [vmem:[#allocation173_spill] sm:$0xff] }
 0x46e   :  { %17359 = vst [vmem:[#allocation432_spill] sm:$0xff] %v11695_v46  ;;  %17361 = vst [vmem:[#allocation433_spill] sm:$0xff] %v11699_v56  ;;  %v4517_v43 = vadd.f32 %v11690_v7, %v11686_v48  ;;  %v4720_v35 = vadd.f32 %v4719_v57, %v11634_v45  ;;  %v11716_v17 = vmul.f32 %v11323_v31, %v17364_v20  ;;  %v17369_v20 = vld [vmem:[#allocation180_spill] sm:$0xff]  ;;  %v17372_v45 = vld [vmem:[#allocation62_spill] sm:$0xff] }
 0x46f   :  { %17363 = vst [vmem:[#allocation434_spill] sm:$0xff] %v11709_v52  ;;  %v11720_v25 = vmul.f32 %v11574_v49, %v17366_v36  ;;  %v11724_v61 = vmul.f32 %v11578_v19, %v17367_v9  ;;  %v4616_v38 = vadd.f32 %v4615_v3, %v11651_v54  ;;  %v4636_v47 = vadd.f32 %v4635_v22, %v11675_v13  ;;  %v17371_v9 = vld [vmem:[#allocation61_spill] sm:$0xff]  ;;  %v17373_v54 = vld [vmem:[#allocation292_spill] sm:$0xff] }
 0x470   :  { %17365 = vst [vmem:[#allocation435_spill] sm:$0xff] %v11716_v17  ;;  %v4518_v15 = vadd.f32 %v4517_v43, %v11699_v56  ;;  %v11731_v57 = vmul.f32 %v11582_v51, %v17368_v11  ;;  %4721 = vadd.xlane.f32.xlu1 %v4720_v35  ;;  %v11735_v31 = vmul.f32 %v11588_v34, %v17369_v20  ;;  %v17376_v56 = vld [vmem:[#allocation174_spill] sm:$0xff] }
 0x471   :  { %v11739_v36 = vmul.f32 %v11592_v39, %v17191_v58  ;;  %v4730_v3 = vadd.f32 %v11724_v61, %v11720_v25  ;;  %v11745_v22 = vmul.f32 %v11574_v49, %v17371_v9  ;;  %v4617_v43 = vadd.f32 %v4616_v38, %v11660_v41  ;;  %v17394_v41 = vld [vmem:[#allocation316_spill] sm:$0xff] }
 0x472   :  { %v4637_v11 = vadd.f32 %v4636_v47, %v11679_v63  ;;  %v4519_v35 = vadd.f32 %v4518_v15, %v11703_v8  ;;  %v11752_v20 = vmul.f32 %v11578_v19, %v17372_v45  ;;  %v11756_v58 = vmul.f32 %v11597_v24, %v17373_v54 }
 0x473   :  { %17370 = vst [vmem:[#allocation436_spill] sm:$0xff] %v11739_v36  ;;  %v4731_v13 = vadd.f32 %v4730_v3, %v11731_v57  ;;  %v11761_v9 = vmul.f32 %v11582_v51, %v17375_v28  ;;  %v11765_v38 = vmul.f32 %v11588_v34, %v17376_v56  ;;  %4618 = vadd.xlane.f32.xlu0 %v4617_v43 }
 0x474   :  { %17374 = vst [vmem:[#allocation437_spill] sm:$0xff] %v11756_v58  ;;  %v4638_v15 = vadd.f32 %v4637_v11, %v11695_v46  ;;  %v4520_v47 = vadd.f32 %v4519_v35, %v11709_v52  ;;  %v11771_v45 = vmul.f32 %v11592_v39, %v17150_v4  ;;  %v4709_v3 = vadd.f32 %v11752_v20, %v11745_v22  ;;  %v17399_v52 = vld [vmem:[#allocation154_spill] sm:$0xff] }
 0x475   :  { %17377 = vst [vmem:[#allocation438_spill] sm:$0xff] %v11765_v38  ;;  %v4732_v54 = vadd.f32 %v4731_v13, %v11735_v31  ;;  %v11778_v28 = vrot.slane %v11317_v55, %v11278_v53  ;;  %v11782_v43 = vrot.slane %v11317_v55, %v11281_v62  ;;  %v11786_v11 = vrot.slane %v11317_v55, %v11284_v26  ;;  %v17385_v26 = vld [vmem:[#allocation91_spill] sm:$0xff] }
 0x476   :  { %17378 = vst [vmem:[#allocation439_spill] sm:$0xff] %v11771_v45  ;;  %4639 = vadd.xlane.f32.xlu1 %v4638_v15  ;;  %v4521_v35 = vadd.f32 %v4520_v47, %v11716_v17  ;;  %v4710_v4 = vadd.f32 %v4709_v3, %v11761_v9  ;;  %v11792_v13 = vrot.slane %v11317_v55, %v11287_v42  ;;  %v17386_v47 = vld [vmem:[#allocation92_spill] sm:$0xff]  ;;  %v17387_v42 = vld [vmem:[#allocation286_spill] sm:$0xff] }
 0x477   :  { %17379 = vst [vmem:[#allocation440_spill] sm:$0xff] %v11778_v28  ;;  %17380 = vst [vmem:[#allocation441_spill] sm:$0xff] %v11782_v43  ;;  %v11796_v56 = vrot.slane %v11317_v55, %v11290_v12  ;;  %v4733_v62 = vadd.f32 %v4732_v54, %v11739_v36  ;;  %v11801_v53 = vrot.slane %v11317_v55, %v11293_v29  ;;  %v17389_v54 = vld [vmem:[#allocation203_spill] sm:$0xff]  ;;  %v17390_v55 = vld [vmem:[#allocation204_spill] sm:$0xff] }
 0x478   :  { %17381 = vst [vmem:[#allocation442_spill] sm:$0xff] %v11786_v11  ;;  %17382 = vst [vmem:[#allocation443_spill] sm:$0xff] %v11792_v13  ;;  %v11805_v15 = vmul.f32 %v11778_v28, %v17385_v26  ;;  %v11809_v3 = vmul.f32 %v11782_v43, %v17386_v47  ;;  %4522 = vadd.xlane.f32.xlu0 %v4521_v35  ;;  %v11813_v17 = vmul.f32 %v11597_v24, %v17387_v42  ;;  %v17393_v42 = vld [vmem:[#allocation41_spill] sm:$0xff] }
 0x479   :  { %17383 = vst [vmem:[#allocation444_spill] sm:$0xff] %v11796_v56  ;;  %17384 = vst [vmem:[#allocation445_spill] sm:$0xff] %v11801_v53  ;;  %v4711_v12 = vadd.f32 %v4710_v4, %v11765_v38  ;;  %v11818_v46 = vmul.f32 %v11786_v11, %v17389_v54  ;;  %v11822_v29 = vmul.f32 %v11792_v13, %v17390_v55  ;;  %v17396_v55 = vld [vmem:[#allocation42_spill] sm:$0xff] }
 0x47a   :  { %17388 = vst [vmem:[#allocation446_spill] sm:$0xff] %v11813_v17  ;;  %v4734_v26 = vadd.f32 %v4733_v62, %v11756_v58  ;;  %v11827_v47 = vmul.f32 %v11796_v56, %v17195_v32  ;;  %v4826_v35 = vadd.f32 %v11809_v3, %v11805_v15  ;;  %v11833_v4 = vmul.f32 %v11326_v14, %v17393_v42  ;;  %v17397_v58 = vld [vmem:[#allocation153_spill] sm:$0xff] }
 0x47b   :  { %17391 = vst [vmem:[#allocation447_spill] sm:$0xff] %v11822_v29  ;;  %v4712_v54 = vadd.f32 %v4711_v12, %v11771_v45  ;;  %v11838_v36 = vmul.f32 %v11801_v53, %v17394_v41  ;;  %v11842_v62 = vmul.f32 %v11341_v5, %v17396_v55  ;;  %v11846_v32 = vmul.f32 %v11380_v10, %v17397_v58  ;;  %v17402_v41 = vld [vmem:[#allocation69_spill] sm:$0xff]  ;;  %v17404_v5 = vld [vmem:[#allocation266_spill] sm:$0xff] }
 0x47c   :  { %17392 = vst [vmem:[#allocation448_spill] sm:$0xff] %v11827_v47  ;;  %4735 = vadd.xlane.f32.xlu1 %v4734_v26  ;;  %v4827_v38 = vadd.f32 %v4826_v35, %v11818_v46  ;;  %v11851_v42 = vmul.f32 %v11383_v6, %v17399_v52  ;;  %v11855_v12 = vmul.f32 %v11387_v59, %v17161_v0  ;;  %v17406_v35 = vld [vmem:[#allocation70_spill] sm:$0xff]  ;;  %v17407_v59 = vld [vmem:[#allocation181_spill] sm:$0xff] }
 0x47d   :  { %17395 = vst [vmem:[#allocation449_spill] sm:$0xff] %v11838_v36  ;;  %17398 = vst [vmem:[#allocation450_spill] sm:$0xff] %v11846_v32  ;;  %v11859_v14 = vmul.f32 %v11574_v49, %v17402_v41  ;;  %v4713_v55 = vadd.f32 %v4712_v54, %v11813_v17  ;;  %v11864_v58 = vmul.f32 %v11390_v44, %v17404_v5  ;;  %v17408_v41 = vld [vmem:[#allocation182_spill] sm:$0xff]  ;;  %v17411_v10 = vld [vmem:[#allocation65_spill] sm:$0xff] }
 0x47e   :  { %17400 = vst [vmem:[#allocation451_spill] sm:$0xff] %v11851_v42  ;;  %17401 = vst [vmem:[#allocation452_spill] sm:$0xff] %v11855_v12  ;;  %v4627_v26 = vadd.f32 %v11842_v62, %v11833_v4  ;;  %v11870_v52 = vmul.f32 %v11578_v19, %v17406_v35  ;;  %v4828_v0 = vadd.f32 %v4827_v38, %v11822_v29  ;;  %v17415_v45 = vld [vmem:[#allocation294_spill] sm:$0xff] }
 0x47f   :  { %17403 = vst [vmem:[#allocation453_spill] sm:$0xff] %v11859_v14  ;;  %17405 = vst [vmem:[#allocation454_spill] sm:$0xff] %v11864_v58  ;;  %v11875_v6 = vmul.f32 %v11582_v51, %v17407_v59  ;;  %v11879_v54 = vmul.f32 %v11588_v34, %v17408_v41  ;;  %v11883_v5 = vmul.f32 %v11592_v39, %v17197_v40  ;;  %4714 = vadd.xlane.f32.xlu0 %v4713_v55  ;;  %v17413_v59 = vld [vmem:[#allocation66_spill] sm:$0xff]  ;;  %v17417_v55 = vld [vmem:[#allocation177_spill] sm:$0xff] }
 0x480   :  { %v4628_v44 = vadd.f32 %v4627_v26, %v11846_v32  ;;  %v4737_v35 = vadd.f32 %v11870_v52, %v11859_v14  ;;  %v11890_v38 = vmul.f32 %v11574_v49, %v17411_v10  ;;  %v11894_v17 = vmul.f32 %v11578_v19, %v17413_v59  ;;  %v17419_v32 = vld [vmem:[#allocation178_spill] sm:$0xff]  ;;  %v17424_v14 = vld [vmem:[#allocation93_spill] sm:$0xff] }
 0x481   :  { %17409 = vst [vmem:[#allocation455_spill] sm:$0xff] %v11879_v54  ;;  %17410 = vst [vmem:[#allocation456_spill] sm:$0xff] %v11883_v5  ;;  %v4829_v41 = vadd.f32 %v4828_v0, %v11827_v47  ;;  %v11899_v40 = vmul.f32 %v11597_v24, %v17415_v45  ;;  %v11903_v26 = vmul.f32 %v11582_v51, %v17417_v55  ;;  %v17422_v47 = vld [vmem:[#allocation290_spill] sm:$0xff] }
 0x482   :  { %17412 = vst [vmem:[#allocation457_spill] sm:$0xff] %v11890_v38  ;;  %17414 = vst [vmem:[#allocation458_spill] sm:$0xff] %v11894_v17  ;;  %v11907_v29 = vmul.f32 %v11588_v34, %v17419_v32  ;;  %v4629_v10 = vadd.f32 %v4628_v44, %v11851_v42  ;;  %v4738_v63 = vadd.f32 %v4737_v35, %v11875_v6  ;;  %v17426_v44 = vld [vmem:[#allocation94_spill] sm:$0xff] }
 0x483   :  { %17416 = vst [vmem:[#allocation459_spill] sm:$0xff] %v11899_v40  ;;  %17418 = vst [vmem:[#allocation460_spill] sm:$0xff] %v11903_v26  ;;  %v11913_v59 = vmul.f32 %v11592_v39, %v17158_v60  ;;  %v4723_v0 = vadd.f32 %v11894_v17, %v11890_v38  ;;  %v4830_v45 = vadd.f32 %v4829_v41, %v11838_v36  ;;  %v17428_v17 = vld [vmem:[#allocation205_spill] sm:$0xff] }
 0x484   :  { %17420 = vst [vmem:[#allocation461_spill] sm:$0xff] %v11907_v29  ;;  %v11920_v55 = vmul.f32 %v11597_v24, %v17422_v47  ;;  %v11924_v32 = vmul.f32 %v11778_v28, %v17424_v14  ;;  %v11928_v35 = vmul.f32 %v11782_v43, %v17426_v44  ;;  %v4630_v60 = vadd.f32 %v4629_v10, %v11855_v12  ;;  %v17429_v47 = vld [vmem:[#allocation206_spill] sm:$0xff]  ;;  %v17432_v44 = vld [vmem:[#allocation89_spill] sm:$0xff] }
 0x485   :  { %17421 = vst [vmem:[#allocation462_spill] sm:$0xff] %v11913_v59  ;;  %v4739_v42 = vadd.f32 %v4738_v63, %v11879_v54  ;;  %v4724_v38 = vadd.f32 %v4723_v0, %v11903_v26  ;;  %v11935_v41 = vmul.f32 %v11786_v11, %v17428_v17  ;;  %4831 = vadd.xlane.f32.xlu1 %v4830_v45  ;;  %v17433_v12 = vld [vmem:[#allocation90_spill] sm:$0xff] }
 0x486   :  { %17423 = vst [vmem:[#allocation463_spill] sm:$0xff] %v11920_v55  ;;  %17425 = vst [vmem:[#allocation464_spill] sm:$0xff] %v11924_v32  ;;  %v11939_v36 = vmul.f32 %v11792_v13, %v17429_v47  ;;  %v11943_v14 = vmul.f32 %v11796_v56, %v17200_v27  ;;  %v4833_v10 = vadd.f32 %v11928_v35, %v11924_v32  ;;  %v17434_v26 = vld [vmem:[#allocation318_spill] sm:$0xff] }
 0x487   :  { %17427 = vst [vmem:[#allocation465_spill] sm:$0xff] %v11928_v35  ;;  %v11949_v63 = vmul.f32 %v11778_v28, %v17432_v44  ;;  %v4631_v0 = vadd.f32 %v4630_v60, %v11864_v58  ;;  %v4740_v17 = vadd.f32 %v4739_v42, %v11883_v5  ;;  %v4725_v45 = vadd.f32 %v4724_v38, %v11907_v29  ;;  %v17436_v35 = vld [vmem:[#allocation201_spill] sm:$0xff]  ;;  %v17438_v54 = vld [vmem:[#allocation202_spill] sm:$0xff] }
 0x488   :  { %17430 = vst [vmem:[#allocation466_spill] sm:$0xff] %v11939_v36  ;;  %17431 = vst [vmem:[#allocation467_spill] sm:$0xff] %v11943_v14  ;;  %v11956_v47 = vmul.f32 %v11782_v43, %v17433_v12  ;;  %v11960_v27 = vmul.f32 %v11801_v53, %v17434_v26  ;;  %v4834_v32 = vadd.f32 %v4833_v10, %v11935_v41  ;;  %v17446_v29 = vld [vmem:[#allocation321_spill] sm:$0xff] }
 0x489   :  { %v11965_v44 = vmul.f32 %v11786_v11, %v17436_v35  ;;  %v11969_v60 = vmul.f32 %v11792_v13, %v17438_v54  ;;  %4632 = vadd.xlane.f32.xlu0 %v4631_v0  ;;  %v4741_v42 = vadd.f32 %v4740_v17, %v11899_v40  ;;  %v4726_v38 = vadd.f32 %v4725_v45, %v11913_v59  ;;  %v17440_v35 = vld [vmem:[#allocation314_spill] sm:$0xff]  ;;  %v17442_v54 = vld [vmem:[#allocation97_spill] sm:$0xff] }
 0x48a   :  { %17435 = vst [vmem:[#allocation468_spill] sm:$0xff] %v11960_v27  ;;  %v11975_v12 = vmul.f32 %v11796_v56, %v17194_v16  ;;  %v4819_v10 = vadd.f32 %v11956_v47, %v11949_v63  ;;  %v4835_v26 = vadd.f32 %v4834_v32, %v11939_v36  ;;  %v11982_v58 = vmul.f32 %v11801_v53, %v17440_v35  ;;  %v17443_v17 = vld [vmem:[#allocation98_spill] sm:$0xff]  ;;  %v17444_v59 = vld [vmem:[#allocation209_spill] sm:$0xff] }
 0x48b   :  { %17437 = vst [vmem:[#allocation469_spill] sm:$0xff] %v11965_v44  ;;  %17439 = vst [vmem:[#allocation470_spill] sm:$0xff] %v11969_v60  ;;  %v11986_v0 = vmul.f32 %v11778_v28, %v17442_v54  ;;  %v11990_v45 = vmul.f32 %v11782_v43, %v17443_v17  ;;  %4742 = vadd.xlane.f32.xlu1 %v4741_v42  ;;  %v4727_v16 = vadd.f32 %v4726_v38, %v11920_v55  ;;  %v17445_v36 = vld [vmem:[#allocation210_spill] sm:$0xff]  ;;  %v17448_v38 = vld [vmem:[#allocation71_spill] sm:$0xff] }
 0x48c   :  { %17441 = vst [vmem:[#allocation471_spill] sm:$0xff] %v11982_v58  ;;  %v4820_v40 = vadd.f32 %v4819_v10, %v11965_v44  ;;  %v11996_v32 = vmul.f32 %v11786_v11, %v17444_v59  ;;  %v12000_v35 = vmul.f32 %v11792_v13, %v17445_v36  ;;  %v4836_v54 = vadd.f32 %v4835_v26, %v11943_v14  ;;  %v17449_v17 = vld [vmem:[#allocation322_spill] sm:$0xff]  ;;  %v17451_v55 = vld [vmem:[#allocation72_spill] sm:$0xff] }
 0x48d   :  { %v12005_v5 = vmul.f32 %v11796_v56, %v17446_v29  ;;  %v4847_v42 = vadd.f32 %v11990_v45, %v11986_v0  ;;  %v12011_v10 = vmul.f32 %v11574_v49, %v17448_v38  ;;  %4728 = vadd.xlane.f32.xlu0 %v4727_v16  ;;  %v12016_v36 = vmul.f32 %v11801_v53, %v17449_v17  ;;  %v17452_v29 = vld [vmem:[#allocation183_spill] sm:$0xff]  ;;  %v17453_v49 = vld [vmem:[#allocation184_spill] sm:$0xff] }
 0x48e   :  { %v4821_v59 = vadd.f32 %v4820_v40, %v11969_v60  ;;  %v12020_v26 = vmul.f32 %v11578_v19, %v17451_v55  ;;  %v12024_v14 = vmul.f32 %v11582_v51, %v17452_v29  ;;  %v4837_v44 = vadd.f32 %v4836_v54, %v11960_v27  ;;  %v17455_v40 = vld [vmem:[#allocation295_spill] sm:$0xff]  ;;  %v17469_v27 = vld [vmem:[#allocation320_spill] sm:$0xff] }
 0x48f   :  { %17447 = vst [vmem:[#allocation472_spill] sm:$0xff] %v12005_v5  ;;  %17450 = vst [vmem:[#allocation473_spill] sm:$0xff] %v12016_v36  ;;  %v4848_v38 = vadd.f32 %v4847_v42, %v11996_v32  ;;  %v12030_v16 = vmul.f32 %v11588_v34, %v17453_v49  ;;  %v12034_v17 = vmul.f32 %v11592_v39, %v17455_v40  ;;  %v17457_v51 = vld [vmem:[#allocation95_spill] sm:$0xff]  ;;  %v17458_v49 = vld [vmem:[#allocation296_spill] sm:$0xff] }
 0x490   :  { %v4822_v60 = vadd.f32 %v4821_v59, %v11975_v12  ;;  %v4744_v55 = vadd.f32 %v12020_v26, %v12011_v10  ;;  %v4056_v29 = vmax.f32 %v11420_v37, %v11431_v1  ;;  %v12043_v54 = vmul.f32 %v11778_v28, %v17457_v51  ;;  %4838 = vadd.xlane.f32.xlu1 %v4837_v44  ;;  %v17460_v40 = vld [vmem:[#allocation96_spill] sm:$0xff]  ;;  %v17461_v39 = vld [vmem:[#allocation207_spill] sm:$0xff] }
 0x491   :  { %17454 = vst [vmem:[#allocation474_spill] sm:$0xff] %v12030_v16  ;;  %17456 = vst [vmem:[#allocation475_spill] sm:$0xff] %v12034_v17  ;;  %v4849_v42 = vadd.f32 %v4848_v38, %v12000_v35  ;;  %v12048_v34 = vmul.f32 %v11597_v24, %v17458_v49  ;;  %v12052_v59 = vmul.f32 %v11782_v43, %v17460_v40  ;;  %v17462_v51 = vld [vmem:[#allocation208_spill] sm:$0xff]  ;;  %v17464_v24 = vld [vmem:[#allocation319_spill] sm:$0xff] }
 0x492   :  { %v12056_v19 = vmul.f32 %v11786_v11, %v17461_v39  ;;  %v4823_v1 = vadd.f32 %v4822_v60, %v11982_v58  ;;  %v4745_v37 = vadd.f32 %v4744_v55, %v12024_v14  ;;  %v4057_v44 = vmax.f32 %v4056_v29, %v11436_v23  ;;  %v17465_v29 = vld [vmem:[#allocation99_spill] sm:$0xff] }
 0x493   :  { %17459 = vst [vmem:[#allocation476_spill] sm:$0xff] %v12048_v34  ;;  %v12063_v38 = vmul.f32 %v11792_v13, %v17462_v51  ;;  %v4850_v49 = vadd.f32 %v4849_v42, %v12005_v5  ;;  %v12068_v40 = vmul.f32 %v11796_v56, %v17464_v24  ;;  %v4840_v39 = vadd.f32 %v12052_v59, %v12043_v54  ;;  %v17467_v42 = vld [vmem:[#allocation100_spill] sm:$0xff] }
 0x494   :  { %v4070_v60 = vmax.f32 %v11330_v18, %v11334_v33  ;;  %4824 = vadd.xlane.f32.xlu0 %v4823_v1  ;;  %v4746_v55 = vadd.f32 %v4745_v37, %v12030_v16  ;;  %v4058_v23 = vmax.f32 %v4057_v44, %v11440_v50  ;;  %v12078_v51 = vmul.f32 %v11778_v28, %v17465_v29  ;;  %v17471_v33 = vld [vmem:[#allocation365_spill] sm:$0xff]  ;;  %v17472_v44 = vld [vmem:[#allocation211_spill] sm:$0xff]  ;;  %v17491_v16 = vld [vmem:[#allocation398_spill] sm:$0xff] }
 0x495   :  { %17463 = vst [vmem:[#allocation477_spill] sm:$0xff] %v12063_v38  ;;  %v12082_v58 = vmul.f32 %v11782_v43, %v17467_v42  ;;  %v4851_v24 = vadd.f32 %v4850_v49, %v12016_v36  ;;  %v12087_v5 = vmul.f32 %v11801_v53, %v17469_v27  ;;  %v4841_v18 = vadd.f32 %v4840_v39, %v12056_v19  ;;  %v17474_v42 = vld [vmem:[#allocation212_spill] sm:$0xff]  ;;  %v17475_v27 = vld [vmem:[#allocation367_spill] sm:$0xff] }
 0x496   :  { %17466 = vst [vmem:[#allocation478_spill] sm:$0xff] %v12078_v51  ;;  %v4071_v1 = vmax.f32 %v4070_v60, %v17471_v33  ;;  %v4747_v50 = vadd.f32 %v4746_v55, %v12034_v17  ;;  %v4059_v37 = vmax.f32 %v4058_v23, %v11444_v2  ;;  %v12095_v29 = vmul.f32 %v11786_v11, %v17472_v44  ;;  %v17476_v39 = vld [vmem:[#allocation323_spill] sm:$0xff]  ;;  %v17479_v44 = vld [vmem:[#allocation381_spill] sm:$0xff]  ;;  %v17485_v17 = vld [vmem:[#allocation386_spill] sm:$0xff] }
 0x497   :  { %17468 = vst [vmem:[#allocation479_spill] sm:$0xff] %v12082_v58  ;;  %17470 = vst [vmem:[#allocation480_spill] sm:$0xff] %v12087_v5  ;;  %v12099_v43 = vmul.f32 %v11792_v13, %v17474_v42  ;;  %4852 = vadd.xlane.f32.xlu1 %v4851_v24  ;;  %v4842_v49 = vadd.f32 %v4841_v18, %v12063_v38  ;;  %v12105_v60 = vmul.f32 %v11796_v56, %v17476_v39  ;;  %v17478_v23 = vld [vmem:[#allocation387_spill] sm:$0xff]  ;;  %v17481_v13 = vld [vmem:[#allocation370_spill] sm:$0xff] }
 0x498   :  { %17473 = vst [vmem:[#allocation365_spill] sm:$0xff] %v12095_v29  ;;  %v4072_v28 = vmax.f32 %v4071_v1, %v17475_v27  ;;  %v4854_v2 = vadd.f32 %v12082_v58, %v12078_v51  ;;  %v4748_v55 = vadd.f32 %v4747_v50, %v12048_v34  ;;  %v4060_v33 = vmax.f32 %v4059_v37, %v17478_v23  ;;  %v17480_v11 = vld [vmem:[#allocation379_spill] sm:$0xff]  ;;  %v17482_v24 = vld [vmem:[#allocation369_spill] sm:$0xff]  ;;  %v17483_v27 = vld [vmem:[#allocation368_spill] sm:$0xff] }
 0x499   :  { %17477 = vst [vmem:[#allocation367_spill] sm:$0xff] %v12105_v60  ;;  %v4166_v42 = vmax.f32 %v17480_v11, %v17479_v44  ;;  %v4049_v36 = vmax.f32 %v17482_v24, %v17481_v13  ;;  %v4843_v18 = vadd.f32 %v4842_v49, %v12068_v40  ;;  %v17484_v56 = vld [vmem:[#allocation388_spill] sm:$0xff]  ;;  %v17486_v51 = vld [vmem:[#allocation382_spill] sm:$0xff]  ;;  %v17488_v23 = vld [vmem:[#allocation393_spill] sm:$0xff] }
 0x49a   :  { %v4073_v1 = vmax.f32 %v4072_v28, %v17483_v27  ;;  %v4855_v39 = vadd.f32 %v4854_v2, %v12095_v29  ;;  %v4180_v38 = vmax.f32 %v17485_v17, %v17484_v56  ;;  %4749 = vadd.xlane.f32.xlu0 %v4748_v55  ;;  %v17487_v58 = vld [vmem:[#allocation372_spill] sm:$0xff]  ;;  %v17490_v44 = vld [vmem:[#allocation399_spill] sm:$0xff]  ;;  %v17493_v27 = vld [vmem:[#allocation389_spill] sm:$0xff] }
 0x49b   :  { %v4167_v50 = vmax.f32 %v4166_v42, %v17486_v51  ;;  %v4050_v37 = vmax.f32 %v4049_v36, %v17487_v58  ;;  %v17489_v34 = vld [vmem:[#allocation392_spill] sm:$0xff]  ;;  %v4084_v13 = vmax.f32 %v17491_v16, %v17490_v44  ;;  %4061 = vmax.xlane.f32.xlu1 %v4060_v33  ;;  %v4844_v49 = vadd.f32 %v4843_v18, %v12087_v5  ;;  %v17492_v28 = vld [vmem:[#allocation371_spill] sm:$0xff]  ;;  %v17495_v51 = vld [vmem:[#allocation373_spill] sm:$0xff] }
 0x49c   :  { %v4063_v11 = vmax.f32 %v17489_v34, %v17488_v23  ;;  %v4074_v24 = vmax.f32 %v4073_v1, %v17492_v28  ;;  %v4856_v2 = vadd.f32 %v4855_v39, %v12099_v43  ;;  %v4181_v56 = vmax.f32 %v4180_v38, %v17493_v27  ;;  %v17494_v17 = vld [vmem:[#allocation383_spill] sm:$0xff]  ;;  %v17497_v29 = vld [vmem:[#allocation401_spill] sm:$0xff]  ;;  %v17498_v16 = vld [vmem:[#allocation390_spill] sm:$0xff] }
 0x49d   :  { %v4168_v55 = vmax.f32 %v4167_v50, %v17494_v17  ;;  %v4051_v42 = vmax.f32 %v4050_v37, %v17495_v51  ;;  %v17496_v58 = vld [vmem:[#allocation395_spill] sm:$0xff]  ;;  %v4085_v34 = vmax.f32 %v4084_v13, %v17497_v29  ;;  %v17499_v44 = vld [vmem:[#allocation405_spill] sm:$0xff]  ;;  %v17500_v18 = vld [vmem:[#allocation404_spill] sm:$0xff] }
 0x49e   :  { %v4064_v36 = vmax.f32 %v4063_v11, %v17496_v58  ;;  %v4857_v23 = vadd.f32 %v4856_v2, %v12105_v60  ;;  %v4182_v33 = vmax.f32 %v4181_v56, %v17498_v16  ;;  %v4159_v5 = vmax.f32 %v17500_v18, %v17499_v44  ;;  %v17501_v1 = vld [vmem:[#allocation417_spill] sm:$0xff]  ;;  %v17502_v28 = vld [vmem:[#allocation416_spill] sm:$0xff]  ;;  %4845 = vadd.xlane.f32.xlu0 %v4844_v49  ;;  %v17505_v11 = vld [vmem:[#allocation374_spill] sm:$0xff] }
 0x49f   :  { %v4276_v39 = vmax.f32 %v17502_v28, %v17501_v1  ;;  %v17503_v38 = vld [vmem:[#allocation325_spill] sm:$0xff]  ;;  %v17504_v37 = vld [vmem:[#allocation384_spill] sm:$0xff]  ;;  %v4052_v17 = vmax.f32 %v4051_v42, %v17505_v11  ;;  %4075 = vmax.xlane.f32.xlu1 %v4074_v24  ;;  %v17507_v2 = vld [vmem:[#allocation391_spill] sm:$0xff] }
 0x4a0   :  { %v12142_v50 = vmul.f32 %v11801_v53, %v17503_v38  ;;  %v4169_v27 = vmax.f32 %v4168_v55, %v17504_v37  ;;  %v17506_v29 = vld [vmem:[#allocation396_spill] sm:$0xff]  ;;  %v4183_v56 = vmax.f32 %v4182_v33, %v17507_v2  ;;  %v17508_v51 = vld [vmem:[#allocation402_spill] sm:$0xff]  ;;  %v17509_v16 = vld [vmem:[#allocation407_spill] sm:$0xff] }
 0x4a1   :  { %v4065_v13 = vmax.f32 %v4064_v36, %v17506_v29  ;;  %v4086_v58 = vmax.f32 %v4085_v34, %v17508_v51  ;;  %v4160_v44 = vmax.f32 %v4159_v5, %v17509_v16  ;;  %v17510_v18 = vld [vmem:[#allocation419_spill] sm:$0xff]  ;;  %v17511_v28 = vld [vmem:[#allocation385_spill] sm:$0xff]  ;;  %v17513_v55 = vld [vmem:[#allocation394_spill] sm:$0xff] }
 0x4a2   :  { %v4277_v1 = vmax.f32 %v4276_v39, %v17510_v18  ;;  %v4858_v49 = vadd.f32 %v4857_v23, %v12142_v50  ;;  %v4170_v38 = vmax.f32 %v4169_v27, %v17511_v28  ;;  %v17512_v53 = vld [vmem:[#allocation397_spill] sm:$0xff]  ;;  %v4184_v37 = vmax.f32 %v4183_v56, %v17513_v55  ;;  %v17514_v42 = vld [vmem:[#allocation408_spill] sm:$0xff]  ;;  %v17517_v33 = vld [vmem:[#allocation422_spill] sm:$0xff] }
 0x4a3   :  { %v4066_v60 = vmax.f32 %v4065_v13, %v17512_v53  ;;  %v4161_v11 = vmax.f32 %v4160_v44, %v17514_v42  ;;  %v17515_v36 = vld [vmem:[#allocation420_spill] sm:$0xff]  ;;  %v4077_v23 = vmax.f32 %v11686_v48, %v11690_v7  ;;  %v17521_v13 = vld [vmem:[#allocation403_spill] sm:$0xff]  ;;  %v17522_v16 = vld [vmem:[#allocation425_spill] sm:$0xff]  ;;  %v4290_v18 = vmax.f32 %v11720_v25, %v11724_v61 }
 0x4a4   :  { %v4278_v24 = vmax.f32 %v4277_v1, %v17515_v36  ;;  %v17516_v29 = vld [vmem:[#allocation424_spill] sm:$0xff]  ;;  %4859 = vadd.xlane.f32.xlu0 %v4858_v49  ;;  %4171 = vmax.xlane.f32.xlu1 %v4170_v38  ;;  %v4087_v56 = vmax.f32 %v4086_v58, %v17521_v13  ;;  %v17523_v49 = vld [vmem:[#allocation433_spill] sm:$0xff]  ;;  %v4386_v7 = vmax.f32 %v11805_v15, %v11809_v3  ;;  %v17526_v58 = vld [vmem:[#allocation426_spill] sm:$0xff] }
 0x4a5   :  { %v4173_v2 = vmax.f32 %v17517_v33, %v17516_v29  ;;  %v17518_v34 = vld [vmem:[#allocation400_spill] sm:$0xff]  ;;  %v17524_v48 = vld [vmem:[#allocation409_spill] sm:$0xff]  ;;  %v4291_v42 = vmax.f32 %v4290_v18, %v11731_v57  ;;  %v17527_v25 = vld [vmem:[#allocation430_spill] sm:$0xff] }
 0x4a6   :  { %v4067_v5 = vmax.f32 %v4066_v60, %v17518_v34  ;;  %v17519_v39 = vld [vmem:[#allocation428_spill] sm:$0xff]  ;;  %v4078_v60 = vmax.f32 %v4077_v23, %v17523_v49  ;;  %v4162_v38 = vmax.f32 %v4161_v11, %v17524_v48  ;;  %v4187_v11 = vmax.f32 %v11833_v4, %v11842_v62  ;;  %v17530_v29 = vld [vmem:[#allocation431_spill] sm:$0xff]  ;;  %v17537_v4 = vld [vmem:[#allocation418_spill] sm:$0xff] }
 0x4a7   :  { %v4194_v51 = vmax.f32 %v17519_v39, %v11666_v21  ;;  %v17520_v53 = vld [vmem:[#allocation380_spill] sm:$0xff]  ;;  %v4174_v44 = vmax.f32 %v4173_v2, %v17522_v16  ;;  %v4269_v21 = vmax.f32 %v11745_v22, %v11752_v20  ;;  %v4387_v20 = vmax.f32 %v4386_v7, %v11818_v46  ;;  %v17528_v22 = vld [vmem:[#allocation427_spill] sm:$0xff]  ;;  %v17531_v2 = vld [vmem:[#allocation434_spill] sm:$0xff] }
 0x4a8   :  { %v4053_v27 = vmax.f32 %v4052_v17, %v17520_v53  ;;  %v17525_v17 = vld [vmem:[#allocation421_spill] sm:$0xff]  ;;  %4185 = vmax.xlane.f32.xlu1 %v4184_v37  ;;  %v4292_v3 = vmax.f32 %v4291_v42, %v11735_v31  ;;  %v17534_v46 = vld [vmem:[#allocation406_spill] sm:$0xff]  ;;  %v17535_v23 = vld [vmem:[#allocation436_spill] sm:$0xff]  ;;  %v4163_v62 = vmax.f32 %v4162_v38, %v17537_v4 }
 0x4a9   :  { %v4195_v1 = vmax.f32 %v4194_v51, %v11671_v30  ;;  %v4279_v28 = vmax.f32 %v4278_v24, %v17525_v17  ;;  %v4175_v55 = vmax.f32 %v4174_v44, %v17526_v58  ;;  %v4079_v30 = vmax.f32 %v4078_v60, %v11703_v8  ;;  %v17529_v24 = vld [vmem:[#allocation453_spill] sm:$0xff]  ;;  %v17532_v8 = vld [vmem:[#allocation438_spill] sm:$0xff]  ;;  %v17541_v60 = vld [vmem:[#allocation432_spill] sm:$0xff] }
 0x4aa   :  { %4054 = vmax.xlane.f32.xlu0 %v4053_v27  ;;  %v4270_v36 = vmax.f32 %v4269_v21, %v11761_v9  ;;  %v4297_v57 = vmax.f32 %v17529_v24, %v11870_v52  ;;  %v17533_v9 = vld [vmem:[#allocation447_spill] sm:$0xff]  ;;  %v4088_v37 = vmax.f32 %v4087_v56, %v17534_v46  ;;  %v4293_v53 = vmax.f32 %v4292_v3, %v17535_v23  ;;  %v17536_v27 = vld [vmem:[#allocation450_spill] sm:$0xff]  ;;  %v17539_v44 = vld [vmem:[#allocation429_spill] sm:$0xff] }
 0x4ab   :  { %v4196_v61 = vmax.f32 %v4195_v1, %v17527_v25  ;;  %v4176_v15 = vmax.f32 %v4175_v55, %v17528_v22  ;;  %v4080_v34 = vmax.f32 %v4079_v30, %v17531_v2  ;;  %v4388_v51 = vmax.f32 %v4387_v20, %v17533_v9  ;;  %v17538_v52 = vld [vmem:[#allocation423_spill] sm:$0xff]  ;;  %v17544_v58 = vld [vmem:[#allocation458_spill] sm:$0xff]  ;;  %v17545_v55 = vld [vmem:[#allocation457_spill] sm:$0xff] }
 0x4ac   :  { %v4271_v39 = vmax.f32 %v4270_v36, %v17532_v8  ;;  %v4188_v31 = vmax.f32 %v4187_v11, %v17536_v27  ;;  %v4298_v13 = vmax.f32 %v4297_v57, %v11875_v6  ;;  %v4280_v16 = vmax.f32 %v4279_v28, %v17538_v52  ;;  %v17540_v1 = vld [vmem:[#allocation439_spill] sm:$0xff]  ;;  %4089 = vmax.xlane.f32.xlu1 %v4088_v37  ;;  %v17547_v38 = vld [vmem:[#allocation448_spill] sm:$0xff]  ;;  %v17548_v28 = vld [vmem:[#allocation465_spill] sm:$0xff] }
 0x4ad   :  { %v4197_v33 = vmax.f32 %v4196_v61, %v17530_v29  ;;  %v4177_v18 = vmax.f32 %v4176_v15, %v17539_v44  ;;  %v17542_v56 = vld [vmem:[#allocation451_spill] sm:$0xff]  ;;  %v4283_v6 = vmax.f32 %v17545_v55, %v17544_v58  ;;  %v12210_v25 = vmax.f32 %v4388_v51, %v17547_v38  ;;  %v17549_v61 = vld [vmem:[#allocation464_spill] sm:$0xff]  ;;  %v17550_v20 = vld [vmem:[#allocation437_spill] sm:$0xff] }
 0x4ae   :  { %4068 = vmax.xlane.f32.xlu0 %v4067_v5  ;;  %v12201_v49 = vmax.f32 %v4271_v39, %v17540_v1  ;;  %v4189_v7 = vmax.f32 %v4188_v31, %v17542_v56  ;;  %v17543_v48 = vld [vmem:[#allocation455_spill] sm:$0xff]  ;;  %v4393_v30 = vmax.f32 %v17549_v61, %v17548_v28  ;;  %v4379_v36 = vmax.f32 %v11949_v63, %v11956_v47  ;;  %v17551_v15 = vld [vmem:[#allocation446_spill] sm:$0xff]  ;;  %v17552_v11 = vld [vmem:[#allocation460_spill] sm:$0xff] }
 0x4af   :  { %v4198_v21 = vmax.f32 %v4197_v33, %v17541_v60  ;;  %v4299_v17 = vmax.f32 %v4298_v13, %v17543_v48  ;;  %v17546_v5 = vld [vmem:[#allocation435_spill] sm:$0xff]  ;;  %v4294_v22 = vmax.f32 %v4293_v53, %v17550_v20  ;;  %v4284_v24 = vmax.f32 %v4283_v6, %v17552_v11  ;;  %v17553_v33 = vld [vmem:[#allocation469_spill] sm:$0xff]  ;;  %v17554_v63 = vld [vmem:[#allocation452_spill] sm:$0xff] }
 0x4b0   :  { %v4081_v42 = vmax.f32 %v4080_v34, %v17546_v5  ;;  %v4273_v3 = vmax.f32 %v12201_v49, %v17551_v15  ;;  %v4407_v57 = vmax.f32 %v11986_v0, %v11990_v45  ;;  %v4394_v29 = vmax.f32 %v4393_v30, %v11935_v41  ;;  %4281 = vmax.xlane.f32.xlu1 %v4280_v16  ;;  %v17555_v39 = vld [vmem:[#allocation456_spill] sm:$0xff]  ;;  %v17556_v51 = vld [vmem:[#allocation461_spill] sm:$0xff]  ;;  %v17557_v41 = vld [vmem:[#allocation466_spill] sm:$0xff] }
 0x4b1   :  { %v4380_v2 = vmax.f32 %v4379_v36, %v17553_v33  ;;  %v4304_v34 = vmax.f32 %v12011_v10, %v12020_v26  ;;  %v4400_v47 = vmax.f32 %v12043_v54, %v12052_v59  ;;  %v12229_v8 = vmax.f32 %v4189_v7, %v17554_v63  ;;  %v17558_v37 = vld [vmem:[#allocation470_spill] sm:$0xff]  ;;  %v17560_v27 = vld [vmem:[#allocation348_spill] sm:$0xff]  ;;  %v17563_v4 = vld [vmem:[#allocation349_spill] sm:$0xff] }
 0x4b2   :  { %4164 = vmax.xlane.f32.xlu0 %v4163_v62  ;;  %v12232_v9 = vmax.f32 %v4299_v17, %v17555_v39  ;;  %v4285_v0 = vmax.f32 %v4284_v24, %v17556_v51  ;;  %v4408_v45 = vmax.f32 %v4407_v57, %v11996_v32  ;;  %v4395_v46 = vmax.f32 %v4394_v29, %v17557_v41  ;;  %v17559_v54 = vld [vmem:[#allocation462_spill] sm:$0xff]  ;;  %v17565_v62 = vld [vmem:[#allocation467_spill] sm:$0xff]  ;;  %v17567_v44 = vld [vmem:[#allocation477_spill] sm:$0xff] }
 0x4b3   :  { %v4381_v23 = vmax.f32 %v4380_v2, %v17558_v37  ;;  %v4305_v10 = vmax.f32 %v4304_v34, %v12024_v14  ;;  %v4401_v26 = vmax.f32 %v4400_v47, %v12056_v19  ;;  %v17561_v31 = vld [vmem:[#allocation354_spill] sm:$0xff]  ;;  %v17570_v7 = vld [vmem:[#allocation472_spill] sm:$0xff]  ;;  %v17574_v55 = vld [vmem:[#allocation475_spill] sm:$0xff] }
 0x4b4   :  { %v12241_v59 = vmax.f32 %v4285_v0, %v17559_v54  ;;  %v4409_v53 = vmax.f32 %v4408_v45, %v12000_v35  ;;  %v12246_v13 = vrot.slane %v17561_v31, %v17560_v27  ;;  %v12250_v32 = vrot.slane %v17561_v31, %v17563_v4  ;;  %v17566_v19 = vld [vmem:[#allocation474_spill] sm:$0xff]  ;;  %4199 = vmax.xlane.f32.xlu1 %v4198_v21  ;;  %v17568_v35 = vld [vmem:[#allocation449_spill] sm:$0xff]  ;;  %v17575_v5 = vld [vmem:[#allocation351_spill] sm:$0xff] }
 0x4b5   :  { %v12253_v52 = vmax.f32 %v4395_v46, %v17565_v62  ;;  %v12256_v14 = vmax.f32 %v4381_v23, %v11975_v12  ;;  %v4306_v16 = vmax.f32 %v4305_v10, %v17566_v19  ;;  %v4402_v1 = vmax.f32 %v4401_v26, %v17567_v44  ;;  %v17569_v60 = vld [vmem:[#allocation454_spill] sm:$0xff]  ;;  %v17573_v12 = vld [vmem:[#allocation459_spill] sm:$0xff]  ;;  %v17578_v61 = vld [vmem:[#allocation468_spill] sm:$0xff] }
 0x4b6   :  { %17562 = vst [vmem:[#allocation387_spill] sm:$0xff] %v12246_v13  ;;  %17564 = vst [vmem:[#allocation381_spill] sm:$0xff] %v12250_v32  ;;  %4178 = vmax.xlane.f32.xlu0 %v4177_v18  ;;  %v4390_v49 = vmax.f32 %v12210_v25, %v17568_v35  ;;  %v4191_v56 = vmax.f32 %v12229_v8, %v17569_v60  ;;  %v12265_v48 = vmax.f32 %v4409_v53, %v17570_v7  ;;  %v17571_v18 = vld [vmem:[#allocation350_spill] sm:$0xff]  ;;  %v17577_v25 = vld [vmem:[#allocation463_spill] sm:$0xff] }
 0x4b7   :  { %v12269_v17 = vrot.slane %v17561_v31, %v17571_v18  ;;  %v4301_v58 = vmax.f32 %v12232_v9, %v17573_v12  ;;  %v12274_v6 = vmax.f32 %v4306_v16, %v17574_v55  ;;  %v12277_v21 = vmax.f32 %v4402_v1, %v12068_v40  ;;  %v17579_v36 = vld [vmem:[#allocation352_spill] sm:$0xff]  ;;  %v17581_v15 = vld [vmem:[#allocation19_spill] sm:$0xff]  ;;  %v17584_v57 = vld [vmem:[#allocation473_spill] sm:$0xff] }
 0x4b8   :  { %v12281_v38 = vrot.slane %v17561_v31, %v17575_v5  ;;  %v4287_v28 = vmax.f32 %v12241_v59, %v17577_v25  ;;  %v4397_v30 = vmax.f32 %v12253_v52, %v17578_v61  ;;  %v12289_v20 = vrot.slane %v17561_v31, %v17579_v36  ;;  %v17583_v40 = vld [vmem:[#allocation471_spill] sm:$0xff]  ;;  %v17585_v33 = vld [vmem:[#allocation353_spill] sm:$0xff]  ;;  %v17587_v34 = vld [vmem:[#allocation20_spill] sm:$0xff]  ;;  %4295 = vmax.xlane.f32.xlu1 %v4294_v22 }
 0x4b9   :  { %17572 = vst [vmem:[#allocation379_spill] sm:$0xff] %v12269_v17  ;;  %v12293_v11 = vmul.f32 %v12246_v13, %v17581_v15  ;;  %v12301_v2 = vrot.slane %v17561_v31, %v17585_v33  ;;  %v12305_v47 = vmul.f32 %v12250_v32, %v17587_v34  ;;  %v17589_v63 = vld [vmem:[#allocation476_spill] sm:$0xff]  ;;  %v17591_v9 = vld [vmem:[#allocation131_spill] sm:$0xff]  ;;  %v17594_v45 = vld [vmem:[#allocation478_spill] sm:$0xff] }
 0x4ba   :  { %17576 = vst [vmem:[#allocation370_spill] sm:$0xff] %v12281_v38  ;;  %17580 = vst [vmem:[#allocation369_spill] sm:$0xff] %v12289_v20  ;;  %4082 = vmax.xlane.f32.xlu0 %v4081_v42  ;;  %v17590_v39 = vld [vmem:[#allocation480_spill] sm:$0xff]  ;;  %v12313_v51 = vmul.f32 %v12269_v17, %v17591_v9  ;;  %v17593_v0 = vld [vmem:[#allocation479_spill] sm:$0xff] }
 0x4bb   :  { %17582 = vst [vmem:[#allocation368_spill] sm:$0xff] %v12293_v11  ;;  %17586 = vst [vmem:[#allocation388_spill] sm:$0xff] %v12301_v2  ;;  %v4414_v41 = vmax.f32 %v17594_v45, %v17593_v0  ;;  %v17595_v46 = vld [vmem:[#allocation132_spill] sm:$0xff]  ;;  %v4544_v22 = vadd.f32 %v12305_v47, %v12293_v11  ;;  %v17597_v23 = vld [vmem:[#allocation21_spill] sm:$0xff] }
 0x4bc   :  { %17588 = vst [vmem:[#allocation386_spill] sm:$0xff] %v12305_v47  ;;  %17592 = vst [vmem:[#allocation382_spill] sm:$0xff] %v12313_v51  ;;  %v12319_v37 = vmul.f32 %v12281_v38, %v17595_v46  ;;  %v12325_v10 = vmul.f32 %v12246_v13, %v17597_v23  ;;  %v17599_v26 = vld [vmem:[#allocation22_spill] sm:$0xff]  ;;  %v17601_v59 = vld [vmem:[#allocation243_spill] sm:$0xff]  ;;  %4391 = vmax.xlane.f32.xlu1 %v4390_v49 }
 0x4bd   :  { %v12329_v54 = vmul.f32 %v12250_v32, %v17599_v26  ;;  %v12333_v53 = vmul.f32 %v12289_v20, %v17601_v59  ;;  %v17603_v31 = vld [vmem:[#allocation365_spill] sm:$0xff]  ;;  %v17606_v16 = vld [vmem:[#allocation134_spill] sm:$0xff]  ;;  %v4545_v1 = vadd.f32 %v4544_v22, %v12313_v51  ;;  %v17611_v25 = vld [vmem:[#allocation359_spill] sm:$0xff] }
 0x4be   :  { %17596 = vst [vmem:[#allocation372_spill] sm:$0xff] %v12319_v37  ;;  %17598 = vst [vmem:[#allocation393_spill] sm:$0xff] %v12325_v10  ;;  %v4415_v62 = vmax.f32 %v4414_v41, %v17603_v31  ;;  %v17604_v52 = vld [vmem:[#allocation133_spill] sm:$0xff]  ;;  %v12342_v44 = vmul.f32 %v12281_v38, %v17606_v16  ;;  %4274 = vmax.xlane.f32.xlu0 %v4273_v3  ;;  %v17609_v7 = vld [vmem:[#allocation358_spill] sm:$0xff] }
 0x4bf   :  { %17600 = vst [vmem:[#allocation392_spill] sm:$0xff] %v12329_v54  ;;  %17602 = vst [vmem:[#allocation399_spill] sm:$0xff] %v12333_v53  ;;  %v12338_v19 = vmul.f32 %v12269_v17, %v17604_v52  ;;  %v4551_v35 = vadd.f32 %v12329_v54, %v12325_v10  ;;  %v17608_v60 = vld [vmem:[#allocation17_spill] sm:$0xff]  ;;  %v17610_v55 = vld [vmem:[#allocation18_spill] sm:$0xff] }
 0x4c0   :  { %17607 = vst [vmem:[#allocation371_spill] sm:$0xff] %v12342_v44  ;;  %v12349_v12 = vmul.f32 %v17609_v7, %v17608_v60  ;;  %v12353_v61 = vmul.f32 %v17611_v25, %v17610_v55  ;;  %v4416_v0 = vmax.f32 %v4415_v62, %v12099_v43  ;;  %v17612_v45 = vld [vmem:[#allocation129_spill] sm:$0xff]  ;;  %v17613_v41 = vld [vmem:[#allocation360_spill] sm:$0xff]  ;;  %v17614_v3 = vld [vmem:[#allocation130_spill] sm:$0xff]  ;;  %v4546_v7 = vadd.f32 %v4545_v1, %v12319_v37 }
 0x4c1   :  { %17605 = vst [vmem:[#allocation398_spill] sm:$0xff] %v12338_v19  ;;  %v12358_v31 = vmul.f32 %v17613_v41, %v17612_v45  ;;  %v17615_v22 = vld [vmem:[#allocation361_spill] sm:$0xff]  ;;  %v17617_v29 = vld [vmem:[#allocation362_spill] sm:$0xff]  ;;  %v4552_v25 = vadd.f32 %v4551_v35, %v12338_v19  ;;  %v17619_v49 = vld [vmem:[#allocation363_spill] sm:$0xff]  ;;  %4302 = vmax.xlane.f32.xlu1 %v4301_v58 }
 0x4c2   :  { %v12362_v42 = vmul.f32 %v17615_v22, %v17614_v3  ;;  %v17616_v8 = vld [vmem:[#allocation241_spill] sm:$0xff]  ;;  %v17618_v55 = vld [vmem:[#allocation242_spill] sm:$0xff]  ;;  %v4531_v43 = vsel %vm534_vm0, %v12349_v12, 0.0  ;;  %v17620_v62 = vld [vmem:[#allocation244_spill] sm:$0xff]  ;;  %v4532_v1 = vsel %vm534_vm0, %v12353_v61, 0.0  ;;  %4192 = vmax.xlane.f32.xlu0 %v4191_v56  ;;  %v4547_v35 = vadd.f32 %v4546_v7, %v12333_v53 }
 0x4c3   :  { %v12366_v24 = vmul.f32 %v17617_v29, %v17616_v8  ;;  %v12372_v60 = vmul.f32 %v17619_v49, %v17618_v55  ;;  %v12378_v41 = vmul.f32 %v12301_v2, %v17620_v62  ;;  %v17622_v22 = vld [vmem:[#allocation367_spill] sm:$0xff]  ;;  %v17623_v29 = vld [vmem:[#allocation245_spill] sm:$0xff]  ;;  %v17625_v49 = vld [vmem:[#allocation246_spill] sm:$0xff]  ;;  %v4553_v45 = vadd.f32 %v4552_v25, %v12342_v44 }
 0x4c4   :  { %v12381_v3 = vmax.f32 %v4416_v0, %v17622_v22  ;;  %v12385_v8 = vmul.f32 %v12289_v20, %v17623_v29  ;;  %v12392_v55 = vmul.f32 %v12301_v2, %v17625_v49  ;;  %v4533_v16 = vadd.f32 %v4532_v1, %v4531_v43  ;;  %v17627_v29 = vld [vmem:[#allocation25_spill] sm:$0xff]  ;;  %v17629_v56 = vld [vmem:[#allocation26_spill] sm:$0xff]  ;;  %v17636_v59 = vld [vmem:[#allocation364_spill] sm:$0xff] }
 0x4c5   :  { %17621 = vst [vmem:[#allocation389_spill] sm:$0xff] %v12378_v41  ;;  %v4534_v0 = vsel %vm534_vm0, %v12358_v31, 0.0  ;;  %v4536_v22 = vsel %vm534_vm0, %v12362_v42, 0.0  ;;  %v12401_v52 = vmul.f32 %v12246_v13, %v17627_v29  ;;  %v12405_v7 = vmul.f32 %v12250_v32, %v17629_v56  ;;  %v17631_v29 = vld [vmem:[#allocation137_spill] sm:$0xff]  ;;  %v17638_v9 = vld [vmem:[#allocation366_spill] sm:$0xff]  ;;  %4398 = vmax.xlane.f32.xlu1 %v4397_v30  ;;  %v17640_v15 = vld [vmem:[#allocation375_spill] sm:$0xff] }
 0x4c6   :  { %17624 = vst [vmem:[#allocation383_spill] sm:$0xff] %v12385_v8  ;;  %17626 = vst [vmem:[#allocation373_spill] sm:$0xff] %v12392_v55  ;;  %v4535_v25 = vadd.f32 %v4534_v0, %v4533_v16  ;;  %v4538_v58 = vsel %vm534_vm0, %v12366_v24, 0.0  ;;  %v4540_v43 = vsel %vm534_vm0, %v12372_v60, 0.0  ;;  %v4548_v1 = vadd.f32 %v4547_v35, %v12378_v41  ;;  %4288 = vmax.xlane.f32.xlu0 %v4287_v28  ;;  %v17633_v16 = vld [vmem:[#allocation138_spill] sm:$0xff]  ;;  %v17635_v62 = vld [vmem:[#allocation45_spill] sm:$0xff] }
 0x4c7   :  { %17628 = vst [vmem:[#allocation395_spill] sm:$0xff] %v12401_v52  ;;  %17630 = vst [vmem:[#allocation401_spill] sm:$0xff] %v12405_v7  ;;  %v4554_v26 = vadd.f32 %v4553_v45, %v12385_v8  ;;  %v12417_v23 = vmul.f32 %v12269_v17, %v17631_v29  ;;  %v4565_v56 = vadd.f32 %v12405_v7, %v12401_v52  ;;  %v17637_v35 = vld [vmem:[#allocation46_spill] sm:$0xff]  ;;  %v17639_v34 = vld [vmem:[#allocation157_spill] sm:$0xff] }
 0x4c8   :  { %v4537_v49 = vadd.f32 %v4536_v22, %v4535_v25  ;;  %v12423_v0 = vmul.f32 %v12281_v38, %v17633_v16  ;;  %v12427_v46 = vmul.f32 %v17636_v59, %v17635_v62  ;;  %v12431_v45 = vmul.f32 %v17638_v9, %v17637_v35  ;;  %v17641_v28 = vld [vmem:[#allocation158_spill] sm:$0xff]  ;;  %v17642_v22 = vld [vmem:[#allocation376_spill] sm:$0xff]  ;;  %v17643_v16 = vld [vmem:[#allocation269_spill] sm:$0xff] }
 0x4c9   :  { %17632 = vst [vmem:[#allocation390_spill] sm:$0xff] %v12417_v23  ;;  %v4566_v29 = vadd.f32 %v4565_v56, %v12417_v23  ;;  %v12436_v41 = vmul.f32 %v17640_v15, %v17639_v34  ;;  %v12440_v25 = vmul.f32 %v17642_v22, %v17641_v28  ;;  %v17644_v53 = vld [vmem:[#allocation377_spill] sm:$0xff]  ;;  %v17645_v62 = vld [vmem:[#allocation270_spill] sm:$0xff]  ;;  %v17652_v35 = vld [vmem:[#allocation355_spill] sm:$0xff]  ;;  %v17691_v44 = vmax.f32 %v12381_v3, %v12142_v50 }
 0x4ca   :  { %17634 = vst [vmem:[#allocation405_spill] sm:$0xff] %v12423_v0  ;;  %v12444_v37 = vmul.f32 %v17644_v53, %v17643_v16  ;;  %v4539_v59 = vadd.f32 %v4538_v58, %v4537_v49  ;;  %v17646_v51 = vld [vmem:[#allocation378_spill] sm:$0xff]  ;;  %v4641_v30 = vsel %vm534_vm0, %v12427_v46, 0.0  ;;  %v4642_v15 = vsel %vm534_vm0, %v12431_v45, 0.0  ;;  %v17647_v56 = vld [vmem:[#allocation249_spill] sm:$0xff] }
 0x4cb   :  { %v12448_v9 = vmul.f32 %v17646_v51, %v17645_v62  ;;  %v12456_v34 = vmul.f32 %v12289_v20, %v17647_v56  ;;  %v17649_v22 = vld [vmem:[#allocation250_spill] sm:$0xff]  ;;  %v4567_v53 = vadd.f32 %v4566_v29, %v12423_v0  ;;  %v4643_v49 = vadd.f32 %v4642_v15, %v4641_v30  ;;  %v17662_v47 = vld [vmem:[#allocation73_spill] sm:$0xff] }
 0x4cc   :  { %v12460_v28 = vmul.f32 %v12301_v2, %v17649_v22  ;;  %v17651_v51 = vmax.f32 %v12256_v14, %v17583_v40  ;;  %v4555_v58 = vadd.f32 %v4554_v26, %v12392_v55  ;;  %v4644_v62 = vsel %vm534_vm0, %v12436_v41, 0.0  ;;  %v17668_v55 = vld [vmem:[#allocation186_spill] sm:$0xff]  ;;  %v17670_v7 = vld [vmem:[#allocation297_spill] sm:$0xff] }
 0x4cd   :  { %17648 = vst [vmem:[#allocation404_spill] sm:$0xff] %v12456_v34  ;;  %v4646_v16 = vsel %vm534_vm0, %v12440_v25, 0.0  ;;  %v12473_v56 = vrot.slane %v17652_v35, %v17560_v27  ;;  %v17653_v29 = vmax.f32 %v12265_v48, %v17584_v57  ;;  %v4568_v30 = vadd.f32 %v4567_v53, %v12456_v34  ;;  %v17655_v48 = vld [vmem:[#allocation49_spill] sm:$0xff]  ;;  %v17663_v34 = vld [vmem:[#allocation410_spill] sm:$0xff] }
 0x4ce   :  { %17650 = vst [vmem:[#allocation417_spill] sm:$0xff] %v12460_v28  ;;  %4384 = vmax.xlane.f32.xlu0 %v17651_v51  ;;  %v4645_v14 = vadd.f32 %v4644_v62, %v4643_v49  ;;  %v12481_v40 = vrot.slane %v17652_v35, %v17563_v4  ;;  %v12485_v26 = vrot.slane %v17652_v35, %v17571_v18  ;;  %v4648_v51 = vsel %vm534_vm0, %v12444_v37, 0.0  ;;  %v17693_v10 = vld [vmem:[#allocation442_spill] sm:$0xff]  ;;  %v17703_v3 = vld [vmem:[#allocation445_spill] sm:$0xff] }
 0x4cf   :  { %4412 = vmax.xlane.f32.xlu1 %v17653_v29  ;;  %v4541_v15 = vadd.f32 %v4540_v43, %v4539_v59  ;;  %v4650_v22 = vsel %vm534_vm0, %v12448_v9, 0.0  ;;  %v12493_v57 = vmul.f32 %v12473_v56, %v17655_v48  ;;  %v12497_v53 = vrot.slane %v17652_v35, %v17575_v5  ;;  %v17657_v43 = vld [vmem:[#allocation50_spill] sm:$0xff] }
 0x4d0   :  { %17654 = vst [vmem:[#allocation416_spill] sm:$0xff] %v12481_v40  ;;  %v4647_v62 = vadd.f32 %v4646_v16, %v4645_v14  ;;  %v12501_v49 = vrot.slane %v17652_v35, %v17579_v36  ;;  %v12505_v59 = vmul.f32 %v12481_v40, %v17657_v43  ;;  %v17659_v29 = vmax.f32 %v12274_v6, %v17589_v63  ;;  %v17660_v14 = vld [vmem:[#allocation161_spill] sm:$0xff]  ;;  %v17664_v63 = vld [vmem:[#allocation74_spill] sm:$0xff] }
 0x4d1   :  { %17656 = vst [vmem:[#allocation384_spill] sm:$0xff] %v12493_v57  ;;  %v4569_v48 = vadd.f32 %v4568_v30, %v12460_v28  ;;  %v12513_v16 = vrot.slane %v17652_v35, %v17585_v33  ;;  %v12517_v11 = vmul.f32 %v12485_v26, %v17660_v14  ;;  %v12521_v0 = vmul.f32 %v17663_v34, %v17662_v47  ;;  %v17666_v28 = vld [vmem:[#allocation185_spill] sm:$0xff]  ;;  %v17667_v35 = vld [vmem:[#allocation412_spill] sm:$0xff]  ;;  %v17671_v34 = vld [vmem:[#allocation414_spill] sm:$0xff] }
 0x4d2   :  { %17658 = vst [vmem:[#allocation374_spill] sm:$0xff] %v12505_v59  ;;  %4309 = vmax.xlane.f32.xlu0 %v17659_v29  ;;  %v4649_v43 = vadd.f32 %v4648_v51, %v4647_v62  ;;  %v4661_v6 = vadd.f32 %v12505_v59, %v12493_v57  ;;  %v17665_v29 = vld [vmem:[#allocation411_spill] sm:$0xff]  ;;  %v12531_v23 = vmul.f32 %v17667_v35, %v17666_v28  ;;  %v17669_v14 = vld [vmem:[#allocation413_spill] sm:$0xff] }
 0x4d3   :  { %17661 = vst [vmem:[#allocation396_spill] sm:$0xff] %v12517_v11  ;;  %4549 = vadd.xlane.f32.xlu1 %v4548_v1  ;;  %v12527_v30 = vmul.f32 %v17665_v29, %v17664_v63  ;;  %v12535_v52 = vmul.f32 %v17669_v14, %v17668_v55  ;;  %v12539_v47 = vmul.f32 %v17671_v34, %v17670_v7  ;;  %v17672_v1 = vld [vmem:[#allocation298_spill] sm:$0xff]  ;;  %v17673_v51 = vld [vmem:[#allocation415_spill] sm:$0xff]  ;;  %v4751_v29 = vsel %vm534_vm0, %v12521_v0, 0.0  ;;  %v17676_v35 = vld [vmem:[#allocation273_spill] sm:$0xff] }
 0x4d4   :  { %v12543_v62 = vmul.f32 %v17673_v51, %v17672_v1  ;;  %v17674_v63 = vld [vmem:[#allocation162_spill] sm:$0xff]  ;;  %v12553_v28 = vmul.f32 %v12501_v49, %v17676_v35  ;;  %v4662_v14 = vadd.f32 %v4661_v6, %v12517_v11  ;;  %v17678_v51 = vmax.f32 %v12277_v21, %v17590_v39  ;;  %v17680_v11 = vld [vmem:[#allocation29_spill] sm:$0xff] }
 0x4d5   :  { %v12549_v57 = vmul.f32 %v12497_v53, %v17674_v63  ;;  %v4752_v34 = vsel %vm534_vm0, %v12527_v30, 0.0  ;;  %v4651_v1 = vadd.f32 %v4650_v22, %v4649_v43  ;;  %v17679_v7 = vld [vmem:[#allocation274_spill] sm:$0xff]  ;;  %v4754_v59 = vsel %vm534_vm0, %v12531_v23, 0.0 }
 0x4d6   :  { %17677 = vst [vmem:[#allocation402_spill] sm:$0xff] %v12553_v28  ;;  %4405 = vmax.xlane.f32.xlu0 %v17678_v51  ;;  %v12563_v55 = vmul.f32 %v12513_v16, %v17679_v7  ;;  %v4753_v63 = vadd.f32 %v4752_v34, %v4751_v29  ;;  %v4756_v6 = vsel %vm534_vm0, %v12535_v52, 0.0  ;;  %v12572_v8 = vmul.f32 %v12246_v13, %v17680_v11  ;;  %v17682_v21 = vld [vmem:[#allocation30_spill] sm:$0xff]  ;;  %v17684_v29 = vld [vmem:[#allocation141_spill] sm:$0xff]  ;;  %v17686_v7 = vld [vmem:[#allocation440_spill] sm:$0xff] }
 0x4d7   :  { %17675 = vst [vmem:[#allocation391_spill] sm:$0xff] %v12549_v57  ;;  %4556 = vadd.xlane.f32.xlu1 %v4555_v58  ;;  %v4663_v35 = vadd.f32 %v4662_v14, %v12549_v57  ;;  %v12576_v39 = vmul.f32 %v12250_v32, %v17682_v21  ;;  %v4758_v43 = vsel %vm534_vm0, %v12539_v47, 0.0  ;;  %v4760_v58 = vsel %vm534_vm0, %v12543_v62, 0.0  ;;  %v17685_v11 = vld [vmem:[#allocation101_spill] sm:$0xff] }
 0x4d8   :  { %17681 = vst [vmem:[#allocation407_spill] sm:$0xff] %v12572_v8  ;;  %v4755_v22 = vadd.f32 %v4754_v59, %v4753_v63  ;;  %v12584_v14 = vmul.f32 %v12269_v17, %v17684_v29  ;;  %v12591_v21 = vmul.f32 %v17686_v7, %v17685_v11  ;;  %v17688_v59 = vld [vmem:[#allocation102_spill] sm:$0xff]  ;;  %v17689_v63 = vld [vmem:[#allocation441_spill] sm:$0xff]  ;;  %v17699_v7 = vld [vmem:[#allocation444_spill] sm:$0xff] }
 0x4d9   :  { %17683 = vst [vmem:[#allocation419_spill] sm:$0xff] %v12576_v39  ;;  %v4664_v34 = vadd.f32 %v4663_v35, %v12553_v28  ;;  %v4579_v51 = vadd.f32 %v12576_v39, %v12572_v8  ;;  %v12595_v57 = vmul.f32 %v17689_v63, %v17688_v59  ;;  %v17692_v29 = vld [vmem:[#allocation213_spill] sm:$0xff]  ;;  %v17695_v35 = vld [vmem:[#allocation214_spill] sm:$0xff]  ;;  %v17696_v28 = vld [vmem:[#allocation443_spill] sm:$0xff] }
 0x4da   :  { %17687 = vst [vmem:[#allocation385_spill] sm:$0xff] %v12591_v21  ;;  %4419 = vmax.xlane.f32.xlu0 %v17691_v44  ;;  %v4757_v19 = vadd.f32 %v4756_v6, %v4755_v22  ;;  %v12602_v54 = vmul.f32 %v17693_v10, %v17692_v29  ;;  %v12606_v8 = vmul.f32 %v17696_v28, %v17695_v35  ;;  %v17698_v39 = vld [vmem:[#allocation326_spill] sm:$0xff]  ;;  %v17702_v44 = vld [vmem:[#allocation327_spill] sm:$0xff]  ;;  %v4861_v10 = vsel %vm534_vm0, %v12591_v21, 0.0  ;;  %v17705_v22 = vld [vmem:[#allocation253_spill] sm:$0xff] }
 0x4db   :  { %17690 = vst [vmem:[#allocation397_spill] sm:$0xff] %v12595_v57  ;;  %v12610_v11 = vmul.f32 %v17699_v7, %v17698_v39  ;;  %4570 = vadd.xlane.f32.xlu1 %v4569_v48  ;;  %v17701_v63 = vld [vmem:[#allocation142_spill] sm:$0xff]  ;;  %v4580_v50 = vadd.f32 %v4579_v51, %v12584_v14  ;;  %v12619_v6 = vmul.f32 %v17703_v3, %v17702_v44  ;;  %v4862_v39 = vsel %vm534_vm0, %v12595_v57, 0.0  ;;  %v17718_v21 = vld [vmem:[#allocation189_spill] sm:$0xff] }
 0x4dc   :  { %17694 = vst [vmem:[#allocation394_spill] sm:$0xff] %v12602_v54  ;;  %17697 = vst [vmem:[#allocation408_spill] sm:$0xff] %v12606_v8  ;;  %v12614_v59 = vmul.f32 %v12281_v38, %v17701_v63  ;;  %v4759_v28 = vadd.f32 %v4758_v43, %v4757_v19  ;;  %v12625_v35 = vmul.f32 %v12289_v20, %v17705_v22  ;;  %v17706_v7 = vld [vmem:[#allocation254_spill] sm:$0xff]  ;;  %v4864_v29 = vsel %vm534_vm0, %v12602_v54, 0.0 }
 0x4dd   :  { %17700 = vst [vmem:[#allocation420_spill] sm:$0xff] %v12610_v11  ;;  %17704 = vst [vmem:[#allocation424_spill] sm:$0xff] %v12619_v6  ;;  %v12629_v48 = vmul.f32 %v12301_v2, %v17706_v7  ;;  %v4665_v51 = vadd.f32 %v4664_v34, %v12563_v55  ;;  %v4863_v44 = vadd.f32 %v4862_v39, %v4861_v10  ;;  %v4866_v19 = vsel %vm534_vm0, %v12606_v8, 0.0  ;;  %v17707_v7 = vld [vmem:[#allocation53_spill] sm:$0xff]  ;;  %v17708_v63 = vld [vmem:[#allocation54_spill] sm:$0xff] }
 0x4de   :  { %v4581_v3 = vadd.f32 %v4580_v50, %v12614_v59  ;;  %4542 = vadd.xlane.f32.xlu0 %v4541_v15  ;;  %v4868_v43 = vsel %vm534_vm0, %v12610_v11, 0.0  ;;  %v12643_v22 = vmul.f32 %v12473_v56, %v17707_v7  ;;  %v12647_v34 = vmul.f32 %v12481_v40, %v17708_v63  ;;  %v17709_v8 = vld [vmem:[#allocation165_spill] sm:$0xff] }
 0x4df   :  { %4666 = vadd.xlane.f32.xlu1 %v4665_v51  ;;  %v4761_v39 = vadd.f32 %v4760_v58, %v4759_v28  ;;  %v4865_v10 = vadd.f32 %v4864_v29, %v4863_v44  ;;  %v4870_v15 = vsel %vm534_vm0, %v12619_v6, 0.0  ;;  %v12654_v54 = vmul.f32 %v12485_v26, %v17709_v8  ;;  %v17710_v29 = vld [vmem:[#allocation166_spill] sm:$0xff]  ;;  %v17712_v8 = vld [vmem:[#allocation277_spill] sm:$0xff] }
 0x4e0   :  { %v4582_v50 = vadd.f32 %v4581_v3, %v12625_v35  ;;  %v4675_v7 = vadd.f32 %v12647_v34, %v12643_v22  ;;  %v4091_v11 = vsel %vm534_vm0, %v12349_v12, -inf  ;;  %v4092_v51 = vsel %vm534_vm0, %v12353_v61, -inf  ;;  %v17713_v6 = vld [vmem:[#allocation278_spill] sm:$0xff] }
 0x4e1   :  { %v4867_v28 = vadd.f32 %v4866_v19, %v4865_v10  ;;  %v12665_v44 = vmul.f32 %v12497_v53, %v17710_v29  ;;  %v4093_v3 = vmax.f32 %v4091_v11, %v4092_v51  ;;  %v12669_v63 = vmul.f32 %v12501_v49, %v17712_v8  ;;  %v17714_v10 = vld [vmem:[#allocation356_spill] sm:$0xff] }
 0x4e2   :  { %v4583_v58 = vadd.f32 %v4582_v50, %v12629_v48  ;;  %4652 = vadd.xlane.f32.xlu0 %v4651_v1  ;;  %v12673_v57 = vmul.f32 %v12513_v16, %v17713_v6  ;;  %v4676_v12 = vadd.f32 %v4675_v7, %v12654_v54  ;;  %v4094_v61 = vsel %vm534_vm0, %v12358_v31, -inf }
 0x4e3   :  { %17711 = vst [vmem:[#allocation422_spill] sm:$0xff] %v12665_v44  ;;  %v4869_v19 = vadd.f32 %v4868_v43, %v4867_v28  ;;  %v4095_v50 = vmax.f32 %v4093_v3, %v4094_v61  ;;  %v12680_v11 = vrot.slane %v17714_v10, %v17560_v27  ;;  %v12684_v1 = vrot.slane %v17714_v10, %v17563_v4  ;;  %v17715_v3 = vld [vmem:[#allocation77_spill] sm:$0xff] }
 0x4e4   :  { %4584 = vadd.xlane.f32.xlu1 %v4583_v58  ;;  %v4677_v51 = vadd.f32 %v4676_v12, %v12665_v44  ;;  %v4096_v6 = vsel %vm534_vm0, %v12362_v42, -inf  ;;  %v12691_v7 = vrot.slane %v17714_v10, %v17571_v18  ;;  %v12695_v31 = vrot.slane %v17714_v10, %v17575_v5 }
 0x4e5   :  { %v4097_v43 = vmax.f32 %v4095_v50, %v4096_v6  ;;  %v12699_v58 = vrot.slane %v17714_v10, %v17579_v36  ;;  %v12703_v28 = vrot.slane %v17714_v10, %v17585_v33  ;;  %v12707_v42 = vmul.f32 %v12680_v11, %v17715_v3  ;;  %v17717_v50 = vld [vmem:[#allocation78_spill] sm:$0xff] }
 0x4e6   :  { %4762 = vadd.xlane.f32.xlu0 %v4761_v39  ;;  %v4678_v12 = vadd.f32 %v4677_v51, %v12669_v63  ;;  %v4098_v61 = vsel %vm534_vm0, %v12366_v24, -inf  ;;  %v4100_v6 = vsel %vm534_vm0, %v12372_v60, -inf  ;;  %v12716_v8 = vmul.f32 %v12684_v1, %v17717_v50  ;;  %v17719_v3 = vld [vmem:[#allocation190_spill] sm:$0xff] }
 0x4e7   :  { %17716 = vst [vmem:[#allocation400_spill] sm:$0xff] %v12707_v42  ;;  %v4871_v29 = vadd.f32 %v4870_v15, %v4869_v19  ;;  %v4099_v10 = vmax.f32 %v4097_v43, %v4098_v61  ;;  %v12720_v44 = vmul.f32 %v12691_v7, %v17718_v21  ;;  %v4201_v39 = vsel %vm534_vm0, %v12427_v46, -inf  ;;  %v17721_v43 = vld [vmem:[#allocation301_spill] sm:$0xff]  ;;  %v17722_v21 = vld [vmem:[#allocation302_spill] sm:$0xff] }
 0x4e8   :  { %v4679_v51 = vadd.f32 %v4678_v12, %v12673_v57  ;;  %v12727_v24 = vmul.f32 %v12695_v31, %v17719_v3  ;;  %v4771_v60 = vadd.f32 %v12716_v8, %v12707_v42  ;;  %v4202_v15 = vsel %vm534_vm0, %v12431_v45, -inf  ;;  %v17723_v42 = vld [vmem:[#allocation57_spill] sm:$0xff] }
 0x4e9   :  { %v4101_v19 = vmax.f32 %v4099_v10, %v4100_v6  ;;  %v12735_v61 = vmul.f32 %v12699_v58, %v17721_v43  ;;  %v12739_v46 = vmul.f32 %v12703_v28, %v17722_v21  ;;  %v4203_v12 = vmax.f32 %v4201_v39, %v4202_v15  ;;  %v17725_v6 = vld [vmem:[#allocation58_spill] sm:$0xff] }
 0x4ea   :  { %17720 = vst [vmem:[#allocation428_spill] sm:$0xff] %v12727_v24  ;;  %4872 = vadd.xlane.f32.xlu0 %v4871_v29  ;;  %4680 = vadd.xlane.f32.xlu1 %v4679_v51  ;;  %v4772_v3 = vadd.f32 %v4771_v60, %v12720_v44  ;;  %v4204_v50 = vsel %vm534_vm0, %v12436_v41, -inf  ;;  %v12746_v45 = vmul.f32 %v12473_v56, %v17723_v42  ;;  %v4206_v21 = vsel %vm534_vm0, %v12440_v25, -inf  ;;  %v17727_v51 = vld [vmem:[#allocation169_spill] sm:$0xff]  ;;  %v17728_v25 = vld [vmem:[#allocation170_spill] sm:$0xff] }
 0x4eb   :  { %v12750_v10 = vmul.f32 %v12481_v40, %v17725_v6  ;;  %v4205_v43 = vmax.f32 %v4203_v12, %v4204_v50  ;;  %v4208_v29 = vsel %vm534_vm0, %v12444_v37, -inf  ;;  %v4210_v39 = vsel %vm534_vm0, %v12448_v9, -inf  ;;  %v17729_v37 = vld [vmem:[#allocation281_spill] sm:$0xff]  ;;  %v17731_v42 = vld [vmem:[#allocation282_spill] sm:$0xff] }
 0x4ec   :  { %17724 = vst [vmem:[#allocation380_spill] sm:$0xff] %v12746_v45  ;;  %v4773_v41 = vadd.f32 %v4772_v3, %v12727_v24  ;;  %v12761_v60 = vmul.f32 %v12485_v26, %v17727_v51  ;;  %v4311_v50 = vsel %vm534_vm0, %v12521_v0, -inf  ;;  %v12769_v6 = vmul.f32 %v12497_v53, %v17728_v25  ;;  %v17734_v24 = vld [vmem:[#allocation82_spill] sm:$0xff] }
 0x4ed   :  { %17726 = vst [vmem:[#allocation403_spill] sm:$0xff] %v12750_v10  ;;  %v4689_v15 = vadd.f32 %v12750_v10, %v12746_v45  ;;  %v4207_v12 = vmax.f32 %v4205_v43, %v4206_v21  ;;  %v12773_v9 = vmul.f32 %v12501_v49, %v17729_v37  ;;  %v4312_v3 = vsel %vm534_vm0, %v12527_v30, -inf  ;;  %v17733_v10 = vld [vmem:[#allocation81_spill] sm:$0xff] }
 0x4ee   :  { %4102 = vmax.xlane.f32.xlu0 %v4101_v19  ;;  %v4774_v51 = vadd.f32 %v4773_v41, %v12735_v61  ;;  %v12780_v45 = vmul.f32 %v12513_v16, %v17731_v42  ;;  %v4313_v21 = vmax.f32 %v4311_v50, %v4312_v3  ;;  %v4314_v25 = vsel %vm534_vm0, %v12531_v23, -inf }
 0x4ef   :  { %17730 = vst [vmem:[#allocation425_spill] sm:$0xff] %v12773_v9  ;;  %v4690_v0 = vadd.f32 %v4689_v15, %v12761_v60  ;;  %v4209_v43 = vmax.f32 %v4207_v12, %v4208_v29  ;;  %v12787_v37 = vmul.f32 %v12680_v11, %v17733_v10  ;;  %v12791_v30 = vmul.f32 %v12684_v1, %v17734_v24  ;;  %v17735_v12 = vld [vmem:[#allocation193_spill] sm:$0xff]  ;;  %v17746_v10 = vld [vmem:[#allocation136_spill] sm:$0xff] }
 0x4f0   :  { %17732 = vst [vmem:[#allocation433_spill] sm:$0xff] %v12780_v45  ;;  %v4775_v19 = vadd.f32 %v4774_v51, %v12739_v46  ;;  %v4315_v42 = vmax.f32 %v4313_v21, %v4314_v25  ;;  %v4316_v15 = vsel %vm534_vm0, %v12535_v52, -inf  ;;  %v4318_v23 = vsel %vm534_vm0, %v12539_v47, -inf  ;;  %v17738_v47 = vld [vmem:[#allocation194_spill] sm:$0xff] }
 0x4f1   :  { %v4691_v41 = vadd.f32 %v4690_v0, %v12769_v6  ;;  %v4211_v29 = vmax.f32 %v4209_v43, %v4210_v39  ;;  %v4320_v50 = vsel %vm534_vm0, %v12543_v62, -inf  ;;  %v12803_v3 = vmul.f32 %v12691_v7, %v17735_v12  ;;  %v17736_v0 = vld [vmem:[#allocation23_spill] sm:$0xff]  ;;  %v17739_v62 = vld [vmem:[#allocation305_spill] sm:$0xff]  ;;  %v17741_v43 = vld [vmem:[#allocation24_spill] sm:$0xff] }
 0x4f2   :  { %4776 = vadd.xlane.f32.xlu1 %v4775_v19  ;;  %v4317_v24 = vmax.f32 %v4315_v42, %v4316_v15  ;;  %v4785_v25 = vadd.f32 %v12791_v30, %v12787_v37  ;;  %v12810_v52 = vmul.f32 %v12246_v13, %v17736_v0  ;;  %v12814_v39 = vmul.f32 %v12695_v31, %v17738_v47  ;;  %v17743_v42 = vld [vmem:[#allocation135_spill] sm:$0xff]  ;;  %v12828_v15 = vpop.xlane.xlu1 %4515 }
 0x4f3   :  { %v4692_v51 = vadd.f32 %v4691_v41, %v12773_v9  ;;  %4212 = vmax.xlane.f32.xlu0 %v4211_v29  ;;  %v12818_v21 = vmul.f32 %v12699_v58, %v17739_v62  ;;  %v12822_v19 = vmul.f32 %v12250_v32, %v17741_v43  ;;  %v12826_v41 = vmul.f32 %v12269_v17, %v17743_v42  ;;  %v17748_v43 = vld [vmem:[#allocation357_spill] sm:$0xff] }
 0x4f4   :  { %17737 = vst [vmem:[#allocation409_spill] sm:$0xff] %v12810_v52  ;;  %17745 = vst [vmem:[#allocation427_spill] sm:$0xff] %v12828_v15  ;;  %v4319_v12 = vmax.f32 %v4317_v24, %v4318_v23  ;;  %v4786_v47 = vadd.f32 %v4785_v25, %v12803_v3  ;;  %v12834_v0 = vmul.f32 %v12281_v38, %v17746_v10  ;;  %v12850_v23 = vpop.xlane.xlu0 %4494  ;;  %v17750_v15 = vld [vmem:[#allocation103_spill] sm:$0xff] }
 0x4f5   :  { %17740 = vst [vmem:[#allocation421_spill] sm:$0xff] %v12818_v21  ;;  %17742 = vst [vmem:[#allocation426_spill] sm:$0xff] %v12822_v19  ;;  %v4693_v29 = vadd.f32 %v4692_v51, %v12780_v45  ;;  %v4558_v62 = vadd.f32 %v12822_v19, %v12810_v52  ;;  %v12840_v9 = vrot.slane %v17748_v43, %v17560_v27  ;;  %v17763_v52 = vld [vmem:[#allocation248_spill] sm:$0xff] }
 0x4f6   :  { %17744 = vst [vmem:[#allocation430_spill] sm:$0xff] %v12826_v41  ;;  %17747 = vst [vmem:[#allocation453_spill] sm:$0xff] %v12834_v0  ;;  %v12844_v42 = vrot.slane %v17748_v43, %v17563_v4  ;;  %v12848_v24 = vrot.slane %v17748_v43, %v17571_v18  ;;  %v4321_v51 = vmax.f32 %v4319_v12, %v4320_v50  ;;  %v17752_v50 = vld [vmem:[#allocation104_spill] sm:$0xff] }
 0x4f7   :  { %17749 = vst [vmem:[#allocation431_spill] sm:$0xff] %v12850_v23  ;;  %4694 = vadd.xlane.f32.xlu1 %v4693_v29  ;;  %v4787_v25 = vadd.f32 %v4786_v47, %v12814_v39  ;;  %v12855_v10 = vrot.slane %v17748_v43, %v17575_v5  ;;  %v12859_v27 = vrot.slane %v17748_v43, %v17579_v36  ;;  %v17754_v47 = vld [vmem:[#allocation306_spill] sm:$0xff]  ;;  %v17769_v45 = vld [vmem:[#allocation328_spill] sm:$0xff] }
 0x4f8   :  { %v4559_v4 = vadd.f32 %v4558_v62, %v12826_v41  ;;  %v12864_v18 = vrot.slane %v17748_v43, %v17585_v33  ;;  %v12868_v29 = vmul.f32 %v12840_v9, %v17750_v15  ;;  %v12872_v12 = vmul.f32 %v12844_v42, %v17752_v50  ;;  %4322 = vmax.xlane.f32.xlu0 %v4321_v51  ;;  %v17756_v62 = vld [vmem:[#allocation247_spill] sm:$0xff]  ;;  %v12883_v43 = vpop.xlane.xlu1 %4611 }
 0x4f9   :  { %v12876_v5 = vmul.f32 %v12703_v28, %v17754_v47  ;;  %v4788_v36 = vadd.f32 %v4787_v25, %v12818_v21  ;;  %v12881_v23 = vmul.f32 %v12289_v20, %v17756_v62  ;;  %17758 = vst [vmem:[#allocation436_spill] sm:$0xff] %v12883_v43  ;;  %v17759_v33 = vld [vmem:[#allocation215_spill] sm:$0xff]  ;;  %v12899_v62 = vmul.f32 %v12301_v2, %v17763_v52  ;;  %v17765_v43 = vld [vmem:[#allocation216_spill] sm:$0xff] }
 0x4fa   :  { %17751 = vst [vmem:[#allocation434_spill] sm:$0xff] %v12868_v29  ;;  %17753 = vst [vmem:[#allocation438_spill] sm:$0xff] %v12872_v12  ;;  %v4560_v15 = vadd.f32 %v4559_v4, %v12834_v0  ;;  %v12888_v41 = vmul.f32 %v12848_v24, %v17759_v33  ;;  %v4874_v51 = vadd.f32 %v12872_v12, %v12868_v29  ;;  %v17761_v50 = vld [vmem:[#allocation47_spill] sm:$0xff]  ;;  %v17767_v0 = vld [vmem:[#allocation48_spill] sm:$0xff] }
 0x4fb   :  { %17755 = vst [vmem:[#allocation447_spill] sm:$0xff] %v12876_v5  ;;  %17757 = vst [vmem:[#allocation406_spill] sm:$0xff] %v12881_v23  ;;  %v12894_v47 = vmul.f32 %v12473_v56, %v17761_v50  ;;  %v4789_v25 = vadd.f32 %v4788_v36, %v12876_v5  ;;  %v12903_v4 = vmul.f32 %v12855_v10, %v17765_v43  ;;  %v17771_v29 = vld [vmem:[#allocation329_spill] sm:$0xff]  ;;  %v12919_v5 = vpop.xlane.xlu0 %4501  ;;  %v17773_v43 = vld [vmem:[#allocation159_spill] sm:$0xff] }
 0x4fc   :  { %17760 = vst [vmem:[#allocation450_spill] sm:$0xff] %v12888_v41  ;;  %17764 = vst [vmem:[#allocation423_spill] sm:$0xff] %v12899_v62  ;;  %v12907_v33 = vmul.f32 %v12481_v40, %v17767_v0  ;;  %v4561_v19 = vadd.f32 %v4560_v15, %v12881_v23  ;;  %v12912_v50 = vmul.f32 %v12859_v27, %v17769_v45  ;;  %v17775_v0 = vld [vmem:[#allocation85_spill] sm:$0xff]  ;;  %v17777_v23 = vld [vmem:[#allocation86_spill] sm:$0xff] }
 0x4fd   :  { %17762 = vst [vmem:[#allocation418_spill] sm:$0xff] %v12894_v47  ;;  %17766 = vst [vmem:[#allocation429_spill] sm:$0xff] %v12903_v4  ;;  %v12916_v36 = vmul.f32 %v12864_v18, %v17771_v29  ;;  %v4875_v52 = vadd.f32 %v4874_v51, %v12888_v41  ;;  %4790 = vadd.xlane.f32.xlu1 %v4789_v25  ;;  %v12923_v12 = vmul.f32 %v12485_v26, %v17773_v43  ;;  %v17779_v25 = vld [vmem:[#allocation160_spill] sm:$0xff]  ;;  %v17781_v43 = vld [vmem:[#allocation271_spill] sm:$0xff] }
 0x4fe   :  { %17768 = vst [vmem:[#allocation439_spill] sm:$0xff] %v12907_v33  ;;  %17770 = vst [vmem:[#allocation432_spill] sm:$0xff] %v12912_v50  ;;  %v4654_v15 = vadd.f32 %v12907_v33, %v12894_v47  ;;  %v12929_v45 = vmul.f32 %v12680_v11, %v17775_v0  ;;  %v12933_v29 = vmul.f32 %v12684_v1, %v17777_v23  ;;  %v17783_v0 = vld [vmem:[#allocation197_spill] sm:$0xff] }
 0x4ff   :  { %17772 = vst [vmem:[#allocation451_spill] sm:$0xff] %v12919_v5  ;;  %17774 = vst [vmem:[#allocation455_spill] sm:$0xff] %v12923_v12  ;;  %v4562_v51 = vadd.f32 %v4561_v19, %v12899_v62  ;;  %v4876_v5 = vadd.f32 %v4875_v52, %v12903_v4  ;;  %v12939_v41 = vmul.f32 %v12497_v53, %v17779_v25  ;;  %v17784_v19 = vld [vmem:[#allocation27_spill] sm:$0xff]  ;;  %v12956_v62 = vpop.xlane.xlu1 %4625 }
 0x500   :  { %17776 = vst [vmem:[#allocation458_spill] sm:$0xff] %v12929_v45  ;;  %17778 = vst [vmem:[#allocation457_spill] sm:$0xff] %v12933_v29  ;;  %v12943_v21 = vmul.f32 %v12501_v49, %v17781_v43  ;;  %v4655_v47 = vadd.f32 %v4654_v15, %v12923_v12  ;;  %v12948_v33 = vmul.f32 %v12691_v7, %v17783_v0  ;;  %v17787_v43 = vld [vmem:[#allocation272_spill] sm:$0xff]  ;;  %v17789_v15 = vld [vmem:[#allocation198_spill] sm:$0xff] }
 0x501   :  { %17780 = vst [vmem:[#allocation435_spill] sm:$0xff] %v12939_v41  ;;  %v4799_v23 = vadd.f32 %v12933_v29, %v12929_v45  ;;  %v12954_v52 = vmul.f32 %v12246_v13, %v17784_v19  ;;  %17786 = vst [vmem:[#allocation464_spill] sm:$0xff] %v12956_v62  ;;  %4563 = vadd.xlane.f32.xlu0 %v4562_v51  ;;  %v4877_v25 = vadd.f32 %v4876_v5, %v12912_v50  ;;  %v17790_v12 = vld [vmem:[#allocation28_spill] sm:$0xff]  ;;  %v17792_v13 = vld [vmem:[#allocation309_spill] sm:$0xff] }
 0x502   :  { %17782 = vst [vmem:[#allocation448_spill] sm:$0xff] %v12943_v21  ;;  %v12961_v4 = vmul.f32 %v12513_v16, %v17787_v43  ;;  %v12965_v0 = vmul.f32 %v12695_v31, %v17789_v15  ;;  %v12969_v45 = vmul.f32 %v12250_v32, %v17790_v12  ;;  %v4656_v19 = vadd.f32 %v4655_v47, %v12939_v41  ;;  %v17794_v51 = vld [vmem:[#allocation139_spill] sm:$0xff]  ;;  %v17796_v29 = vld [vmem:[#allocation109_spill] sm:$0xff]  ;;  %v17798_v47 = vld [vmem:[#allocation110_spill] sm:$0xff] }
 0x503   :  { %17785 = vst [vmem:[#allocation465_spill] sm:$0xff] %v12954_v52  ;;  %v12974_v62 = vmul.f32 %v12699_v58, %v17792_v13  ;;  %v4800_v5 = vadd.f32 %v4799_v23, %v12948_v33  ;;  %v12979_v43 = vmul.f32 %v12269_v17, %v17794_v51  ;;  %v4878_v50 = vadd.f32 %v4877_v25, %v12916_v36  ;;  %v12992_v13 = vpop.xlane.xlu0 %4508  ;;  %v17800_v41 = vld [vmem:[#allocation310_spill] sm:$0xff]  ;;  %v17801_v17 = vld [vmem:[#allocation140_spill] sm:$0xff] }
 0x504   :  { %17788 = vst [vmem:[#allocation437_spill] sm:$0xff] %v12961_v4  ;;  %17791 = vst [vmem:[#allocation446_spill] sm:$0xff] %v12969_v45  ;;  %v4572_v15 = vadd.f32 %v12969_v45, %v12954_v52  ;;  %v12986_v12 = vmul.f32 %v12840_v9, %v17796_v29  ;;  %v12990_v32 = vmul.f32 %v12844_v42, %v17798_v47  ;;  %v17803_v29 = vld [vmem:[#allocation251_spill] sm:$0xff] }
 0x505   :  { %17793 = vst [vmem:[#allocation460_spill] sm:$0xff] %v12974_v62  ;;  %17795 = vst [vmem:[#allocation469_spill] sm:$0xff] %v12979_v43  ;;  %v4657_v23 = vadd.f32 %v4656_v19, %v12943_v21  ;;  %v12997_v51 = vmul.f32 %v12703_v28, %v17800_v41  ;;  %v4801_v25 = vadd.f32 %v4800_v5, %v12965_v0  ;;  %4879 = vadd.xlane.f32.xlu1 %v4878_v50 }
 0x506   :  { %17797 = vst [vmem:[#allocation452_spill] sm:$0xff] %v12986_v12  ;;  %17799 = vst [vmem:[#allocation456_spill] sm:$0xff] %v12992_v13  ;;  %v13002_v52 = vmul.f32 %v12281_v38, %v17801_v17  ;;  %v13006_v45 = vmul.f32 %v12289_v20, %v17803_v29  ;;  %v4573_v47 = vadd.f32 %v4572_v15, %v12979_v43  ;;  %v17805_v13 = vld [vmem:[#allocation221_spill] sm:$0xff]  ;;  %v17806_v17 = vld [vmem:[#allocation51_spill] sm:$0xff]  ;;  %v13025_v15 = vpop.xlane.xlu1 %4529 }
 0x507   :  { %v13011_v19 = vmul.f32 %v12848_v24, %v17805_v13  ;;  %v4895_v41 = vadd.f32 %v12990_v32, %v12986_v12  ;;  %v4658_v5 = vadd.f32 %v4657_v23, %v12961_v4  ;;  %v4802_v21 = vadd.f32 %v4801_v25, %v12974_v62  ;;  %v17808_v38 = vld [vmem:[#allocation52_spill] sm:$0xff]  ;;  %17810 = vst [vmem:[#allocation354_spill] sm:$0xff] %v13025_v15  ;;  %v17813_v12 = vld [vmem:[#allocation222_spill] sm:$0xff]  ;;  %v17816_v15 = vld [vmem:[#allocation163_spill] sm:$0xff] }
 0x508   :  { %17802 = vst [vmem:[#allocation461_spill] sm:$0xff] %v13002_v52  ;;  %17804 = vst [vmem:[#allocation466_spill] sm:$0xff] %v13006_v45  ;;  %v13019_v50 = vmul.f32 %v12473_v56, %v17806_v17  ;;  %v13023_v29 = vmul.f32 %v12481_v40, %v17808_v38  ;;  %v17811_v20 = vld [vmem:[#allocation252_spill] sm:$0xff]  ;;  %v4574_v43 = vadd.f32 %v4573_v47, %v13002_v52  ;;  %v17815_v4 = vld [vmem:[#allocation334_spill] sm:$0xff] }
 0x509   :  { %v13029_v13 = vmul.f32 %v12301_v2, %v17811_v20  ;;  %v13034_v23 = vmul.f32 %v12855_v10, %v17813_v12  ;;  %v4896_v25 = vadd.f32 %v4895_v41, %v13011_v19  ;;  %4659 = vadd.xlane.f32.xlu0 %v4658_v5  ;;  %v4803_v17 = vadd.f32 %v4802_v21, %v12997_v51  ;;  %v17818_v2 = vld [vmem:[#allocation113_spill] sm:$0xff]  ;;  %v17820_v21 = vld [vmem:[#allocation114_spill] sm:$0xff] }
 0x50a   :  { %17807 = vst [vmem:[#allocation470_spill] sm:$0xff] %v13019_v50  ;;  %17809 = vst [vmem:[#allocation462_spill] sm:$0xff] %v13023_v29  ;;  %v13040_v38 = vmul.f32 %v12859_v27, %v17815_v4  ;;  %v13044_v62 = vmul.f32 %v12485_v26, %v17816_v15  ;;  %v4668_v47 = vadd.f32 %v13023_v29, %v13019_v50  ;;  %v13058_v4 = vpop.xlane.xlu0 %4604  ;;  %v17823_v15 = vld [vmem:[#allocation335_spill] sm:$0xff]  ;;  %v17825_v50 = vld [vmem:[#allocation164_spill] sm:$0xff] }
 0x50b   :  { %17812 = vst [vmem:[#allocation467_spill] sm:$0xff] %v13029_v13  ;;  %17814 = vst [vmem:[#allocation474_spill] sm:$0xff] %v13034_v23  ;;  %v4575_v20 = vadd.f32 %v4574_v43, %v13006_v45  ;;  %v4897_v12 = vadd.f32 %v4896_v25, %v13034_v23  ;;  %v13052_v41 = vmul.f32 %v12840_v9, %v17818_v2  ;;  %4804 = vadd.xlane.f32.xlu1 %v4803_v17  ;;  %v17827_v45 = vld [vmem:[#allocation225_spill] sm:$0xff]  ;;  %v17831_v23 = vld [vmem:[#allocation75_spill] sm:$0xff] }
 0x50c   :  { %17817 = vst [vmem:[#allocation477_spill] sm:$0xff] %v13044_v62  ;;  %v13056_v5 = vmul.f32 %v12844_v42, %v17820_v21  ;;  %17822 = vst [vmem:[#allocation472_spill] sm:$0xff] %v13058_v4  ;;  %v13062_v52 = vmul.f32 %v12864_v18, %v17823_v15  ;;  %v13066_v43 = vmul.f32 %v12497_v53, %v17825_v50  ;;  %v17829_v4 = vld [vmem:[#allocation275_spill] sm:$0xff] }
 0x50d   :  { %17819 = vst [vmem:[#allocation449_spill] sm:$0xff] %v13052_v41  ;;  %v4669_v25 = vadd.f32 %v4668_v47, %v13044_v62  ;;  %v4576_v2 = vadd.f32 %v4575_v20, %v13029_v13  ;;  %v4898_v29 = vadd.f32 %v4897_v12, %v13040_v38  ;;  %v13073_v21 = vmul.f32 %v12848_v24, %v17827_v45  ;;  %v13086_v20 = vpop.xlane.xlu1 %4721  ;;  %v17834_v45 = vld [vmem:[#allocation226_spill] sm:$0xff]  ;;  %v17845_v13 = vld [vmem:[#allocation393_spill] sm:$0xff] }
 0x50e   :  { %17821 = vst [vmem:[#allocation454_spill] sm:$0xff] %v13056_v5  ;;  %17824 = vst [vmem:[#allocation459_spill] sm:$0xff] %v13062_v52  ;;  %v4909_v17 = vadd.f32 %v13056_v5, %v13052_v41  ;;  %v13079_v15 = vmul.f32 %v12501_v49, %v17829_v4  ;;  %v13084_v47 = vmul.f32 %v12680_v11, %v17831_v23  ;;  %v17836_v5 = vld [vmem:[#allocation76_spill] sm:$0xff] }
 0x50f   :  { %17826 = vst [vmem:[#allocation475_spill] sm:$0xff] %v13066_v43  ;;  %17828 = vst [vmem:[#allocation463_spill] sm:$0xff] %v13073_v21  ;;  %v4670_v50 = vadd.f32 %v4669_v25, %v13066_v43  ;;  %4577 = vadd.xlane.f32.xlu0 %v4576_v2  ;;  %v4899_v12 = vadd.f32 %v4898_v29, %v13062_v52  ;;  %v13091_v62 = vmul.f32 %v12855_v10, %v17834_v45  ;;  %v17838_v25 = vld [vmem:[#allocation276_spill] sm:$0xff]  ;;  %v17842_v45 = vld [vmem:[#allocation187_spill] sm:$0xff]  ;;  %v13116_v52 = vpop.xlane.xlu0 %4618 }
 0x510   :  { %17830 = vst [vmem:[#allocation468_spill] sm:$0xff] %v13079_v15  ;;  %17832 = vst [vmem:[#allocation471_spill] sm:$0xff] %v13084_v47  ;;  %v4910_v41 = vadd.f32 %v4909_v17, %v13073_v21  ;;  %v13096_v4 = vmul.f32 %v12684_v1, %v17836_v5  ;;  %v13100_v43 = vmul.f32 %v12513_v16, %v17838_v25  ;;  %v17844_v21 = vld [vmem:[#allocation392_spill] sm:$0xff] }
 0x511   :  { %17833 = vst [vmem:[#allocation473_spill] sm:$0xff] %v13086_v20  ;;  %17835 = vst [vmem:[#allocation476_spill] sm:$0xff] %v13091_v62  ;;  %v4671_v23 = vadd.f32 %v4670_v50, %v13079_v15  ;;  %v17840_v20 = vld [vmem:[#allocation338_spill] sm:$0xff]  ;;  %4900 = vadd.xlane.f32.xlu1 %v4899_v12  ;;  %v13110_v17 = vmul.f32 %v12691_v7, %v17842_v45  ;;  %v4111_v25 = vmax.f32 %v17845_v13, %v17844_v21  ;;  %v17847_v15 = vld [vmem:[#allocation339_spill] sm:$0xff] }
 0x512   :  { %17837 = vst [vmem:[#allocation480_spill] sm:$0xff] %v13096_v4  ;;  %17839 = vst [vmem:[#allocation479_spill] sm:$0xff] %v13100_v43  ;;  %v13105_v2 = vmul.f32 %v12859_v27, %v17840_v20  ;;  %v4911_v29 = vadd.f32 %v4910_v41, %v13091_v62  ;;  %v4764_v5 = vadd.f32 %v13096_v4, %v13084_v47  ;;  %v17849_v12 = vld [vmem:[#allocation188_spill] sm:$0xff]  ;;  %v17851_v47 = vld [vmem:[#allocation398_spill] sm:$0xff] }
 0x513   :  { %17843 = vst [vmem:[#allocation365_spill] sm:$0xff] %v13110_v17  ;;  %17846 = vst [vmem:[#allocation358_spill] sm:$0xff] %v13116_v52  ;;  %v4672_v50 = vadd.f32 %v4671_v23, %v13100_v43  ;;  %v13121_v20 = vmul.f32 %v12864_v18, %v17847_v15  ;;  %v13126_v45 = vmul.f32 %v12695_v31, %v17849_v12  ;;  %v17852_v13 = vld [vmem:[#allocation55_spill] sm:$0xff]  ;;  %v17854_v23 = vld [vmem:[#allocation56_spill] sm:$0xff]  ;;  %v13138_v15 = vpop.xlane.xlu1 %4639 }
 0x514   :  { %17841 = vst [vmem:[#allocation478_spill] sm:$0xff] %v13105_v2  ;;  %v4912_v41 = vadd.f32 %v4911_v29, %v13105_v2  ;;  %v4765_v62 = vadd.f32 %v4764_v5, %v13110_v17  ;;  %v4112_v4 = vmax.f32 %v4111_v25, %v17851_v47  ;;  %v13132_v21 = vmul.f32 %v12473_v56, %v17852_v13  ;;  %v17857_v2 = vld [vmem:[#allocation299_spill] sm:$0xff] }
 0x515   :  { %17848 = vst [vmem:[#allocation359_spill] sm:$0xff] %v13121_v20  ;;  %17850 = vst [vmem:[#allocation360_spill] sm:$0xff] %v13126_v45  ;;  %4673 = vadd.xlane.f32.xlu0 %v4672_v50  ;;  %v13136_v52 = vmul.f32 %v12481_v40, %v17854_v23  ;;  %v13143_v12 = vmul.f32 %v12699_v58, %v17857_v2  ;;  %v17859_v47 = vld [vmem:[#allocation371_spill] sm:$0xff]  ;;  %v17860_v50 = vld [vmem:[#allocation300_spill] sm:$0xff] }
 0x516   :  { %17853 = vst [vmem:[#allocation361_spill] sm:$0xff] %v13132_v21  ;;  %17856 = vst [vmem:[#allocation363_spill] sm:$0xff] %v13138_v15  ;;  %v4913_v29 = vadd.f32 %v4912_v41, %v13121_v20  ;;  %v4766_v5 = vadd.f32 %v4765_v62, %v13126_v45  ;;  %v4113_v25 = vmax.f32 %v4112_v4, %v17859_v47  ;;  %v17862_v17 = vld [vmem:[#allocation383_spill] sm:$0xff]  ;;  %v13153_v15 = vpop.xlane.xlu0 %4522  ;;  %v17866_v2 = vld [vmem:[#allocation401_spill] sm:$0xff] }
 0x517   :  { %17855 = vst [vmem:[#allocation362_spill] sm:$0xff] %v13136_v52  ;;  %17858 = vst [vmem:[#allocation367_spill] sm:$0xff] %v13143_v12  ;;  %v13149_v13 = vmul.f32 %v12703_v28, %v17860_v50  ;;  %v17864_v41 = vld [vmem:[#allocation167_spill] sm:$0xff]  ;;  %v4682_v62 = vadd.f32 %v13136_v52, %v13132_v21  ;;  %v17868_v50 = vld [vmem:[#allocation373_spill] sm:$0xff] }
 0x518   :  { %4914 = vadd.xlane.f32.xlu1 %v4913_v29  ;;  %v4767_v23 = vadd.f32 %v4766_v5, %v13143_v12  ;;  %v4114_v43 = vmax.f32 %v4113_v25, %v17862_v17  ;;  %17863 = vst [vmem:[#allocation366_spill] sm:$0xff] %v13153_v15  ;;  %v13157_v20 = vmul.f32 %v12485_v26, %v17864_v41  ;;  %v17867_v4 = vld [vmem:[#allocation395_spill] sm:$0xff]  ;;  %v17869_v40 = vld [vmem:[#allocation168_spill] sm:$0xff]  ;;  %v17871_v25 = vld [vmem:[#allocation390_spill] sm:$0xff]  ;;  %v13171_v41 = vpop.xlane.xlu1 %4735 }
 0x519   :  { %17861 = vst [vmem:[#allocation364_spill] sm:$0xff] %v13149_v13  ;;  %v4125_v29 = vmax.f32 %v17867_v4, %v17866_v2  ;;  %v13167_v5 = vmul.f32 %v12497_v53, %v17869_v40  ;;  %17872 = vst [vmem:[#allocation377_spill] sm:$0xff] %v13171_v41  ;;  %v17873_v21 = vld [vmem:[#allocation279_spill] sm:$0xff]  ;;  %v17877_v40 = vld [vmem:[#allocation80_spill] sm:$0xff] }
 0x51a   :  { %17865 = vst [vmem:[#allocation375_spill] sm:$0xff] %v13157_v20  ;;  %v4768_v47 = vadd.f32 %v4767_v23, %v13149_v13  ;;  %v4115_v45 = vmax.f32 %v4114_v43, %v17868_v50  ;;  %v4683_v17 = vadd.f32 %v4682_v62, %v13157_v20  ;;  %v13175_v52 = vmul.f32 %v12501_v49, %v17873_v21  ;;  %v17874_v23 = vld [vmem:[#allocation405_spill] sm:$0xff]  ;;  %v17875_v50 = vld [vmem:[#allocation79_spill] sm:$0xff]  ;;  %v17882_v21 = vld [vmem:[#allocation404_spill] sm:$0xff] }
 0x51b   :  { %17870 = vst [vmem:[#allocation376_spill] sm:$0xff] %v13167_v5  ;;  %v4126_v15 = vmax.f32 %v4125_v29, %v17871_v25  ;;  %v13181_v4 = vmul.f32 %v12680_v11, %v17875_v50  ;;  %v13185_v62 = vmul.f32 %v12684_v1, %v17877_v40  ;;  %v13187_v29 = vpop.xlane.xlu0 %4714  ;;  %v17883_v41 = vld [vmem:[#allocation191_spill] sm:$0xff]  ;;  %v17885_v50 = vld [vmem:[#allocation374_spill] sm:$0xff]  ;;  %v17886_v40 = vld [vmem:[#allocation384_spill] sm:$0xff] }
 0x51c   :  { %4769 = vadd.xlane.f32.xlu0 %v4768_v47  ;;  %4116 = vmax.xlane.f32.xlu1 %v4115_v45  ;;  %v4684_v2 = vadd.f32 %v4683_v17, %v13167_v5  ;;  %17879 = vst [vmem:[#allocation410_spill] sm:$0xff] %v13187_v29  ;;  %v17880_v47 = vld [vmem:[#allocation280_spill] sm:$0xff]  ;;  %v4221_v5 = vmax.f32 %v17886_v40, %v17885_v50  ;;  %v17887_v20 = vld [vmem:[#allocation417_spill] sm:$0xff]  ;;  %v17894_v40 = vld [vmem:[#allocation106_spill] sm:$0xff] }
 0x51d   :  { %v4127_v43 = vmax.f32 %v4126_v15, %v17874_v23  ;;  %17876 = vst [vmem:[#allocation378_spill] sm:$0xff] %v13181_v4  ;;  %17878 = vst [vmem:[#allocation355_spill] sm:$0xff] %v13185_v62  ;;  %v13191_v45 = vmul.f32 %v12513_v16, %v17880_v47  ;;  %v13197_v15 = vmul.f32 %v12691_v7, %v17883_v41  ;;  %v13205_v47 = vpop.xlane.xlu1 %4831  ;;  %v17889_v12 = vld [vmem:[#allocation192_spill] sm:$0xff] }
 0x51e   :  { %v4685_v25 = vadd.f32 %v4684_v2, %v13175_v52  ;;  %v4778_v23 = vadd.f32 %v13185_v62, %v13181_v4  ;;  %17888 = vst [vmem:[#allocation413_spill] sm:$0xff] %v13205_v47  ;;  %v13209_v2 = vmul.f32 %v12695_v31, %v17889_v12  ;;  %v17892_v4 = vld [vmem:[#allocation105_spill] sm:$0xff]  ;;  %v13219_v50 = vmul.f32 %v12844_v42, %v17894_v40  ;;  %v17897_v12 = vld [vmem:[#allocation391_spill] sm:$0xff] }
 0x51f   :  { %17881 = vst [vmem:[#allocation411_spill] sm:$0xff] %v13191_v45  ;;  %v4128_v17 = vmax.f32 %v4127_v43, %v17882_v21  ;;  %17884 = vst [vmem:[#allocation412_spill] sm:$0xff] %v13197_v15  ;;  %v17891_v43 = vld [vmem:[#allocation396_spill] sm:$0xff]  ;;  %v13215_v62 = vmul.f32 %v12840_v9, %v17892_v4  ;;  %v13227_v47 = vpop.xlane.xlu0 %4632 }
 0x520   :  { %v4686_v29 = vadd.f32 %v4685_v25, %v13191_v45  ;;  %17890 = vst [vmem:[#allocation414_spill] sm:$0xff] %v13209_v2  ;;  %v4779_v21 = vadd.f32 %v4778_v23, %v13197_v15  ;;  %v4222_v41 = vmax.f32 %v4221_v5, %v17891_v43  ;;  %17898 = vst [vmem:[#allocation441_spill] sm:$0xff] %v13227_v47  ;;  %v17899_v5 = vld [vmem:[#allocation304_spill] sm:$0xff]  ;;  %v17900_v43 = vld [vmem:[#allocation402_spill] sm:$0xff] }
 0x521   :  { %v4129_v13 = vmax.f32 %v4128_v17, %v17887_v20  ;;  %17893 = vst [vmem:[#allocation415_spill] sm:$0xff] %v13215_v62  ;;  %v17895_v20 = vld [vmem:[#allocation303_spill] sm:$0xff]  ;;  %v13235_v40 = vpop.xlane.xlu1 %4742  ;;  %v17902_v15 = vld [vmem:[#allocation217_spill] sm:$0xff] }
 0x522   :  { %4687 = vadd.xlane.f32.xlu0 %v4686_v29  ;;  %v13223_v25 = vmul.f32 %v12699_v58, %v17895_v20  ;;  %v4780_v17 = vadd.f32 %v4779_v21, %v13209_v2  ;;  %v4223_v23 = vmax.f32 %v4222_v41, %v17897_v12  ;;  %17901 = vst [vmem:[#allocation442_spill] sm:$0xff] %v13235_v40  ;;  %v17903_v12 = vld [vmem:[#allocation419_spill] sm:$0xff] }
 0x523   :  { %4130 = vmax.xlane.f32.xlu1 %v4129_v13  ;;  %v13231_v13 = vmul.f32 %v12703_v28, %v17899_v5  ;;  %v13239_v20 = vmul.f32 %v12848_v24, %v17902_v15  ;;  %v4881_v21 = vadd.f32 %v13219_v50, %v13215_v62  ;;  %v17904_v41 = vld [vmem:[#allocation407_spill] sm:$0xff]  ;;  %v17908_v62 = vld [vmem:[#allocation84_spill] sm:$0xff] }
 0x524   :  { %17896 = vst [vmem:[#allocation440_spill] sm:$0xff] %v13223_v25  ;;  %v4781_v29 = vadd.f32 %v4780_v17, %v13223_v25  ;;  %v4224_v4 = vmax.f32 %v4223_v23, %v17900_v43  ;;  %v4139_v47 = vmax.f32 %v17904_v41, %v17903_v12  ;;  %v17905_v45 = vld [vmem:[#allocation83_spill] sm:$0xff]  ;;  %v13251_v23 = vpop.xlane.xlu0 %4728  ;;  %v17907_v43 = vld [vmem:[#allocation218_spill] sm:$0xff]  ;;  %v13261_v12 = vmul.f32 %v12684_v1, %v17908_v62 }
 0x525   :  { %v13249_v17 = vmul.f32 %v12680_v11, %v17905_v45  ;;  %17906 = vst [vmem:[#allocation443_spill] sm:$0xff] %v13251_v23  ;;  %v13255_v15 = vmul.f32 %v12855_v10, %v17907_v43  ;;  %v4882_v40 = vadd.f32 %v4881_v21, %v13239_v20  ;;  %v13269_v45 = vpop.xlane.xlu1 %4838  ;;  %v17911_v43 = vld [vmem:[#allocation195_spill] sm:$0xff] }
 0x526   :  { %v4782_v2 = vadd.f32 %v4781_v29, %v13231_v13  ;;  %v4225_v5 = vmax.f32 %v4224_v4, %v12563_v55  ;;  %v4140_v25 = vmax.f32 %v4139_v47, %v12584_v14  ;;  %v17909_v55 = vld [vmem:[#allocation330_spill] sm:$0xff]  ;;  %17910 = vst [vmem:[#allocation444_spill] sm:$0xff] %v13269_v45  ;;  %v13273_v21 = vmul.f32 %v12691_v7, %v17911_v43 }
 0x527   :  { %v13265_v4 = vmul.f32 %v12859_v27, %v17909_v55  ;;  %v4883_v29 = vadd.f32 %v4882_v40, %v13255_v15  ;;  %v4792_v14 = vadd.f32 %v13261_v12, %v13249_v17  ;;  %v4235_v47 = vmax.f32 %v12643_v22, %v12647_v34 }
 0x528   :  { %4783 = vadd.xlane.f32.xlu0 %v4782_v2  ;;  %4226 = vmax.xlane.f32.xlu1 %v4225_v5  ;;  %v4141_v41 = vmax.f32 %v4140_v25, %v12614_v59  ;;  %v17912_v2 = vld [vmem:[#allocation331_spill] sm:$0xff]  ;;  %v17913_v25 = vld [vmem:[#allocation196_spill] sm:$0xff]  ;;  %v13291_v45 = vpop.xlane.xlu0 %4824 }
 0x529   :  { %v13281_v5 = vmul.f32 %v12864_v18, %v17912_v2  ;;  %v4884_v40 = vadd.f32 %v4883_v29, %v13265_v4  ;;  %v13287_v62 = vmul.f32 %v12695_v31, %v17913_v25  ;;  %v4793_v43 = vadd.f32 %v4792_v14, %v13273_v21  ;;  %17914 = vst [vmem:[#allocation445_spill] sm:$0xff] %v13291_v45  ;;  %v17915_v2 = vld [vmem:[#allocation307_spill] sm:$0xff]  ;;  %v17917_v29 = vld [vmem:[#allocation422_spill] sm:$0xff] }
 0x52a   :  { %v4142_v59 = vmax.f32 %v4141_v41, %v12625_v35  ;;  %v4236_v55 = vmax.f32 %v4235_v47, %v12654_v54  ;;  %v13297_v23 = vmul.f32 %v12699_v58, %v17915_v2  ;;  %v17918_v25 = vld [vmem:[#allocation107_spill] sm:$0xff]  ;;  %v13305_v54 = vpop.xlane.xlu1 %4852  ;;  %v17920_v47 = vld [vmem:[#allocation308_spill] sm:$0xff] }
 0x52b   :  { %v4885_v22 = vadd.f32 %v4884_v40, %v13281_v5  ;;  %v4794_v35 = vadd.f32 %v4793_v43, %v13287_v62  ;;  %v13303_v14 = vmul.f32 %v12840_v9, %v17918_v25  ;;  %17919 = vst [vmem:[#allocation357_spill] sm:$0xff] %v13305_v54  ;;  %v13309_v40 = vmul.f32 %v12703_v28, %v17920_v47  ;;  %v17922_v2 = vld [vmem:[#allocation108_spill] sm:$0xff] }
 0x52c   :  { %v4143_v34 = vmax.f32 %v4142_v59, %v12629_v48  ;;  %17916 = vst [vmem:[#allocation356_spill] sm:$0xff] %v13297_v23  ;;  %v4237_v41 = vmax.f32 %v4236_v55, %v17917_v29  ;;  %v13315_v43 = vmul.f32 %v12844_v42, %v17922_v2  ;;  %v17924_v29 = vld [vmem:[#allocation219_spill] sm:$0xff] }
 0x52d   :  { %4886 = vadd.xlane.f32.xlu0 %v4885_v22  ;;  %17921 = vst [vmem:[#allocation392_spill] sm:$0xff] %v13309_v40  ;;  %v4795_v48 = vadd.f32 %v4794_v35, %v13297_v23  ;;  %v13323_v25 = vmul.f32 %v12848_v24, %v17924_v29  ;;  %v17925_v35 = vld [vmem:[#allocation400_spill] sm:$0xff]  ;;  %v17927_v2 = vld [vmem:[#allocation111_spill] sm:$0xff]  ;;  %v17940_v23 = vld [vmem:[#allocation333_spill] sm:$0xff] }
 0x52e   :  { %4144 = vmax.xlane.f32.xlu1 %v4143_v34  ;;  %v4238_v59 = vmax.f32 %v4237_v41, %v12669_v63  ;;  %v13319_v34 = vpop.xlane.xlu0 %4749  ;;  %v4888_v47 = vadd.f32 %v13315_v43, %v13303_v14  ;;  %v4331_v63 = vmax.f32 %v17925_v35, %v12716_v8  ;;  %v13329_v41 = vpop.xlane.xlu1 %4061  ;;  %v17931_v29 = vld [vmem:[#allocation220_spill] sm:$0xff] }
 0x52f   :  { %v4796_v55 = vadd.f32 %v4795_v48, %v13309_v40  ;;  %17923 = vst [vmem:[#allocation393_spill] sm:$0xff] %v13319_v34  ;;  %17926 = vst [vmem:[#allocation398_spill] sm:$0xff] %v13329_v41  ;;  %v13333_v48 = vmul.f32 %v12840_v9, %v17927_v2  ;;  %v13341_v54 = vmul.f32 %v12855_v10, %v17931_v29  ;;  %v17935_v41 = vld [vmem:[#allocation428_spill] sm:$0xff]  ;;  %v17937_v40 = vld [vmem:[#allocation223_spill] sm:$0xff] }
 0x530   :  { %v4239_v22 = vmax.f32 %v4238_v59, %v12673_v57  ;;  %v17929_v57 = vld [vmem:[#allocation112_spill] sm:$0xff]  ;;  %v4889_v34 = vadd.f32 %v4888_v47, %v13323_v25  ;;  %v4332_v8 = vmax.f32 %v4331_v63, %v12720_v44  ;;  %v13357_v29 = vmul.f32 %v12848_v24, %v17937_v40  ;;  %v17938_v44 = vld [vmem:[#allocation403_spill] sm:$0xff] }
 0x531   :  { %4797 = vadd.xlane.f32.xlu0 %v4796_v55  ;;  %17928 = vst [vmem:[#allocation371_spill] sm:$0xff] %v13333_v48  ;;  %v13337_v59 = vmul.f32 %v12844_v42, %v17929_v57  ;;  %v17933_v55 = vld [vmem:[#allocation332_spill] sm:$0xff] }
 0x532   :  { %4240 = vmax.xlane.f32.xlu1 %v4239_v22  ;;  %v13345_v35 = vpop.xlane.xlu0 %4845  ;;  %v13349_v22 = vmul.f32 %v12859_v27, %v17933_v55  ;;  %v4890_v2 = vadd.f32 %v4889_v34, %v13341_v54  ;;  %v4333_v45 = vmax.f32 %v4332_v8, %v17935_v41  ;;  %v13353_v57 = vpop.xlane.xlu1 %4075  ;;  %v17939_v63 = vld [vmem:[#allocation380_spill] sm:$0xff]  ;;  %v4345_v55 = vmax.f32 %v12787_v37, %v12791_v30 }
 0x533   :  { %17930 = vst [vmem:[#allocation383_spill] sm:$0xff] %v13337_v59  ;;  %17932 = vst [vmem:[#allocation401_spill] sm:$0xff] %v13345_v35  ;;  %v4902_v47 = vadd.f32 %v13337_v59, %v13333_v48  ;;  %v4249_v35 = vmax.f32 %v17939_v63, %v17938_v44  ;;  %v13367_v34 = vmul.f32 %v12864_v18, %v17940_v23  ;;  %v17944_v23 = vld [vmem:[#allocation386_spill] sm:$0xff] }
 0x534   :  { %17934 = vst [vmem:[#allocation395_spill] sm:$0xff] %v13349_v22  ;;  %17936 = vst [vmem:[#allocation373_spill] sm:$0xff] %v13353_v57  ;;  %v4891_v41 = vadd.f32 %v4890_v2, %v13349_v22  ;;  %v4334_v8 = vmax.f32 %v4333_v45, %v12735_v61  ;;  %v17941_v57 = vld [vmem:[#allocation224_spill] sm:$0xff]  ;;  %v4346_v44 = vmax.f32 %v4345_v55, %v12803_v3 }
 0x535   :  { %v13373_v40 = vmul.f32 %v12855_v10, %v17941_v57  ;;  %v4903_v48 = vadd.f32 %v4902_v47, %v13357_v29  ;;  %v4250_v59 = vmax.f32 %v4249_v35, %v12761_v60  ;;  %v17945_v2 = vld [vmem:[#allocation368_spill] sm:$0xff]  ;;  %v17949_v35 = vld [vmem:[#allocation382_spill] sm:$0xff] }
 0x536   :  { %v13378_v63 = vpop.xlane.xlu0 %4859  ;;  %v4892_v37 = vadd.f32 %v4891_v41, %v13367_v34  ;;  %v4335_v30 = vmax.f32 %v4334_v8, %v12739_v46  ;;  %v4104_v22 = vmax.f32 %v17945_v2, %v17944_v23  ;;  %v13384_v61 = vpop.xlane.xlu1 %4171  ;;  %v17947_v45 = vld [vmem:[#allocation336_spill] sm:$0xff]  ;;  %v4347_v3 = vmax.f32 %v4346_v44, %v12814_v39  ;;  %v17950_v46 = vld [vmem:[#allocation337_spill] sm:$0xff] }
 0x537   :  { %17942 = vst [vmem:[#allocation390_spill] sm:$0xff] %v13373_v40  ;;  %17943 = vst [vmem:[#allocation405_spill] sm:$0xff] %v13378_v63  ;;  %v13388_v57 = vmul.f32 %v12859_v27, %v17947_v45  ;;  %v4904_v47 = vadd.f32 %v4903_v48, %v13373_v40  ;;  %v4251_v60 = vmax.f32 %v4250_v59, %v12769_v6  ;;  %v17952_v8 = vld [vmem:[#allocation425_spill] sm:$0xff]  ;;  %v17956_v59 = vld [vmem:[#allocation438_spill] sm:$0xff] }
 0x538   :  { %17946 = vst [vmem:[#allocation404_spill] sm:$0xff] %v13384_v61  ;;  %4893 = vadd.xlane.f32.xlu0 %v4892_v37  ;;  %4336 = vmax.xlane.f32.xlu1 %v4335_v30  ;;  %v4105_v55 = vmax.f32 %v4104_v22, %v17949_v35  ;;  %v13396_v41 = vmul.f32 %v12864_v18, %v17950_v46  ;;  %v17954_v63 = vld [vmem:[#allocation421_spill] sm:$0xff]  ;;  %v17955_v61 = vld [vmem:[#allocation372_spill] sm:$0xff]  ;;  %v17957_v37 = vld [vmem:[#allocation434_spill] sm:$0xff] }
 0x539   :  { %17948 = vst [vmem:[#allocation374_spill] sm:$0xff] %v13388_v57  ;;  %v4905_v23 = vadd.f32 %v4904_v47, %v13388_v57  ;;  %v4252_v2 = vmax.f32 %v4251_v60, %v17952_v8  ;;  %v4348_v48 = vmax.f32 %v4347_v3, %v17954_v63  ;;  %v4434_v30 = vmax.f32 %v17957_v37, %v17956_v59  ;;  %v17959_v44 = vld [vmem:[#allocation433_spill] sm:$0xff]  ;;  %v17960_v46 = vld [vmem:[#allocation426_spill] sm:$0xff]  ;;  %v17962_v57 = vld [vmem:[#allocation399_spill] sm:$0xff] }
 0x53a   :  { %17951 = vst [vmem:[#allocation384_spill] sm:$0xff] %v13396_v41  ;;  %v13400_v45 = vpop.xlane.xlu0 %4054  ;;  %v4106_v6 = vmax.f32 %v4105_v55, %v17955_v61  ;;  %v13406_v39 = vpop.xlane.xlu1 %4185  ;;  %v17961_v40 = vld [vmem:[#allocation409_spill] sm:$0xff]  ;;  %v17963_v8 = vld [vmem:[#allocation450_spill] sm:$0xff]  ;;  %v17965_v59 = vld [vmem:[#allocation447_spill] sm:$0xff] }
 0x53b   :  { %17953 = vst [vmem:[#allocation417_spill] sm:$0xff] %v13400_v45  ;;  %17958 = vst [vmem:[#allocation396_spill] sm:$0xff] %v13406_v39  ;;  %v4906_v22 = vadd.f32 %v4905_v23, %v13396_v41  ;;  %v4253_v35 = vmax.f32 %v4252_v2, %v17959_v44  ;;  %v4118_v47 = vmax.f32 %v17961_v40, %v17960_v46  ;;  %v17964_v3 = vld [vmem:[#allocation430_spill] sm:$0xff]  ;;  %v17966_v39 = vld [vmem:[#allocation457_spill] sm:$0xff] }
 0x53c   :  { %v4107_v60 = vmax.f32 %v4106_v6, %v17962_v57  ;;  %v4435_v63 = vmax.f32 %v4434_v30, %v17963_v8  ;;  %v4349_v37 = vmax.f32 %v4348_v48, %v17965_v59  ;;  %v17967_v45 = vld [vmem:[#allocation458_spill] sm:$0xff]  ;;  %v17969_v2 = vld [vmem:[#allocation389_spill] sm:$0xff]  ;;  %v17974_v8 = vld [vmem:[#allocation432_spill] sm:$0xff] }
 0x53d   :  { %4907 = vadd.xlane.f32.xlu0 %v4906_v22  ;;  %4254 = vmax.xlane.f32.xlu1 %v4253_v35  ;;  %v4119_v61 = vmax.f32 %v4118_v47, %v17964_v3  ;;  %v4359_v23 = vmax.f32 %v17967_v45, %v17966_v39  ;;  %v17970_v40 = vld [vmem:[#allocation429_spill] sm:$0xff]  ;;  %v17972_v22 = vld [vmem:[#allocation439_spill] sm:$0xff]  ;;  %v17973_v35 = vld [vmem:[#allocation418_spill] sm:$0xff] }
 0x53e   :  { %v13415_v55 = vpop.xlane.xlu0 %4068  ;;  %v13420_v41 = vpop.xlane.xlu1 %4089  ;;  %v4108_v44 = vmax.f32 %v4107_v60, %v17969_v2  ;;  %v4436_v46 = vmax.f32 %v4435_v63, %v17970_v40  ;;  %v17971_v57 = vld [vmem:[#allocation453_spill] sm:$0xff]  ;;  %v4214_v30 = vmax.f32 %v17973_v35, %v17972_v22  ;;  %v17975_v3 = vld [vmem:[#allocation406_spill] sm:$0xff]  ;;  %v17976_v60 = vld [vmem:[#allocation455_spill] sm:$0xff] }
 0x53f   :  { %17968 = vst [vmem:[#allocation391_spill] sm:$0xff] %v13420_v41  ;;  %v4120_v6 = vmax.f32 %v4119_v61, %v17971_v57  ;;  %v4360_v47 = vmax.f32 %v4359_v23, %v12948_v33  ;;  %v17978_v40 = vld [vmem:[#allocation423_spill] sm:$0xff]  ;;  %v17979_v33 = vld [vmem:[#allocation452_spill] sm:$0xff]  ;;  %v17983_v35 = vld [vmem:[#allocation465_spill] sm:$0xff] }
 0x540   :  { %v4437_v48 = vmax.f32 %v4436_v46, %v17974_v8  ;;  %v4215_v2 = vmax.f32 %v4214_v30, %v17976_v60  ;;  %v17980_v23 = vld [vmem:[#allocation460_spill] sm:$0xff]  ;;  %v17981_v46 = vld [vmem:[#allocation435_spill] sm:$0xff] }
 0x541   :  { %4350 = vmax.xlane.f32.xlu1 %v4349_v37  ;;  %4109 = vmax.xlane.f32.xlu0 %v4108_v44  ;;  %v4121_v59 = vmax.f32 %v4120_v6, %v17975_v3  ;;  %v4361_v39 = vmax.f32 %v4360_v47, %v12965_v0  ;;  %v4455_v37 = vmax.f32 %v17979_v33, %v12990_v32  ;;  %v17982_v0 = vld [vmem:[#allocation446_spill] sm:$0xff]  ;;  %v17984_v8 = vld [vmem:[#allocation448_spill] sm:$0xff] }
 0x542   :  { %v13430_v45 = vpop.xlane.xlu0 %4164  ;;  %v13434_v63 = vpop.xlane.xlu1 %4281  ;;  %v4438_v61 = vmax.f32 %v4437_v48, %v12916_v36  ;;  %v4216_v22 = vmax.f32 %v4215_v2, %v17981_v46  ;;  %v4132_v30 = vmax.f32 %v17983_v35, %v17982_v0  ;;  %v17986_v32 = vld [vmem:[#allocation474_spill] sm:$0xff]  ;;  %v17988_v2 = vld [vmem:[#allocation437_spill] sm:$0xff]  ;;  %v17991_v33 = vld [vmem:[#allocation32_spill] sm:$0xff] }
 0x543   :  { %17977 = vst [vmem:[#allocation402_spill] sm:$0xff] %v13434_v63  ;;  %v4122_v57 = vmax.f32 %v4121_v59, %v17978_v40  ;;  %v4362_v44 = vmax.f32 %v4361_v39, %v17980_v23  ;;  %v4456_v6 = vmax.f32 %v4455_v37, %v13011_v19  ;;  %v17987_v39 = vld [vmem:[#allocation469_spill] sm:$0xff]  ;;  %v17989_v40 = vld [vmem:[#allocation31_spill] sm:$0xff]  ;;  %v18022_v41 = vld [vmem:[#allocation284_spill] sm:$0xff] }
 0x544   :  { %v4217_v36 = vmax.f32 %v4216_v22, %v17984_v8  ;;  %v4133_v60 = vmax.f32 %v4132_v30, %v17987_v39  ;;  %v17992_v37 = vld [vmem:[#allocation381_spill] sm:$0xff]  ;;  %v17998_v8 = vld [vmem:[#allocation459_spill] sm:$0xff] }
 0x545   :  { %4439 = vmax.xlane.f32.xlu1 %v4438_v61  ;;  %4123 = vmax.xlane.f32.xlu0 %v4122_v57  ;;  %v4363_v3 = vmax.f32 %v4362_v44, %v12997_v51  ;;  %v4457_v59 = vmax.f32 %v4456_v6, %v17986_v32  ;;  %v17990_v57 = vld [vmem:[#allocation387_spill] sm:$0xff]  ;;  %v13460_v23 = vmul.f32 %v17992_v37, %v17991_v33  ;;  %v17993_v22 = vld [vmem:[#allocation461_spill] sm:$0xff]  ;;  %v17999_v32 = vld [vmem:[#allocation466_spill] sm:$0xff] }
 0x546   :  { %v13445_v47 = vpop.xlane.xlu0 %4178  ;;  %v13448_v48 = vpop.xlane.xlu1 %4199  ;;  %v4218_v61 = vmax.f32 %v4217_v36, %v17988_v2  ;;  %v13456_v19 = vmul.f32 %v17990_v57, %v17989_v40  ;;  %v4134_v0 = vmax.f32 %v4133_v60, %v17993_v22  ;;  %v17995_v44 = vld [vmem:[#allocation143_spill] sm:$0xff]  ;;  %v18000_v2 = vld [vmem:[#allocation144_spill] sm:$0xff]  ;;  %v18001_v57 = vld [vmem:[#allocation370_spill] sm:$0xff] }
 0x547   :  { %17985 = vst [vmem:[#allocation419_spill] sm:$0xff] %v13448_v48  ;;  %v4458_v46 = vmax.f32 %v4457_v59, %v13040_v38  ;;  %v17996_v6 = vld [vmem:[#allocation379_spill] sm:$0xff]  ;;  %v4587_v59 = vsel %vm534_vm0, %v13460_v23, 0.0  ;;  %v18013_v40 = vld [vmem:[#allocation256_spill] sm:$0xff] }
 0x548   :  { %v13468_v35 = vmul.f32 %v17996_v6, %v17995_v44  ;;  %v4135_v39 = vmax.f32 %v4134_v0, %v17999_v32  ;;  %v4586_v38 = vsel %vm534_vm0, %v13456_v19, 0.0  ;;  %v18002_v60 = vld [vmem:[#allocation467_spill] sm:$0xff]  ;;  %v18006_v32 = vld [vmem:[#allocation462_spill] sm:$0xff] }
 0x549   :  { %4364 = vmax.xlane.f32.xlu1 %v4363_v3  ;;  %4219 = vmax.xlane.f32.xlu0 %v4218_v61  ;;  %v4459_v36 = vmax.f32 %v4458_v46, %v17998_v8  ;;  %v13476_v3 = vmul.f32 %v18001_v57, %v18000_v2  ;;  %v4588_v37 = vadd.f32 %v4587_v59, %v4586_v38  ;;  %v18004_v6 = vld [vmem:[#allocation255_spill] sm:$0xff]  ;;  %v18005_v46 = vld [vmem:[#allocation369_spill] sm:$0xff]  ;;  %v18007_v57 = vld [vmem:[#allocation470_spill] sm:$0xff] }
 0x54a   :  { %v13464_v51 = vpop.xlane.xlu0 %4082  ;;  %v13470_v30 = vpop.xlane.xlu1 %4295  ;;  %v4136_v61 = vmax.f32 %v4135_v39, %v18002_v60  ;;  %v13487_v8 = vmul.f32 %v18005_v46, %v18004_v6  ;;  %v4589_v0 = vsel %vm534_vm0, %v13468_v35, 0.0  ;;  %v4228_v2 = vmax.f32 %v18007_v57, %v18006_v32  ;;  %v18010_v38 = vld [vmem:[#allocation60_spill] sm:$0xff]  ;;  %v18012_v46 = vld [vmem:[#allocation171_spill] sm:$0xff] }
 0x54b   :  { %17994 = vst [vmem:[#allocation407_spill] sm:$0xff] %v13464_v51  ;;  %17997 = vst [vmem:[#allocation422_spill] sm:$0xff] %v13470_v30  ;;  %v4590_v33 = vadd.f32 %v4589_v0, %v4588_v37  ;;  %v18011_v59 = vld [vmem:[#allocation416_spill] sm:$0xff]  ;;  %v13505_v6 = vmul.f32 %v12485_v26, %v18012_v46  ;;  %v18015_v37 = vld [vmem:[#allocation477_spill] sm:$0xff] }
 0x54c   :  { %v13501_v60 = vmul.f32 %v18011_v59, %v18010_v38  ;;  %v18014_v30 = vld [vmem:[#allocation388_spill] sm:$0xff]  ;;  %v4229_v0 = vmax.f32 %v4228_v2, %v18015_v37  ;;  %v18018_v38 = vld [vmem:[#allocation475_spill] sm:$0xff] }
 0x54d   :  { %4460 = vmax.xlane.f32.xlu1 %v4459_v36  ;;  %4137 = vmax.xlane.f32.xlu0 %v4136_v61  ;;  %v18009_v36 = vld [vmem:[#allocation59_spill] sm:$0xff]  ;;  %v13509_v63 = vmul.f32 %v18014_v30, %v18013_v40  ;;  %v4591_v61 = vsel %vm534_vm0, %v13476_v3, 0.0  ;;  %v4593_v30 = vsel %vm534_vm0, %v13487_v8, 0.0  ;;  %v4699_v37 = vsel %vm534_vm0, %v13505_v6, 0.0 }
 0x54e   :  { %v13483_v22 = vpop.xlane.xlu0 %4274  ;;  %v13493_v44 = vpop.xlane.xlu1 %4391  ;;  %v13497_v39 = vmul.f32 %v12473_v56, %v18009_v36  ;;  %v4592_v32 = vadd.f32 %v4591_v61, %v4590_v33  ;;  %v18016_v56 = vld [vmem:[#allocation172_spill] sm:$0xff]  ;;  %v4697_v26 = vsel %vm534_vm0, %v13501_v60, 0.0  ;;  %v4230_v36 = vmax.f32 %v4229_v0, %v18018_v38  ;;  %v18020_v61 = vld [vmem:[#allocation283_spill] sm:$0xff] }
 0x54f   :  { %18003 = vst [vmem:[#allocation400_spill] sm:$0xff] %v13483_v22  ;;  %18008 = vst [vmem:[#allocation428_spill] sm:$0xff] %v13493_v44  ;;  %v13516_v57 = vmul.f32 %v12497_v53, %v18016_v56  ;;  %v13531_v53 = vmul.f32 %v12501_v49, %v18020_v61  ;;  %v4595_v56 = vsel %vm534_vm0, %v13509_v63, 0.0  ;;  %v18021_v44 = vld [vmem:[#allocation468_spill] sm:$0xff]  ;;  %v13540_v38 = vmul.f32 %v12513_v16, %v18022_v41  ;;  %v18024_v49 = vld [vmem:[#allocation471_spill] sm:$0xff] }
 0x550   :  { %v4696_v59 = vsel %vm534_vm0, %v13497_v39, 0.0  ;;  %v4594_v33 = vadd.f32 %v4593_v30, %v4592_v32  ;;  %v4231_v22 = vmax.f32 %v4230_v36, %v18021_v44  ;;  %v18023_v32 = vld [vmem:[#allocation480_spill] sm:$0xff]  ;;  %v18026_v30 = vld [vmem:[#allocation479_spill] sm:$0xff]  ;;  %v18029_v36 = vld [vmem:[#allocation365_spill] sm:$0xff] }
 0x551   :  { %v4698_v40 = vadd.f32 %v4697_v26, %v4696_v59  ;;  %v4701_v0 = vsel %vm534_vm0, %v13516_v57, 0.0  ;;  %v4324_v59 = vmax.f32 %v18024_v49, %v18023_v32  ;;  %v18027_v51 = vld [vmem:[#allocation87_spill] sm:$0xff]  ;;  %v4703_v16 = vsel %vm534_vm0, %v13531_v53, 0.0 }
 0x552   :  { %v13522_v46 = vpop.xlane.xlu0 %4192  ;;  %v13527_v2 = vpop.xlane.xlu1 %4302  ;;  %v4232_v61 = vmax.f32 %v4231_v22, %v18026_v30  ;;  %v13551_v44 = vmul.f32 %v12680_v11, %v18027_v51  ;;  %v18031_v22 = vld [vmem:[#allocation199_spill] sm:$0xff]  ;;  %v4705_v11 = vsel %vm534_vm0, %v13540_v38, 0.0  ;;  %v18034_v51 = vld [vmem:[#allocation200_spill] sm:$0xff] }
 0x553   :  { %18017 = vst [vmem:[#allocation403_spill] sm:$0xff] %v13522_v46  ;;  %18019 = vst [vmem:[#allocation380_spill] sm:$0xff] %v13527_v2  ;;  %v4700_v48 = vadd.f32 %v4699_v37, %v4698_v40  ;;  %v4596_v46 = vadd.f32 %v4595_v56, %v4594_v33  ;;  %v4325_v56 = vmax.f32 %v4324_v59, %v18029_v36  ;;  %v18030_v33 = vld [vmem:[#allocation88_spill] sm:$0xff] }
 0x554   :  { %v13560_v37 = vmul.f32 %v12684_v1, %v18030_v33  ;;  %4233 = vmax.xlane.f32.xlu0 %v4232_v61  ;;  %v13573_v59 = vmul.f32 %v12695_v31, %v18034_v51  ;;  %v4806_v1 = vsel %vm534_vm0, %v13551_v44, 0.0  ;;  %v18036_v61 = vld [vmem:[#allocation367_spill] sm:$0xff] }
 0x555   :  { %v4702_v2 = vadd.f32 %v4701_v0, %v4700_v48  ;;  %4597 = vadd.xlane.f32.xlu1 %v4596_v46  ;;  %v13564_v48 = vmul.f32 %v12691_v7, %v18031_v22  ;;  %v18032_v0 = vld [vmem:[#allocation360_spill] sm:$0xff] }
 0x556   :  { %v13546_v26 = vpop.xlane.xlu0 %4288  ;;  %v13553_v40 = vpop.xlane.xlu1 %4398  ;;  %v4326_v46 = vmax.f32 %v4325_v56, %v18032_v0  ;;  %v18037_v56 = vld [vmem:[#allocation311_spill] sm:$0xff]  ;;  %v18040_v22 = vld [vmem:[#allocation364_spill] sm:$0xff] }
 0x557   :  { %18025 = vst [vmem:[#allocation386_spill] sm:$0xff] %v13546_v26  ;;  %18028 = vst [vmem:[#allocation368_spill] sm:$0xff] %v13553_v40  ;;  %v4704_v32 = vadd.f32 %v4703_v16, %v4702_v2  ;;  %v4807_v2 = vsel %vm534_vm0, %v13560_v37, 0.0  ;;  %v13584_v0 = vmul.f32 %v12699_v58, %v18037_v56  ;;  %v4809_v31 = vsel %vm534_vm0, %v13564_v48, 0.0  ;;  %v18041_v40 = vld [vmem:[#allocation115_spill] sm:$0xff]  ;;  %v18044_v58 = vld [vmem:[#allocation312_spill] sm:$0xff] }
 0x558   :  { %v4327_v16 = vmax.f32 %v4326_v46, %v18036_v61  ;;  %v4808_v36 = vadd.f32 %v4807_v2, %v4806_v1  ;;  %v18042_v46 = vld [vmem:[#allocation116_spill] sm:$0xff]  ;;  %v13603_v2 = vmul.f32 %v12703_v28, %v18044_v58  ;;  %v4811_v61 = vsel %vm534_vm0, %v13573_v59, 0.0  ;;  %v18056_v26 = vld [vmem:[#allocation449_spill] sm:$0xff] }
 0x559   :  { %v4706_v30 = vadd.f32 %v4705_v11, %v4704_v32  ;;  %v18038_v32 = vld [vmem:[#allocation362_spill] sm:$0xff]  ;;  %v18039_v11 = vld [vmem:[#allocation361_spill] sm:$0xff]  ;;  %v18049_v58 = vld [vmem:[#allocation228_spill] sm:$0xff] }
 0x55a   :  { %v4242_v51 = vmax.f32 %v18039_v11, %v18038_v32  ;;  %v4328_v33 = vmax.f32 %v4327_v16, %v18040_v22  ;;  %v4810_v41 = vadd.f32 %v4809_v31, %v4808_v36  ;;  %v18045_v32 = vld [vmem:[#allocation375_spill] sm:$0xff]  ;;  %v18048_v11 = vld [vmem:[#allocation376_spill] sm:$0xff] }
 0x55b   :  { %v13569_v49 = vpop.xlane.xlu0 %4384  ;;  %4707 = vadd.xlane.f32.xlu1 %v4706_v30  ;;  %v13597_v30 = vmul.f32 %v12844_v42, %v18042_v46  ;;  %v18047_v36 = vld [vmem:[#allocation227_spill] sm:$0xff]  ;;  %v4813_v42 = vsel %vm534_vm0, %v13584_v0, 0.0 }
 0x55c   :  { %18033 = vst [vmem:[#allocation382_spill] sm:$0xff] %v13569_v49  ;;  %v13579_v7 = vpop.xlane.xlu1 %4412  ;;  %v4243_v22 = vmax.f32 %v4242_v51, %v18045_v32  ;;  %4329 = vmax.xlane.f32.xlu0 %v4328_v33  ;;  %v13612_v31 = vmul.f32 %v12848_v24, %v18047_v36  ;;  %v13621_v51 = vmul.f32 %v12855_v10, %v18049_v58  ;;  %v4815_v24 = vsel %vm534_vm0, %v13603_v2, 0.0  ;;  %v18051_v36 = vld [vmem:[#allocation324_spill] sm:$0xff]  ;;  %v18053_v58 = vld [vmem:[#allocation378_spill] sm:$0xff] }
 0x55d   :  { %18035 = vst [vmem:[#allocation425_spill] sm:$0xff] %v13579_v7  ;;  %v13593_v7 = vmul.f32 %v12840_v9, %v18041_v40  ;;  %v4812_v9 = vadd.f32 %v4811_v61, %v4810_v41  ;;  %v4917_v41 = vsel %vm534_vm0, %v13597_v30, 0.0  ;;  %v18055_v49 = vld [vmem:[#allocation454_spill] sm:$0xff] }
 0x55e   :  { %v4244_v46 = vmax.f32 %v4243_v22, %v18048_v11  ;;  %v4919_v10 = vsel %vm534_vm0, %v13612_v31, 0.0 }
 0x55f   :  { %v13599_v1 = vpop.xlane.xlu0 %4309  ;;  %v4916_v28 = vsel %vm534_vm0, %v13593_v7, 0.0  ;;  %v4814_v40 = vadd.f32 %v4813_v42, %v4812_v9  ;;  %v13634_v9 = vmul.f32 %v12859_v27, %v18051_v36  ;;  %v18052_v42 = vld [vmem:[#allocation355_spill] sm:$0xff]  ;;  %v4921_v27 = vsel %vm534_vm0, %v13621_v51, 0.0 }
 0x560   :  { %18043 = vst [vmem:[#allocation421_spill] sm:$0xff] %v13599_v1  ;;  %v13608_v16 = vpop.xlane.xlu1 %4549  ;;  %v4245_v61 = vmax.f32 %v4244_v46, %v13175_v52  ;;  %v4918_v32 = vadd.f32 %v4917_v41, %v4916_v28  ;;  %v4338_v56 = vmax.f32 %v18053_v58, %v18052_v42  ;;  %v4469_v52 = vmax.f32 %v18056_v26, %v18055_v49  ;;  %v18057_v46 = vld [vmem:[#allocation340_spill] sm:$0xff]  ;;  %v18062_v49 = vld [vmem:[#allocation414_spill] sm:$0xff] }
 0x561   :  { %18046 = vst [vmem:[#allocation372_spill] sm:$0xff] %v13608_v16  ;;  %v4816_v11 = vadd.f32 %v4815_v24, %v4814_v40  ;;  %v13645_v40 = vmul.f32 %v12864_v18, %v18057_v46  ;;  %v18058_v28 = vld [vmem:[#allocation412_spill] sm:$0xff]  ;;  %v18059_v24 = vld [vmem:[#allocation415_spill] sm:$0xff]  ;;  %v4923_v18 = vsel %vm534_vm0, %v13634_v9, 0.0  ;;  %v18065_v46 = vld [vmem:[#allocation478_spill] sm:$0xff] }
 0x562   :  { %v4920_v16 = vadd.f32 %v4919_v10, %v4918_v32  ;;  %v4339_v41 = vmax.f32 %v4338_v56, %v18058_v28  ;;  %v4441_v36 = vmax.f32 %v18059_v24, %v13219_v50  ;;  %v18063_v56 = vld [vmem:[#allocation476_spill] sm:$0xff]  ;;  %v4146_v50 = vsel %vm534_vm0, %v13456_v19, -inf }
 0x563   :  { %v13625_v33 = vpop.xlane.xlu0 %4405  ;;  %4817 = vadd.xlane.f32.xlu1 %v4816_v11 }
 0x564   :  { %18050 = vst [vmem:[#allocation438_spill] sm:$0xff] %v13625_v33  ;;  %v13630_v22 = vpop.xlane.xlu1 %4556  ;;  %v18054_v33 = vld [vmem:[#allocation411_spill] sm:$0xff]  ;;  %v4340_v11 = vmax.f32 %v4339_v41, %v18062_v49  ;;  %v4442_v10 = vmax.f32 %v4441_v36, %v13239_v20  ;;  %v4147_v20 = vsel %vm534_vm0, %v13460_v23, -inf  ;;  %v4151_v23 = vsel %vm534_vm0, %v13476_v3, -inf }
 0x565   :  { %v4246_v1 = vmax.f32 %v4245_v61, %v18054_v33  ;;  %v4922_v33 = vadd.f32 %v4921_v27, %v4920_v16  ;;  %v18061_v61 = vld [vmem:[#allocation463_spill] sm:$0xff]  ;;  %v18064_v16 = vld [vmem:[#allocation440_spill] sm:$0xff]  ;;  %v4148_v19 = vmax.f32 %v4146_v50, %v4147_v20 }
 0x566   :  { %v4470_v32 = vmax.f32 %v4469_v52, %v18061_v61  ;;  %v4341_v52 = vmax.f32 %v4340_v11, %v18064_v16  ;;  %v4443_v27 = vmax.f32 %v4442_v10, %v13255_v15  ;;  %v18066_v11 = vld [vmem:[#allocation359_spill] sm:$0xff]  ;;  %v4261_v16 = vsel %vm534_vm0, %v13516_v57, -inf }
 0x567   :  { %v13652_v58 = vpop.xlane.xlu0 %4419  ;;  %4247 = vmax.xlane.f32.xlu0 %v4246_v1  ;;  %v4924_v42 = vadd.f32 %v4923_v18, %v4922_v33  ;;  %v4925_v1 = vsel %vm534_vm0, %v13645_v40, 0.0  ;;  %v4149_v18 = vsel %vm534_vm0, %v13468_v35, -inf  ;;  %v4257_v35 = vsel %vm534_vm0, %v13501_v60, -inf }
 0x568   :  { %18060 = vst [vmem:[#allocation434_spill] sm:$0xff] %v13652_v58  ;;  %v13655_v26 = vpop.xlane.xlu1 %4570  ;;  %v4471_v28 = vmax.f32 %v4470_v32, %v18063_v56  ;;  %v4342_v36 = vmax.f32 %v4341_v52, %v13231_v13  ;;  %v4444_v33 = vmax.f32 %v4443_v27, %v13265_v4  ;;  %v4150_v15 = vmax.f32 %v4148_v19, %v4149_v18 }
 0x569   :  { %v4926_v61 = vadd.f32 %v4925_v1, %v4924_v42  ;;  %v4352_v13 = vmax.f32 %v13249_v17, %v13261_v12  ;;  %v4256_v4 = vsel %vm534_vm0, %v13497_v39, -inf  ;;  %v4153_v56 = vsel %vm534_vm0, %v13487_v8, -inf }
 0x56a   :  { %v4472_v41 = vmax.f32 %v4471_v28, %v18065_v46  ;;  %v4445_v10 = vmax.f32 %v4444_v33, %v13281_v5  ;;  %v4152_v42 = vmax.f32 %v4150_v15, %v4151_v23  ;;  %v4258_v50 = vmax.f32 %v4256_v4, %v4257_v35 }
 0x56b   :  { %v13668_v24 = vpop.xlane.xlu0 %4542  ;;  %4927 = vadd.xlane.f32.xlu1 %v4926_v61  ;;  %4343 = vmax.xlane.f32.xlu0 %v4342_v36  ;;  %v4353_v28 = vmax.f32 %v4352_v13, %v13273_v21  ;;  %v4259_v17 = vsel %vm534_vm0, %v13505_v6, -inf  ;;  %v4448_v12 = vmax.f32 %v13303_v14, %v13315_v43  ;;  %v4155_v60 = vsel %vm534_vm0, %v13509_v63, -inf  ;;  %v18067_v14 = vld [vmem:[#allocation356_spill] sm:$0xff] }
 0x56c   :  { %v13675_v32 = vpop.xlane.xlu1 %4666  ;;  %v4473_v46 = vmax.f32 %v4472_v41, %v18066_v11  ;;  %v4154_v3 = vmax.f32 %v4152_v42, %v4153_v56  ;;  %v4260_v1 = vmax.f32 %v4258_v50, %v4259_v17  ;;  %v4366_v6 = vsel %vm534_vm0, %v13551_v44, -inf  ;;  %v18068_v41 = vld [vmem:[#allocation392_spill] sm:$0xff]  ;;  %v18069_v44 = vld [vmem:[#allocation395_spill] sm:$0xff] }
 0x56d   :  { %v4354_v8 = vmax.f32 %v4353_v28, %v13287_v62  ;;  %v4449_v52 = vmax.f32 %v4448_v12, %v13323_v25  ;;  %v4367_v61 = vsel %vm534_vm0, %v13560_v37, -inf  ;;  %v4263_v62 = vsel %vm534_vm0, %v13531_v53, -inf  ;;  %v18070_v11 = vld [vmem:[#allocation383_spill] sm:$0xff]  ;;  %v18072_v28 = vld [vmem:[#allocation390_spill] sm:$0xff] }
 0x56e   :  { %v4156_v21 = vmax.f32 %v4154_v3, %v4155_v60  ;;  %v4262_v27 = vmax.f32 %v4260_v1, %v4261_v16  ;;  %v4368_v36 = vmax.f32 %v4366_v6, %v4367_v61  ;;  %v4265_v25 = vsel %vm534_vm0, %v13540_v38, -inf  ;;  %v18074_v60 = vld [vmem:[#allocation397_spill] sm:$0xff] }
 0x56f   :  { %v13679_v49 = vpop.xlane.xlu0 %4652  ;;  %4474 = vmax.xlane.f32.xlu1 %v4473_v46  ;;  %4446 = vmax.xlane.f32.xlu0 %v4445_v10  ;;  %v4355_v43 = vmax.f32 %v4354_v8, %v18067_v14  ;;  %v4450_v63 = vmax.f32 %v4449_v52, %v13341_v54  ;;  %v4369_v19 = vsel %vm534_vm0, %v13564_v48, -inf  ;;  %v4371_v54 = vsel %vm534_vm0, %v13573_v59, -inf  ;;  %v18071_v46 = vld [vmem:[#allocation371_spill] sm:$0xff]  ;;  %v18075_v8 = vld [vmem:[#allocation374_spill] sm:$0xff]  ;;  %v18077_v14 = vld [vmem:[#allocation384_spill] sm:$0xff] }
 0x570   :  { %v4264_v57 = vmax.f32 %v4262_v27, %v4263_v62  ;;  %v4370_v15 = vmax.f32 %v4368_v36, %v4369_v19  ;;  %v4462_v23 = vmax.f32 %v18071_v46, %v18070_v11  ;;  %v4476_v48 = vsel %vm534_vm0, %v13593_v7, -inf  ;;  %v18076_v52 = vld [vmem:[#allocation394_spill] sm:$0xff]  ;;  %v18078_v62 = vld [vmem:[#allocation408_spill] sm:$0xff] }
 0x571   :  { %v13700_v39 = vpop.xlane.xlu1 %4584  ;;  %v4356_v20 = vmax.f32 %v4355_v43, %v18068_v41  ;;  %v4451_v33 = vmax.f32 %v4450_v63, %v18069_v44  ;;  %v4477_v4 = vsel %vm534_vm0, %v13597_v30, -inf  ;;  %v4373_v10 = vsel %vm534_vm0, %v13584_v0, -inf  ;;  %v18073_v0 = vld [vmem:[#allocation385_spill] sm:$0xff] }
 0x572   :  { %v4266_v53 = vmax.f32 %v4264_v57, %v4265_v25  ;;  %v4372_v13 = vmax.f32 %v4370_v15, %v4371_v54  ;;  %v4463_v42 = vmax.f32 %v4462_v23, %v13357_v29  ;;  %v4478_v35 = vmax.f32 %v4476_v48, %v4477_v4 }
 0x573   :  { %v13698_v5 = vpop.xlane.xlu0 %4762  ;;  %4157 = vmax.xlane.f32.xlu1 %v4156_v21  ;;  %4357 = vmax.xlane.f32.xlu0 %v4356_v20  ;;  %v4452_v38 = vmax.f32 %v4451_v33, %v13367_v34  ;;  %v4479_v56 = vsel %vm534_vm0, %v13612_v31, -inf  ;;  %v4375_v34 = vsel %vm534_vm0, %v13603_v2, -inf  ;;  %v4481_v29 = vsel %vm534_vm0, %v13621_v51, -inf  ;;  %v18082_v33 = vld [vmem:[#allocation424_spill] sm:$0xff] }
 0x574   :  { %v4374_v59 = vmax.f32 %v4372_v13, %v4373_v10  ;;  %v4464_v50 = vmax.f32 %v4463_v42, %v18072_v28  ;;  %v4480_v7 = vmax.f32 %v4478_v35, %v4479_v56  ;;  %v4421_v12 = vsel %vm534_vm0, %v18073_v0, -inf  ;;  %v8403_v10 = vld [vmem:[%s15665_s4 + $0x8] sm:$0xff]   ;;  %v18088_v42 = vld [vmem:[#allocation451_spill] sm:$0xff]  ;;  %v18092_v0 = vld [vmem:[#allocation456_spill] sm:$0xff] }
 0x575   :  { %v4422_v31 = vsel %vm534_vm0, %v18074_v60, -inf  ;;  %v4483_v16 = vsel %vm534_vm0, %v13634_v9, -inf  ;;  %v4424_v6 = vsel %vm534_vm0, %v18076_v52, -inf  ;;  %v4485_v61 = vsel %vm534_vm0, %v13645_v40, -inf  ;;  %v18081_v9 = vld [vmem:[#allocation420_spill] sm:$0xff] }
 0x576   :  { %v4376_v17 = vmax.f32 %v4374_v59, %v4375_v34  ;;  %v4465_v1 = vmax.f32 %v4464_v50, %v18075_v8  ;;  %v4482_v2 = vmax.f32 %v4480_v7, %v4481_v29  ;;  %v4423_v21 = vmax.f32 %v4421_v12, %v4422_v31  ;;  %v18090_v34 = vld [vmem:[#allocation431_spill] sm:$0xff]  ;;  %v18093_v60 = vld [vmem:[#allocation472_spill] sm:$0xff] }
 0x577   :  { %v13722_v18 = vpop.xlane.xlu0 %4872  ;;  %v13724_v37 = vpop.xlane.xlu1 %4680  ;;  %4267 = vmax.xlane.f32.xlu1 %v4266_v53  ;;  %4453 = vmax.xlane.f32.xlu0 %v4452_v38  ;;  %v4426_v63 = vsel %vm534_vm0, %v18078_v62, -inf  ;;  %v4428_v25 = vsel %vm534_vm0, %v18081_v9, -inf  ;;  %v4430_v19 = vsel %vm534_vm0, %v18082_v33, -inf  ;;  %v8402_v38 = vld [vmem:[%s15665_s4] sm:$0xff]   ;;  %v16552_v4 = vmov 0.0   ;;  %v18099_v9 = vld [vmem:[#allocation342_spill] sm:$0xff] }
 0x578   :  { %v4466_v43 = vmax.f32 %v4465_v1, %v18077_v14  ;;  %v4484_v51 = vmax.f32 %v4482_v2, %v4483_v16  ;;  %v4425_v27 = vmax.f32 %v4423_v21, %v4424_v6  ;;  %8109 = vmatprep.subr.bf16.mxu1 %v16552_v4  ;;  %8117 = vmatprep.mubr.msk.bf16.mxu1 %vm8512_vm9, %v16552_v4  ;;  %v4930_v35 = vmul.f32 0.0013020834, %v18088_v42  ;;  %v8405_v29 = vld [vmem:[%s15665_s4 + $0x18] ss:$0 sps:$4 sm:$0x11]   ;;  %v18096_v52 = vld [vmem:[#allocation436_spill] sm:$0xff] }
 0x579   :  { %8110 = vmatpush3.bf16.msra.mxu1 %v8402_v38  ;;  %v18089_v59 = vlaneseq  ;;  %v4929_v28 = vmul.f32 0.0013020834, %v18090_v34  ;;  %v4931_v12 = vmul.f32 0.0013020834, %v18092_v0  ;;  %v4943_v31 = vmul.f32 0.0013020834, %v18093_v60 }
 0x57a   :  { %v4486_v41 = vmax.f32 %v4484_v51, %v4485_v61  ;;  %v4427_v20 = vmax.f32 %v4425_v27, %v4426_v63  ;;  %8111 = vmatprep.subr.bf16.mxu1 %v16552_v4  ;;  %v8513_v8 = vmov 0   ;;  %v18095_v2 = vld [vmem:[#allocation427_spill] sm:$0xff]  ;;  %v4944_v6 = vmul.f32 0.0013020834, %v18096_v52  ;;  %v18098_v61 = vld [vmem:[#allocation464_spill] sm:$0xff] }
 0x57b   :  { %v13743_v3 = vpop.xlane.xlu0 %4102  ;;  %4377 = vmax.xlane.f32.xlu1 %v4376_v17  ;;  %4467 = vmax.xlane.f32.xlu0 %v4466_v43  ;;  %v13799_v56 = vand.u32 127, %v18089_v59  ;;  %v8404_v17 = vld [vmem:[%s15665_s4 + $0x10] sm:$0xff]   ;;  %v13816_v1 = vsel %vm534_vm0, 65535, %v8513_v8  ;;  %v4932_v21 = vmul.f32 0.0013020834, %v18095_v2  ;;  %v5024_v16 = vpack.c.bf16 %v4930_v35, %v4929_v28 }
 0x57c   :  { %v4429_v44 = vmax.f32 %v4427_v20, %v4428_v25  ;;  %18094 = vst [vmem:[#allocation458_spill] sm:$0xff] %v13816_v1  ;;  %v18097_v43 = vld [vmem:[#allocation358_spill] sm:$0xff]  ;;  %v5473_v27 = vand.u32 %v8405_v29, %v13816_v1  ;;  %v4946_v62 = vmul.f32 0.0013020834, %v18098_v61  ;;  %v5032_v20 = vpack.c.bf16 %v4944_v6, %v4943_v31  ;;  %v18103_v6 = vld [vmem:[#allocation473_spill] sm:$0xff] }
 0x57d   :  { %8112 = vmatpush3.bf16.msra.mxu1 %v8403_v10  ;;  %v5157_v14 = vadd.s32 4294967288, %v13799_v56  ;;  %v4945_v51 = vmul.f32 0.0013020834, %v18097_v43  ;;  %v5164_v63 = vadd.s32 4294967280, %v13799_v56  ;;  %v13828_v25 = vsub.s32 %v13799_v56, %v18099_v9  ;;  %v18100_v28 = vld [vmem:[#allocation366_spill] sm:$0xff]  ;;  %v18104_v43 = vld [vmem:[#allocation441_spill] sm:$0xff] }
 0x57e   :  { %v4431_v53 = vmax.f32 %v4429_v44, %v4430_v19  ;;  %8113 = vmatprep.subr.bf16.mxu1 %v16552_v4  ;;  %v5095_v44 = vunpack.c.l.b16 %v5024_v16  ;;  %v5096_v38 = vunpack.c.h.b16 %v5024_v16  ;;  %v5171_v42 = vadd.s32 4294967272, %v13799_v56  ;;  %v18102_v8 = vld [vmem:[#allocation354_spill] sm:$0xff]  ;;  %v18108_v1 = vld [vmem:[#allocation377_spill] sm:$0xff] }
 0x57f   :  { %v13745_v30 = vpop.xlane.xlu1 %4776  ;;  %4487 = vmax.xlane.f32.xlu1 %v4486_v41  ;;  %v5025_v41 = vpack.c.bf16 %v4932_v21, %v4931_v12  ;;  %v5033_v10 = vpack.c.bf16 %v4946_v62, %v4945_v51  ;;  %v13839_v35 = vsub.s32 %v5164_v63, %v18099_v9  ;;  %v5109_v34 = vunpack.c.l.b16 %v5032_v20  ;;  %v18101_v12 = vld [vmem:[#allocation410_spill] sm:$0xff] }
 0x580   :  { %v13763_v57 = vpop.xlane.xlu0 %4212  ;;  %4432 = vmax.xlane.f32.xlu0 %v4431_v53  ;;  %v13835_v53 = vsub.s32 %v5157_v14, %v18099_v9  ;;  %v5156_v29 = vrot.slane %v5095_v44, %v13828_v25  ;;  %v5110_v0 = vunpack.c.h.b16 %v5032_v20  ;;  %v4957_v60 = vmul.f32 0.0013020834, %v18101_v12  ;;  %v18107_v12 = vld [vmem:[#allocation443_spill] sm:$0xff] }
 0x581   :  { %18079 = vst [vmem:[#allocation433_spill] sm:$0xff] %v13763_v57  ;;  %8114 = vmatpush3.bf16.msra.mxu1 %v8404_v17  ;;  %v5097_v59 = vunpack.c.l.b16 %v5025_v41  ;;  %v4933_v17 = vmul.f32 0.0013020834, %v18100_v28  ;;  %v4934_v2 = vmul.f32 0.0013020834, %v18102_v8  ;;  %v5111_v21 = vunpack.c.l.b16 %v5033_v10 }
 0x582   :  { %8115 = vmatprep.subr.bf16.mxu1 %v16552_v4  ;;  %v5161_v31 = vrot.slane %v5096_v38, %v13835_v53  ;;  %v13848_v16 = vsub.s32 %v5171_v42, %v18099_v9  ;;  %v5098_v52 = vunpack.c.h.b16 %v5025_v41  ;;  %v4958_v14 = vmul.f32 0.0013020834, %v18103_v6  ;;  %v18106_v42 = vld [vmem:[#allocation363_spill] sm:$0xff] }
 0x583   :  { %v4947_v51 = vmul.f32 0.0013020834, %v18104_v43  ;;  %v5168_v62 = vrot.slane %v5097_v59, %v13839_v35  ;;  %v5236_v63 = vrot.slane %v5109_v34, %v13828_v25  ;;  %v5178_v20 = vadd.s32 4294967264, %v13799_v56 }
 0x584   :  { %v13765_v36 = vpop.xlane.xlu1 %4694  ;;  %v5026_v44 = vpack.c.bf16 %v4934_v2, %v4933_v17  ;;  %v5240_v38 = vrot.slane %v5110_v0, %v13835_v53  ;;  %v4948_v28 = vmul.f32 0.0013020834, %v18106_v42  ;;  %v5040_v41 = vpack.c.bf16 %v4958_v14, %v4957_v60 }
 0x585   :  { %18080 = vst [vmem:[#allocation426_spill] sm:$0xff] %v13765_v36  ;;  %v13771_v40 = vpop.xlane.xlu0 %4322  ;;  %8116 = vmatpush3.bf16.msra.mxu1 %v5473_v27  ;;  %v4959_v8 = vmul.f32 0.0013020834, %v18107_v12  ;;  %v5163_v6 = vsel %vm5162_vm10, %v5161_v31, %v5156_v29  ;;  %v5112_v43 = vunpack.c.h.b16 %v5033_v10  ;;  %v5185_v59 = vadd.s32 4294967256, %v13799_v56 }
 0x586   :  { %18083 = vst [vmem:[#allocation409_spill] sm:$0xff] %v13771_v40  ;;  %8121 = vmatprep.subr.bf16.mxu1 %v16552_v4  ;;  %v5245_v4 = vrot.slane %v5111_v21, %v13839_v35  ;;  %v4960_v34 = vmul.f32 0.0013020834, %v18108_v1  ;;  %v5034_v40 = vpack.c.bf16 %v4948_v28, %v4947_v51  ;;  %v5170_v17 = vsel %vm5169_vm11, %v5168_v62, %v5163_v6  ;;  %v18111_v62 = vld [vmem:[#allocation445_spill] sm:$0xff] }
 0x587   :  { %v5175_v0 = vrot.slane %v5098_v52, %v13848_v16  ;;  %v13869_v2 = vsub.s32 %v5178_v20, %v18099_v9  ;;  %v5099_v60 = vunpack.c.l.b16 %v5026_v44  ;;  %v5241_v14 = vsel %vm5162_vm10, %v5240_v38, %v5236_v63  ;;  %v18112_v6 = vld [vmem:[#allocation401_spill] sm:$0xff] }
 0x588   :  { %v5123_v29 = vunpack.c.l.b16 %v5040_v41  ;;  %v5124_v10 = vunpack.c.h.b16 %v5040_v41  ;;  %v5041_v31 = vpack.c.bf16 %v4960_v34, %v4959_v8  ;;  %v5246_v1 = vsel %vm5169_vm11, %v5245_v4, %v5241_v14  ;;  %v18113_v8 = vld [vmem:[#allocation413_spill] sm:$0xff] }
 0x589   :  { %v5250_v51 = vrot.slane %v5112_v43, %v13848_v16  ;;  %v4971_v28 = vmul.f32 0.0013020834, %v18111_v62  ;;  %v13880_v52 = vsub.s32 %v5185_v59, %v18099_v9  ;;  %v5100_v20 = vunpack.c.h.b16 %v5026_v44  ;;  %v18114_v62 = vld [vmem:[#allocation444_spill] sm:$0xff] }
 0x58a   :  { %v13773_v15 = vpop.xlane.xlu1 %4790  ;;  %v5113_v12 = vunpack.c.l.b16 %v5034_v40  ;;  %v4974_v63 = vmul.f32 0.0013020834, %v18112_v6  ;;  %v5177_v38 = vsel %vm5176_vm12, %v5175_v0, %v5170_v17  ;;  %v5182_v41 = vrot.slane %v5099_v60, %v13869_v2 }
 0x58b   :  { %18084 = vst [vmem:[#allocation399_spill] sm:$0xff] %v13773_v15  ;;  %v4972_v34 = vmul.f32 0.0013020834, %v18113_v8  ;;  %v5304_v4 = vrot.slane %v5123_v29, %v13828_v25  ;;  %v5308_v43 = vrot.slane %v5124_v10, %v13835_v53  ;;  %v5125_v14 = vunpack.c.l.b16 %v5041_v31 }
 0x58c   :  { %v4973_v58 = vmul.f32 0.0013020834, %v18114_v62  ;;  %v5251_v59 = vsel %vm5176_vm12, %v5250_v51, %v5246_v1  ;;  %v5114_v44 = vunpack.c.h.b16 %v5034_v40  ;;  %v13892_v17 = vrot.slane %v5100_v20, %v13880_v52  ;;  %v18117_v62 = vld [vmem:[#allocation442_spill] sm:$0xff]  ;;  %v18118_v40 = vld [vmem:[#allocation417_spill] sm:$0xff] }
 0x58d   :  { %v5048_v57 = vpack.c.bf16 %v4972_v34, %v4971_v28  ;;  %v5255_v0 = vrot.slane %v5113_v12, %v13869_v2  ;;  %v5126_v60 = vunpack.c.h.b16 %v5041_v31  ;;  %v13900_v10 = vsel %vm5183_vm13, %v5182_v41, %v5177_v38  ;;  %v18119_v51 = vld [vmem:[#allocation398_spill] sm:$0xff] }
 0x58e   :  { %v13775_v54 = vpop.xlane.xlu0 %4563  ;;  %v5049_v8 = vpack.c.bf16 %v4974_v63, %v4973_v58  ;;  %v4961_v1 = vmul.f32 0.0013020834, %v18117_v62  ;;  %v4985_v28 = vpack.c.bf16 %v18119_v51, %v18118_v40  ;;  %v5309_v34 = vsel %vm5162_vm10, %v5308_v43, %v5304_v4  ;;  %v18121_v58 = vld [vmem:[#allocation373_spill] sm:$0xff]  ;;  %v18122_v63 = vld [vmem:[#allocation396_spill] sm:$0xff] }
 0x58f   :  { %v5313_v31 = vrot.slane %v5125_v14, %v13839_v35  ;;  %v4986_v12 = vpack.c.bf16 %v18121_v58, %v13415_v55  ;;  %v13914_v38 = vrot.slane %v5114_v44, %v13880_v52  ;;  %v5137_v41 = vunpack.c.l.b16 %v5048_v57  ;;  %v18123_v43 = vld [vmem:[#allocation405_spill] sm:$0xff] }
 0x590   :  { %v5138_v62 = vunpack.c.h.b16 %v5048_v57  ;;  %v13917_v40 = vsel %vm5183_vm13, %v5255_v0, %v5251_v59  ;;  %v5139_v4 = vunpack.c.l.b16 %v5049_v8  ;;  %v4976_v14 = vmul.f32 0.0013020834, %v18123_v43 }
 0x591   :  { %v5547_v51 = vunpack.c.l.b16 %v4985_v28  ;;  %v5372_v59 = vrot.slane %v5137_v41, %v13828_v25 }
 0x592   :  { %v13777_v11 = vpop.xlane.xlu1 %4879  ;;  %v5376_v0 = vrot.slane %v5138_v62, %v13835_v53  ;;  %v5550_v62 = vunpack.c.h.b16 %v4986_v12 }
 0x593   :  { %18085 = vst [vmem:[#allocation450_spill] sm:$0xff] %v13777_v11  ;;  %v5606_v15 = vrot.slane %v5547_v51, %v13828_v25 }
 0x596   :  { %v13779_v46 = vpop.xlane.xlu0 %4659 }
 0x598   :  { %v13781_v23 = vpop.xlane.xlu1 %4804 }
 0x599   :  { %18086 = vst [vmem:[#allocation430_spill] sm:$0xff] %v13781_v23  ;;  %v5549_v23 = vunpack.c.l.b16 %v4986_v12 }
 0x59c   :  { %v13786_v13 = vpop.xlane.xlu0 %4577 }
 0x59e   :  { %v13788_v48 = vpop.xlane.xlu1 %4900 }
 0x59f   :  { %18087 = vst [vmem:[#allocation447_spill] sm:$0xff] %v13788_v48  ;;  %v4994_v48 = vpack.c.bf16 %v18122_v63, %v13445_v47  ;;  %v5314_v47 = vsel %vm5169_vm11, %v5313_v31, %v5309_v34  ;;  %v18124_v63 = vld [vmem:[#allocation357_spill] sm:$0xff]  ;;  %v18129_v31 = vld [vmem:[#allocation403_spill] sm:$0xff] }
 0x5a0   :  { %v4975_v44 = vmul.f32 0.0013020834, %v18124_v63  ;;  %v18130_v63 = vld [vmem:[#allocation419_spill] sm:$0xff] }
 0x5a1   :  { %v5563_v11 = vunpack.c.l.b16 %v4994_v48  ;;  %v5564_v36 = vunpack.c.h.b16 %v4994_v48 }
 0x5a2   :  { %v13802_v50 = vpop.xlane.xlu0 %4673  ;;  %v5050_v43 = vpack.c.bf16 %v4976_v14, %v4975_v44  ;;  %v5377_v14 = vsel %vm5162_vm10, %v5376_v0, %v5372_v59 }
 0x5a4   :  { %v5141_v48 = vunpack.c.l.b16 %v5050_v43 }
 0x5a5   :  { %v13804_v7 = vpop.xlane.xlu1 %4914 }
 0x5a6   :  { %18091 = vst [vmem:[#allocation457_spill] sm:$0xff] %v13804_v7 }
 0x5a9   :  { %v13830_v33 = vpop.xlane.xlu0 %4769  ;;  %v13832_v19 = vpop.xlane.xlu1 %4116 }
 0x5af   :  { %v13852_v27 = vpop.xlane.xlu0 %4687 }
 0x5b0   :  { %18105 = vst [vmem:[#allocation389_spill] sm:$0xff] %v13852_v27  ;;  %v13854_v61 = vpop.xlane.xlu1 %4130  ;;  %v4995_v27 = vpack.c.bf16 %v18130_v63, %v18129_v31  ;;  %v18132_v31 = vld [vmem:[#allocation402_spill] sm:$0xff] }
 0x5b5   :  { %v13872_v21 = vpop.xlane.xlu0 %4783  ;;  %v13874_v42 = vpop.xlane.xlu1 %4226 }
 0x5b6   :  { %18109 = vst [vmem:[#allocation429_spill] sm:$0xff] %v13872_v21  ;;  %18110 = vst [vmem:[#allocation453_spill] sm:$0xff] %v13874_v42  ;;  %v18115_v42 = vld [vmem:[#allocation393_spill] sm:$0xff]  ;;  %v18128_v21 = vld [vmem:[#allocation391_spill] sm:$0xff] }
 0x5b7   :  { %v4962_v6 = vmul.f32 0.0013020834, %v18115_v42  ;;  %v18120_v42 = vld [vmem:[#allocation404_spill] sm:$0xff] }
 0x5b8   :  { %v4993_v20 = vpack.c.bf16 %v18120_v42, %v13430_v45  ;;  %v5318_v45 = vrot.slane %v5126_v60, %v13848_v16  ;;  %v5548_v42 = vunpack.c.h.b16 %v4985_v28  ;;  %v5381_v28 = vrot.slane %v5139_v4, %v13839_v35 }
 0x5b9   :  { %v5683_v4 = vrot.slane %v5563_v11, %v13839_v35  ;;  %v5142_v11 = vunpack.c.h.b16 %v5050_v43 }
 0x5ba   :  { %v13895_v7 = vpop.xlane.xlu0 %4886  ;;  %v5561_v55 = vunpack.c.l.b16 %v4993_v20  ;;  %v5562_v58 = vunpack.c.h.b16 %v4993_v20  ;;  %v18127_v20 = vld [vmem:[#allocation407_spill] sm:$0xff] }
 0x5bb   :  { %18116 = vst [vmem:[#allocation439_spill] sm:$0xff] %v13895_v7  ;;  %v13897_v29 = vpop.xlane.xlu1 %4144  ;;  %v5042_v7 = vpack.c.bf16 %v4962_v6, %v4961_v1  ;;  %v5140_v1 = vunpack.c.h.b16 %v5049_v8  ;;  %v4987_v34 = vpack.c.bf16 %v18128_v21, %v18127_v20  ;;  %v5615_v8 = vrot.slane %v5549_v23, %v13839_v35  ;;  %v18131_v20 = vld [vmem:[#allocation400_spill] sm:$0xff] }
 0x5bc   :  { %v5678_v41 = vrot.slane %v5562_v58, %v13835_v53  ;;  %v5001_v51 = vpack.c.bf16 %v18132_v31, %v18131_v20  ;;  %v5565_v58 = vunpack.c.l.b16 %v4995_v27 }
 0x5bd   :  { %v5127_v60 = vunpack.c.l.b16 %v5042_v7  ;;  %v5128_v21 = vunpack.c.h.b16 %v5042_v7  ;;  %v5551_v63 = vunpack.c.l.b16 %v4987_v34 }
 0x5be   :  { %v13923_v57 = vpop.xlane.xlu0 %4797  ;;  %v5575_v20 = vunpack.c.l.b16 %v5001_v51  ;;  %v5576_v31 = vunpack.c.h.b16 %v5001_v51 }
 0x5bf   :  { %18125 = vst [vmem:[#allocation418_spill] sm:$0xff] %v13923_v57  ;;  %v13925_v6 = vpop.xlane.xlu1 %4240  ;;  %v5610_v57 = vrot.slane %v5548_v42, %v13835_v53  ;;  %v5323_v44 = vrot.slane %v5127_v60, %v13869_v2  ;;  %v5382_v42 = vsel %vm5169_vm11, %v5381_v28, %v5377_v14  ;;  %v5620_v60 = vrot.slane %v5550_v62, %v13848_v16 }
 0x5c0   :  { %18126 = vst [vmem:[#allocation432_spill] sm:$0xff] %v13925_v6  ;;  %v5674_v6 = vrot.slane %v5561_v55, %v13828_v25  ;;  %v5386_v55 = vrot.slane %v5140_v1, %v13848_v16  ;;  %v5688_v1 = vrot.slane %v5564_v36, %v13848_v16  ;;  %v5552_v14 = vunpack.c.h.b16 %v4987_v34 }
 0x5c1   :  { %v5611_v59 = vsel %vm5162_vm10, %v5610_v57, %v5606_v15  ;;  %v13958_v43 = vrot.slane %v5128_v21, %v13880_v52  ;;  %v5625_v15 = vrot.slane %v5551_v63, %v13869_v2  ;;  %v5693_v57 = vrot.slane %v5565_v58, %v13869_v2 }
 0x5c2   :  { %v5679_v7 = vsel %vm5162_vm10, %v5678_v41, %v5674_v6  ;;  %v5616_v0 = vsel %vm5169_vm11, %v5615_v8, %v5611_v59  ;;  %v5387_v41 = vsel %vm5176_vm12, %v5386_v55, %v5382_v42  ;;  %v5391_v36 = vrot.slane %v5141_v48, %v13869_v2  ;;  %v18135_v8 = vld [vmem:[#allocation386_spill] sm:$0xff] }
 0x5c3   :  { %v5684_v28 = vsel %vm5169_vm11, %v5683_v4, %v5679_v7  ;;  %v13968_v34 = vrot.slane %v5142_v11, %v13880_v52  ;;  %v18136_v4 = vld [vmem:[#allocation422_spill] sm:$0xff]  ;;  %v5630_v51 = vrot.slane %v5552_v14, %v13880_v52  ;;  %v5742_v42 = vrot.slane %v5575_v20, %v13828_v25  ;;  %v18138_v11 = vld [vmem:[#allocation428_spill] sm:$0xff] }
 0x5c4   :  { %v5689_v62 = vsel %vm5176_vm12, %v5688_v1, %v5684_v28  ;;  %v5002_v21 = vpack.c.bf16 %v18136_v4, %v18135_v8  ;;  %v5746_v55 = vrot.slane %v5576_v31, %v13835_v53  ;;  %v18137_v48 = vld [vmem:[#allocation382_spill] sm:$0xff]  ;;  %v18139_v7 = vld [vmem:[#allocation372_spill] sm:$0xff]  ;;  %v18141_v28 = vld [vmem:[#allocation421_spill] sm:$0xff]  ;;  %v4935_v14 = vmul.f32 0.0013020834, %v13668_v24 }
 0x5c5   :  { %v13946_v12 = vpop.xlane.xlu0 %4893  ;;  %v13948_v23 = vpop.xlane.xlu1 %4336  ;;  %v5009_v59 = vpack.c.bf16 %v18138_v11, %v18137_v48  ;;  %v18143_v8 = vld [vmem:[#allocation368_spill] sm:$0xff]  ;;  %v18144_v4 = vld [vmem:[#allocation438_spill] sm:$0xff] }
 0x5c6   :  { %18133 = vst [vmem:[#allocation406_spill] sm:$0xff] %v13946_v12  ;;  %18134 = vst [vmem:[#allocation455_spill] sm:$0xff] %v13948_v23  ;;  %v5566_v12 = vunpack.c.h.b16 %v4995_v27  ;;  %v5319_v23 = vsel %vm5176_vm12, %v5318_v45, %v5314_v47  ;;  %v5621_v47 = vsel %vm5176_vm12, %v5620_v60, %v5616_v0  ;;  %v4936_v0 = vmul.f32 0.0013020834, %v18139_v7 }
 0x5c7   :  { %v13963_v6 = vsel %vm5183_vm13, %v5323_v44, %v5319_v23  ;;  %v4937_v44 = vmul.f32 0.0013020834, %v13630_v22  ;;  %v5626_v58 = vsel %vm5183_vm13, %v5625_v15, %v5621_v47  ;;  %v5694_v23 = vsel %vm5183_vm13, %v5693_v57, %v5689_v62  ;;  %v18140_v22 = vld [vmem:[#allocation380_spill] sm:$0xff] }
 0x5c8   :  { %v5698_v63 = vrot.slane %v5566_v12, %v13880_v52  ;;  %v13989_v60 = vsel %vm5183_vm13, %v5391_v36, %v5387_v41  ;;  %v13993_v1 = vpack.c.bf16 %v18141_v28, %v18140_v22  ;;  %v5577_v31 = vunpack.c.l.b16 %v5002_v21  ;;  %v18152_v22 = vld [vmem:[#allocation450_spill] sm:$0xff] }
 0x5c9   :  { %v5578_v15 = vunpack.c.h.b16 %v5002_v21  ;;  %v5028_v57 = vpack.c.bf16 %v4937_v44, %v4936_v0  ;;  %v14000_v62 = vsel %vm5190_vm14, %v5630_v51, %v5626_v58  ;;  %v14003_v41 = vsel %vm5162_vm10, %v5746_v55, %v5742_v42 }
 0x5ca   :  { %v13970_v27 = vpop.xlane.xlu0 %4907  ;;  %v13972_v45 = vpop.xlane.xlu1 %4254  ;;  %v14006_v36 = vsel %vm5190_vm14, %v5698_v63, %v5694_v23  ;;  %v14010_v24 = vpack.c.bf16 %v18144_v4, %v18143_v8  ;;  %v5589_v48 = vunpack.c.l.b16 %v5009_v59  ;;  %v5590_v11 = vunpack.c.h.b16 %v5009_v59 }
 0x5cb   :  { %18142 = vst [vmem:[#allocation423_spill] sm:$0xff] %v14006_v36  ;;  %v5192_v51 = vadd.s32 4294967248, %v13799_v56  ;;  %v5027_v58 = vpack.c.bf16 %v4935_v14, %v4935_v14  ;;  %v14018_v63 = vrot.slane %v5577_v31, %v13839_v35  ;;  %v14021_v23 = vrot.slane %v5578_v15, %v13848_v16 }
 0x5cc   :  { %v5102_v0 = vunpack.c.l.b16 %v5028_v57  ;;  %v5103_v28 = vunpack.c.h.b16 %v5028_v57  ;;  %v14028_v14 = vrot.slane %v5589_v48, %v13828_v25  ;;  %v14032_v15 = vrot.slane %v5590_v11, %v13835_v53 }
 0x5cd   :  { %v14035_v4 = vsub.s32 %v5192_v51, %v18099_v9  ;;  %v4938_v57 = vmul.f32 0.0013020834, %v13775_v54  ;;  %v4963_v11 = vmul.f32 0.0013020834, %v13698_v5  ;;  %v4950_v51 = vmul.f32 0.0013020834, %v13779_v46 }
 0x5ce   :  { %v13996_v12 = vpop.xlane.xlu1 %4350  ;;  %v4110_v20 = vpop.xlane.xlu0 %4109  ;;  %18145 = vst [vmem:[#allocation452_spill] sm:$0xff] %v14028_v14  ;;  %18146 = vst [vmem:[#allocation460_spill] sm:$0xff] %v14032_v15  ;;  %v14060_v46 = vsel %vm5190_vm14, %v13914_v38, %v13917_v40  ;;  %v4941_v38 = vmul.f32 0.0013020834, %v13700_v39  ;;  %v4953_v40 = vmul.f32 0.0013020834, %v13724_v37 }
 0x5cf   :  { %v4989_v47 = vpack.c.bf16 %v13832_v19, %v4110_v20  ;;  %v18157_v36 = vld [vmem:[#allocation406_spill] sm:$0xff] }
 0x5d1   :  { %v5554_v7 = vunpack.c.l.b16 %v4989_v47  ;;  %v5555_v21 = vunpack.c.h.b16 %v4989_v47  ;;  %v4949_v47 = vmul.f32 0.0013020834, %v13679_v49 }
 0x5d2   :  { %v14015_v42 = vpop.xlane.xlu1 %4439  ;;  %v4124_v55 = vpop.xlane.xlu0 %4123 }
 0x5d3   :  { %v4990_v59 = vpack.c.bf16 %v13854_v61, %v4124_v55  ;;  %v5640_v20 = vrot.slane %v5554_v7, %v13828_v25  ;;  %v5644_v56 = vrot.slane %v5555_v21, %v13835_v53  ;;  %v5101_v61 = vunpack.c.l.b16 %v5027_v58 }
 0x5d4   :  { %v5202_v7 = vrot.slane %v5102_v0, %v13828_v25  ;;  %v4939_v21 = vmul.f32 0.0013020834, %v13655_v26  ;;  %v5191_v26 = vsel %vm5190_vm14, %v13892_v17, %v13900_v10  ;;  %v5035_v54 = vpack.c.bf16 %v4949_v47, %v4949_v47 }
 0x5d5   :  { %v5556_v31 = vunpack.c.l.b16 %v4990_v59  ;;  %v5557_v8 = vunpack.c.h.b16 %v4990_v59  ;;  %v5206_v59 = vrot.slane %v5103_v28, %v13835_v53  ;;  %v5645_v58 = vsel %vm5162_vm10, %v5644_v56, %v5640_v20 }
 0x5d6   :  { %v14042_v49 = vpop.xlane.xlu0 %4219  ;;  %v14048_v19 = vpop.xlane.xlu1 %4364  ;;  %v4951_v28 = vmul.f32 0.0013020834, %v13675_v32  ;;  %v14065_v17 = vsel %vm5190_vm14, %v13958_v43, %v13963_v6  ;;  %v4940_v10 = vmul.f32 0.0013020834, %v13786_v13  ;;  %v4952_v20 = vmul.f32 0.0013020834, %v13802_v50 }
 0x5d7   :  { %v5649_v48 = vrot.slane %v5556_v31, %v13839_v35  ;;  %v5654_v55 = vrot.slane %v5557_v8, %v13848_v16  ;;  %v5196_v31 = vrot.slane %v5101_v61, %v14035_v4  ;;  %v5029_v8 = vpack.c.bf16 %v4939_v21, %v4938_v57  ;;  %v18153_v50 = vld [vmem:[#allocation430_spill] sm:$0xff] }
 0x5d8   :  { %v5207_v56 = vsel %vm5162_vm10, %v5206_v59, %v5202_v7  ;;  %v5043_v32 = vpack.c.bf16 %v4963_v11, %v4963_v11  ;;  %v14071_v47 = vmul.f32 0.0013020834, %v13722_v18  ;;  %v5036_v61 = vpack.c.bf16 %v4951_v28, %v4950_v51  ;;  %v18149_v28 = vld [vmem:[#allocation399_spill] sm:$0xff] }
 0x5d9   :  { %v5650_v0 = vsel %vm5169_vm11, %v5649_v48, %v5645_v58  ;;  %v14073_v21 = vunpack.c.l.b16 %v5035_v54  ;;  %v14079_v13 = vsel %vm5197_vm15, %v5196_v31, %v5191_v26  ;;  %v4965_v6 = vmul.f32 0.0013020834, %v13745_v30 }
 0x5da   :  { %v5655_v5 = vsel %vm5176_vm12, %v5654_v55, %v5650_v0  ;;  %v4138_v57 = vpop.xlane.xlu0 %4137  ;;  %v5104_v18 = vunpack.c.l.b16 %v5029_v8  ;;  %v14084_v7 = vpop.xlane.xlu1 %4460  ;;  %v5030_v48 = vpack.c.bf16 %v4941_v38, %v4940_v10  ;;  %v5037_v55 = vpack.c.bf16 %v4953_v40, %v4952_v20  ;;  %v18148_v0 = vld [vmem:[#allocation426_spill] sm:$0xff] }
 0x5db   :  { %v4991_v43 = vpack.c.bf16 %v13897_v29, %v4138_v57  ;;  %18147 = vst [vmem:[#allocation435_spill] sm:$0xff] %v14084_v7  ;;  %v14086_v39 = vunpack.c.l.b16 %v5043_v32  ;;  %v5105_v29 = vunpack.c.h.b16 %v5029_v8  ;;  %v5116_v51 = vunpack.c.l.b16 %v5036_v61  ;;  %v18150_v32 = vld [vmem:[#allocation389_spill] sm:$0xff]  ;;  %v18156_v7 = vld [vmem:[#allocation418_spill] sm:$0xff] }
 0x5dc   :  { %v5117_v58 = vunpack.c.h.b16 %v5036_v61  ;;  %v4964_v26 = vmul.f32 0.0013020834, %v13830_v33  ;;  %v4955_v31 = vmul.f32 0.0013020834, %v18148_v0  ;;  %v4967_v10 = vmul.f32 0.0013020834, %v18149_v28 }
 0x5dd   :  { %v5558_v59 = vunpack.c.l.b16 %v4991_v43  ;;  %v5559_v11 = vunpack.c.h.b16 %v4991_v43  ;;  %v5211_v20 = vrot.slane %v5104_v18, %v13839_v35  ;;  %v4954_v57 = vmul.f32 0.0013020834, %v18150_v32  ;;  %v18151_v43 = vld [vmem:[#allocation429_spill] sm:$0xff] }
 0x5de   :  { %v5106_v38 = vunpack.c.l.b16 %v5030_v48  ;;  %v5118_v40 = vunpack.c.l.b16 %v5037_v55  ;;  %v4966_v8 = vmul.f32 0.0013020834, %v18151_v43  ;;  %v5216_v33 = vrot.slane %v5105_v29, %v13848_v16 }
 0x5df   :  { %v5659_v54 = vrot.slane %v5558_v59, %v13869_v2  ;;  %v5664_v30 = vrot.slane %v5559_v11, %v13880_v52  ;;  %v4978_v59 = vmul.f32 0.0013020834, %v18152_v22  ;;  %v4969_v11 = vmul.f32 0.0013020834, %v18153_v50 }
 0x5e0   :  { %v5270_v18 = vrot.slane %v5116_v51, %v13828_v25  ;;  %v5274_v32 = vrot.slane %v5117_v58, %v13835_v53  ;;  %v5044_v44 = vpack.c.bf16 %v4965_v6, %v4964_v26  ;;  %v5212_v43 = vsel %vm5169_vm11, %v5211_v20, %v5207_v56 }
 0x5e1   :  { %v5660_v61 = vsel %vm5183_vm13, %v5659_v54, %v5655_v5  ;;  %v5107_v9 = vunpack.c.h.b16 %v5030_v48  ;;  %v5038_v5 = vpack.c.bf16 %v4955_v31, %v4954_v57  ;;  %v18154_v54 = vld [vmem:[#allocation439_spill] sm:$0xff]  ;;  %v5221_v22 = vrot.slane %v5106_v38, %v13869_v2  ;;  %v14114_v26 = vpop.xlane.xlu0 %4233 }
 0x5e2   :  { %v14103_v0 = vsel %vm5190_vm14, %v5664_v30, %v5660_v61  ;;  %v4598_v28 = vpop.xlane.xlu1 %4597  ;;  %v4979_v29 = vmul.f32 0.0013020834, %v18154_v54  ;;  %v5119_v15 = vunpack.c.h.b16 %v5037_v55  ;;  %v5279_v50 = vrot.slane %v5118_v40, %v13839_v35  ;;  %v18155_v61 = vld [vmem:[#allocation447_spill] sm:$0xff] }
 0x5e3   :  { %v4942_v37 = vmul.f32 0.0013020834, %v4598_v28  ;;  %v5045_v30 = vpack.c.bf16 %v4967_v10, %v4966_v8  ;;  %v4981_v14 = vmul.f32 0.0013020834, %v18155_v61  ;;  %v4968_v51 = vmul.f32 0.0013020834, %v18156_v7 }
 0x5e4   :  { %v4980_v58 = vmul.f32 0.0013020834, %v18157_v36  ;;  %v5217_v56 = vsel %vm5176_vm12, %v5216_v33, %v5212_v43  ;;  %v5275_v48 = vsel %vm5162_vm10, %v5274_v32, %v5270_v18  ;;  %v5130_v31 = vunpack.c.l.b16 %v5044_v44 }
 0x5e5   :  { %v5031_v6 = vpack.c.bf16 %v4942_v37, %v4942_v37  ;;  %v5131_v20 = vunpack.c.h.b16 %v5044_v44  ;;  %v5226_v55 = vrot.slane %v5107_v9, %v13880_v52  ;;  %v5120_v38 = vunpack.c.l.b16 %v5038_v5 }
 0x5e6   :  { %v5052_v10 = vpack.c.bf16 %v4979_v29, %v4978_v59  ;;  %v5222_v8 = vsel %vm5183_vm13, %v5221_v22, %v5217_v56  ;;  %v5280_v7 = vsel %vm5169_vm11, %v5279_v50, %v5275_v48  ;;  %v5284_v36 = vrot.slane %v5119_v15, %v13848_v16 }
 0x5e7   :  { %v5132_v37 = vunpack.c.l.b16 %v5045_v30  ;;  %v5046_v28 = vpack.c.bf16 %v4969_v11, %v4968_v51  ;;  %v5053_v54 = vpack.c.bf16 %v4981_v14, %v4980_v58  ;;  %v5108_v33 = vunpack.c.l.b16 %v5031_v6  ;;  %v18158_v14 = vld [vmem:[#allocation457_spill] sm:$0xff] }
 0x5e8   :  { %v4708_v57 = vpop.xlane.xlu1 %4707  ;;  %v5338_v18 = vrot.slane %v5130_v31, %v13828_v25  ;;  %v5342_v44 = vrot.slane %v5131_v20, %v13835_v53  ;;  %v5121_v32 = vunpack.c.h.b16 %v5038_v5  ;;  %v4982_v9 = vmul.f32 0.0013020834, %v13970_v27 }
 0x5e9   :  { %v4956_v40 = vmul.f32 0.0013020834, %v4708_v57  ;;  %v5289_v59 = vrot.slane %v5120_v38, %v13869_v2  ;;  %v5133_v29 = vunpack.c.h.b16 %v5045_v30  ;;  %v5144_v22 = vunpack.c.l.b16 %v5052_v10  ;;  %v14126_v50 = vpop.xlane.xlu0 %4329 }
 0x5ea   :  { %v5145_v61 = vunpack.c.h.b16 %v5052_v10  ;;  %v5265_v15 = vrot.slane %v14073_v21, %v14035_v4  ;;  %v4983_v11 = vmul.f32 0.0013020834, %v18158_v14  ;;  %v5347_v51 = vrot.slane %v5132_v37, %v13839_v35 }
 0x5eb   :  { %v5039_v43 = vpack.c.bf16 %v4956_v40, %v4956_v40  ;;  %v5227_v58 = vsel %vm5190_vm14, %v5226_v55, %v5222_v8  ;;  %v5134_v6 = vunpack.c.l.b16 %v5046_v28  ;;  %v5146_v5 = vunpack.c.l.b16 %v5053_v54 }
 0x5ec   :  { %v5231_v27 = vrot.slane %v5108_v33, %v14035_v4  ;;  %v5285_v30 = vsel %vm5176_vm12, %v5284_v36, %v5280_v7  ;;  %v5343_v48 = vsel %vm5162_vm10, %v5342_v44, %v5338_v18  ;;  %v5294_v31 = vrot.slane %v5121_v32, %v13880_v52 }
 0x5ed   :  { %v5122_v56 = vunpack.c.l.b16 %v5039_v43  ;;  %v5054_v20 = vpack.c.bf16 %v4983_v11, %v4982_v9  ;;  %v5290_v21 = vsel %vm5183_vm13, %v5289_v59, %v5285_v30  ;;  %v5352_v57 = vrot.slane %v5133_v29, %v13848_v16 }
 0x5ee   :  { %v5406_v38 = vrot.slane %v5144_v22, %v13828_v25  ;;  %v5410_v55 = vrot.slane %v5145_v61, %v13835_v53  ;;  %v5348_v40 = vsel %vm5169_vm11, %v5347_v51, %v5343_v48  ;;  %v5135_v8 = vunpack.c.h.b16 %v5046_v28  ;;  %v18160_v61 = vld [vmem:[#allocation453_spill] sm:$0xff] }
 0x5ef   :  { %v5147_v37 = vunpack.c.h.b16 %v5053_v54  ;;  %v5357_v7 = vrot.slane %v5134_v6, %v13869_v2  ;;  %v5415_v36 = vrot.slane %v5146_v5, %v13839_v35  ;;  %v5232_v43 = vsel %vm5197_vm15, %v5231_v27, %v5227_v58  ;;  %v18161_v27 = vld [vmem:[#allocation432_spill] sm:$0xff] }
 0x5f0   :  { %v4818_v10 = vpop.xlane.xlu1 %4817  ;;  %v5299_v18 = vrot.slane %v5122_v56, %v14035_v4  ;;  %v5333_v32 = vrot.slane %v14086_v39, %v14035_v4  ;;  %v18159_v9 = vpack.c.bf16 %v14071_v47, %v14071_v47  ;;  %v5148_v29 = vunpack.c.l.b16 %v5054_v20 }
 0x5f1   :  { %v4970_v33 = vmul.f32 0.0013020834, %v4818_v10  ;;  %v5353_v54 = vsel %vm5176_vm12, %v5352_v57, %v5348_v40  ;;  %v5411_v22 = vsel %vm5162_vm10, %v5410_v55, %v5406_v38  ;;  %v4997_v14 = vpack.c.bf16 %v18160_v61, %v14042_v49 }
 0x5f2   :  { %v5143_v59 = vunpack.c.l.b16 %v18159_v9  ;;  %v5295_v11 = vsel %vm5190_vm14, %v5294_v31, %v5290_v21  ;;  %v5362_v51 = vrot.slane %v5135_v8, %v13880_v52  ;;  %v5420_v58 = vrot.slane %v5147_v37, %v13848_v16  ;;  %v18162_v8 = vld [vmem:[#allocation433_spill] sm:$0xff] }
 0x5f3   :  { %v5047_v28 = vpack.c.bf16 %v4970_v33, %v4970_v33  ;;  %v5437_v39 = vsel %vm1874_vm1, %v5232_v43, %v14079_v13  ;;  %v5358_v6 = vsel %vm5183_vm13, %v5357_v7, %v5353_v54  ;;  %v5416_v5 = vsel %vm5169_vm11, %v5415_v36, %v5411_v22 }
 0x5f4   :  { %v4248_v44 = vpop.xlane.xlu0 %4247  ;;  %v4998_v56 = vpack.c.bf16 %v18161_v27, %v14114_v26  ;;  %v5300_v30 = vsel %vm5197_vm15, %v5299_v18, %v5295_v11  ;;  %v5266_v49 = vsel %vm5197_vm15, %v5265_v15, %v14060_v46  ;;  %v5149_v48 = vunpack.c.h.b16 %v5054_v20 }
 0x5f5   :  { %v5136_v47 = vunpack.c.l.b16 %v5047_v28  ;;  %v5425_v31 = vrot.slane %v5148_v29, %v13869_v2  ;;  %v5568_v13 = vunpack.c.l.b16 %v4997_v14  ;;  %v5569_v38 = vunpack.c.h.b16 %v4997_v14 }
 0x5f6   :  { %v5438_v55 = vsel %vm1876_vm2, %v5266_v49, %v5437_v39  ;;  %v4996_v26 = vpack.c.bf16 %v18162_v8, %v18162_v8  ;;  %v5421_v37 = vsel %vm5176_vm12, %v5420_v58, %v5416_v5  ;;  %v5363_v46 = vsel %vm5190_vm14, %v5362_v51, %v5358_v6 }
 0x5f7   :  { %v5367_v21 = vrot.slane %v5136_v47, %v14035_v4  ;;  %v5439_v33 = vsel %vm1878_vm3, %v5300_v30, %v5438_v55  ;;  %v5570_v15 = vunpack.c.l.b16 %v4998_v56  ;;  %v4999_v7 = vpack.c.bf16 %v13972_v45, %v4248_v44 }
 0x5f8   :  { %v4928_v57 = vpop.xlane.xlu1 %4927  ;;  %v4344_v40 = vpop.xlane.xlu0 %4343  ;;  %v5334_v43 = vsel %vm5197_vm15, %v5333_v32, %v14065_v17  ;;  %v5401_v18 = vrot.slane %v5143_v59, %v14035_v4  ;;  %v5426_v9 = vsel %vm5183_vm13, %v5425_v31, %v5421_v37  ;;  %v5430_v29 = vrot.slane %v5149_v48, %v13880_v52  ;;  %v18165_v48 = vld [vmem:[#allocation455_spill] sm:$0xff] }
 0x5f9   :  { %v4984_v10 = vmul.f32 0.0013020834, %v4928_v57  ;;  %v5368_v20 = vsel %vm5197_vm15, %v5367_v21, %v5363_v46  ;;  %v5708_v54 = vrot.slane %v5568_v13, %v13828_v25  ;;  %v5712_v22 = vrot.slane %v5569_v38, %v13835_v53  ;;  %v8406_v57 = vld [vmem:[%s15664_s3] sm:$0xff]  }
 0x5fa   :  { %v5440_v61 = vsel %vm1880_vm4, %v5334_v43, %v5439_v33  ;;  %v5752_v45 = vsel %vm5169_vm11, %v14018_v63, %v14003_v41  ;;  %v18163_v17 = vunpack.c.l.b16 %v13993_v1  ;;  %v5571_v32 = vunpack.c.h.b16 %v4998_v56 }
 0x5fb   :  { %v5055_v36 = vpack.c.bf16 %v4984_v10, %v4984_v10  ;;  %v5441_v59 = vsel %vm1882_vm5, %v5368_v20, %v5440_v61  ;;  %v5397_v51 = vsel %vm5190_vm14, %v13968_v34, %v13989_v60  ;;  %v5717_v58 = vrot.slane %v5570_v15, %v13839_v35 }
 0x5fc   :  { %v14182_v28 = vpop.xlane.xlu1 %4474  ;;  %v14193_v44 = vrot.slane %v18163_v17, %v13869_v2  ;;  %v4447_v11 = vpop.xlane.xlu0 %4446  ;;  %v5572_v39 = vunpack.c.l.b16 %v4999_v7  ;;  %v5402_v41 = vsel %vm5197_vm15, %v5401_v18, %v5397_v51  ;;  %v18164_v63 = vpack.c.bf16 %v13743_v3, %v13743_v3 }
 0x5fd   :  { %v5150_v14 = vunpack.c.l.b16 %v5055_v36  ;;  %v5567_v5 = vunpack.c.l.b16 %v4996_v26  ;;  %v5431_v27 = vsel %vm5190_vm14, %v5430_v29, %v5426_v9  ;;  %v5713_v56 = vsel %vm5162_vm10, %v5712_v22, %v5708_v54  ;;  %v18168_v36 = vld [vmem:[#allocation434_spill] sm:$0xff]  ;;  %v8407_v29 = vld [vmem:[%s15664_s3 + $0x8] sm:$0xff]  }
 0x5fe   :  { %v5553_v6 = vunpack.c.l.b16 %v18164_v63  ;;  %v5442_v30 = vsel %vm1884_vm6, %v5402_v41, %v5441_v59  ;;  %v5722_v49 = vrot.slane %v5571_v32, %v13848_v16  ;;  %v5005_v31 = vpack.c.bf16 %v18165_v48, %v14126_v50 }
 0x5ff   :  { %v5435_v47 = vrot.slane %v5150_v14, %v14035_v4  ;;  %v5718_v13 = vsel %vm5169_vm11, %v5717_v58, %v5713_v56  ;;  %v5573_v38 = vunpack.c.h.b16 %v4999_v7  ;;  %v5727_v55 = vrot.slane %v5572_v39, %v13869_v2  ;;  %v18167_v7 = vld [vmem:[#allocation425_spill] sm:$0xff] }
 0x600   :  { %v4158_v60 = vpop.xlane.xlu1 %4157  ;;  %v5592_v8 = vunpack.c.h.b16 %v14010_v24  ;;  %v14220_v26 = vpack.c.bf16 %v13996_v12, %v4344_v40  ;;  %v5013_v50 = vpack.c.bf16 %v4447_v11, %v14015_v42  ;;  %v4358_v33 = vpop.xlane.xlu0 %4357  ;;  %v14225_v46 = vsel %vm5176_vm12, %v14021_v23, %v5752_v45  ;;  %v18170_v39 = vld [vmem:[#allocation409_spill] sm:$0xff] }
 0x601   :  { %v5436_v34 = vsel %vm5197_vm15, %v5435_v47, %v5431_v27  ;;  %v4992_v3 = vpack.c.bf16 %v4158_v60, %v4158_v60  ;;  %v18166_v15 = vunpack.c.l.b16 %v14010_v24  ;;  %v14232_v43 = vpack.c.bf16 %v18168_v36, %v18167_v7  ;;  %v18175_v36 = vld [vmem:[#allocation458_spill] sm:$0xff] }
 0x602   :  { %v5443_v21 = vsel %vm1886_vm7, %v5436_v34, %v5442_v30  ;;  %v5635_v18 = vrot.slane %v5553_v6, %v14035_v4  ;;  %v5703_v12 = vrot.slane %v5567_v5, %v14035_v4  ;;  %v5723_v42 = vsel %vm5176_vm12, %v5722_v49, %v5718_v13  ;;  %v18171_v6 = vld [vmem:[#allocation423_spill] sm:$0xff] }
 0x603   :  { %v5444_v10 = vpack.c.b16 %v5443_v21, %v5443_v21  ;;  %v5560_v37 = vunpack.c.l.b16 %v4992_v3  ;;  %v5819_v20 = vrot.slane %v18166_v15, %v13839_v35  ;;  %v5582_v40 = vunpack.c.l.b16 %v5005_v31  ;;  %v18172_v30 = vld [vmem:[#allocation435_spill] sm:$0xff] }
 0x604   :  { %v4268_v9 = vpop.xlane.xlu1 %4267  ;;  %v18169_v54 = vmov 0.0   ;;  %v5583_v22 = vunpack.c.h.b16 %v5005_v31  ;;  %v5728_v61 = vsel %vm5183_vm13, %v5727_v55, %v5723_v42  ;;  %v5732_v14 = vrot.slane %v5573_v38, %v13880_v52  ;;  %v4454_v51 = vpop.xlane.xlu0 %4453 }
 0x605   :  { %8118 = vmatmul.mubr.msk.bf16.vlgmr.msra.gmra.mrb[12].mxu1 %vm5466_vm8, %v5444_v10  ;;  %v5669_v23 = vrot.slane %v5560_v37, %v14035_v4  ;;  %v5000_v45 = vpack.c.bf16 %v4268_v9, %v4268_v9  ;;  %v5584_v17 = vunpack.c.l.b16 %v14220_v26  ;;  %v5596_v32 = vunpack.c.l.b16 %v5013_v50  ;;  %v18173_v37 = vld [vmem:[#allocation452_spill] sm:$0xff] }
 0x606   :  { %8122 = vmatpush3.bf16.msra.mxu1 %v8406_v57  ;;  %8129 = vmatprep.mubr.msk.bf16.mxu1 %vm8512_vm9, %v18169_v54  ;;  %v5597_v59 = vunpack.c.h.b16 %v5013_v50  ;;  %v5636_v58 = vsel %vm5197_vm15, %v5635_v18, %v14000_v62  ;;  %v5004_v47 = vpack.c.bf16 %v18170_v39, %v18170_v39  ;;  %v5007_v41 = vpack.c.bf16 %v14048_v19, %v4358_v33  ;;  %v8408_v62 = vld [vmem:[%s15664_s3 + $0x10] sm:$0xff]  }
 0x607   :  { %8123 = vmatprep.subr.bf16.mxu1 %v18169_v54  ;;  %v5670_v11 = vsel %vm5197_vm15, %v5669_v23, %v14103_v0  ;;  %v5574_v63 = vunpack.c.l.b16 %v5000_v45  ;;  %v5704_v5 = vsel %vm5197_vm15, %v5703_v12, %v18171_v6  ;;  %v5776_v27 = vrot.slane %v5582_v40, %v13828_v25  ;;  %v8409_v0 = vld [vmem:[%s15664_s3 + $0x18] ss:$0 sps:$4 sm:$0x11]  }
 0x608   :  { %v5875_v56 = vsel %vm1874_vm1, %v5670_v11, %v5636_v58  ;;  %v5014_v34 = vpack.c.bf16 %v18172_v30, %v4454_v51  ;;  %v5780_v19 = vrot.slane %v5583_v22, %v13835_v53  ;;  %v5733_v60 = vsel %vm5190_vm14, %v5732_v14, %v5728_v61  ;;  %v4378_v13 = vpop.xlane.xlu1 %4377  ;;  %v4468_v40 = vpop.xlane.xlu0 %4467 }
 0x609   :  { %v5585_v49 = vunpack.c.h.b16 %v14220_v26  ;;  %v5737_v48 = vrot.slane %v5574_v63, %v14035_v4  ;;  %v5785_v31 = vrot.slane %v5584_v17, %v13839_v35  ;;  %v5844_v21 = vrot.slane %v5596_v32, %v13828_v25  ;;  %v18174_v26 = vld [vmem:[#allocation460_spill] sm:$0xff] }
 0x60a   :  { %8124 = vmatpush3.bf16.msra.mxu1 %v8407_v29  ;;  %v5848_v3 = vrot.slane %v5597_v59, %v13835_v53  ;;  %v5598_v57 = vunpack.c.l.b16 %v5014_v34  ;;  %v5586_v38 = vunpack.c.l.b16 %v5007_v41  ;;  %v5876_v10 = vsel %vm1876_vm2, %v5704_v5, %v5875_v56 }
 0x60b   :  { %8125 = vmatprep.subr.bf16.mxu1 %v18169_v54  ;;  %v5738_v55 = vsel %vm5197_vm15, %v5737_v48, %v5733_v60  ;;  %v5008_v50 = vpack.c.bf16 %v4378_v13, %v4378_v13  ;;  %v5815_v33 = vsel %vm5162_vm10, %v18174_v26, %v18173_v37  ;;  %v5599_v7 = vunpack.c.h.b16 %v5014_v34 }
 0x60c   :  { %v5877_v15 = vsel %vm1878_vm3, %v5738_v55, %v5876_v10  ;;  %v5908_v25 = vand.u32 %v8409_v0, %v18175_v36  ;;  %v5820_v53 = vsel %vm5169_vm11, %v5819_v20, %v5815_v33  ;;  %v5593_v18 = vunpack.c.l.b16 %v14232_v43  ;;  %v4488_v17 = vpop.xlane.xlu1 %4487 }
 0x60d   :  { %v5581_v12 = vunpack.c.l.b16 %v5004_v47  ;;  %v5853_v42 = vrot.slane %v5598_v57, %v13839_v35  ;;  %v5781_v23 = vsel %vm5162_vm10, %v5780_v19, %v5776_v27  ;;  %v5790_v9 = vrot.slane %v5585_v49, %v13848_v16  ;;  %v4433_v5 = vpop.xlane.xlu0 %4432 }
 0x60e   :  { %8126 = vmatpush3.bf16.msra.mxu1 %v8408_v62  ;;  %v5587_v29 = vunpack.c.h.b16 %v5007_v41  ;;  %v5015_v22 = vpack.c.bf16 %v14182_v28, %v4468_v40  ;;  %v5786_v61 = vsel %vm5169_vm11, %v5785_v31, %v5781_v23  ;;  %v5849_v14 = vsel %vm5162_vm10, %v5848_v3, %v5844_v21  ;;  %v18179_v40 = vld [vmem:[#allocation350_spill] sm:$0xff] }
 0x60f   :  { %8127 = vmatprep.subr.bf16.mxu1 %v18169_v54  ;;  %v5795_v20 = vrot.slane %v5586_v38, %v13869_v2  ;;  %v5588_v45 = vunpack.c.l.b16 %v5008_v50  ;;  %v5858_v35 = vrot.slane %v5599_v7, %v13848_v16  ;;  %v5016_v54 = vpack.c.bf16 %v4488_v17, %v4488_v17 }
 0x610   :  { %v5600_v32 = vunpack.c.l.b16 %v5015_v22  ;;  %v5601_v59 = vunpack.c.h.b16 %v5015_v22  ;;  %v5824_v11 = vrot.slane %v5592_v8, %v13848_v16  ;;  %v5594_v28 = vunpack.c.h.b16 %v14232_v43  ;;  %v18181_v22 = vld [vmem:[#allocation352_spill] sm:$0xff] }
 0x611   :  { %v5829_v51 = vrot.slane %v5593_v18, %v13869_v2  ;;  %v5854_v58 = vsel %vm5169_vm11, %v5853_v42, %v5849_v14  ;;  %v5791_v39 = vsel %vm5176_vm12, %v5790_v9, %v5786_v61  ;;  %v5800_v47 = vrot.slane %v5587_v29, %v13880_v52  ;;  %v18180_v9 = vld [vmem:[#allocation351_spill] sm:$0xff]  ;;  %v18182_v14 = vld [vmem:[#allocation353_spill] sm:$0xff] }
 0x612   :  { %8128 = vmatpush3.bf16.msra.mxu1 %v5908_v25  ;;  %v5863_v41 = vrot.slane %v5600_v32, %v13869_v2  ;;  %v5602_v63 = vunpack.c.l.b16 %v5016_v54  ;;  %v5762_v6 = vsel %vm5183_vm13, %v14193_v44, %v14225_v46  ;;  %v18176_v16 = vunpack.c.h.b16 %v13993_v1 }
 0x613   :  { %v5796_v8 = vsel %vm5183_vm13, %v5795_v20, %v5791_v39  ;;  %v5805_v43 = vrot.slane %v5588_v45, %v14035_v4  ;;  %v5771_v27 = vrot.slane %v5581_v12, %v14035_v4  ;;  %v5859_v56 = vsel %vm5176_vm12, %v5858_v35, %v5854_v58  ;;  %v18178_v12 = vld [vmem:[#allocation349_spill] sm:$0xff]  ;;  %v18183_v45 = vld [vmem:[#allocation342_spill] sm:$0xff]  ;;  %v18185_v58 = vld [vmem:[#allocation8_spill] sm:$0xff] }
 0x614   :  { %v5766_v24 = vrot.slane %v18176_v16, %v13880_v52  ;;  %v5868_v2 = vrot.slane %v5601_v59, %v13880_v52  ;;  %v5012_v30 = vpack.c.bf16 %v4433_v5, %v4433_v5  ;;  %v5825_v34 = vsel %vm5176_vm12, %v5824_v11, %v5820_v53  ;;  %v18177_v53 = vld [vmem:[#allocation348_spill] sm:$0xff]  ;;  %v18188_v16 = vld [vmem:[#allocation231_spill] sm:$0xff]  ;;  %v18190_v5 = vld [vmem:[#allocation5_spill] sm:$0xff] }
 0x615   :  { %v5834_v44 = vrot.slane %v5594_v28, %v13880_v52  ;;  %v5864_v46 = vsel %vm5183_vm13, %v5863_v41, %v5859_v56  ;;  %v5873_v1 = vrot.slane %v5602_v63, %v14035_v4  ;;  %v5830_v62 = vsel %vm5183_vm13, %v5829_v51, %v5825_v34  ;;  %v18184_v28 = vld [vmem:[#allocation7_spill] sm:$0xff]  ;;  %v18187_v63 = vld [vmem:[#allocation120_spill] sm:$0xff]  ;;  %v18191_v56 = vld [vmem:[#allocation6_spill] sm:$0xff] }
 0x616   :  { %v5801_v0 = vsel %vm5190_vm14, %v5800_v47, %v5796_v8  ;;  %v5595_v19 = vunpack.c.l.b16 %v5012_v30  ;;  %v5767_v60 = vsel %vm5190_vm14, %v5766_v24, %v5762_v6  ;;  %v5869_v31 = vsel %vm5190_vm14, %v5868_v2, %v5864_v46  ;;  %v18186_v47 = vld [vmem:[#allocation119_spill] sm:$0xff]  ;;  %v18189_v8 = vld [vmem:[#allocation232_spill] sm:$0xff]  ;;  %v18192_v30 = vld [vmem:[#allocation117_spill] sm:$0xff] }
 0x617   :  { %v5806_v49 = vsel %vm5197_vm15, %v5805_v43, %v5801_v0  ;;  %v5772_v48 = vsel %vm5197_vm15, %v5771_v27, %v5767_v60  ;;  %v5874_v3 = vsel %vm5197_vm15, %v5873_v1, %v5869_v31  ;;  %v5835_v57 = vsel %vm5190_vm14, %v5834_v44, %v5830_v62  ;;  %v18193_v44 = vld [vmem:[#allocation118_spill] sm:$0xff]  ;;  %v18194_v1 = vld [vmem:[#allocation229_spill] sm:$0xff] }
 0x618   :  { %v5839_v21 = vrot.slane %v5595_v19, %v14035_v4  ;;  %v5878_v52 = vsel %vm1880_vm4, %v5772_v48, %v5877_v15  ;;  %v6144_v17 = vsub.s32 6, %v18183_v45  ;;  %v6175_v32 = vsub.s32 7, %v18183_v45  ;;  %v18195_v0 = vld [vmem:[#allocation230_spill] sm:$0xff] }
 0x619   :  { %v5879_v13 = vsel %vm1882_vm5, %v5806_v49, %v5878_v52 }
 0x61a   :  { %v5840_v38 = vsel %vm5197_vm15, %v5839_v21, %v5835_v57 }
 0x61b   :  { %v5880_v55 = vsel %vm1884_vm6, %v5840_v38, %v5879_v13  ;;  %v18196_v13 = vld [vmem:[#allocation19_spill] sm:$0xff] }
 0x61c   :  { %v5881_v10 = vsel %vm1886_vm7, %v5874_v3, %v5880_v55  ;;  %v18197_v55 = vld [vmem:[#allocation20_spill] sm:$0xff] }
 0x61d   :  { %v5882_v50 = vpack.c.b16 %v5881_v10, %v5881_v10 }
 0x61f   :  { %8130 = vmatmul.mubr.msk.bf16.vlgmr.msra.gmra.mrb[12].mxu1 %vm5466_vm8, %v5882_v50  ;;  %v18198_v50 = vld [vmem:[#allocation131_spill] sm:$0xff] }
 0x6f2   :  { %v5944_v37 = vpop.f32.mrb[12].mxu1 }
 0x6f3   :  { %v7984_v26 = vmul.f32 -1.442695, %v5944_v37  ;;  %v8131_v4 = vpop.f32.mrb[13].mxu1 }
 0x6f4   :  { %v5947_v33 = vpop.f32.mrb[14].mxu1 }
 0x6f5   :  { %8482 = vpow2.f32 %v7984_v26  ;;  %v8132_v15 = vpop.f32.mrb[15].mxu1  ;;  %v18199_v26 = vld [vmem:[#allocation132_spill] sm:$0xff]  ;;  %v18200_v33 = vld [vmem:[#allocation243_spill] sm:$0xff] }
 0x6ff   :  { %v8483_v7 = vpop.eup %8482 }
 0x700   :  { %v5953_v36 = vadd.f32 1.0, %v8483_v7  ;;  %v18201_v7 = vld [vmem:[#allocation244_spill] sm:$0xff] }
 0x702   :  { %8484 = vrcp.f32 %v5953_v36 }
 0x70c   :  { %v8485_v25 = vpop.eup %8484 }
 0x70d   :  { %v5959_v18 = vrot.slane %v8485_v25, %v18177_v53  ;;  %v5990_v42 = vrot.slane %v8485_v25, %v18178_v12  ;;  %v6021_v23 = vrot.slane %v8485_v25, %v18179_v40  ;;  %v6052_v29 = vrot.slane %v8485_v25, %v18180_v9 }
 0x70e   :  { %v6083_v61 = vrot.slane %v8485_v25, %v18181_v22  ;;  %v6114_v20 = vrot.slane %v8485_v25, %v18182_v14  ;;  %v6145_v35 = vrot.slane %v8485_v25, %v6144_v17  ;;  %v6176_v59 = vrot.slane %v8485_v25, %v6175_v32  ;;  %v18202_v25 = vld [vmem:[#allocation33_spill] sm:$0xff]  ;;  %v18209_v32 = vld [vmem:[#allocation22_spill] sm:$0xff] }
 0x70f   :  { %5965 = vbcast.lane.b32.xlu1 %v5959_v18, 264  ;;  %5961 = vbcast.lane.b32.xlu0 %v5959_v18, 256  ;;  %v18208_v17 = vld [vmem:[#allocation21_spill] sm:$0xff] }
 0x713   :  { %5992 = vbcast.lane.b32.xlu1 %v5990_v42, 256  ;;  %6023 = vbcast.lane.b32.xlu0 %v6021_v23, 256 }
 0x717   :  { %5996 = vbcast.lane.b32.xlu1 %v5990_v42, 264  ;;  %5969 = vbcast.lane.b32.xlu0 %v5959_v18, 272 }
 0x71b   :  { %6027 = vbcast.lane.b32.xlu1 %v6021_v23, 264  ;;  %6054 = vbcast.lane.b32.xlu0 %v6052_v29, 256 }
 0x71f   :  { %6000 = vbcast.lane.b32.xlu1 %v5990_v42, 272  ;;  %6031 = vbcast.lane.b32.xlu0 %v6021_v23, 272 }
 0x723   :  { %6058 = vbcast.lane.b32.xlu1 %v6052_v29, 264  ;;  %6089 = vbcast.lane.b32.xlu0 %v6083_v61, 264 }
 0x727   :  { %6085 = vbcast.lane.b32.xlu1 %v6083_v61, 256  ;;  %6004 = vbcast.lane.b32.xlu0 %v5990_v42, 280 }
 0x72b   :  { %5973 = vbcast.lane.b32.xlu1 %v5959_v18, 280  ;;  %6116 = vbcast.lane.b32.xlu0 %v6114_v20, 256 }
 0x72f   :  { %6062 = vbcast.lane.b32.xlu1 %v6052_v29, 272  ;;  %6035 = vbcast.lane.b32.xlu0 %v6021_v23, 280 }
 0x733   :  { %6120 = vbcast.lane.b32.xlu1 %v6114_v20, 264  ;;  %6147 = vbcast.lane.b32.xlu0 %v6145_v35, 256 }
 0x737   :  { %6093 = vbcast.lane.b32.xlu1 %v6083_v61, 272  ;;  %5977 = vbcast.lane.b32.xlu0 %v5959_v18, 288 }
 0x73b   :  { %6151 = vbcast.lane.b32.xlu1 %v6145_v35, 264  ;;  %6066 = vbcast.lane.b32.xlu0 %v6052_v29, 280 }
 0x73f   :  { %6008 = vbcast.lane.b32.xlu1 %v5990_v42, 288  ;;  %6178 = vbcast.lane.b32.xlu0 %v6176_v59, 256 }
 0x743   :  { %6124 = vbcast.lane.b32.xlu1 %v6114_v20, 272  ;;  %6039 = vbcast.lane.b32.xlu0 %v6021_v23, 288 }
 0x747   :  { %6182 = vbcast.lane.b32.xlu1 %v6176_v59, 264  ;;  %6155 = vbcast.lane.b32.xlu0 %v6145_v35, 272 }
 0x74b   :  { %6097 = vbcast.lane.b32.xlu1 %v6083_v61, 280  ;;  %6012 = vbcast.lane.b32.xlu0 %v5990_v42, 296 }
 0x74f   :  { %5981 = vbcast.lane.b32.xlu1 %v5959_v18, 296  ;;  %6128 = vbcast.lane.b32.xlu0 %v6114_v20, 280 }
 0x753   :  { %6070 = vbcast.lane.b32.xlu1 %v6052_v29, 288  ;;  %5985 = vbcast.lane.b32.xlu0 %v5959_v18, 304  ;;  %v18203_v18 = vld [vmem:[#allocation34_spill] sm:$0xff] }
 0x757   :  { %6186 = vbcast.lane.b32.xlu1 %v6176_v59, 272  ;;  %6043 = vbcast.lane.b32.xlu0 %v6021_v23, 296 }
 0x75b   :  { %6016 = vbcast.lane.b32.xlu1 %v5990_v42, 304  ;;  %6159 = vbcast.lane.b32.xlu0 %v6145_v35, 280  ;;  %v18204_v42 = vld [vmem:[#allocation145_spill] sm:$0xff] }
 0x75f   :  { %6101 = vbcast.lane.b32.xlu1 %v6083_v61, 288  ;;  %6074 = vbcast.lane.b32.xlu0 %v6052_v29, 296 }
 0x763   :  { %6047 = vbcast.lane.b32.xlu1 %v6021_v23, 304  ;;  %6190 = vbcast.lane.b32.xlu0 %v6176_v59, 280  ;;  %v18205_v23 = vld [vmem:[#allocation146_spill] sm:$0xff] }
 0x767   :  { %6132 = vbcast.lane.b32.xlu1 %v6114_v20, 288  ;;  %6105 = vbcast.lane.b32.xlu0 %v6083_v61, 296 }
 0x76b   :  { %6078 = vbcast.lane.b32.xlu1 %v6052_v29, 304  ;;  %6109 = vbcast.lane.b32.xlu0 %v6083_v61, 304  ;;  %v18206_v29 = vld [vmem:[#allocation257_spill] sm:$0xff]  ;;  %v18207_v61 = vld [vmem:[#allocation258_spill] sm:$0xff] }
 0x76f   :  { %6163 = vbcast.lane.b32.xlu1 %v6145_v35, 288  ;;  %6194 = vbcast.lane.b32.xlu0 %v6176_v59, 288 }
 0x773   :  { %6136 = vbcast.lane.b32.xlu1 %v6114_v20, 296  ;;  %6167 = vbcast.lane.b32.xlu0 %v6145_v35, 296 }
 0x777   :  { %6140 = vbcast.lane.b32.xlu1 %v6114_v20, 304  ;;  %6198 = vbcast.lane.b32.xlu0 %v6176_v59, 296 }
 0x77b   :  { %6171 = vbcast.lane.b32.xlu1 %v6145_v35, 304 }
 0x77f   :  { %6202 = vbcast.lane.b32.xlu1 %v6176_v59, 304 }
 0x781   :  { %v5966_v54 = vpop.permute.xlu1 %5965  ;;  %v5962_v11 = vpop.permute.xlu0 %5961 }
 0x782   :  { %v6210_v51 = vmul.f32 %v5966_v54, %v18184_v28  ;;  %v6211_v39 = vmul.f32 %v5966_v54, %v18185_v58  ;;  %v6212_v41 = vmul.f32 %v5966_v54, %v18186_v47  ;;  %v6213_v6 = vmul.f32 %v5966_v54, %v18187_v63  ;;  %v18211_v28 = vld [vmem:[#allocation134_spill] sm:$0xff]  ;;  %v18212_v58 = vld [vmem:[#allocation245_spill] sm:$0xff] }
 0x783   :  { %v6214_v24 = vmul.f32 %v5966_v54, %v18188_v16  ;;  %v6215_v43 = vmul.f32 %v5966_v54, %v18189_v8  ;;  %v6204_v27 = vmul.f32 %v5962_v11, %v18190_v5  ;;  %v6205_v2 = vmul.f32 %v5962_v11, %v18191_v56  ;;  %v18210_v54 = vld [vmem:[#allocation133_spill] sm:$0xff]  ;;  %v18213_v47 = vld [vmem:[#allocation246_spill] sm:$0xff] }
 0x784   :  { %v6206_v34 = vmul.f32 %v5962_v11, %v18192_v30  ;;  %v6207_v46 = vmul.f32 %v5962_v11, %v18193_v44  ;;  %v6208_v62 = vmul.f32 %v5962_v11, %v18194_v1  ;;  %v6209_v19 = vmul.f32 %v5962_v11, %v18195_v0  ;;  %v18214_v63 = vld [vmem:[#allocation9_spill] sm:$0xff]  ;;  %v18215_v16 = vld [vmem:[#allocation10_spill] sm:$0xff] }
 0x785   :  { %v6540_v60 = vadd.f32 %v6210_v51, %v6204_v27  ;;  %v6553_v49 = vadd.f32 %v6211_v39, %v6205_v2  ;;  %v5993_v48 = vpop.permute.xlu1 %5992  ;;  %v6024_v31 = vpop.permute.xlu0 %6023  ;;  %v18216_v30 = vld [vmem:[#allocation121_spill] sm:$0xff]  ;;  %v18217_v44 = vld [vmem:[#allocation122_spill] sm:$0xff] }
 0x786   :  { %v6566_v21 = vadd.f32 %v6212_v41, %v6206_v34  ;;  %v6579_v52 = vadd.f32 %v6213_v6, %v6207_v46  ;;  %v6592_v3 = vadd.f32 %v6214_v24, %v6208_v62  ;;  %v6605_v57 = vadd.f32 %v6215_v43, %v6209_v19  ;;  %v18218_v0 = vld [vmem:[#allocation233_spill] sm:$0xff] }
 0x787   :  { %v6246_v38 = vmul.f32 %v5993_v48, %v18196_v13  ;;  %v6247_v10 = vmul.f32 %v5993_v48, %v18197_v55  ;;  %v6248_v37 = vmul.f32 %v5993_v48, %v18198_v50  ;;  %v6249_v4 = vmul.f32 %v5993_v48, %v18199_v26  ;;  %v18220_v50 = vld [vmem:[#allocation35_spill] sm:$0xff]  ;;  %v18221_v26 = vld [vmem:[#allocation36_spill] sm:$0xff] }
 0x788   :  { %v6250_v15 = vmul.f32 %v5993_v48, %v18200_v33  ;;  %v6251_v36 = vmul.f32 %v5993_v48, %v18201_v7  ;;  %v6288_v53 = vmul.f32 %v6024_v31, %v18202_v25  ;;  %v6289_v12 = vmul.f32 %v6024_v31, %v18203_v18  ;;  %v18219_v48 = vld [vmem:[#allocation234_spill] sm:$0xff]  ;;  %v18222_v7 = vld [vmem:[#allocation147_spill] sm:$0xff]  ;;  %v18223_v25 = vld [vmem:[#allocation148_spill] sm:$0xff] }
 0x789   :  { %v6290_v40 = vmul.f32 %v6024_v31, %v18204_v42  ;;  %v6291_v9 = vmul.f32 %v6024_v31, %v18205_v23  ;;  %v6292_v22 = vmul.f32 %v6024_v31, %v18206_v29  ;;  %v6293_v14 = vmul.f32 %v6024_v31, %v18207_v61  ;;  %v5997_v20 = vpop.permute.xlu1 %5996  ;;  %v5970_v45 = vpop.permute.xlu0 %5969 }
 0x78a   :  { %v6252_v35 = vmul.f32 %v5997_v20, %v18208_v17  ;;  %v6253_v59 = vmul.f32 %v5997_v20, %v18209_v32  ;;  %v6254_v11 = vmul.f32 %v5997_v20, %v18210_v54  ;;  %v6255_v51 = vmul.f32 %v5997_v20, %v18211_v28  ;;  %v18226_v17 = vld [vmem:[#allocation47_spill] sm:$0xff]  ;;  %v18229_v28 = vld [vmem:[#allocation160_spill] sm:$0xff] }
 0x78b   :  { %v6256_v39 = vmul.f32 %v5997_v20, %v18212_v58  ;;  %v6257_v41 = vmul.f32 %v5997_v20, %v18213_v47  ;;  %v6216_v6 = vmul.f32 %v5970_v45, %v18214_v63  ;;  %v6217_v24 = vmul.f32 %v5970_v45, %v18215_v16  ;;  %v18228_v54 = vld [vmem:[#allocation159_spill] sm:$0xff]  ;;  %v18231_v47 = vld [vmem:[#allocation272_spill] sm:$0xff] }
 0x78c   :  { %v6618_v8 = vadd.f32 %v6252_v35, %v6246_v38  ;;  %v6631_v43 = vadd.f32 %v6253_v59, %v6247_v10  ;;  %v6644_v5 = vadd.f32 %v6254_v11, %v6248_v37  ;;  %v6657_v27 = vadd.f32 %v6255_v51, %v6249_v4  ;;  %v18230_v58 = vld [vmem:[#allocation271_spill] sm:$0xff]  ;;  %v18233_v63 = vld [vmem:[#allocation24_spill] sm:$0xff] }
 0x78d   :  { %v6670_v56 = vadd.f32 %v6256_v39, %v6250_v15  ;;  %v6683_v2 = vadd.f32 %v6257_v41, %v6251_v36  ;;  %v6218_v34 = vmul.f32 %v5970_v45, %v18216_v30  ;;  %v6219_v46 = vmul.f32 %v5970_v45, %v18217_v44  ;;  %v6028_v1 = vpop.permute.xlu1 %6027  ;;  %v6055_v62 = vpop.permute.xlu0 %6054  ;;  %v18235_v16 = vld [vmem:[#allocation136_spill] sm:$0xff]  ;;  %v18236_v30 = vld [vmem:[#allocation247_spill] sm:$0xff] }
 0x78e   :  { %v6220_v19 = vmul.f32 %v5970_v45, %v18218_v0  ;;  %v6221_v31 = vmul.f32 %v5970_v45, %v18219_v48  ;;  %v14375_v13 = vadd.f32 %v6540_v60, %v6216_v6  ;;  %v14377_v55 = vadd.f32 %v6553_v49, %v6217_v24  ;;  %v18224_v60 = vld [vmem:[#allocation259_spill] sm:$0xff]  ;;  %v18225_v49 = vld [vmem:[#allocation260_spill] sm:$0xff] }
 0x78f   :  { %v14379_v38 = vadd.f32 %v6566_v21, %v6218_v34  ;;  %v14381_v10 = vadd.f32 %v6579_v52, %v6219_v46  ;;  %v6294_v37 = vmul.f32 %v6028_v1, %v18220_v50  ;;  %v6295_v4 = vmul.f32 %v6028_v1, %v18221_v26 }
 0x790   :  { %v14385_v33 = vadd.f32 %v6592_v3, %v6220_v19  ;;  %v14387_v15 = vadd.f32 %v6605_v57, %v6221_v31  ;;  %v6296_v36 = vmul.f32 %v6028_v1, %v18222_v7  ;;  %v6297_v18 = vmul.f32 %v6028_v1, %v18223_v25  ;;  %v18227_v3 = vld [vmem:[#allocation48_spill] sm:$0xff]  ;;  %v18238_v19 = vld [vmem:[#allocation37_spill] sm:$0xff]  ;;  %v18239_v31 = vld [vmem:[#allocation38_spill] sm:$0xff] }
 0x791   :  { %v6298_v42 = vmul.f32 %v6028_v1, %v18224_v60  ;;  %v6299_v23 = vmul.f32 %v6028_v1, %v18225_v49  ;;  %v6696_v21 = vadd.f32 %v6294_v37, %v6288_v53  ;;  %v6709_v29 = vadd.f32 %v6295_v4, %v6289_v12  ;;  %v6001_v52 = vpop.permute.xlu1 %6000  ;;  %v6032_v61 = vpop.permute.xlu0 %6031  ;;  %v18232_v53 = vld [vmem:[#allocation23_spill] sm:$0xff]  ;;  %v18240_v7 = vld [vmem:[#allocation149_spill] sm:$0xff]  ;;  %v18241_v25 = vld [vmem:[#allocation150_spill] sm:$0xff] }
 0x792   :  { %v6722_v20 = vadd.f32 %v6296_v36, %v6290_v40  ;;  %v6735_v45 = vadd.f32 %v6297_v18, %v6291_v9  ;;  %v6330_v35 = vmul.f32 %v6055_v62, %v18226_v17  ;;  %v6331_v32 = vmul.f32 %v6055_v62, %v18227_v3  ;;  %v18234_v40 = vld [vmem:[#allocation135_spill] sm:$0xff]  ;;  %v18242_v60 = vld [vmem:[#allocation261_spill] sm:$0xff]  ;;  %v18243_v49 = vld [vmem:[#allocation262_spill] sm:$0xff] }
 0x793   :  { %v6748_v57 = vadd.f32 %v6298_v42, %v6292_v22  ;;  %v6761_v59 = vadd.f32 %v6299_v23, %v6293_v14  ;;  %v6332_v11 = vmul.f32 %v6055_v62, %v18228_v54  ;;  %v6333_v51 = vmul.f32 %v6055_v62, %v18229_v28  ;;  %v18237_v22 = vld [vmem:[#allocation248_spill] sm:$0xff]  ;;  %v18245_v3 = vld [vmem:[#allocation50_spill] sm:$0xff] }
 0x794   :  { %v6334_v39 = vmul.f32 %v6055_v62, %v18230_v58  ;;  %v6335_v41 = vmul.f32 %v6055_v62, %v18231_v47  ;;  %v6258_v12 = vmul.f32 %v6001_v52, %v18232_v53  ;;  %v6259_v6 = vmul.f32 %v6001_v52, %v18233_v63  ;;  %v18246_v47 = vld [vmem:[#allocation161_spill] sm:$0xff]  ;;  %v18249_v63 = vld [vmem:[#allocation274_spill] sm:$0xff] }
 0x795   :  { %v6260_v9 = vmul.f32 %v6001_v52, %v18234_v40  ;;  %v6261_v24 = vmul.f32 %v6001_v52, %v18235_v16  ;;  %v6262_v34 = vmul.f32 %v6001_v52, %v18236_v30  ;;  %v6263_v14 = vmul.f32 %v6001_v52, %v18237_v22  ;;  %v6059_v44 = vpop.permute.xlu1 %6058  ;;  %v6090_v46 = vpop.permute.xlu0 %6089 }
 0x796   :  { %v6619_v1 = vadd.f32 %v6618_v8, %v6258_v12  ;;  %v6632_v0 = vadd.f32 %v6631_v43, %v6259_v6  ;;  %v6300_v48 = vmul.f32 %v6032_v61, %v18238_v19  ;;  %v6301_v62 = vmul.f32 %v6032_v61, %v18239_v31  ;;  %v18244_v43 = vld [vmem:[#allocation49_spill] sm:$0xff]  ;;  %v18255_v31 = vld [vmem:[#allocation288_spill] sm:$0xff] }
 0x797   :  { %v6645_v50 = vadd.f32 %v6644_v5, %v6260_v9  ;;  %v6658_v37 = vadd.f32 %v6657_v27, %v6261_v24  ;;  %v6671_v26 = vadd.f32 %v6670_v56, %v6262_v34  ;;  %v6684_v4 = vadd.f32 %v6683_v2, %v6263_v14  ;;  %v18252_v14 = vld [vmem:[#allocation175_spill] sm:$0xff] }
 0x798   :  { %v6302_v36 = vmul.f32 %v6032_v61, %v18240_v7  ;;  %v6303_v18 = vmul.f32 %v6032_v61, %v18241_v25  ;;  %v6304_v42 = vmul.f32 %v6032_v61, %v18242_v60  ;;  %v6305_v23 = vmul.f32 %v6032_v61, %v18243_v49  ;;  %v18256_v7 = vld [vmem:[#allocation61_spill] sm:$0xff]  ;;  %v18257_v25 = vld [vmem:[#allocation62_spill] sm:$0xff] }
 0x799   :  { %v14411_v52 = vadd.f32 %v6696_v21, %v6300_v48  ;;  %v14413_v8 = vadd.f32 %v6709_v29, %v6301_v62  ;;  %v6336_v17 = vmul.f32 %v6059_v44, %v18244_v43  ;;  %v6337_v54 = vmul.f32 %v6059_v44, %v18245_v3  ;;  %v6086_v5 = vpop.permute.xlu1 %6085  ;;  %v6005_v27 = vpop.permute.xlu0 %6004  ;;  %v18247_v21 = vld [vmem:[#allocation162_spill] sm:$0xff]  ;;  %v18248_v29 = vld [vmem:[#allocation273_spill] sm:$0xff]  ;;  %v18254_v48 = vld [vmem:[#allocation287_spill] sm:$0xff] }
 0x79a   :  { %v14417_v56 = vadd.f32 %v6722_v20, %v6302_v36  ;;  %v14419_v2 = vadd.f32 %v6735_v45, %v6303_v18  ;;  %v14421_v28 = vadd.f32 %v6748_v57, %v6304_v42  ;;  %v14423_v58 = vadd.f32 %v6761_v59, %v6305_v23  ;;  %v18250_v20 = vld [vmem:[#allocation63_spill] sm:$0xff]  ;;  %v18251_v45 = vld [vmem:[#allocation64_spill] sm:$0xff]  ;;  %v18258_v18 = vld [vmem:[#allocation173_spill] sm:$0xff] }
 0x79b   :  { %v6338_v61 = vmul.f32 %v6059_v44, %v18246_v47  ;;  %v6339_v53 = vmul.f32 %v6059_v44, %v18247_v21  ;;  %v6340_v12 = vmul.f32 %v6059_v44, %v18248_v29  ;;  %v6341_v6 = vmul.f32 %v6059_v44, %v18249_v63  ;;  %v18253_v44 = vld [vmem:[#allocation176_spill] sm:$0xff]  ;;  %v18259_v60 = vld [vmem:[#allocation174_spill] sm:$0xff]  ;;  %v18264_v63 = vld [vmem:[#allocation137_spill] sm:$0xff] }
 0x79c   :  { %v14429_v40 = vadd.f32 %v6336_v17, %v6330_v35  ;;  %v14431_v9 = vadd.f32 %v6337_v54, %v6331_v32  ;;  %v6378_v16 = vmul.f32 %v6090_v46, %v18250_v20  ;;  %v6379_v24 = vmul.f32 %v6090_v46, %v18251_v45  ;;  %v18261_v23 = vld [vmem:[#allocation286_spill] sm:$0xff]  ;;  %v18262_v17 = vld [vmem:[#allocation25_spill] sm:$0xff] }
 0x79d   :  { %v14435_v57 = vadd.f32 %v6338_v61, %v6332_v11  ;;  %v14437_v59 = vadd.f32 %v6339_v53, %v6333_v51  ;;  %v14439_v30 = vadd.f32 %v6340_v12, %v6334_v39  ;;  %v14441_v34 = vadd.f32 %v6341_v6, %v6335_v41  ;;  %v5974_v22 = vpop.permute.xlu1 %5973  ;;  %v6117_v42 = vpop.permute.xlu0 %6116  ;;  %v18260_v41 = vld [vmem:[#allocation285_spill] sm:$0xff]  ;;  %v18263_v54 = vld [vmem:[#allocation26_spill] sm:$0xff] }
 0x79e   :  { %v6380_v19 = vmul.f32 %v6090_v46, %v18252_v14  ;;  %v6381_v35 = vmul.f32 %v6090_v46, %v18253_v44  ;;  %v6382_v32 = vmul.f32 %v6090_v46, %v18254_v48  ;;  %v6383_v62 = vmul.f32 %v6090_v46, %v18255_v31  ;;  %v18265_v20 = vld [vmem:[#allocation138_spill] sm:$0xff]  ;;  %v18266_v14 = vld [vmem:[#allocation249_spill] sm:$0xff] }
 0x79f   :  { %v6372_v36 = vmul.f32 %v6086_v5, %v18256_v7  ;;  %v6373_v11 = vmul.f32 %v6086_v5, %v18257_v25  ;;  %v6374_v51 = vmul.f32 %v6086_v5, %v18258_v18  ;;  %v6375_v39 = vmul.f32 %v6086_v5, %v18259_v60  ;;  %v18267_v48 = vld [vmem:[#allocation250_spill] sm:$0xff]  ;;  %v18269_v7 = vld [vmem:[#allocation12_spill] sm:$0xff]  ;;  %v18270_v18 = vld [vmem:[#allocation123_spill] sm:$0xff] }
 0x7a0   :  { %v6376_v49 = vmul.f32 %v6086_v5, %v18260_v41  ;;  %v6377_v43 = vmul.f32 %v6086_v5, %v18261_v23  ;;  %v6264_v3 = vmul.f32 %v6005_v27, %v18262_v17  ;;  %v6265_v47 = vmul.f32 %v6005_v27, %v18263_v54  ;;  %v18271_v60 = vld [vmem:[#allocation124_spill] sm:$0xff]  ;;  %v18274_v23 = vld [vmem:[#allocation75_spill] sm:$0xff] }
 0x7a1   :  { %v14455_v61 = vadd.f32 %v6378_v16, %v6372_v36  ;;  %v14457_v46 = vadd.f32 %v6379_v24, %v6373_v11  ;;  %v14459_v21 = vadd.f32 %v6380_v19, %v6374_v51  ;;  %v14461_v53 = vadd.f32 %v6381_v35, %v6375_v39  ;;  %v6063_v45 = vpop.permute.xlu1 %6062  ;;  %v18272_v39 = vld [vmem:[#allocation235_spill] sm:$0xff]  ;;  %v18273_v41 = vld [vmem:[#allocation236_spill] sm:$0xff] }
 0x7a2   :  { %v14463_v29 = vadd.f32 %v6382_v32, %v6376_v49  ;;  %v14465_v12 = vadd.f32 %v6383_v62, %v6377_v43  ;;  %v6266_v6 = vmul.f32 %v6005_v27, %v18264_v63  ;;  %v6267_v5 = vmul.f32 %v6005_v27, %v18265_v20  ;;  %v18268_v32 = vld [vmem:[#allocation11_spill] sm:$0xff]  ;;  %v18275_v17 = vld [vmem:[#allocation76_spill] sm:$0xff] }
 0x7a3   :  { %v6268_v44 = vmul.f32 %v6005_v27, %v18266_v14  ;;  %v6269_v16 = vmul.f32 %v6005_v27, %v18267_v48  ;;  %v14471_v31 = vadd.f32 %v6619_v1, %v6264_v3  ;;  %v14473_v24 = vadd.f32 %v6632_v0, %v6265_v47  ;;  %v6036_v1 = vpop.permute.xlu0 %6035  ;;  %v18280_v14 = vld [vmem:[#allocation51_spill] sm:$0xff]  ;;  %v18281_v48 = vld [vmem:[#allocation52_spill] sm:$0xff] }
 0x7a4   :  { %v14475_v19 = vadd.f32 %v6645_v50, %v6266_v6  ;;  %v14477_v35 = vadd.f32 %v6658_v37, %v6267_v5  ;;  %v6222_v62 = vmul.f32 %v5974_v22, %v18268_v32  ;;  %v6223_v36 = vmul.f32 %v5974_v22, %v18269_v7  ;;  %v18279_v5 = vld [vmem:[#allocation300_spill] sm:$0xff]  ;;  %v18282_v32 = vld [vmem:[#allocation163_spill] sm:$0xff] }
 0x7a5   :  { %v14481_v25 = vadd.f32 %v6671_v26, %v6268_v44  ;;  %v14483_v11 = vadd.f32 %v6684_v4, %v6269_v16  ;;  %v6224_v51 = vmul.f32 %v5974_v22, %v18270_v18  ;;  %v6225_v27 = vmul.f32 %v5974_v22, %v18271_v60  ;;  %v6121_v6 = vpop.permute.xlu1 %6120  ;;  %v18285_v18 = vld [vmem:[#allocation276_spill] sm:$0xff] }
 0x7a6   :  { %v6226_v0 = vmul.f32 %v5974_v22, %v18272_v39  ;;  %v6227_v50 = vmul.f32 %v5974_v22, %v18273_v41  ;;  %v14490_v37 = vadd.f32 %v14375_v13, %v6222_v62  ;;  %v14493_v49 = vadd.f32 %v14377_v55, %v6223_v36  ;;  %v18276_v13 = vld [vmem:[#allocation187_spill] sm:$0xff]  ;;  %v18277_v55 = vld [vmem:[#allocation188_spill] sm:$0xff] }
 0x7a7   :  { %v14496_v26 = vadd.f32 %v14379_v38, %v6224_v51  ;;  %v14499_v4 = vadd.f32 %v14381_v10, %v6225_v27  ;;  %v6414_v43 = vmul.f32 %v6117_v42, %v18274_v23  ;;  %v6415_v3 = vmul.f32 %v6117_v42, %v18275_v17  ;;  %v18278_v38 = vld [vmem:[#allocation299_spill] sm:$0xff] }
 0x7a8   :  { %v14504_v54 = vadd.f32 %v14385_v33, %v6226_v0  ;;  %v14507_v22 = vadd.f32 %v14387_v15, %v6227_v50  ;;  %v6416_v47 = vmul.f32 %v6117_v42, %v18276_v13  ;;  %v6417_v63 = vmul.f32 %v6117_v42, %v18277_v55  ;;  %v18283_v33 = vld [vmem:[#allocation164_spill] sm:$0xff]  ;;  %v18284_v36 = vld [vmem:[#allocation275_spill] sm:$0xff]  ;;  %v6148_v50 = vpop.permute.xlu0 %6147 }
 0x7a9   :  { %v6418_v20 = vmul.f32 %v6117_v42, %v18278_v38  ;;  %v6419_v10 = vmul.f32 %v6117_v42, %v18279_v5  ;;  %v6342_v44 = vmul.f32 %v6063_v45, %v18280_v14  ;;  %v6343_v16 = vmul.f32 %v6063_v45, %v18281_v48  ;;  %v18286_v39 = vld [vmem:[#allocation39_spill] sm:$0xff]  ;;  %v18287_v0 = vld [vmem:[#allocation40_spill] sm:$0xff] }
 0x7aa   :  { %v6344_v62 = vmul.f32 %v6063_v45, %v18282_v32  ;;  %v6345_v7 = vmul.f32 %v6063_v45, %v18283_v33  ;;  %v6346_v15 = vmul.f32 %v6063_v45, %v18284_v36  ;;  %v6347_v51 = vmul.f32 %v6063_v45, %v18285_v18  ;;  %v18288_v45 = vld [vmem:[#allocation151_spill] sm:$0xff]  ;;  %v18289_v55 = vld [vmem:[#allocation152_spill] sm:$0xff]  ;;  %v18293_v32 = vld [vmem:[#allocation78_spill] sm:$0xff] }
 0x7ab   :  { %v14520_v60 = vadd.f32 %v14429_v40, %v6342_v44  ;;  %v14523_v27 = vadd.f32 %v14431_v9, %v6343_v16  ;;  %v6306_v42 = vmul.f32 %v6036_v1, %v18286_v39  ;;  %v6307_v41 = vmul.f32 %v6036_v1, %v18287_v0  ;;  %v18290_v5 = vld [vmem:[#allocation263_spill] sm:$0xff]  ;;  %v18291_v44 = vld [vmem:[#allocation264_spill] sm:$0xff]  ;;  %v18292_v16 = vld [vmem:[#allocation77_spill] sm:$0xff] }
 0x7ac   :  { %v14528_v23 = vadd.f32 %v14435_v57, %v6344_v62  ;;  %v14531_v17 = vadd.f32 %v14437_v59, %v6345_v7  ;;  %v14534_v13 = vadd.f32 %v14439_v30, %v6346_v15  ;;  %v14537_v40 = vadd.f32 %v14441_v34, %v6347_v51  ;;  %v6094_v34 = vpop.permute.xlu1 %6093  ;;  %v18295_v15 = vld [vmem:[#allocation190_spill] sm:$0xff]  ;;  %v18296_v51 = vld [vmem:[#allocation301_spill] sm:$0xff] }
 0x7ad   :  { %v6308_v9 = vmul.f32 %v6036_v1, %v18288_v45  ;;  %v6309_v38 = vmul.f32 %v6036_v1, %v18289_v55  ;;  %v6310_v14 = vmul.f32 %v6036_v1, %v18290_v5  ;;  %v6311_v48 = vmul.f32 %v6036_v1, %v18291_v44  ;;  %v18294_v1 = vld [vmem:[#allocation189_spill] sm:$0xff]  ;;  %v5978_v55 = vpop.permute.xlu0 %5977 }
 0x7ae   :  { %v14544_v57 = vadd.f32 %v14411_v52, %v6306_v42  ;;  %v14547_v59 = vadd.f32 %v14413_v8, %v6307_v41  ;;  %v6420_v30 = vmul.f32 %v6121_v6, %v18292_v16  ;;  %v6421_v62 = vmul.f32 %v6121_v6, %v18293_v32  ;;  %v18297_v42 = vld [vmem:[#allocation302_spill] sm:$0xff]  ;;  %v18300_v44 = vld [vmem:[#allocation201_spill] sm:$0xff] }
 0x7af   :  { %v14552_v33 = vadd.f32 %v14417_v56, %v6308_v9  ;;  %v14555_v7 = vadd.f32 %v14419_v2, %v6309_v38  ;;  %v14558_v36 = vadd.f32 %v14421_v28, %v6310_v14  ;;  %v14561_v52 = vadd.f32 %v14423_v58, %v6311_v48  ;;  %v18298_v2 = vld [vmem:[#allocation89_spill] sm:$0xff]  ;;  %v18299_v9 = vld [vmem:[#allocation90_spill] sm:$0xff] }
 0x7b0   :  { %v6422_v8 = vmul.f32 %v6121_v6, %v18294_v1  ;;  %v6423_v18 = vmul.f32 %v6121_v6, %v18295_v15  ;;  %v6424_v39 = vmul.f32 %v6121_v6, %v18296_v51  ;;  %v6425_v0 = vmul.f32 %v6121_v6, %v18297_v42  ;;  %v18301_v6 = vld [vmem:[#allocation202_spill] sm:$0xff]  ;;  %v18302_v16 = vld [vmem:[#allocation313_spill] sm:$0xff] }
 0x7b1   :  { %v14567_v41 = vadd.f32 %v6420_v30, %v6414_v43  ;;  %v14569_v56 = vadd.f32 %v6421_v62, %v6415_v3  ;;  %v6456_v45 = vmul.f32 %v6148_v50, %v18298_v2  ;;  %v6457_v28 = vmul.f32 %v6148_v50, %v18299_v9  ;;  %v18303_v30 = vld [vmem:[#allocation314_spill] sm:$0xff]  ;;  %v18304_v62 = vld [vmem:[#allocation65_spill] sm:$0xff] }
 0x7b2   :  { %v14573_v38 = vadd.f32 %v6422_v8, %v6416_v47  ;;  %v14575_v58 = vadd.f32 %v6423_v18, %v6417_v63  ;;  %v14577_v5 = vadd.f32 %v6424_v39, %v6418_v20  ;;  %v14579_v14 = vadd.f32 %v6425_v0, %v6419_v10  ;;  %v18305_v15 = vld [vmem:[#allocation66_spill] sm:$0xff]  ;;  %v18306_v47 = vld [vmem:[#allocation177_spill] sm:$0xff]  ;;  %v6152_v20 = vpop.permute.xlu1 %6151 }
 0x7b3   :  { %v6458_v48 = vmul.f32 %v6148_v50, %v18300_v44  ;;  %v6459_v43 = vmul.f32 %v6148_v50, %v18301_v6  ;;  %v6460_v3 = vmul.f32 %v6148_v50, %v18302_v16  ;;  %v6461_v32 = vmul.f32 %v6148_v50, %v18303_v30  ;;  %v18307_v63 = vld [vmem:[#allocation178_spill] sm:$0xff]  ;;  %v18308_v39 = vld [vmem:[#allocation289_spill] sm:$0xff] }
 0x7b4   :  { %v6384_v1 = vmul.f32 %v6094_v34, %v18304_v62  ;;  %v6385_v51 = vmul.f32 %v6094_v34, %v18305_v15  ;;  %v6386_v8 = vmul.f32 %v6094_v34, %v18306_v47  ;;  %v6387_v18 = vmul.f32 %v6094_v34, %v18307_v63  ;;  %v18309_v42 = vld [vmem:[#allocation290_spill] sm:$0xff]  ;;  %v18310_v2 = vld [vmem:[#allocation13_spill] sm:$0xff] }
 0x7b5   :  { %v6388_v10 = vmul.f32 %v6094_v34, %v18308_v39  ;;  %v6389_v0 = vmul.f32 %v6094_v34, %v18309_v42  ;;  %v6228_v9 = vmul.f32 %v5978_v55, %v18310_v2  ;;  %v18311_v44 = vld [vmem:[#allocation14_spill] sm:$0xff]  ;;  %v18312_v47 = vld [vmem:[#allocation125_spill] sm:$0xff] }
 0x7b6   :  { %v6229_v6 = vmul.f32 %v5978_v55, %v18311_v44  ;;  %v14594_v16 = vadd.f32 %v14455_v61, %v6384_v1  ;;  %v14597_v50 = vadd.f32 %v14457_v46, %v6385_v51  ;;  %v14600_v30 = vadd.f32 %v14459_v21, %v6386_v8  ;;  %v18313_v39 = vld [vmem:[#allocation126_spill] sm:$0xff]  ;;  %v6067_v1 = vpop.permute.xlu0 %6066  ;;  %v18314_v42 = vld [vmem:[#allocation237_spill] sm:$0xff]  ;;  %v18316_v8 = vld [vmem:[#allocation91_spill] sm:$0xff] }
 0x7b7   :  { %v14603_v62 = vadd.f32 %v14461_v53, %v6387_v18  ;;  %v14606_v15 = vadd.f32 %v14463_v29, %v6388_v10  ;;  %v14609_v34 = vadd.f32 %v14465_v12, %v6389_v0  ;;  %v6230_v63 = vmul.f32 %v5978_v55, %v18312_v47  ;;  %v18315_v51 = vld [vmem:[#allocation238_spill] sm:$0xff]  ;;  %v18317_v10 = vld [vmem:[#allocation92_spill] sm:$0xff]  ;;  %v6009_v47 = vpop.permute.xlu1 %6008 }
 0x7b8   :  { %v6231_v61 = vmul.f32 %v5978_v55, %v18313_v39  ;;  %v6232_v46 = vmul.f32 %v5978_v55, %v18314_v42  ;;  %v6233_v2 = vmul.f32 %v5978_v55, %v18315_v51  ;;  %v14616_v21 = vadd.f32 %v14490_v37, %v6228_v9  ;;  %v18319_v37 = vld [vmem:[#allocation203_spill] sm:$0xff]  ;;  %v18322_v39 = vld [vmem:[#allocation316_spill] sm:$0xff] }
 0x7b9   :  { %v14619_v53 = vadd.f32 %v14493_v49, %v6229_v6  ;;  %v14622_v29 = vadd.f32 %v14496_v26, %v6230_v63  ;;  %v6462_v18 = vmul.f32 %v6152_v20, %v18316_v8  ;;  %v6463_v0 = vmul.f32 %v6152_v20, %v18317_v10  ;;  %v18320_v49 = vld [vmem:[#allocation204_spill] sm:$0xff]  ;;  %v18321_v26 = vld [vmem:[#allocation315_spill] sm:$0xff] }
 0x7ba   :  { %v14625_v12 = vadd.f32 %v14499_v4, %v6231_v61  ;;  %v14630_v44 = vadd.f32 %v14504_v54, %v6232_v46  ;;  %v14633_v55 = vadd.f32 %v14507_v22, %v6233_v2  ;;  %v6464_v9 = vmul.f32 %v6152_v20, %v18319_v37  ;;  %v18323_v46 = vld [vmem:[#allocation53_spill] sm:$0xff]  ;;  %v18324_v2 = vld [vmem:[#allocation54_spill] sm:$0xff] }
 0x7bb   :  { %v6465_v6 = vmul.f32 %v6152_v20, %v18320_v49  ;;  %v6466_v63 = vmul.f32 %v6152_v20, %v18321_v26  ;;  %v6467_v4 = vmul.f32 %v6152_v20, %v18322_v39  ;;  %v14639_v61 = vadd.f32 %v6462_v18, %v6456_v45  ;;  %v18325_v49 = vld [vmem:[#allocation165_spill] sm:$0xff]  ;;  %v6179_v45 = vpop.permute.xlu0 %6178 }
 0x7bc   :  { %18318 = vst [vmem:[#allocation446_spill] sm:$0xff] %v14633_v55  ;;  %v14641_v42 = vadd.f32 %v6463_v0, %v6457_v28  ;;  %v14643_v51 = vadd.f32 %v6464_v9, %v6458_v48  ;;  %v6348_v22 = vmul.f32 %v6067_v1, %v18323_v46  ;;  %v6349_v8 = vmul.f32 %v6067_v1, %v18324_v2  ;;  %v18326_v55 = vld [vmem:[#allocation166_spill] sm:$0xff]  ;;  %v18327_v18 = vld [vmem:[#allocation277_spill] sm:$0xff]  ;;  %v6125_v2 = vpop.permute.xlu1 %6124 }
 0x7bd   :  { %v14645_v54 = vadd.f32 %v6465_v6, %v6459_v43  ;;  %v14649_v10 = vadd.f32 %v6466_v63, %v6460_v3  ;;  %v14651_v37 = vadd.f32 %v6467_v4, %v6461_v32  ;;  %v6350_v26 = vmul.f32 %v6067_v1, %v18325_v49  ;;  %v18328_v0 = vld [vmem:[#allocation278_spill] sm:$0xff]  ;;  %v18330_v6 = vld [vmem:[#allocation27_spill] sm:$0xff]  ;;  %v18337_v49 = vld [vmem:[#allocation252_spill] sm:$0xff] }
 0x7be   :  { %v6351_v20 = vmul.f32 %v6067_v1, %v18326_v55  ;;  %v6352_v28 = vmul.f32 %v6067_v1, %v18327_v18  ;;  %v6353_v48 = vmul.f32 %v6067_v1, %v18328_v0  ;;  %v14658_v43 = vadd.f32 %v14520_v60, %v6348_v22  ;;  %v18331_v55 = vld [vmem:[#allocation28_spill] sm:$0xff]  ;;  %v18334_v60 = vld [vmem:[#allocation139_spill] sm:$0xff] }
 0x7bf   :  { %v14661_v9 = vadd.f32 %v14523_v27, %v6349_v8  ;;  %v14664_v3 = vadd.f32 %v14528_v23, %v6350_v26  ;;  %v6270_v63 = vmul.f32 %v6009_v47, %v18330_v6  ;;  %v6271_v39 = vmul.f32 %v6009_v47, %v18331_v55  ;;  %v18335_v27 = vld [vmem:[#allocation140_spill] sm:$0xff]  ;;  %v18336_v23 = vld [vmem:[#allocation251_spill] sm:$0xff] }
 0x7c0   :  { %v14667_v32 = vadd.f32 %v14531_v17, %v6351_v20  ;;  %v14672_v4 = vadd.f32 %v14534_v13, %v6352_v28  ;;  %v14675_v1 = vadd.f32 %v14537_v40, %v6353_v48  ;;  %v6272_v46 = vmul.f32 %v6009_v47, %v18334_v60  ;;  %v18338_v18 = vld [vmem:[#allocation103_spill] sm:$0xff]  ;;  %v18339_v0 = vld [vmem:[#allocation104_spill] sm:$0xff] }
 0x7c1   :  { %v6273_v22 = vmul.f32 %v6009_v47, %v18335_v27  ;;  %v6274_v8 = vmul.f32 %v6009_v47, %v18336_v23  ;;  %v6275_v17 = vmul.f32 %v6009_v47, %v18337_v49  ;;  %v14682_v26 = vadd.f32 %v14471_v31, %v6270_v63  ;;  %v18340_v31 = vld [vmem:[#allocation215_spill] sm:$0xff]  ;;  %v18345_v23 = vld [vmem:[#allocation80_spill] sm:$0xff] }
 0x7c2   :  { %18329 = vst [vmem:[#allocation465_spill] sm:$0xff] %v14667_v32  ;;  %18332 = vst [vmem:[#allocation448_spill] sm:$0xff] %v14672_v4  ;;  %v14685_v20 = vadd.f32 %v14473_v24, %v6271_v39  ;;  %v14688_v13 = vadd.f32 %v14475_v19, %v6272_v46  ;;  %v6498_v28 = vmul.f32 %v6179_v45, %v18338_v18  ;;  %v18341_v24 = vld [vmem:[#allocation216_spill] sm:$0xff]  ;;  %v6040_v39 = vpop.permute.xlu0 %6039  ;;  %v18343_v46 = vld [vmem:[#allocation329_spill] sm:$0xff]  ;;  %v6183_v32 = vpop.permute.xlu1 %6182 }
 0x7c3   :  { %18333 = vst [vmem:[#allocation474_spill] sm:$0xff] %v14675_v1  ;;  %v14691_v40 = vadd.f32 %v14477_v35, %v6273_v22  ;;  %v6499_v48 = vmul.f32 %v6179_v45, %v18339_v0  ;;  %v14696_v6 = vadd.f32 %v14481_v25, %v6274_v8  ;;  %v14699_v47 = vadd.f32 %v14483_v11, %v6275_v17  ;;  %v18342_v19 = vld [vmem:[#allocation328_spill] sm:$0xff]  ;;  %v18344_v27 = vld [vmem:[#allocation79_spill] sm:$0xff] }
 0x7c4   :  { %v6500_v63 = vmul.f32 %v6179_v45, %v18340_v31  ;;  %v6501_v55 = vmul.f32 %v6179_v45, %v18341_v24  ;;  %v6502_v60 = vmul.f32 %v6179_v45, %v18342_v19  ;;  %v6503_v35 = vmul.f32 %v6179_v45, %v18343_v46  ;;  %v18346_v18 = vld [vmem:[#allocation191_spill] sm:$0xff]  ;;  %v18347_v25 = vld [vmem:[#allocation192_spill] sm:$0xff]  ;;  %v18350_v19 = vld [vmem:[#allocation41_spill] sm:$0xff] }
 0x7c5   :  { %v6426_v22 = vmul.f32 %v6125_v2, %v18344_v27  ;;  %v6427_v49 = vmul.f32 %v6125_v2, %v18345_v23  ;;  %v6428_v0 = vmul.f32 %v6125_v2, %v18346_v18  ;;  %v6429_v8 = vmul.f32 %v6125_v2, %v18347_v25  ;;  %v18348_v1 = vld [vmem:[#allocation303_spill] sm:$0xff]  ;;  %v18349_v17 = vld [vmem:[#allocation304_spill] sm:$0xff]  ;;  %v18351_v46 = vld [vmem:[#allocation42_spill] sm:$0xff] }
 0x7c6   :  { %v6430_v11 = vmul.f32 %v6125_v2, %v18348_v1  ;;  %v6431_v4 = vmul.f32 %v6125_v2, %v18349_v17  ;;  %v6312_v45 = vmul.f32 %v6040_v39, %v18350_v19  ;;  %v6313_v27 = vmul.f32 %v6040_v39, %v18351_v46  ;;  %v18352_v2 = vld [vmem:[#allocation153_spill] sm:$0xff]  ;;  %v18355_v19 = vld [vmem:[#allocation266_spill] sm:$0xff] }
 0x7c7   :  { %v14712_v31 = vadd.f32 %v14567_v41, %v6426_v22  ;;  %v14715_v24 = vadd.f32 %v14569_v56, %v6427_v49  ;;  %v14720_v23 = vadd.f32 %v14573_v38, %v6428_v0  ;;  %v14723_v18 = vadd.f32 %v14575_v58, %v6429_v8  ;;  %v18353_v22 = vld [vmem:[#allocation154_spill] sm:$0xff]  ;;  %v18354_v25 = vld [vmem:[#allocation265_spill] sm:$0xff] }
 0x7c8   :  { %v14726_v1 = vadd.f32 %v14577_v5, %v6430_v11  ;;  %v14729_v41 = vadd.f32 %v14579_v14, %v6431_v4  ;;  %v6314_v56 = vmul.f32 %v6040_v39, %v18352_v2  ;;  %v6315_v49 = vmul.f32 %v6040_v39, %v18353_v22  ;;  %v18357_v0 = vld [vmem:[#allocation105_spill] sm:$0xff]  ;;  %v18358_v8 = vld [vmem:[#allocation106_spill] sm:$0xff]  ;;  %v6156_v14 = vpop.permute.xlu0 %6155 }
 0x7c9   :  { %v6316_v17 = vmul.f32 %v6040_v39, %v18354_v25  ;;  %v6317_v46 = vmul.f32 %v6040_v39, %v18355_v19  ;;  %v14736_v38 = vadd.f32 %v14544_v57, %v6312_v45  ;;  %v14739_v58 = vadd.f32 %v14547_v59, %v6313_v27  ;;  %v18360_v39 = vld [vmem:[#allocation217_spill] sm:$0xff]  ;;  %v18361_v45 = vld [vmem:[#allocation218_spill] sm:$0xff] }
 0x7ca   :  { %v6504_v5 = vmul.f32 %v6183_v32, %v18357_v0  ;;  %v6505_v11 = vmul.f32 %v6183_v32, %v18358_v8  ;;  %v14744_v4 = vadd.f32 %v14552_v33, %v6314_v56  ;;  %v14747_v2 = vadd.f32 %v14555_v7, %v6315_v49  ;;  %v18362_v25 = vld [vmem:[#allocation330_spill] sm:$0xff]  ;;  %v18363_v0 = vld [vmem:[#allocation331_spill] sm:$0xff]  ;;  %v18364_v7 = vld [vmem:[#allocation93_spill] sm:$0xff] }
 0x7cb   :  { %18356 = vst [vmem:[#allocation469_spill] sm:$0xff] %v14739_v58  ;;  %v14750_v22 = vadd.f32 %v14558_v36, %v6316_v17  ;;  %v14753_v57 = vadd.f32 %v14561_v52, %v6317_v46  ;;  %v6506_v59 = vmul.f32 %v6183_v32, %v18360_v39  ;;  %v6507_v27 = vmul.f32 %v6183_v32, %v18361_v45  ;;  %v18365_v49 = vld [vmem:[#allocation94_spill] sm:$0xff]  ;;  %v6098_v17 = vpop.permute.xlu1 %6097  ;;  %v18366_v45 = vld [vmem:[#allocation205_spill] sm:$0xff] }
 0x7cc   :  { %v6508_v19 = vmul.f32 %v6183_v32, %v18362_v25  ;;  %v6509_v8 = vmul.f32 %v6183_v32, %v18363_v0  ;;  %v14759_v58 = vadd.f32 %v6504_v5, %v6498_v28  ;;  %v14761_v33 = vadd.f32 %v6505_v11, %v6499_v48  ;;  %v18367_v32 = vld [vmem:[#allocation206_spill] sm:$0xff]  ;;  %v18368_v5 = vld [vmem:[#allocation317_spill] sm:$0xff] }
 0x7cd   :  { %18359 = vst [vmem:[#allocation437_spill] sm:$0xff] %v14750_v22  ;;  %v6468_v56 = vmul.f32 %v6156_v14, %v18364_v7  ;;  %v6469_v36 = vmul.f32 %v6156_v14, %v18365_v49  ;;  %v14765_v22 = vadd.f32 %v6506_v59, %v6500_v63  ;;  %v14767_v52 = vadd.f32 %v6507_v27, %v6501_v55  ;;  %v18369_v11 = vld [vmem:[#allocation318_spill] sm:$0xff]  ;;  %v18370_v55 = vld [vmem:[#allocation67_spill] sm:$0xff] }
 0x7ce   :  { %v14769_v46 = vadd.f32 %v6508_v19, %v6502_v60  ;;  %v14771_v39 = vadd.f32 %v6509_v8, %v6503_v35  ;;  %v6470_v25 = vmul.f32 %v6156_v14, %v18366_v45  ;;  %v6471_v28 = vmul.f32 %v6156_v14, %v18367_v32  ;;  %v18371_v60 = vld [vmem:[#allocation68_spill] sm:$0xff]  ;;  %v6013_v35 = vpop.permute.xlu0 %6012  ;;  %v18374_v45 = vld [vmem:[#allocation291_spill] sm:$0xff] }
 0x7cf   :  { %v6472_v48 = vmul.f32 %v6156_v14, %v18368_v5  ;;  %v6473_v0 = vmul.f32 %v6156_v14, %v18369_v11  ;;  %v14778_v7 = vadd.f32 %v14639_v61, %v6468_v56  ;;  %v14781_v63 = vadd.f32 %v14641_v42, %v6469_v36  ;;  %v8410_v42 = vld [vmem:[%s15666_s5 + $0x40] sm:$0xff]   ;;  %v18377_v11 = vld [vmem:[#allocation29_spill] sm:$0xff] }
 0x7d0   :  { %v6390_v59 = vmul.f32 %v6098_v17, %v18370_v55  ;;  %v6391_v27 = vmul.f32 %v6098_v17, %v18371_v60  ;;  %v14786_v19 = vadd.f32 %v14643_v51, %v6470_v25  ;;  %v14789_v8 = vadd.f32 %v14645_v54, %v6471_v28  ;;  %v8411_v14 = vld [vmem:[%s15666_s5] sm:$0xff]   ;;  %v18372_v54 = vld [vmem:[#allocation179_spill] sm:$0xff]  ;;  %v18378_v55 = vld [vmem:[#allocation30_spill] sm:$0xff]  ;;  %8043 = vmatprep.subr.bf16.mxu1 %v8410_v42 }
 0x7d1   :  { %v14792_v49 = vadd.f32 %v14649_v10, %v6472_v48  ;;  %v14795_v61 = vadd.f32 %v14651_v37, %v6473_v0  ;;  %v8412_v51 = vld [vmem:[%s15666_s5 + $0xc0] sm:$0xff]   ;;  %v6392_v56 = vmul.f32 %v6098_v17, %v18372_v54  ;;  %v6394_v25 = vmul.f32 %v6098_v17, %v18374_v45  ;;  %v5982_v54 = vpop.permute.xlu1 %5981  ;;  %8044 = vmatpush3.bf16.msra.mxu1 %v8411_v14  ;;  %v18382_v42 = vld [vmem:[#allocation254_spill] sm:$0xff] }
 0x7d2   :  { %v18373_v36 = vld [vmem:[#allocation180_spill] sm:$0xff]  ;;  %v14814_v5 = vadd.f32 %v14594_v16, %v6390_v59  ;;  %v14817_v48 = vadd.f32 %v14597_v50, %v6391_v27  ;;  %v6276_v0 = vmul.f32 %v6013_v35, %v18377_v11  ;;  %v6277_v60 = vmul.f32 %v6013_v35, %v18378_v55  ;;  %v18379_v50 = vld [vmem:[#allocation141_spill] sm:$0xff]  ;;  %v18380_v27 = vld [vmem:[#allocation142_spill] sm:$0xff]  ;;  %8065 = vmatprep.subr.bf16.mxu0 %v8412_v51  ;;  %v6129_v14 = vpop.permute.xlu0 %6128 }
 0x7d3   :  { %v6393_v10 = vmul.f32 %v6098_v17, %v18373_v36  ;;  %v18375_v37 = vld [vmem:[#allocation292_spill] sm:$0xff]  ;;  %v14822_v36 = vadd.f32 %v14600_v30, %v6392_v56  ;;  %v14828_v45 = vadd.f32 %v14606_v15, %v6394_v25  ;;  %v6278_v59 = vmul.f32 %v6013_v35, %v18379_v50  ;;  %v18381_v11 = vld [vmem:[#allocation253_spill] sm:$0xff]  ;;  %v18383_v15 = vld [vmem:[#allocation15_spill] sm:$0xff] }
 0x7d4   :  { %v6395_v32 = vmul.f32 %v6098_v17, %v18375_v37  ;;  %v8413_v28 = vld [vmem:[%s15666_s5 + $0x80] sm:$0xff]   ;;  %18376 = vst [vmem:[#allocation387_spill] sm:$0xff] %v14817_v48  ;;  %v6279_v37 = vmul.f32 %v6013_v35, %v18380_v27  ;;  %v6280_v55 = vmul.f32 %v6013_v35, %v18381_v11  ;;  %v6281_v48 = vmul.f32 %v6013_v35, %v18382_v42  ;;  %v18387_v50 = vld [vmem:[#allocation239_spill] sm:$0xff]  ;;  %v18390_v42 = vld [vmem:[#allocation82_spill] sm:$0xff] }
 0x7d5   :  { %v14825_v17 = vadd.f32 %v14603_v62, %v6393_v10  ;;  %v14838_v30 = vadd.f32 %v14682_v26, %v6276_v0  ;;  %v14841_v62 = vadd.f32 %v14685_v20, %v6277_v60  ;;  %v6234_v56 = vmul.f32 %v5982_v54, %v18383_v15  ;;  %8066 = vmatpush3.bf16.msra.mxu0 %v8413_v28  ;;  %v18385_v20 = vld [vmem:[#allocation127_spill] sm:$0xff]  ;;  %v18386_v0 = vld [vmem:[#allocation128_spill] sm:$0xff] }
 0x7d6   :  { %v14831_v16 = vadd.f32 %v14609_v34, %v6395_v32  ;;  %v18384_v34 = vld [vmem:[#allocation16_spill] sm:$0xff]  ;;  %v14846_v25 = vadd.f32 %v14688_v13, %v6278_v59  ;;  %v14849_v32 = vadd.f32 %v14691_v40, %v6279_v37  ;;  %v14852_v35 = vadd.f32 %v14696_v6, %v6280_v55  ;;  %v18389_v40 = vld [vmem:[#allocation81_spill] sm:$0xff]  ;;  %v6071_v55 = vpop.permute.xlu1 %6070 }
 0x7d7   :  { %v6235_v10 = vmul.f32 %v5982_v54, %v18384_v34  ;;  %v14855_v26 = vadd.f32 %v14699_v47, %v6281_v48  ;;  %v6236_v51 = vmul.f32 %v5982_v54, %v18385_v20  ;;  %v6237_v60 = vmul.f32 %v5982_v54, %v18386_v0  ;;  %v18388_v11 = vld [vmem:[#allocation240_spill] sm:$0xff]  ;;  %v18391_v34 = vld [vmem:[#allocation446_spill] sm:$0xff]  ;;  %v18392_v0 = vld [vmem:[#allocation193_spill] sm:$0xff] }
 0x7d8   :  { %v6238_v27 = vmul.f32 %v5982_v54, %v18387_v50  ;;  %v6239_v28 = vmul.f32 %v5982_v54, %v18388_v11  ;;  %v6544_v13 = vadd.f32 %v14616_v21, %v6234_v56  ;;  %v6432_v37 = vmul.f32 %v6129_v14, %v18389_v40  ;;  %v18393_v54 = vld [vmem:[#allocation194_spill] sm:$0xff]  ;;  %v18394_v21 = vld [vmem:[#allocation305_spill] sm:$0xff] }
 0x7d9   :  { %v6557_v59 = vadd.f32 %v14619_v53, %v6235_v10  ;;  %v6433_v6 = vmul.f32 %v6129_v14, %v18390_v42  ;;  %v6570_v47 = vadd.f32 %v14622_v29, %v6236_v51  ;;  %v6583_v48 = vadd.f32 %v14625_v12, %v6237_v60  ;;  %v18395_v53 = vld [vmem:[#allocation306_spill] sm:$0xff]  ;;  %v18398_v29 = vld [vmem:[#allocation55_spill] sm:$0xff]  ;;  %v18399_v51 = vld [vmem:[#allocation56_spill] sm:$0xff]  ;;  %v5986_v60 = vpop.permute.xlu0 %5985 }
 0x7da   :  { %v6596_v15 = vadd.f32 %v14630_v44, %v6238_v27  ;;  %v6609_v20 = vadd.f32 %v18391_v34, %v6239_v28  ;;  %v6434_v50 = vmul.f32 %v6129_v14, %v18392_v0  ;;  %v6435_v11 = vmul.f32 %v6129_v14, %v18393_v54  ;;  %v8414_v27 = vld [vmem:[%s15666_s5 + $0x48] sm:$0xff]   ;;  %v18404_v0 = vld [vmem:[#allocation167_spill] sm:$0xff] }
 0x7db   :  { %v6436_v56 = vmul.f32 %v6129_v14, %v18394_v21  ;;  %v6437_v10 = vmul.f32 %v6129_v14, %v18395_v53  ;;  %v14874_v40 = vadd.f32 %v14712_v31, %v6432_v37  ;;  %v14877_v42 = vadd.f32 %v14715_v24, %v6433_v6  ;;  %v8415_v28 = vld [vmem:[%s15666_s5 + $0x8] sm:$0xff]   ;;  %v18405_v21 = vld [vmem:[#allocation168_spill] sm:$0xff]  ;;  %8045 = vmatprep.subr.bf16.mxu1 %v8414_v27 }
 0x7dc   :  { %v6354_v12 = vmul.f32 %v6071_v55, %v18398_v29  ;;  %v6355_v44 = vmul.f32 %v6071_v55, %v18399_v51  ;;  %v8416_v31 = vld [vmem:[%s15666_s5 + $0xc8] sm:$0xff]   ;;  %v14891_v24 = vadd.f32 %v14720_v23, %v6434_v50  ;;  %v14894_v14 = vadd.f32 %v14723_v18, %v6435_v11  ;;  %v18406_v29 = vld [vmem:[#allocation279_spill] sm:$0xff]  ;;  %v18407_v50 = vld [vmem:[#allocation280_spill] sm:$0xff]  ;;  %8046 = vmatpush3.bf16.msra.mxu1 %v8415_v28 }
 0x7dd   :  { %18396 = vst [vmem:[#allocation381_spill] sm:$0xff] %v14874_v40  ;;  %18397 = vst [vmem:[#allocation461_spill] sm:$0xff] %v14877_v42  ;;  %v14897_v37 = vadd.f32 %v14726_v1, %v6436_v56  ;;  %v14900_v6 = vadd.f32 %v14729_v41, %v6437_v10  ;;  %v8417_v34 = vld [vmem:[%s15666_s5 + $0x88] sm:$0xff]   ;;  %v6356_v54 = vmul.f32 %v6071_v55, %v18404_v0  ;;  %v18409_v56 = vld [vmem:[#allocation18_spill] sm:$0xff]  ;;  %8067 = vmatprep.subr.bf16.mxu0 %v8416_v31 }
 0x7de   :  { %18400 = vst [vmem:[#allocation379_spill] sm:$0xff] %v14891_v24  ;;  %18401 = vst [vmem:[#allocation459_spill] sm:$0xff] %v14894_v14  ;;  %v6357_v53 = vmul.f32 %v6071_v55, %v18405_v21  ;;  %v6358_v23 = vmul.f32 %v6071_v55, %v18406_v29  ;;  %v6359_v51 = vmul.f32 %v6071_v55, %v18407_v50  ;;  %v18408_v41 = vld [vmem:[#allocation17_spill] sm:$0xff]  ;;  %v18411_v55 = vld [vmem:[#allocation448_spill] sm:$0xff]  ;;  %8068 = vmatpush3.bf16.msra.mxu0 %v8417_v34 }
 0x7df   :  { %18402 = vst [vmem:[#allocation466_spill] sm:$0xff] %v14897_v37  ;;  %18403 = vst [vmem:[#allocation370_spill] sm:$0xff] %v14900_v6  ;;  %v14910_v18 = vadd.f32 %v14658_v43, %v6354_v12  ;;  %v14913_v1 = vadd.f32 %v14661_v9, %v6355_v44  ;;  %v6240_v11 = vmul.f32 %v5986_v60, %v18408_v41  ;;  %v6187_v6 = vpop.permute.xlu1 %6186  ;;  %v18410_v21 = vld [vmem:[#allocation465_spill] sm:$0xff]  ;;  %v18412_v43 = vld [vmem:[#allocation474_spill] sm:$0xff] }
 0x7e0   :  { %v6241_v10 = vmul.f32 %v5986_v60, %v18409_v56  ;;  %v14918_v0 = vadd.f32 %v14664_v3, %v6356_v54  ;;  %v14921_v29 = vadd.f32 %v18410_v21, %v6357_v53  ;;  %v14924_v27 = vadd.f32 %v18411_v55, %v6358_v23  ;;  %v18413_v9 = vld [vmem:[#allocation129_spill] sm:$0xff]  ;;  %v18414_v50 = vld [vmem:[#allocation130_spill] sm:$0xff]  ;;  %v18417_v53 = vld [vmem:[#allocation107_spill] sm:$0xff] }
 0x7e1   :  { %v14927_v12 = vadd.f32 %v18412_v43, %v6359_v51  ;;  %v6242_v44 = vmul.f32 %v5986_v60, %v18413_v9  ;;  %v6243_v41 = vmul.f32 %v5986_v60, %v18414_v50  ;;  %v18415_v56 = vld [vmem:[#allocation241_spill] sm:$0xff]  ;;  %v18416_v28 = vld [vmem:[#allocation242_spill] sm:$0xff]  ;;  %v6545_v3 = vsel %vm534_vm0, %v6240_v11, 0.0  ;;  %v18418_v21 = vld [vmem:[#allocation108_spill] sm:$0xff] }
 0x7e2   :  { %v6244_v37 = vmul.f32 %v5986_v60, %v18415_v56  ;;  %v6245_v14 = vmul.f32 %v5986_v60, %v18416_v28  ;;  %v6558_v54 = vsel %vm534_vm0, %v6241_v10, 0.0  ;;  %v6510_v23 = vmul.f32 %v6187_v6, %v18417_v53  ;;  %v18419_v40 = vld [vmem:[#allocation219_spill] sm:$0xff] }
 0x7e3   :  { %v6511_v55 = vmul.f32 %v6187_v6, %v18418_v21  ;;  %v6546_v51 = vadd.f32 %v6545_v3, %v6544_v13  ;;  %v6559_v43 = vadd.f32 %v6558_v54, %v6557_v59  ;;  %v6571_v31 = vsel %vm534_vm0, %v6242_v44, 0.0  ;;  %v18420_v13 = vld [vmem:[#allocation220_spill] sm:$0xff]  ;;  %v8418_v44 = vld [vmem:[%s15666_s5 + $0x50] sm:$0xff]  }
 0x7e4   :  { %v6584_v9 = vsel %vm534_vm0, %v6243_v41, 0.0  ;;  %v6572_v50 = vadd.f32 %v6571_v31, %v6570_v47  ;;  %v6597_v56 = vsel %vm534_vm0, %v6244_v37, 0.0  ;;  %v6610_v60 = vsel %vm534_vm0, %v6245_v14, 0.0  ;;  %v8419_v47 = vld [vmem:[%s15666_s5 + $0x10] sm:$0xff]   ;;  %v8422_v41 = vld [vmem:[%s15666_s5 + $0x58] sm:$0xff]   ;;  %v18421_v31 = vld [vmem:[#allocation332_spill] sm:$0xff]  ;;  %8047 = vmatprep.subr.bf16.mxu1 %v8418_v44 }
 0x7e5   :  { %v6585_v24 = vadd.f32 %v6584_v9, %v6583_v48  ;;  %v6547_v34 = vrot.slane %v6546_v51, 4  ;;  %v6560_v11 = vrot.slane %v6559_v43, 4  ;;  %v6598_v28 = vadd.f32 %v6597_v56, %v6596_v15  ;;  %v8420_v48 = vld [vmem:[%s15666_s5 + $0xd0] sm:$0xff]   ;;  %v18422_v56 = vld [vmem:[#allocation333_spill] sm:$0xff]  ;;  %8048 = vmatpush3.bf16.msra.mxu1 %v8419_v47 }
 0x7e6   :  { %v6611_v10 = vadd.f32 %v6610_v60, %v6609_v20  ;;  %v6573_v42 = vrot.slane %v6572_v50, 4  ;;  %v6512_v21 = vmul.f32 %v6187_v6, %v18419_v40  ;;  %v6513_v59 = vmul.f32 %v6187_v6, %v18420_v13  ;;  %v8421_v40 = vld [vmem:[%s15666_s5 + $0x90] sm:$0xff]   ;;  %8069 = vmatprep.subr.bf16.mxu0 %v8420_v48  ;;  %8049 = vmatprep.subr.bf16.mxu1 %v8422_v41 }
 0x7e7   :  { %v6586_v53 = vrot.slane %v6585_v24, 4  ;;  %v6548_v15 = vadd.f32 %v6547_v34, %v6546_v51  ;;  %v6561_v20 = vadd.f32 %v6560_v11, %v6559_v43  ;;  %v6599_v14 = vrot.slane %v6598_v28, 4  ;;  %v8424_v51 = vld [vmem:[%s15666_s5 + $0xd8] sm:$0xff]   ;;  %8070 = vmatpush3.bf16.msra.mxu0 %v8421_v40 }
 0x7e8   :  { %v6612_v37 = vrot.slane %v6611_v10, 4  ;;  %v6574_v3 = vadd.f32 %v6573_v42, %v6572_v50  ;;  %v6514_v9 = vmul.f32 %v6187_v6, %v18421_v31  ;;  %v6515_v60 = vmul.f32 %v6187_v6, %v18422_v56  ;;  %v8423_v42 = vld [vmem:[%s15666_s5 + $0x18] sm:$0xff]   ;;  %8071 = vmatprep.subr.bf16.mxu0 %v8424_v51  ;;  %v8427_v56 = vld [vmem:[%s15666_s5 + $0x20] sm:$0xff]  }
 0x7e9   :  { %v6587_v54 = vadd.f32 %v6586_v53, %v6585_v24  ;;  %v6549_v43 = vrot.slane %v6548_v15, 2  ;;  %v6562_v34 = vrot.slane %v6561_v20, 2  ;;  %v6600_v11 = vadd.f32 %v6599_v14, %v6598_v28  ;;  %v8425_v28 = vld [vmem:[%s15666_s5 + $0x98] sm:$0xff]   ;;  %8050 = vmatpush3.bf16.msra.mxu1 %v8423_v42 }
 0x7ea   :  { %v6613_v13 = vadd.f32 %v6612_v37, %v6611_v10  ;;  %v6575_v24 = vrot.slane %v6574_v3, 2  ;;  %v14967_v53 = vadd.f32 %v14759_v58, %v6510_v23  ;;  %v14970_v6 = vadd.f32 %v14761_v33, %v6511_v55  ;;  %v8426_v10 = vld [vmem:[%s15666_s5 + $0x60] sm:$0xff]  }
 0x7eb   :  { %v6588_v50 = vrot.slane %v6587_v54, 2  ;;  %v6550_v44 = vadd.f32 %v6549_v43, %v6548_v15  ;;  %v6563_v47 = vadd.f32 %v6562_v34, %v6561_v20  ;;  %v6601_v48 = vrot.slane %v6600_v11, 2  ;;  %v8428_v58 = vld [vmem:[%s15666_s5 + $0xe0] sm:$0xff]   ;;  %v6044_v20 = vpop.permute.xlu0 %6043  ;;  %8072 = vmatpush3.bf16.msra.mxu0 %v8425_v28  ;;  %8051 = vmatprep.subr.bf16.mxu1 %v8426_v10 }
 0x7ec   :  { %v6614_v14 = vrot.slane %v6613_v13, 2  ;;  %v6576_v33 = vadd.f32 %v6575_v24, %v6574_v3  ;;  %v14982_v55 = vadd.f32 %v14765_v22, %v6512_v21  ;;  %v14985_v37 = vadd.f32 %v14767_v52, %v6513_v59  ;;  %v8429_v52 = vld [vmem:[%s15666_s5 + $0xa0] sm:$0xff]   ;;  %8073 = vmatprep.subr.bf16.mxu0 %v8428_v58  ;;  %v6017_v24 = vpop.permute.xlu1 %6016  ;;  %v8431_v58 = vld [vmem:[%s15666_s5 + $0x28] sm:$0xff]  }
 0x7ed   :  { %v6589_v23 = vadd.f32 %v6588_v50, %v6587_v54  ;;  %v6551_v40 = vrot.slane %v6550_v44, 1  ;;  %v6564_v41 = vrot.slane %v6563_v47, 1  ;;  %v6602_v31 = vadd.f32 %v6601_v48, %v6600_v11  ;;  %v8432_v50 = vld [vmem:[%s15666_s5 + $0xe8] sm:$0xff]   ;;  %v18432_v48 = vld [vmem:[#allocation156_spill] sm:$0xff]  ;;  %8052 = vmatpush3.bf16.msra.mxu1 %v8427_v56  ;;  %v8434_v56 = vld [vmem:[%s15666_s5 + $0x70] sm:$0xff]  }
 0x7ee   :  { %v6615_v15 = vadd.f32 %v6614_v14, %v6613_v13  ;;  %v6577_v51 = vrot.slane %v6576_v33, 1  ;;  %v14991_v3 = vadd.f32 %v14769_v46, %v6514_v9  ;;  %v14994_v22 = vadd.f32 %v14771_v39, %v6515_v60  ;;  %v8430_v46 = vld [vmem:[%s15666_s5 + $0x68] sm:$0xff]   ;;  %v18427_v60 = vld [vmem:[#allocation43_spill] sm:$0xff]  ;;  %v18428_v13 = vld [vmem:[#allocation44_spill] sm:$0xff] }
 0x7ef   :  { %v6590_v43 = vrot.slane %v6589_v23, 1  ;;  %v14999_v21 = vadd.f32 %v6551_v40, %v6550_v44  ;;  %v15001_v59 = vadd.f32 %v6564_v41, %v6563_v47  ;;  %v6603_v54 = vrot.slane %v6602_v31, 1  ;;  %v18431_v44 = vld [vmem:[#allocation155_spill] sm:$0xff]  ;;  %v18434_v40 = vld [vmem:[#allocation268_spill] sm:$0xff]  ;;  %8074 = vmatpush3.bf16.msra.mxu0 %v8429_v52  ;;  %8053 = vmatprep.subr.bf16.mxu1 %v8430_v46  ;;  %v8436_v52 = vld [vmem:[%s15666_s5 + $0xf0] sm:$0xff]  }
 0x7f0   :  { %v6616_v34 = vrot.slane %v6615_v15, 1  ;;  %v15006_v9 = vadd.f32 %v6577_v51, %v6576_v33  ;;  %v6318_v11 = vmul.f32 %v6044_v20, %v18427_v60  ;;  %v6319_v42 = vmul.f32 %v6044_v20, %v18428_v13  ;;  %v18433_v33 = vld [vmem:[#allocation267_spill] sm:$0xff]  ;;  %v18437_v60 = vld [vmem:[#allocation32_spill] sm:$0xff]  ;;  %v18438_v13 = vld [vmem:[#allocation437_spill] sm:$0xff]  ;;  %8075 = vmatprep.subr.bf16.mxu0 %v8432_v50 }
 0x7f1   :  { %18423 = vst [vmem:[#allocation467_spill] sm:$0xff] %v14999_v21  ;;  %18424 = vst [vmem:[#allocation369_spill] sm:$0xff] %v15001_v59  ;;  %v15008_v39 = vadd.f32 %v6590_v43, %v6589_v23  ;;  %v15015_v28 = vadd.f32 %v6603_v54, %v6602_v31  ;;  %v6320_v47 = vmul.f32 %v6044_v20, %v18431_v44  ;;  %v18435_v31 = vld [vmem:[#allocation469_spill] sm:$0xff]  ;;  %8054 = vmatpush3.bf16.msra.mxu1 %v8431_v58  ;;  %v8438_v58 = vld [vmem:[%s15666_s5 + $0x78] sm:$0xff]  }
 0x7f2   :  { %18425 = vst [vmem:[#allocation462_spill] sm:$0xff] %v15006_v9  ;;  %v15017_v10 = vadd.f32 %v6616_v34, %v6615_v15  ;;  %v6321_v14 = vmul.f32 %v6044_v20, %v18432_v48  ;;  %v6322_v23 = vmul.f32 %v6044_v20, %v18433_v33  ;;  %v6323_v41 = vmul.f32 %v6044_v20, %v18434_v40  ;;  %v8433_v15 = vld [vmem:[%s15666_s5 + $0xa8] sm:$0xff]   ;;  %v18440_v48 = vld [vmem:[#allocation144_spill] sm:$0xff] }
 0x7f3   :  { %18426 = vst [vmem:[#allocation470_spill] sm:$0xff] %v15008_v39  ;;  %18429 = vst [vmem:[#allocation416_spill] sm:$0xff] %v15015_v28  ;;  %v15027_v51 = vadd.f32 %v14736_v38, %v6318_v11  ;;  %v15030_v43 = vadd.f32 %v18435_v31, %v6319_v42  ;;  %v15039_v54 = vadd.f32 %v14744_v4, %v6320_v47  ;;  %v18436_v38 = vld [vmem:[#allocation31_spill] sm:$0xff]  ;;  %v18442_v40 = vld [vmem:[#allocation256_spill] sm:$0xff]  ;;  %8076 = vmatpush3.bf16.msra.mxu0 %v8433_v15 }
 0x7f4   :  { %18430 = vst [vmem:[#allocation388_spill] sm:$0xff] %v15017_v10  ;;  %v15042_v20 = vadd.f32 %v14747_v2, %v6321_v14  ;;  %v6282_v34 = vmul.f32 %v6017_v24, %v18436_v38  ;;  %v6283_v11 = vmul.f32 %v6017_v24, %v18437_v60  ;;  %v15050_v42 = vadd.f32 %v18438_v13, %v6322_v23  ;;  %v18439_v4 = vld [vmem:[#allocation143_spill] sm:$0xff]  ;;  %v8435_v23 = vld [vmem:[%s15666_s5 + $0x30] sm:$0xff]   ;;  %v6160_v13 = vpop.permute.xlu0 %6159  ;;  %v18448_v9 = vld [vmem:[#allocation320_spill] sm:$0xff] }
 0x7f5   :  { %v15053_v44 = vadd.f32 %v14753_v57, %v6323_v41  ;;  %v6284_v47 = vmul.f32 %v6017_v24, %v18439_v4  ;;  %v6285_v2 = vmul.f32 %v6017_v24, %v18440_v48  ;;  %v18441_v14 = vld [vmem:[#allocation255_spill] sm:$0xff]  ;;  %v6287_v31 = vmul.f32 %v6017_v24, %v18442_v40  ;;  %8055 = vmatprep.subr.bf16.mxu1 %v8434_v56 }
 0x7f6   :  { %v6286_v33 = vmul.f32 %v6017_v24, %v18441_v14  ;;  %v6623_v46 = vsel %vm534_vm0, %v6282_v34, 0.0  ;;  %v6636_v38 = vsel %vm534_vm0, %v6283_v11, 0.0  ;;  %v8437_v24 = vld [vmem:[%s15666_s5 + $0xb0] sm:$0xff]   ;;  %8077 = vmatprep.subr.bf16.mxu0 %v8436_v52  ;;  %v8440_v15 = vld [vmem:[%s15666_s5 + $0xf8] sm:$0xff]   ;;  %8056 = vmatpush3.bf16.msra.mxu1 %v8435_v23  ;;  %v6479_v21 = vmul.f32 %v6160_v13, %v18448_v9  ;;  %v6102_v9 = vpop.permute.xlu1 %6101 }
 0x7f7   :  { %v6624_v57 = vadd.f32 %v6623_v46, %v14838_v30  ;;  %v6637_v41 = vadd.f32 %v6636_v38, %v14841_v62  ;;  %v6649_v60 = vsel %vm534_vm0, %v6284_v47, 0.0  ;;  %v6662_v50 = vsel %vm534_vm0, %v6285_v2, 0.0  ;;  %v8439_v52 = vld [vmem:[%s15666_s5 + $0x38] sm:$0xff]   ;;  %8078 = vmatpush3.bf16.msra.mxu0 %v8437_v24  ;;  %8057 = vmatprep.subr.bf16.mxu1 %v8438_v58 }
 0x7f8   :  { %v6650_v34 = vadd.f32 %v6649_v60, %v14846_v25  ;;  %v6663_v30 = vadd.f32 %v6662_v50, %v14849_v32  ;;  %v6675_v62 = vsel %vm534_vm0, %v6286_v33, 0.0  ;;  %v6688_v11 = vsel %vm534_vm0, %v6287_v31, 0.0  ;;  %v18443_v25 = vld [vmem:[#allocation95_spill] sm:$0xff]  ;;  %v18444_v32 = vld [vmem:[#allocation96_spill] sm:$0xff]  ;;  %8079 = vmatprep.subr.bf16.mxu0 %v8440_v15 }
 0x7f9   :  { %v6625_v56 = vrot.slane %v6624_v57, 4  ;;  %v6638_v4 = vrot.slane %v6637_v41, 4  ;;  %v6676_v47 = vadd.f32 %v6675_v62, %v14852_v35  ;;  %v6689_v48 = vadd.f32 %v6688_v11, %v14855_v26  ;;  %v8441_v35 = vld [vmem:[%s15666_s5 + $0xb8] sm:$0xff]   ;;  %v8442_v26 = vld [vmem:[%s15666_s5 + $0x140] sm:$0xff]  }
 0x7fa   :  { %v6651_v2 = vrot.slane %v6650_v34, 4  ;;  %v6664_v14 = vrot.slane %v6663_v30, 4  ;;  %v6474_v40 = vmul.f32 %v6160_v13, %v18443_v25  ;;  %v6475_v46 = vmul.f32 %v6160_v13, %v18444_v32  ;;  %v18445_v62 = vld [vmem:[#allocation207_spill] sm:$0xff]  ;;  %v18446_v25 = vld [vmem:[#allocation208_spill] sm:$0xff]  ;;  %8058 = vmatpush3.bf16.msra.mxu1 %v8439_v52 }
 0x7fb   :  { %v6626_v33 = vadd.f32 %v6625_v56, %v6624_v57  ;;  %v6639_v31 = vadd.f32 %v6638_v4, %v6637_v41  ;;  %v6677_v38 = vrot.slane %v6676_v47, 4  ;;  %v6690_v60 = vrot.slane %v6689_v48, 4  ;;  %v18447_v28 = vld [vmem:[#allocation319_spill] sm:$0xff]  ;;  %8080 = vmatpush3.bf16.msra.mxu0 %v8441_v35  ;;  %8087 = vmatprep.subr.bf16.mxu1 %v8442_v26 }
 0x7fc   :  { %v6652_v50 = vadd.f32 %v6651_v2, %v6650_v34  ;;  %v6665_v23 = vadd.f32 %v6664_v14, %v6663_v30  ;;  %v6476_v11 = vmul.f32 %v6160_v13, %v18445_v62  ;;  %v6477_v32 = vmul.f32 %v6160_v13, %v18446_v25 }
 0x7fd   :  { %v6627_v57 = vrot.slane %v6626_v33, 2  ;;  %v6640_v41 = vrot.slane %v6639_v31, 2  ;;  %v6678_v56 = vadd.f32 %v6677_v38, %v6676_v47  ;;  %v6691_v24 = vadd.f32 %v6690_v60, %v6689_v48 }
 0x7fe   :  { %v6653_v58 = vrot.slane %v6652_v50, 2  ;;  %v6666_v4 = vrot.slane %v6665_v23, 2  ;;  %v6478_v10 = vmul.f32 %v6160_v13, %v18447_v28  ;;  %v15099_v15 = vadd.f32 %v14778_v7, %v6474_v40 }
 0x7ff   :  { %v6628_v39 = vadd.f32 %v6627_v57, %v6626_v33  ;;  %v6641_v59 = vadd.f32 %v6640_v41, %v6639_v31  ;;  %v6679_v34 = vrot.slane %v6678_v56, 2  ;;  %v6692_v30 = vrot.slane %v6691_v24, 2  ;;  %v18454_v41 = vld [vmem:[#allocation182_spill] sm:$0xff] }
 0x800   :  { %v6654_v2 = vadd.f32 %v6653_v58, %v6652_v50  ;;  %v6667_v14 = vadd.f32 %v6666_v4, %v6665_v23  ;;  %v15102_v47 = vadd.f32 %v14781_v63, %v6475_v46  ;;  %v15105_v33 = vadd.f32 %v14786_v19, %v6476_v11  ;;  %v6075_v19 = vpop.permute.xlu0 %6074  ;;  %v18452_v11 = vld [vmem:[#allocation70_spill] sm:$0xff] }
 0x801   :  { %v6629_v48 = vrot.slane %v6628_v39, 1  ;;  %v6642_v38 = vrot.slane %v6641_v59, 1  ;;  %v6680_v28 = vadd.f32 %v6679_v34, %v6678_v56  ;;  %v6693_v60 = vadd.f32 %v6692_v30, %v6691_v24  ;;  %v18455_v24 = vld [vmem:[#allocation293_spill] sm:$0xff] }
 0x802   :  { %v6655_v13 = vrot.slane %v6654_v2, 1  ;;  %v6668_v52 = vrot.slane %v6667_v14, 1  ;;  %v15108_v31 = vadd.f32 %v14789_v8, %v6477_v32  ;;  %v15119_v50 = vadd.f32 %v14792_v49, %v6478_v10  ;;  %v18453_v32 = vld [vmem:[#allocation181_spill] sm:$0xff]  ;;  %v18456_v49 = vld [vmem:[#allocation294_spill] sm:$0xff] }
 0x803   :  { %v15110_v35 = vadd.f32 %v6629_v48, %v6628_v39  ;;  %v15112_v7 = vadd.f32 %v6642_v38, %v6641_v59  ;;  %v6681_v40 = vrot.slane %v6680_v28, 1  ;;  %v6694_v63 = vrot.slane %v6693_v60, 1  ;;  %v18451_v39 = vld [vmem:[#allocation69_spill] sm:$0xff]  ;;  %v6048_v48 = vpop.permute.xlu1 %6047 }
 0x804   :  { %v15114_v46 = vadd.f32 %v6655_v13, %v6654_v2  ;;  %v15116_v26 = vadd.f32 %v6668_v52, %v6667_v14  ;;  %v15122_v23 = vadd.f32 %v14795_v61, %v6479_v21  ;;  %v6396_v59 = vmul.f32 %v6102_v9, %v18451_v39  ;;  %v18457_v21 = vld [vmem:[#allocation387_spill] sm:$0xff]  ;;  %v18458_v34 = vld [vmem:[#allocation57_spill] sm:$0xff]  ;;  %v18459_v2 = vld [vmem:[#allocation58_spill] sm:$0xff] }
 0x805   :  { %v15124_v62 = vadd.f32 %v6681_v40, %v6680_v28  ;;  %v15126_v8 = vadd.f32 %v6694_v63, %v6693_v60  ;;  %v6397_v25 = vmul.f32 %v6102_v9, %v18452_v11  ;;  %v6398_v57 = vmul.f32 %v6102_v9, %v18453_v32  ;;  %v18461_v52 = vld [vmem:[#allocation170_spill] sm:$0xff]  ;;  %v18462_v63 = vld [vmem:[#allocation281_spill] sm:$0xff] }
 0x806   :  { %v6399_v56 = vmul.f32 %v6102_v9, %v18454_v41  ;;  %v6400_v58 = vmul.f32 %v6102_v9, %v18455_v24  ;;  %v6401_v10 = vmul.f32 %v6102_v9, %v18456_v49  ;;  %v15135_v61 = vadd.f32 %v14814_v5, %v6396_v59  ;;  %v18460_v9 = vld [vmem:[#allocation169_spill] sm:$0xff]  ;;  %v18463_v59 = vld [vmem:[#allocation282_spill] sm:$0xff] }
 0x807   :  { %18449 = vst [vmem:[#allocation477_spill] sm:$0xff] %v15124_v62  ;;  %18450 = vst [vmem:[#allocation475_spill] sm:$0xff] %v15126_v8  ;;  %v15138_v4 = vadd.f32 %v18457_v21, %v6397_v25  ;;  %v6360_v30 = vmul.f32 %v6075_v19, %v18458_v34  ;;  %v6361_v14 = vmul.f32 %v6075_v19, %v18459_v2  ;;  %v18464_v25 = vld [vmem:[#allocation45_spill] sm:$0xff]  ;;  %v18465_v32 = vld [vmem:[#allocation46_spill] sm:$0xff] }
 0x808   :  { %v15143_v38 = vadd.f32 %v14822_v36, %v6398_v57  ;;  %v15146_v28 = vadd.f32 %v14825_v17, %v6399_v56  ;;  %v15149_v60 = vadd.f32 %v14828_v45, %v6400_v58  ;;  %v15152_v5 = vadd.f32 %v14831_v16, %v6401_v10  ;;  %v6191_v16 = vpop.permute.xlu0 %6190  ;;  %v18467_v58 = vld [vmem:[#allocation158_spill] sm:$0xff]  ;;  %v18468_v10 = vld [vmem:[#allocation269_spill] sm:$0xff] }
 0x809   :  { %v6362_v13 = vmul.f32 %v6075_v19, %v18460_v9  ;;  %v6363_v40 = vmul.f32 %v6075_v19, %v18461_v52  ;;  %v6364_v39 = vmul.f32 %v6075_v19, %v18462_v63  ;;  %v6365_v11 = vmul.f32 %v6075_v19, %v18463_v59  ;;  %v18466_v19 = vld [vmem:[#allocation157_spill] sm:$0xff]  ;;  %v18469_v34 = vld [vmem:[#allocation270_spill] sm:$0xff] }
 0x80a   :  { %v15159_v36 = vadd.f32 %v14910_v18, %v6360_v30  ;;  %v15162_v17 = vadd.f32 %v14913_v1, %v6361_v14  ;;  %v6324_v45 = vmul.f32 %v6048_v48, %v18464_v25  ;;  %v6325_v57 = vmul.f32 %v6048_v48, %v18465_v32  ;;  %v18471_v9 = vld [vmem:[#allocation110_spill] sm:$0xff]  ;;  %v18507_v8 = vld [vmem:[#allocation297_spill] sm:$0xff] }
 0x80b   :  { %v15167_v41 = vadd.f32 %v14918_v0, %v6362_v13  ;;  %v15170_v56 = vadd.f32 %v14921_v29, %v6363_v40  ;;  %v15173_v24 = vadd.f32 %v14924_v27, %v6364_v39  ;;  %v15176_v18 = vadd.f32 %v14927_v12, %v6365_v11  ;;  %v18470_v29 = vld [vmem:[#allocation109_spill] sm:$0xff] }
 0x80c   :  { %v6326_v1 = vmul.f32 %v6048_v48, %v18466_v19  ;;  %v6327_v49 = vmul.f32 %v6048_v48, %v18467_v58  ;;  %v6328_v21 = vmul.f32 %v6048_v48, %v18468_v10  ;;  %v6329_v30 = vmul.f32 %v6048_v48, %v18469_v34 }
 0x80d   :  { %v6701_v0 = vsel %vm534_vm0, %v6324_v45, 0.0  ;;  %v6714_v2 = vsel %vm534_vm0, %v6325_v57, 0.0  ;;  %v6516_v14 = vmul.f32 %v6191_v16, %v18470_v29  ;;  %v6517_v27 = vmul.f32 %v6191_v16, %v18471_v9  ;;  %v18472_v57 = vld [vmem:[#allocation221_spill] sm:$0xff] }
 0x80e   :  { %v6702_v13 = vadd.f32 %v6701_v0, %v15027_v51  ;;  %v6715_v12 = vadd.f32 %v6714_v2, %v15030_v43  ;;  %v6727_v52 = vsel %vm534_vm0, %v6326_v1, 0.0  ;;  %v6740_v40 = vsel %vm534_vm0, %v6327_v49, 0.0  ;;  %v18473_v1 = vld [vmem:[#allocation222_spill] sm:$0xff]  ;;  %v18475_v2 = vld [vmem:[#allocation335_spill] sm:$0xff] }
 0x80f   :  { %v6728_v63 = vadd.f32 %v6727_v52, %v15039_v54  ;;  %v6741_v48 = vadd.f32 %v6740_v40, %v15042_v20  ;;  %v6753_v39 = vsel %vm534_vm0, %v6328_v21, 0.0  ;;  %v6766_v59 = vsel %vm534_vm0, %v6329_v30, 0.0  ;;  %v18474_v0 = vld [vmem:[#allocation334_spill] sm:$0xff] }
 0x810   :  { %v6703_v11 = vrot.slane %v6702_v13, 4  ;;  %v6716_v25 = vrot.slane %v6715_v12, 4  ;;  %v6754_v45 = vadd.f32 %v6753_v39, %v15050_v42  ;;  %v6767_v51 = vadd.f32 %v6766_v59, %v15053_v44 }
 0x811   :  { %v6729_v32 = vrot.slane %v6728_v63, 4  ;;  %v6742_v43 = vrot.slane %v6741_v48, 4  ;;  %v6518_v19 = vmul.f32 %v6191_v16, %v18472_v57  ;;  %v6519_v58 = vmul.f32 %v6191_v16, %v18473_v1 }
 0x812   :  { %v6704_v49 = vadd.f32 %v6703_v11, %v6702_v13  ;;  %v6717_v54 = vadd.f32 %v6716_v25, %v6715_v12  ;;  %v6755_v10 = vrot.slane %v6754_v45, 4  ;;  %v6768_v20 = vrot.slane %v6767_v51, 4 }
 0x813   :  { %v6730_v34 = vadd.f32 %v6729_v32, %v6728_v63  ;;  %v6743_v21 = vadd.f32 %v6742_v43, %v6741_v48  ;;  %v6520_v30 = vmul.f32 %v6191_v16, %v18474_v0  ;;  %v6521_v29 = vmul.f32 %v6191_v16, %v18475_v2  ;;  %v6106_v2 = vpop.permute.xlu0 %6105 }
 0x814   :  { %v6705_v9 = vrot.slane %v6704_v49, 2  ;;  %v6718_v42 = vrot.slane %v6717_v54, 2  ;;  %v6756_v52 = vadd.f32 %v6755_v10, %v6754_v45  ;;  %v6769_v44 = vadd.f32 %v6768_v20, %v6767_v51  ;;  %v18477_v20 = vld [vmem:[#allocation83_spill] sm:$0xff] }
 0x815   :  { %v6731_v40 = vrot.slane %v6730_v34, 2  ;;  %v6744_v39 = vrot.slane %v6743_v21, 2  ;;  %v15201_v59 = vadd.f32 %v14967_v53, %v6516_v14  ;;  %v15204_v13 = vadd.f32 %v14970_v6, %v6517_v27  ;;  %v6133_v14 = vpop.permute.xlu1 %6132 }
 0x816   :  { %v6706_v12 = vadd.f32 %v6705_v9, %v6704_v49  ;;  %v6719_v11 = vadd.f32 %v6718_v42, %v6717_v54  ;;  %v6757_v63 = vrot.slane %v6756_v52, 2  ;;  %v6770_v48 = vrot.slane %v6769_v44, 2  ;;  %v18482_v9 = vld [vmem:[#allocation196_spill] sm:$0xff] }
 0x817   :  { %v6732_v25 = vadd.f32 %v6731_v40, %v6730_v34  ;;  %v6745_v32 = vadd.f32 %v6744_v39, %v6743_v21  ;;  %v15207_v16 = vadd.f32 %v14982_v55, %v6518_v19  ;;  %v15210_v45 = vadd.f32 %v14985_v37, %v6519_v58  ;;  %v18478_v21 = vld [vmem:[#allocation84_spill] sm:$0xff] }
 0x818   :  { %v6707_v51 = vrot.slane %v6706_v12, 1  ;;  %v6720_v43 = vrot.slane %v6719_v11, 1  ;;  %v6758_v57 = vadd.f32 %v6757_v63, %v6756_v52  ;;  %v6771_v53 = vadd.f32 %v6770_v48, %v6769_v44  ;;  %v18483_v52 = vld [vmem:[#allocation307_spill] sm:$0xff]  ;;  %v18484_v40 = vld [vmem:[#allocation308_spill] sm:$0xff]  ;;  %v18486_v63 = vld [vmem:[#allocation461_spill] sm:$0xff] }
 0x819   :  { %v6733_v1 = vrot.slane %v6732_v25, 1  ;;  %v6746_v6 = vrot.slane %v6745_v32, 1  ;;  %v15213_v27 = vadd.f32 %v14991_v3, %v6520_v30  ;;  %v15216_v49 = vadd.f32 %v14994_v22, %v6521_v29  ;;  %v18481_v22 = vld [vmem:[#allocation195_spill] sm:$0xff] }
 0x81a   :  { %v15218_v54 = vadd.f32 %v6707_v51, %v6706_v12  ;;  %v15220_v55 = vadd.f32 %v6720_v43, %v6719_v11  ;;  %v6759_v19 = vrot.slane %v6758_v57, 1  ;;  %v6772_v37 = vrot.slane %v6771_v53, 1  ;;  %v18485_v12 = vld [vmem:[#allocation381_spill] sm:$0xff]  ;;  %v18488_v51 = vld [vmem:[#allocation459_spill] sm:$0xff] }
 0x81b   :  { %v15222_v58 = vadd.f32 %v6733_v1, %v6732_v25  ;;  %v15224_v10 = vadd.f32 %v6746_v6, %v6745_v32  ;;  %v6438_v34 = vmul.f32 %v6133_v14, %v18477_v20  ;;  %v6439_v0 = vmul.f32 %v6133_v14, %v18478_v21  ;;  %v18487_v25 = vld [vmem:[#allocation379_spill] sm:$0xff]  ;;  %v18490_v1 = vld [vmem:[#allocation72_spill] sm:$0xff] }
 0x81c   :  { %v15228_v3 = vadd.f32 %v6759_v19, %v6758_v57  ;;  %v15230_v30 = vadd.f32 %v6772_v37, %v6771_v53  ;;  %v6440_v29 = vmul.f32 %v6133_v14, %v18481_v22  ;;  %v6441_v42 = vmul.f32 %v6133_v14, %v18482_v9  ;;  %v18489_v57 = vld [vmem:[#allocation71_spill] sm:$0xff]  ;;  %v6079_v19 = vpop.permute.xlu1 %6078  ;;  %v18491_v37 = vld [vmem:[#allocation466_spill] sm:$0xff]  ;;  %v18494_v22 = vld [vmem:[#allocation184_spill] sm:$0xff] }
 0x81d   :  { %18476 = vst [vmem:[#allocation468_spill] sm:$0xff] %v15222_v58  ;;  %v6442_v44 = vmul.f32 %v6133_v14, %v18483_v52  ;;  %v6443_v39 = vmul.f32 %v6133_v14, %v18484_v40  ;;  %v15237_v11 = vadd.f32 %v18485_v12, %v6438_v34  ;;  %v15240_v48 = vadd.f32 %v18486_v63, %v6439_v0  ;;  %v18492_v14 = vld [vmem:[#allocation370_spill] sm:$0xff]  ;;  %v18493_v21 = vld [vmem:[#allocation183_spill] sm:$0xff]  ;;  %v18496_v40 = vld [vmem:[#allocation296_spill] sm:$0xff] }
 0x81e   :  { %18479 = vst [vmem:[#allocation480_spill] sm:$0xff] %v15228_v3  ;;  %18480 = vst [vmem:[#allocation471_spill] sm:$0xff] %v15230_v30  ;;  %v15243_v32 = vadd.f32 %v18487_v25, %v6440_v29  ;;  %v15246_v43 = vadd.f32 %v18488_v51, %v6441_v42  ;;  %v6402_v53 = vmul.f32 %v6106_v2, %v18489_v57  ;;  %v18495_v29 = vld [vmem:[#allocation295_spill] sm:$0xff]  ;;  %v18498_v57 = vld [vmem:[#allocation60_spill] sm:$0xff] }
 0x81f   :  { %v6403_v6 = vmul.f32 %v6106_v2, %v18490_v1  ;;  %v15251_v20 = vadd.f32 %v18491_v37, %v6442_v44  ;;  %v15254_v34 = vadd.f32 %v18492_v14, %v6443_v39  ;;  %v6404_v0 = vmul.f32 %v6106_v2, %v18493_v21  ;;  %v18497_v39 = vld [vmem:[#allocation59_spill] sm:$0xff]  ;;  %v18502_v21 = vld [vmem:[#allocation284_spill] sm:$0xff]  ;;  %v18508_v58 = vld [vmem:[#allocation298_spill] sm:$0xff] }
 0x820   :  { %v6405_v9 = vmul.f32 %v6106_v2, %v18494_v22  ;;  %v6406_v52 = vmul.f32 %v6106_v2, %v18495_v29  ;;  %v6407_v42 = vmul.f32 %v6106_v2, %v18496_v40  ;;  %v6856_v12 = vadd.f32 %v15135_v61, %v6402_v53  ;;  %v18499_v2 = vld [vmem:[#allocation171_spill] sm:$0xff]  ;;  %v18500_v53 = vld [vmem:[#allocation172_spill] sm:$0xff] }
 0x821   :  { %v6869_v63 = vadd.f32 %v15138_v4, %v6403_v6  ;;  %v15263_v25 = vadd.f32 %v15143_v38, %v6404_v0  ;;  %v6366_v51 = vmul.f32 %v6079_v19, %v18497_v39  ;;  %v6367_v1 = vmul.f32 %v6079_v19, %v18498_v57  ;;  %v18501_v6 = vld [vmem:[#allocation283_spill] sm:$0xff] }
 0x822   :  { %v15266_v44 = vadd.f32 %v15146_v28, %v6405_v9  ;;  %v15271_v37 = vadd.f32 %v15149_v60, %v6406_v52  ;;  %v15274_v14 = vadd.f32 %v15152_v5, %v6407_v42  ;;  %v6368_v61 = vmul.f32 %v6079_v19, %v18499_v2  ;;  %v6110_v52 = vpop.permute.xlu0 %6109 }
 0x823   :  { %v6369_v4 = vmul.f32 %v6079_v19, %v18500_v53  ;;  %v6370_v38 = vmul.f32 %v6079_v19, %v18501_v6  ;;  %v6371_v0 = vmul.f32 %v6079_v19, %v18502_v21  ;;  %v6779_v28 = vsel %vm534_vm0, %v6366_v51, 0.0 }
 0x824   :  { %v6792_v22 = vsel %vm534_vm0, %v6367_v1, 0.0  ;;  %v6780_v9 = vadd.f32 %v6779_v28, %v15159_v36  ;;  %v6805_v29 = vsel %vm534_vm0, %v6368_v61, 0.0  ;;  %v18503_v61 = vld [vmem:[#allocation73_spill] sm:$0xff] }
 0x825   :  { %v6793_v60 = vadd.f32 %v6792_v22, %v15162_v17  ;;  %v6818_v5 = vsel %vm534_vm0, %v6369_v4, 0.0  ;;  %v6806_v40 = vadd.f32 %v6805_v29, %v15167_v41  ;;  %v6831_v39 = vsel %vm534_vm0, %v6370_v38, 0.0  ;;  %v18504_v4 = vld [vmem:[#allocation74_spill] sm:$0xff]  ;;  %v18505_v29 = vld [vmem:[#allocation185_spill] sm:$0xff] }
 0x826   :  { %v6819_v42 = vadd.f32 %v6818_v5, %v15170_v56  ;;  %v6844_v19 = vsel %vm534_vm0, %v6371_v0, 0.0  ;;  %v6781_v51 = vrot.slane %v6780_v9, 4  ;;  %v6832_v1 = vadd.f32 %v6831_v39, %v15173_v24  ;;  %v18506_v5 = vld [vmem:[#allocation186_spill] sm:$0xff] }
 0x827   :  { %v6794_v57 = vrot.slane %v6793_v60, 4  ;;  %v6845_v36 = vadd.f32 %v6844_v19, %v15176_v18  ;;  %v6807_v17 = vrot.slane %v6806_v40, 4  ;;  %v6408_v53 = vmul.f32 %v6110_v52, %v18503_v61 }
 0x828   :  { %v6820_v2 = vrot.slane %v6819_v42, 4  ;;  %v6409_v6 = vmul.f32 %v6110_v52, %v18504_v4  ;;  %v6782_v21 = vadd.f32 %v6781_v51, %v6780_v9  ;;  %v6833_v28 = vrot.slane %v6832_v1, 4 }
 0x829   :  { %v6795_v41 = vadd.f32 %v6794_v57, %v6793_v60  ;;  %v6846_v56 = vrot.slane %v6845_v36, 4  ;;  %v6808_v22 = vadd.f32 %v6807_v17, %v6806_v40  ;;  %v6410_v0 = vmul.f32 %v6110_v52, %v18505_v29 }
 0x82a   :  { %v6821_v38 = vadd.f32 %v6820_v2, %v6819_v42  ;;  %v6411_v3 = vmul.f32 %v6110_v52, %v18506_v5  ;;  %v6783_v62 = vrot.slane %v6782_v21, 2  ;;  %v6834_v39 = vadd.f32 %v6833_v28, %v6832_v1  ;;  %v6164_v5 = vpop.permute.xlu1 %6163 }
 0x82b   :  { %v6796_v24 = vrot.slane %v6795_v41, 2  ;;  %v6847_v18 = vadd.f32 %v6846_v56, %v6845_v36  ;;  %v6809_v19 = vrot.slane %v6808_v22, 2  ;;  %v6412_v61 = vmul.f32 %v6110_v52, %v18507_v8  ;;  %v18530_v36 = vld [vmem:[#allocation100_spill] sm:$0xff] }
 0x82c   :  { %v6822_v30 = vrot.slane %v6821_v38, 2  ;;  %v6413_v4 = vmul.f32 %v6110_v52, %v18508_v58  ;;  %v6784_v9 = vadd.f32 %v6783_v62, %v6782_v21  ;;  %v6835_v51 = vrot.slane %v6834_v39, 2  ;;  %v18529_v62 = vld [vmem:[#allocation99_spill] sm:$0xff] }
 0x82d   :  { %v15298_v60 = vadd.f32 %v6796_v24, %v6795_v41  ;;  %v6848_v40 = vrot.slane %v6847_v18, 2  ;;  %v6810_v42 = vadd.f32 %v6809_v19, %v6808_v22  ;;  %v6857_v17 = vsel %vm534_vm0, %v6408_v53, 0.0 }
 0x82e   :  { %v15300_v57 = vadd.f32 %v6822_v30, %v6821_v38  ;;  %v6870_v2 = vsel %vm534_vm0, %v6409_v6, 0.0  ;;  %v6785_v1 = vrot.slane %v6784_v9, 1  ;;  %v6836_v28 = vadd.f32 %v6835_v51, %v6834_v39 }
 0x82f   :  { %v15305_v56 = vadd.f32 %v6848_v40, %v6847_v18  ;;  %v6811_v8 = vrot.slane %v6810_v42, 1  ;;  %v6858_v58 = vadd.f32 %v6857_v17, %v6856_v12  ;;  %v6871_v52 = vadd.f32 %v6870_v2, %v6869_v63  ;;  %v18511_v17 = vld [vmem:[#allocation98_spill] sm:$0xff] }
 0x830   :  { %v15308_v21 = vadd.f32 %v6785_v1, %v6784_v9  ;;  %v6837_v41 = vrot.slane %v6836_v28, 1  ;;  %v6883_v53 = vsel %vm534_vm0, %v6410_v0, 0.0  ;;  %v6896_v39 = vsel %vm534_vm0, %v6411_v3, 0.0 }
 0x831   :  { %v15312_v22 = vadd.f32 %v6811_v8, %v6810_v42  ;;  %v6859_v6 = vrot.slane %v6858_v58, 4  ;;  %v6872_v38 = vrot.slane %v6871_v52, 4  ;;  %v6884_v29 = vadd.f32 %v6883_v53, %v15263_v25  ;;  %v18510_v42 = vld [vmem:[#allocation97_spill] sm:$0xff] }
 0x832   :  { %v15315_v24 = vadd.f32 %v6837_v41, %v6836_v28  ;;  %v6909_v12 = vsel %vm534_vm0, %v6412_v61, 0.0  ;;  %v6922_v63 = vsel %vm534_vm0, %v6413_v4, 0.0  ;;  %v6897_v0 = vadd.f32 %v6896_v39, %v15266_v44  ;;  %v18512_v4 = vld [vmem:[#allocation209_spill] sm:$0xff] }
 0x833   :  { %v6860_v18 = vadd.f32 %v6859_v6, %v6858_v58  ;;  %v6873_v19 = vadd.f32 %v6872_v38, %v6871_v52  ;;  %v6885_v9 = vrot.slane %v6884_v29, 4  ;;  %v6910_v51 = vadd.f32 %v6909_v12, %v15271_v37  ;;  %v18513_v52 = vld [vmem:[#allocation210_spill] sm:$0xff]  ;;  %v6195_v38 = vpop.permute.xlu0 %6194 }
 0x834   :  { %18509 = vst [vmem:[#allocation479_spill] sm:$0xff] %v15315_v24  ;;  %v6923_v40 = vadd.f32 %v6922_v63, %v15274_v14  ;;  %v6480_v25 = vmul.f32 %v6164_v5, %v18510_v42  ;;  %v6481_v2 = vmul.f32 %v6164_v5, %v18511_v17  ;;  %v6898_v8 = vrot.slane %v6897_v0, 4  ;;  %v18514_v63 = vld [vmem:[#allocation321_spill] sm:$0xff]  ;;  %v18515_v17 = vld [vmem:[#allocation322_spill] sm:$0xff] }
 0x835   :  { %v6861_v1 = vrot.slane %v6860_v18, 2  ;;  %v6874_v28 = vrot.slane %v6873_v19, 2  ;;  %v6886_v3 = vadd.f32 %v6885_v9, %v6884_v29  ;;  %v6911_v61 = vrot.slane %v6910_v51, 4 }
 0x836   :  { %v6924_v41 = vrot.slane %v6923_v40, 4  ;;  %v6482_v58 = vmul.f32 %v6164_v5, %v18512_v4  ;;  %v6483_v53 = vmul.f32 %v6164_v5, %v18513_v52  ;;  %v6899_v14 = vadd.f32 %v6898_v8, %v6897_v0 }
 0x837   :  { %v15327_v6 = vadd.f32 %v6861_v1, %v6860_v18  ;;  %v15329_v44 = vadd.f32 %v6874_v28, %v6873_v19  ;;  %v6887_v37 = vrot.slane %v6886_v3, 2  ;;  %v6912_v39 = vadd.f32 %v6911_v61, %v6910_v51  ;;  %v6137_v28 = vpop.permute.xlu1 %6136  ;;  %v18528_v51 = vld [vmem:[#allocation310_spill] sm:$0xff] }
 0x838   :  { %v6925_v12 = vadd.f32 %v6924_v41, %v6923_v40  ;;  %v6484_v42 = vmul.f32 %v6164_v5, %v18514_v63  ;;  %v6485_v29 = vmul.f32 %v6164_v5, %v18515_v17  ;;  %v6900_v4 = vrot.slane %v6899_v14, 2 }
 0x839   :  { %v15334_v30 = vadd.f32 %v6887_v37, %v6886_v3  ;;  %v7011_v52 = vadd.f32 %v15099_v15, %v6480_v25  ;;  %v6913_v18 = vrot.slane %v6912_v39, 2  ;;  %v7024_v19 = vadd.f32 %v15102_v47, %v6481_v2  ;;  %v18517_v25 = vld [vmem:[#allocation111_spill] sm:$0xff]  ;;  %v18518_v47 = vld [vmem:[#allocation112_spill] sm:$0xff] }
 0x83a   :  { %v6926_v1 = vrot.slane %v6925_v12, 2  ;;  %v7037_v0 = vadd.f32 %v15105_v33, %v6482_v58  ;;  %v15340_v40 = vadd.f32 %v6900_v4, %v6899_v14  ;;  %v7050_v5 = vadd.f32 %v15108_v31, %v6483_v53  ;;  %v18519_v33 = vld [vmem:[#allocation223_spill] sm:$0xff]  ;;  %v18520_v37 = vld [vmem:[#allocation224_spill] sm:$0xff]  ;;  %v6168_v31 = vpop.permute.xlu0 %6167  ;;  %v18522_v53 = vld [vmem:[#allocation337_spill] sm:$0xff] }
 0x83b   :  { %v7063_v8 = vadd.f32 %v15119_v50, %v6484_v42  ;;  %v15344_v3 = vadd.f32 %v6913_v18, %v6912_v39  ;;  %v7076_v15 = vadd.f32 %v15122_v23, %v6485_v29  ;;  %v6522_v41 = vmul.f32 %v6195_v38, %v18517_v25  ;;  %v18521_v14 = vld [vmem:[#allocation336_spill] sm:$0xff]  ;;  %v18524_v4 = vld [vmem:[#allocation86_spill] sm:$0xff]  ;;  %v18525_v29 = vld [vmem:[#allocation197_spill] sm:$0xff] }
 0x83c   :  { %v15346_v61 = vadd.f32 %v6926_v1, %v6925_v12  ;;  %v6523_v2 = vmul.f32 %v6195_v38, %v18518_v47  ;;  %v6524_v58 = vmul.f32 %v6195_v38, %v18519_v33  ;;  %v6525_v63 = vmul.f32 %v6195_v38, %v18520_v37  ;;  %v18523_v12 = vld [vmem:[#allocation85_spill] sm:$0xff]  ;;  %v18526_v1 = vld [vmem:[#allocation198_spill] sm:$0xff] }
 0x83d   :  { %18516 = vst [vmem:[#allocation365_spill] sm:$0xff] %v15344_v3  ;;  %v15354_v17 = vmul.f32 %v6195_v38, %v18521_v14  ;;  %v6527_v39 = vmul.f32 %v6195_v38, %v18522_v53  ;;  %v6444_v42 = vmul.f32 %v6137_v28, %v18523_v12  ;;  %v6445_v23 = vmul.f32 %v6137_v28, %v18524_v4  ;;  %v18527_v47 = vld [vmem:[#allocation309_spill] sm:$0xff]  ;;  %v6141_v53 = vpop.permute.xlu1 %6140  ;;  %v18535_v3 = vld [vmem:[#allocation87_spill] sm:$0xff] }
 0x83e   :  { %v6446_v18 = vmul.f32 %v6137_v28, %v18525_v29  ;;  %v6447_v25 = vmul.f32 %v6137_v28, %v18526_v1  ;;  %v6448_v33 = vmul.f32 %v6137_v28, %v18527_v47  ;;  %v6449_v37 = vmul.f32 %v6137_v28, %v18528_v51  ;;  %v18531_v47 = vld [vmem:[#allocation211_spill] sm:$0xff]  ;;  %v18532_v28 = vld [vmem:[#allocation212_spill] sm:$0xff] }
 0x83f   :  { %v6934_v14 = vadd.f32 %v15237_v11, %v6444_v42  ;;  %v6947_v9 = vadd.f32 %v15240_v48, %v6445_v23  ;;  %v6486_v50 = vmul.f32 %v6168_v31, %v18529_v62  ;;  %v6487_v38 = vmul.f32 %v6168_v31, %v18530_v36  ;;  %v18533_v11 = vld [vmem:[#allocation323_spill] sm:$0xff]  ;;  %v18534_v48 = vld [vmem:[#allocation325_spill] sm:$0xff] }
 0x840   :  { %v6960_v12 = vadd.f32 %v15243_v32, %v6446_v18  ;;  %v6973_v4 = vadd.f32 %v15246_v43, %v6447_v25  ;;  %v6986_v29 = vadd.f32 %v15251_v20, %v6448_v33  ;;  %v6999_v1 = vadd.f32 %v15254_v34, %v6449_v37  ;;  %v18536_v18 = vld [vmem:[#allocation88_spill] sm:$0xff]  ;;  %v18537_v37 = vld [vmem:[#allocation199_spill] sm:$0xff] }
 0x841   :  { %v6488_v24 = vmul.f32 %v6168_v31, %v18531_v47  ;;  %v6489_v51 = vmul.f32 %v6168_v31, %v18532_v28  ;;  %v6490_v42 = vmul.f32 %v6168_v31, %v18533_v11  ;;  %v6491_v23 = vmul.f32 %v6168_v31, %v18534_v48  ;;  %v18538_v28 = vld [vmem:[#allocation200_spill] sm:$0xff] }
 0x842   :  { %v15376_v62 = vadd.f32 %v7011_v52, %v6486_v50  ;;  %v15378_v36 = vadd.f32 %v7024_v19, %v6487_v38  ;;  %v6450_v32 = vmul.f32 %v6141_v53, %v18535_v3  ;;  %v6451_v43 = vmul.f32 %v6141_v53, %v18536_v18  ;;  %v18539_v52 = vld [vmem:[#allocation311_spill] sm:$0xff]  ;;  %v18540_v19 = vld [vmem:[#allocation312_spill] sm:$0xff] }
 0x843   :  { %v15382_v25 = vadd.f32 %v7037_v0, %v6488_v24  ;;  %v15384_v20 = vadd.f32 %v7050_v5, %v6489_v51  ;;  %v15386_v34 = vadd.f32 %v7063_v8, %v6490_v42  ;;  %v15388_v33 = vadd.f32 %v7076_v15, %v6491_v23 }
 0x844   :  { %v6452_v47 = vmul.f32 %v6141_v53, %v18537_v37  ;;  %v6453_v31 = vmul.f32 %v6141_v53, %v18538_v28  ;;  %v6454_v50 = vmul.f32 %v6141_v53, %v18539_v52  ;;  %v6455_v38 = vmul.f32 %v6141_v53, %v18540_v19 }
 0x845   :  { %v6935_v3 = vsel %vm534_vm0, %v6450_v32, 0.0  ;;  %v6948_v11 = vsel %vm534_vm0, %v6451_v43, 0.0  ;;  %v7089_v24 = vadd.f32 %v15201_v59, %v6522_v41  ;;  %v7102_v0 = vadd.f32 %v15204_v13, %v6523_v2 }
 0x846   :  { %v6936_v5 = vadd.f32 %v6935_v3, %v6934_v14  ;;  %v6949_v8 = vadd.f32 %v6948_v11, %v6947_v9  ;;  %v6961_v15 = vsel %vm534_vm0, %v6452_v47, 0.0  ;;  %v6974_v51 = vsel %vm534_vm0, %v6453_v31, 0.0  ;;  %v6172_v47 = vpop.permute.xlu1 %6171  ;;  %v18542_v11 = vld [vmem:[#allocation114_spill] sm:$0xff] }
 0x847   :  { %v6962_v42 = vadd.f32 %v6961_v15, %v6960_v12  ;;  %v6975_v48 = vadd.f32 %v6974_v51, %v6973_v4  ;;  %v6987_v23 = vsel %vm534_vm0, %v6454_v50, 0.0  ;;  %v7000_v53 = vsel %vm534_vm0, %v6455_v38, 0.0  ;;  %v6199_v4 = vpop.permute.xlu0 %6198  ;;  %v18541_v38 = vld [vmem:[#allocation113_spill] sm:$0xff]  ;;  %v18544_v51 = vld [vmem:[#allocation226_spill] sm:$0xff] }
 0x848   :  { %v6937_v18 = vrot.slane %v6936_v5, 4  ;;  %v6950_v32 = vrot.slane %v6949_v8, 4  ;;  %v6988_v37 = vadd.f32 %v6987_v23, %v6986_v29  ;;  %v7001_v43 = vadd.f32 %v7000_v53, %v6999_v1  ;;  %v18546_v53 = vld [vmem:[#allocation339_spill] sm:$0xff] }
 0x849   :  { %v6963_v28 = vrot.slane %v6962_v42, 4  ;;  %v6976_v59 = vrot.slane %v6975_v48, 4  ;;  %v7115_v13 = vadd.f32 %v15207_v16, %v6524_v58  ;;  %v7128_v9 = vadd.f32 %v15210_v45, %v6525_v63 }
 0x84a   :  { %v6938_v41 = vadd.f32 %v6937_v18, %v6936_v5  ;;  %v15404_v2 = vadd.f32 %v6950_v32, %v6949_v8  ;;  %v6989_v14 = vrot.slane %v6988_v37, 4  ;;  %v7002_v12 = vrot.slane %v7001_v43, 4 }
 0x84b   :  { %v6964_v31 = vadd.f32 %v6963_v28, %v6962_v42  ;;  %v15406_v52 = vadd.f32 %v6976_v59, %v6975_v48  ;;  %v7141_v29 = vadd.f32 %v15213_v27, %v15354_v17  ;;  %v7154_v1 = vadd.f32 %v15216_v49, %v6527_v39  ;;  %v18543_v17 = vld [vmem:[#allocation225_spill] sm:$0xff]  ;;  %v18545_v48 = vld [vmem:[#allocation338_spill] sm:$0xff]  ;;  %v6203_v59 = vpop.permute.xlu1 %6202 }
 0x84c   :  { %v6939_v50 = vrot.slane %v6938_v41, 2  ;;  %v6952_v16 = vrot.slane %v15404_v2, 2  ;;  %v6990_v58 = vadd.f32 %v6989_v14, %v6988_v37  ;;  %v15412_v45 = vadd.f32 %v7002_v12, %v7001_v43 }
 0x84d   :  { %v6965_v63 = vrot.slane %v6964_v31, 2  ;;  %v6528_v3 = vmul.f32 %v6199_v4, %v18541_v38  ;;  %v6529_v5 = vmul.f32 %v6199_v4, %v18542_v11  ;;  %v6530_v49 = vmul.f32 %v6199_v4, %v18543_v17  ;;  %v18548_v11 = vld [vmem:[#allocation102_spill] sm:$0xff] }
 0x84e   :  { %v15417_v8 = vadd.f32 %v6939_v50, %v6938_v41  ;;  %v6991_v15 = vrot.slane %v6990_v58, 2  ;;  %v6531_v42 = vmul.f32 %v6199_v4, %v18544_v51  ;;  %v6532_v23 = vmul.f32 %v6199_v4, %v18545_v48  ;;  %v18547_v50 = vld [vmem:[#allocation101_spill] sm:$0xff]  ;;  %v18550_v51 = vld [vmem:[#allocation214_spill] sm:$0xff] }
 0x84f   :  { %v15421_v39 = vadd.f32 %v6965_v63, %v6964_v31  ;;  %v6533_v18 = vmul.f32 %v6199_v4, %v18546_v53  ;;  %v7090_v37 = vadd.f32 %v7089_v24, %v6528_v3  ;;  %v7103_v43 = vadd.f32 %v7102_v0, %v6529_v5  ;;  %v18549_v63 = vld [vmem:[#allocation213_spill] sm:$0xff]  ;;  %v18551_v48 = vld [vmem:[#allocation326_spill] sm:$0xff]  ;;  %v18552_v4 = vld [vmem:[#allocation327_spill] sm:$0xff] }
 0x850   :  { %v15426_v32 = vadd.f32 %v6991_v15, %v6990_v58  ;;  %v7116_v28 = vadd.f32 %v7115_v13, %v6530_v49  ;;  %v7129_v41 = vadd.f32 %v7128_v9, %v6531_v42  ;;  %v7142_v14 = vadd.f32 %v7141_v29, %v6532_v23  ;;  %v18553_v0 = vld [vmem:[#allocation115_spill] sm:$0xff]  ;;  %v18554_v3 = vld [vmem:[#allocation116_spill] sm:$0xff] }
 0x851   :  { %v7155_v12 = vadd.f32 %v7154_v1, %v6533_v18  ;;  %v6492_v38 = vmul.f32 %v6172_v47, %v18547_v50  ;;  %v6493_v31 = vmul.f32 %v6172_v47, %v18548_v11  ;;  %v6494_v17 = vmul.f32 %v6172_v47, %v18549_v63  ;;  %v18555_v50 = vld [vmem:[#allocation227_spill] sm:$0xff]  ;;  %v18556_v63 = vld [vmem:[#allocation228_spill] sm:$0xff] }
 0x852   :  { %v6495_v27 = vmul.f32 %v6172_v47, %v18550_v51  ;;  %v6496_v19 = vmul.f32 %v6172_v47, %v18551_v48  ;;  %v6497_v58 = vmul.f32 %v6172_v47, %v18552_v4  ;;  %v6534_v13 = vmul.f32 %v6203_v59, %v18553_v0  ;;  %v18558_v4 = vld [vmem:[#allocation340_spill] sm:$0xff] }
 0x853   :  { %v7013_v24 = vsel %vm534_vm0, %v6492_v38, 0.0  ;;  %v6535_v9 = vmul.f32 %v6203_v59, %v18554_v3  ;;  %v7026_v1 = vsel %vm534_vm0, %v6493_v31, 0.0  ;;  %v7039_v5 = vsel %vm534_vm0, %v6494_v17, 0.0 }
 0x854   :  { %v7014_v29 = vadd.f32 %v7013_v24, %v15376_v62  ;;  %v7052_v15 = vsel %vm534_vm0, %v6495_v27, 0.0  ;;  %v7027_v49 = vadd.f32 %v7026_v1, %v15378_v36  ;;  %v7040_v42 = vadd.f32 %v7039_v5, %v15382_v25 }
 0x855   :  { %v15444_v47 = vadd.f32 %v7052_v15, %v15384_v20  ;;  %v7065_v23 = vsel %vm534_vm0, %v6496_v19, 0.0  ;;  %v7078_v62 = vsel %vm534_vm0, %v6497_v58, 0.0  ;;  %v6536_v38 = vmul.f32 %v6203_v59, %v18555_v50  ;;  %v18557_v19 = vld [vmem:[#allocation324_spill] sm:$0xff] }
 0x856   :  { %v7015_v53 = vrot.slane %v7014_v29, 4  ;;  %v7066_v18 = vadd.f32 %v7065_v23, %v15386_v34  ;;  %v7028_v11 = vrot.slane %v7027_v49, 4  ;;  %v7041_v31 = vrot.slane %v7040_v42, 4 }
 0x857   :  { %v7054_v27 = vrot.slane %v15444_v47, 4  ;;  %v15452_v36 = vadd.f32 %v7078_v62, %v15388_v33  ;;  %v6537_v17 = vmul.f32 %v6203_v59, %v18556_v63  ;;  %v6538_v51 = vmul.f32 %v6203_v59, %v18557_v19 }
 0x858   :  { %v15454_v25 = vadd.f32 %v7015_v53, %v7014_v29  ;;  %v7067_v20 = vrot.slane %v7066_v18, 4  ;;  %v15458_v48 = vadd.f32 %v7041_v31, %v7040_v42  ;;  %v6539_v58 = vmul.f32 %v6203_v59, %v18558_v4 }
 0x859   :  { %v7080_v34 = vrot.slane %v15452_v36, 4  ;;  %v7091_v24 = vsel %vm534_vm0, %v6534_v13, 0.0  ;;  %v7104_v29 = vsel %vm534_vm0, %v6535_v9, 0.0  ;;  %v7117_v15 = vsel %vm534_vm0, %v6536_v38, 0.0 }
 0x85a   :  { %v7017_v0 = vrot.slane %v15454_v25, 2  ;;  %v15464_v3 = vadd.f32 %v7067_v20, %v7066_v18  ;;  %v7092_v33 = vadd.f32 %v7091_v24, %v7090_v37  ;;  %v7043_v1 = vrot.slane %v15458_v48, 2 }
 0x85b   :  { %v7105_v5 = vadd.f32 %v7104_v29, %v7103_v43  ;;  %v7130_v42 = vsel %vm534_vm0, %v6537_v17, 0.0  ;;  %v7118_v59 = vadd.f32 %v7117_v15, %v7116_v28  ;;  %v7143_v50 = vsel %vm534_vm0, %v6538_v51, 0.0 }
 0x85c   :  { %v7069_v23 = vrot.slane %v15464_v3, 2  ;;  %v7093_v53 = vrot.slane %v7092_v33, 4  ;;  %v7131_v62 = vadd.f32 %v7130_v42, %v7129_v41  ;;  %v7156_v18 = vsel %vm534_vm0, %v6539_v58, 0.0 }
 0x85d   :  { %v7106_v13 = vrot.slane %v7105_v5, 4  ;;  %v18559_v37 = vrot.slane %v15298_v60, 1  ;;  %v7119_v43 = vrot.slane %v7118_v59, 4  ;;  %v7144_v38 = vadd.f32 %v7143_v50, %v7142_v14  ;;  %v18560_v50 = vld [vmem:[#allocation369_spill] sm:$0xff] }
 0x85e   :  { %v7094_v31 = vadd.f32 %v7093_v53, %v7092_v33  ;;  %v7132_v20 = vrot.slane %v7131_v62, 4  ;;  %v7157_v17 = vadd.f32 %v7156_v18, %v7155_v12  ;;  %v6876_v19 = vrot.slane %v15329_v44, 1 }
 0x85f   :  { %v6799_v9 = vadd.f32 %v18559_v37, %v15298_v60  ;;  %v7107_v63 = vadd.f32 %v7106_v13, %v7105_v5  ;;  %v6953_v28 = vadd.f32 %v6952_v16, %v15404_v2  ;;  %v7120_v51 = vadd.f32 %v7119_v43, %v7118_v59 }
 0x860   :  { %v7095_v41 = vrot.slane %v7094_v31, 2  ;;  %v7133_v4 = vadd.f32 %v7132_v20, %v7131_v62  ;;  %v7145_v58 = vrot.slane %v7144_v38, 4  ;;  %v7158_v24 = vrot.slane %v7157_v17, 4 }
 0x861   :  { %v6877_v29 = vadd.f32 %v6876_v19, %v15329_v44  ;;  %v6954_v60 = vrot.slane %v6953_v28, 1  ;;  %v7029_v33 = vadd.f32 %v7028_v11, %v7027_v49  ;;  %v7121_v42 = vrot.slane %v7120_v51, 2 }
 0x862   :  { %v7096_v15 = vadd.f32 %v7095_v41, %v7094_v31  ;;  %v7146_v14 = vadd.f32 %v7145_v58, %v7144_v38  ;;  %v7108_v5 = vrot.slane %v7107_v63, 2  ;;  %v15481_v12 = vadd.f32 %v7158_v24, %v7157_v17 }
 0x863   :  { %v6955_v53 = vadd.f32 %v6954_v60, %v6953_v28  ;;  %v7030_v13 = vrot.slane %v7029_v33, 2  ;;  %v7219_v2 = vsel %vm1874_vm1, %v15112_v7, %v18560_v50  ;;  %v7122_v16 = vadd.f32 %v7121_v42, %v7120_v51  ;;  %v18563_v51 = vld [vmem:[#allocation470_spill] sm:$0xff]  ;;  %v18565_v50 = vld [vmem:[#allocation343_spill] sm:$0xff] }
 0x864   :  { %v7147_v59 = vrot.slane %v7146_v14, 2  ;;  %v7109_v62 = vadd.f32 %v7108_v5, %v7107_v63  ;;  %v7220_v44 = vsel %vm1876_vm2, %v15220_v55, %v7219_v2  ;;  %v18561_v11 = vrot.slane %v15300_v57, 1 }
 0x865   :  { %v7031_v18 = vadd.f32 %v7030_v13, %v7029_v33  ;;  %v7221_v49 = vsel %vm1878_vm3, %v6799_v9, %v7220_v44  ;;  %v6902_v31 = vrot.slane %v15340_v40, 1  ;;  %v18562_v38 = vrot.slane %v15406_v52, 2 }
 0x866   :  { %v6825_v37 = vadd.f32 %v18561_v11, %v15300_v57  ;;  %v15493_v43 = vadd.f32 %v7147_v59, %v7146_v14  ;;  %v7110_v20 = vrot.slane %v7109_v62, 1  ;;  %v7222_v7 = vsel %vm1880_vm4, %v6877_v29, %v7221_v49  ;;  %v18566_v49 = vld [vmem:[#allocation467_spill] sm:$0xff] }
 0x867   :  { %v6979_v63 = vadd.f32 %v18562_v38, %v15406_v52  ;;  %v7032_v17 = vrot.slane %v7031_v18, 1  ;;  %v7223_v55 = vsel %vm1882_vm5, %v6955_v53, %v7222_v7  ;;  %v6903_v9 = vadd.f32 %v6902_v31, %v15340_v40 }
 0x868   :  { %v7055_v57 = vadd.f32 %v7054_v27, %v15444_v47  ;;  %v7111_v19 = vadd.f32 %v7110_v20, %v7109_v62  ;;  %v7134_v41 = vrot.slane %v7133_v4, 2  ;;  %v7233_v58 = vsel %vm1874_vm1, %v15116_v26, %v18563_v51  ;;  %v18570_v51 = vld [vmem:[#allocation468_spill] sm:$0xff] }
 0x869   :  { %v6980_v28 = vrot.slane %v6979_v63, 1  ;;  %v7033_v24 = vadd.f32 %v7032_v17, %v7031_v18  ;;  %v7234_v52 = vsel %vm1876_vm2, %v15224_v10, %v7233_v58  ;;  %v18564_v60 = vrot.slane %v15327_v6, 1 }
 0x86a   :  { %v7056_v29 = vrot.slane %v7055_v57, 2  ;;  %v7135_v42 = vadd.f32 %v7134_v41, %v7133_v4  ;;  %v7235_v47 = vsel %vm1878_vm3, %v6825_v37, %v7234_v52  ;;  %v6941_v27 = vrot.slane %v15417_v8, 1  ;;  %v18569_v41 = vld [vmem:[#allocation345_spill] sm:$0xff] }
 0x86b   :  { %v6864_v40 = vadd.f32 %v18564_v60, %v15327_v6  ;;  %v6981_v33 = vadd.f32 %v6980_v28, %v6979_v63  ;;  %v7224_v14 = vsel %vm1884_vm6, %v7033_v24, %v7223_v55  ;;  %v7236_v26 = vsel %vm1880_vm4, %v6903_v9, %v7235_v47 }
 0x86c   :  { %v7057_v5 = vadd.f32 %v7056_v29, %v7055_v57  ;;  %v7018_v53 = vadd.f32 %v7017_v0, %v15454_v25  ;;  %v7225_v10 = vsel %vm1886_vm7, %v7111_v19, %v7224_v14  ;;  %v7136_v13 = vrot.slane %v7135_v42, 1  ;;  %v18568_v57 = vld [vmem:[#allocation462_spill] sm:$0xff] }
 0x86d   :  { %v7237_v6 = vsel %vm1882_vm5, %v6981_v33, %v7236_v26  ;;  %v6942_v4 = vadd.f32 %v6941_v27, %v15417_v8  ;;  %v7261_v2 = vmul.f32 %v18565_v50, %v7225_v10  ;;  %v7097_v44 = vrot.slane %v7096_v15, 1  ;;  %v18573_v27 = vld [vmem:[#allocation341_spill] sm:$0xff]  ;;  %v18574_v50 = vld [vmem:[#allocation388_spill] sm:$0xff] }
 0x86e   :  { %v7058_v59 = vrot.slane %v7057_v5, 1  ;;  %v7019_v62 = vrot.slane %v7018_v53, 1  ;;  %v7137_v18 = vadd.f32 %v7136_v13, %v7135_v42  ;;  %v7212_v11 = vsel %vm1874_vm1, %v15110_v35, %v18566_v49 }
 0x86f   :  { %v18567_v25 = vrot.slane %v15334_v30, 1  ;;  %v6967_v37 = vrot.slane %v15421_v39, 1  ;;  %v7267_v31 = vmul.f32 0.020408163, %v7261_v2  ;;  %v7098_v8 = vadd.f32 %v7097_v44, %v7096_v15  ;;  %v18575_v2 = vld [vmem:[#allocation475_spill] sm:$0xff] }
 0x870   :  { %v7059_v20 = vadd.f32 %v7058_v59, %v7057_v5  ;;  %v7020_v7 = vadd.f32 %v7019_v62, %v7018_v53  ;;  %v7213_v38 = vsel %vm1876_vm2, %v15218_v54, %v7212_v11  ;;  %v7044_v17 = vadd.f32 %v7043_v1, %v15458_v48 }
 0x871   :  { %v6890_v0 = vadd.f32 %v18567_v25, %v15334_v30  ;;  %v6968_v63 = vadd.f32 %v6967_v37, %v15421_v39  ;;  %v7123_v35 = vrot.slane %v7122_v16, 1  ;;  %v7273_v55 = vpack.c.bf16 %v7267_v31, %v7267_v31  ;;  %v8444_v37 = vld [vmem:[%s15666_s5 + $0x148] sm:$0xff]  }
 0x872   :  { %v7238_v9 = vsel %vm1884_vm6, %v7059_v20, %v7237_v6  ;;  %v7214_v30 = vsel %vm1878_vm3, %v15308_v21, %v7213_v38  ;;  %v7226_v15 = vsel %vm1874_vm1, %v15114_v46, %v18568_v57  ;;  %v7045_v39 = vrot.slane %v7044_v17, 1  ;;  %v18578_v31 = vld [vmem:[#allocation365_spill] sm:$0xff] }
 0x873   :  { %v7239_v19 = vsel %vm1886_vm7, %v7137_v18, %v7238_v9  ;;  %v7215_v54 = vsel %vm1880_vm4, %v6864_v40, %v7214_v30  ;;  %v7124_v28 = vadd.f32 %v7123_v35, %v7122_v16  ;;  %7694 = vmatprep.mubr.bf16.mxu1 %v7273_v55  ;;  %v7227_v58 = vsel %vm1876_vm2, %v18570_v51, %v7226_v15  ;;  %v18577_v18 = vld [vmem:[#allocation471_spill] sm:$0xff]  ;;  %v8445_v15 = vld [vmem:[%s15666_s5 + $0x108] sm:$0xff]  }
 0x874   :  { %v7263_v48 = vmul.f32 %v18569_v41, %v7239_v19  ;;  %v7216_v1 = vsel %vm1882_vm5, %v6942_v4, %v7215_v54  ;;  %v18571_v21 = vrot.slane %v15305_v56, 1  ;;  %v7046_v29 = vadd.f32 %v7045_v39, %v7044_v17  ;;  %v18580_v54 = vld [vmem:[#allocation416_spill] sm:$0xff]  ;;  %v18581_v39 = vld [vmem:[#allocation477_spill] sm:$0xff] }
 0x875   :  { %v7217_v46 = vsel %vm1884_vm6, %v7020_v7, %v7216_v1  ;;  %v7228_v52 = vsel %vm1878_vm3, %v15312_v22, %v7227_v58  ;;  %v6928_v16 = vrot.slane %v15346_v61, 1  ;;  %v18572_v42 = vrot.slane %v15412_v45, 2  ;;  %v18583_v58 = vld [vmem:[#allocation479_spill] sm:$0xff] }
 0x876   :  { %v6851_v24 = vadd.f32 %v18571_v21, %v15305_v56  ;;  %v7269_v60 = vmul.f32 0.020408163, %v7263_v48  ;;  %v7218_v40 = vsel %vm1886_vm7, %v7098_v8, %v7217_v46  ;;  %v7229_v33 = vsel %vm1880_vm4, %v6890_v0, %v7228_v52  ;;  %v18582_v48 = vld [vmem:[#allocation480_spill] sm:$0xff]  ;;  %v8447_v52 = vld [vmem:[%s15666_s5 + $0x110] sm:$0xff]  }
 0x877   :  { %v7005_v47 = vadd.f32 %v18572_v42, %v15412_v45  ;;  %v7260_v14 = vmul.f32 %v18573_v27, %v7218_v40  ;;  %v7230_v56 = vsel %vm1882_vm5, %v6968_v63, %v7229_v33  ;;  %v6929_v5 = vadd.f32 %v6928_v16, %v15346_v61  ;;  %v18576_v61 = vld [vmem:[#allocation344_spill] sm:$0xff]  ;;  %v8449_v27 = vld [vmem:[%s15666_s5 + $0x118] sm:$0xff]  }
 0x878   :  { %v7081_v22 = vadd.f32 %v7080_v34, %v15452_v36  ;;  %v7275_v26 = vpack.c.bf16 %v7269_v60, %v7269_v60  ;;  %v7231_v53 = vsel %vm1884_vm6, %v7046_v29, %v7230_v56  ;;  %v7160_v13 = vrot.slane %v15481_v12, 2  ;;  %v8443_v36 = vld [vmem:[%s15666_s5 + $0x100] sm:$0xff]   ;;  %v18584_v60 = vld [vmem:[#allocation347_spill] sm:$0xff] }
 0x879   :  { %v7006_v10 = vrot.slane %v7005_v47, 1  ;;  %v7266_v6 = vmul.f32 0.020408163, %v7260_v14  ;;  %v7232_v4 = vsel %vm1886_vm7, %v7124_v28, %v7231_v53  ;;  %v7247_v59 = vsel %vm1874_vm1, %v18575_v2, %v18574_v50  ;;  %v8450_v56 = vld [vmem:[%s15666_s5 + $0x160] sm:$0xff]   ;;  %v8454_v53 = vld [vmem:[%s15666_s5 + $0x170] sm:$0xff]  }
 0x87a   :  { %v7082_v45 = vrot.slane %v7081_v22, 2  ;;  %7734 = vmatprep.mubr.bf16.mxu0 %v7275_v26  ;;  %v7262_v62 = vmul.f32 %v18576_v61, %v7232_v4  ;;  %v7161_v44 = vadd.f32 %v7160_v13, %v15481_v12  ;;  %v7248_v49 = vsel %vm1876_vm2, %v18577_v18, %v7247_v59  ;;  %v8453_v26 = vld [vmem:[%s15666_s5 + $0x128] sm:$0xff]   ;;  %v8456_v13 = vld [vmem:[%s15666_s5 + $0x178] sm:$0xff]  }
 0x87b   :  { %v7007_v34 = vadd.f32 %v7006_v10, %v7005_v47  ;;  %v7272_v11 = vpack.c.bf16 %v7266_v6, %v7266_v6  ;;  %v7249_v0 = vsel %vm1878_vm3, %v6851_v24, %v7248_v49  ;;  %v18579_v20 = vrot.slane %v18578_v31, 1  ;;  %v8455_v10 = vld [vmem:[%s15666_s5 + $0x130] sm:$0xff]  }
 0x87c   :  { %v7083_v25 = vadd.f32 %v7082_v45, %v7081_v22  ;;  %v7268_v8 = vmul.f32 0.020408163, %v7262_v62  ;;  %v7162_v38 = vrot.slane %v7161_v44, 1  ;;  %v7250_v63 = vsel %vm1880_vm4, %v6929_v5, %v7249_v0  ;;  %v8451_v5 = vld [vmem:[%s15666_s5 + $0x120] sm:$0xff]   ;;  %v8452_v22 = vld [vmem:[%s15666_s5 + $0x168] sm:$0xff]   ;;  %v18585_v6 = vld [vmem:[#allocation346_spill] sm:$0xff] }
 0x87d   :  { %v6916_v7 = vadd.f32 %v18579_v20, %v18578_v31  ;;  %v6993_v12 = vrot.slane %v15426_v32, 1  ;;  %7695 = vmatmul.mubr.bf16.vlgmr.msra.gmra.mrb[16].mxu1 %v7272_v11  ;;  %v7251_v35 = vsel %vm1882_vm5, %v7007_v34, %v7250_v63  ;;  %v7070_v55 = vadd.f32 %v7069_v23, %v15464_v3  ;;  %v8446_v3 = vld [vmem:[%s15666_s5 + $0x150] sm:$0xff]   ;;  %v8457_v45 = vld [vmem:[%s15666_s5 + $0x138] sm:$0xff]  }
 0x87e   :  { %v7084_v17 = vrot.slane %v7083_v25, 1  ;;  %v7149_v9 = vrot.slane %v15493_v43, 1  ;;  %v7274_v30 = vpack.c.bf16 %v7268_v8, %v7268_v8  ;;  %8088 = vmatpush3.bf16.msra.mxu1 %v8443_v36  ;;  %v7163_v57 = vadd.f32 %v7162_v38, %v7161_v44 }
 0x87f   :  { %v6994_v19 = vadd.f32 %v6993_v12, %v15426_v32  ;;  %v7240_v28 = vsel %vm1874_vm1, %v18581_v39, %v18580_v54  ;;  %8089 = vmatprep.subr.bf16.mxu1 %v8444_v37  ;;  %v7071_v23 = vrot.slane %v7070_v55, 1 }
 0x880   :  { %v7085_v41 = vadd.f32 %v7084_v17, %v7083_v25  ;;  %v7241_v1 = vsel %vm1876_vm2, %v18582_v48, %v7240_v28  ;;  %7735 = vmatmul.mubr.bf16.vlgmr.msra.gmra.mrb[4].mxu0 %v7274_v30  ;;  %v7150_v51 = vadd.f32 %v7149_v9, %v15493_v43  ;;  %v8448_v43 = vld [vmem:[%s15666_s5 + $0x158] sm:$0xff]   ;;  %s7789_s5 = sshll.u32 %s8514_s29, 4  ;;  %s7790_s5 = int_to_ptr.vmem [resolvable:$true] %s7789_s5 }
 0x881   :  { %v7242_v32 = vsel %vm1878_vm3, %v18583_v58, %v7241_v1  ;;  %v7072_v24 = vadd.f32 %v7071_v23, %v7070_v55  ;;  %s8486_s30 = scalar_lea.vmem %s7790_s5, 128  ;;  %p8491_p1 = scmp.lt.s32.totalorder %s7790_s5, %s7790_s5 }
 0x882   :  { %v7252_v21 = vsel %vm1884_vm6, %v7085_v41, %v7251_v35  ;;  %v7243_v46 = vsel %vm1880_vm4, %v6916_v7, %v7242_v32  ;;  %8090 = vmatpush3.bf16.msra.mxu1 %v8445_v15  ;;  %p8487_p0 = scmp.ne.s32.totalorder %s7790_s5, %s8486_s30  ;;  %p8492_p2 = scmp.lt.s32.totalorder %s8486_s30, %s8486_s30 }
 0x883   :  { %v7253_v29 = vsel %vm1886_vm7, %v7163_v57, %v7252_v21  ;;  %v7244_v16 = vsel %vm1882_vm5, %v6994_v19, %v7243_v46  ;;  %8091 = vmatprep.subr.bf16.mxu1 %v8446_v3 }
 0x884   :  { %v7265_v40 = vmul.f32 %v18584_v60, %v7253_v29  ;;  %v7245_v33 = vsel %vm1884_vm6, %v7072_v24, %v7244_v16  ;;  %p8493_p3 = por %p8492_p2, %p8491_p1 }
 0x885   :  { %v7246_v42 = vsel %vm1886_vm7, %v7150_v51, %v7245_v33 }
 0x886   :  { %v7271_v47 = vmul.f32 0.020408163, %v7265_v40  ;;  %8092 = vmatpush3.bf16.msra.mxu1 %v8447_v52  ;;  %v7264_v4 = vmul.f32 %v18585_v6, %v7246_v42  ;;  %p8494_p4 = pnand %p8493_p3, %p8487_p0 }
 0x887   :  { %8093 = vmatprep.subr.bf16.mxu1 %v8448_v43 }
 0x888   :  { %v7277_v14 = vpack.c.bf16 %v7271_v47, %v7271_v47  ;;  %v7270_v50 = vmul.f32 0.020408163, %v7264_v4 }
 0x88a   :  { %7774 = vmatprep.mubr.bf16.mxu1 %v7277_v14  ;;  %8094 = vmatpush3.bf16.msra.mxu1 %v8449_v27  ;;  %v7276_v2 = vpack.c.bf16 %v7270_v50, %v7270_v50 }
 0x88b   :  { %8095 = vmatprep.subr.bf16.mxu1 %v8450_v56 }
 0x88e   :  { %8096 = vmatpush3.bf16.msra.mxu1 %v8451_v5 }
 0x88f   :  { %8097 = vmatprep.subr.bf16.mxu1 %v8452_v22 }
 0x892   :  { %8098 = vmatpush3.bf16.msra.mxu1 %v8453_v26 }
 0x893   :  { %8099 = vmatprep.subr.bf16.mxu1 %v8454_v53 }
 0x896   :  { %8100 = vmatpush3.bf16.msra.mxu1 %v8455_v10 }
 0x897   :  { %8101 = vmatprep.subr.bf16.mxu1 %v8456_v13 }
 0x89a   :  { %8102 = vmatpush3.bf16.msra.mxu1 %v8457_v45 }
 0x89d   :  { %7775 = vmatmul.mubr.bf16.vlgmr.msra.gmra.mrb[20].mxu1 %v7276_v2 }
 0x950   :  { %v8059_v59 = vpop.f32.mrb[16].mxu1 }
 0x951   :  { %v8060_v61 = vpop.f32.mrb[17].mxu1 }
 0x952   :  { %v8061_v62 = vadd.f32 %v8060_v61, %v8059_v59  ;;  %v8062_v36 = vpop.f32.mrb[18].mxu1 }
 0x953   :  { %v8081_v34 = vpop.f32.mrb[4].mxu0  ;;  %v8063_v44 = vpop.f32.mrb[19].mxu1 }
 0x954   :  { %v8082_v18 = vpop.f32.mrb[5].mxu0 }
 0x955   :  { %v8083_v49 = vadd.f32 %v8082_v18, %v8081_v34  ;;  %v8084_v11 = vpop.f32.mrb[6].mxu0 }
 0x956   :  { %v8085_v25 = vpop.f32.mrb[7].mxu0 }
 0x957   :  { %v7737_v0 = vadd.f32 %v8083_v49, %v8061_v62 }
 0x970   :  { %v8103_v37 = vpop.f32.mrb[20].mxu1 }
 0x971   :  { %v8104_v31 = vpop.f32.mrb[21].mxu1 }
 0x972   :  { %v8105_v20 = vadd.f32 %v8104_v31, %v8103_v37  ;;  %v8106_v7 = vpop.f32.mrb[22].mxu1 }
 0x973   :  { %v8107_v8 = vpop.f32.mrb[23].mxu1 }
 0x974   :  { %v7777_v38 = vadd.f32 %v8105_v20, %v7737_v0 }
 0x976   :  { %7782 = vst [vmem:[#allocation2] sm:$0xff] %v7777_v38 }
 0x977   :  { %8497 = shalt.err (!%p8494_p4)
}
 0x978   :  { %s8498_s2 = scalar_lea.hbm %s15667_s6, 128 }
 0x979   :  { %p8499_p5 = scmp.ne.s32.totalorder %s15667_s6, %s8498_s2  ;;  %p8502_p6 = scmp.lt.u32.totalorder %s8498_s2, %s15667_s6 }
 0x97b   :  { %p8504_p7 = pnand %p8502_p6, %p8499_p5 }
 0x97d   :  { %8507 = shalt.err (!%p8504_p7)
}
 0x97e   :  { %7792 = dma.vmem_to_hbm [thread:$0]  %s7790_s5, 128, %s15667_s6, [#allocation3]  }
 0x97f   :  { %8508 = dma.done.wait [#allocation3], 128  }
 0x980   :  { %8509 = vsyncadd [#allocation3], 4294967168 }
 0x981   :  { %7796 = vsyncpa [#allocation3], 1 }

</bundles_post_ra>
